<compile_context>
chip_gen: v7x
topology: tpu7x:2x2x1
jax: 0.10.0
libtpu: 0.0.40
codegen_flags: <defaults>
</compile_context>

<pallas_src>
import functools

import jax
import jax.numpy as jnp
import numpy as np
from jax import lax
from jax.experimental import pallas as pl
from jax.experimental.pallas import tpu as pltpu


def _roi_pool_kernel(bidx_ref, x1_ref, y1_ref, x2_ref, y2_ref,   # scalar prefetch (SMEM)
                     x_ref,                                       # (N, H, W, C) VMEM (resident)
                     o_ref,                                       # (TR, PH*PW, C) VMEM
                     *, H, W, PH, PW, TR):
    g = pl.program_id(0)
    neg_inf = jnp.float32(-jnp.inf)
    zero = jnp.float32(0.0)

    # Spatial index vectors, hoisted out of all loops (sublane-axis iotas).
    ww = lax.broadcasted_iota(jnp.int32, (1, W, 1), 1)   # W index, broadcast over H and C
    hh = lax.broadcasted_iota(jnp.int32, (H, 1), 0)      # H index, broadcast over C

    for tr in range(TR):                                  # static unroll over rois of this block
        r = g * TR + tr
        b = bidx_ref[r]
        rsw = x1_ref[r]
        rsh = y1_ref[r]
        rew = x2_ref[r]
        reh = y2_ref[r]

        roi_w = jnp.maximum(rew - rsw + 1, 1)
        roi_h = jnp.maximum(reh - rsh + 1, 1)
        bin_w = roi_w.astype(jnp.float32) / jnp.float32(PW)
        bin_h = roi_h.astype(jnp.float32) / jnp.float32(PH)

        # Widen once per roi (not per bin); channels-last so C is on lanes.
        xv = x_ref[b].astype(jnp.float32)                 # (H, W, C)

        # ---- stage 1 (separable): masked max over W for each pooled column ----
        col_maxes = []                                    # PW arrays of (H, C)
        w_empty = []                                      # PW scalar bools
        for pw in range(PW):
            ws = jnp.clip(jnp.floor(jnp.float32(pw) * bin_w).astype(jnp.int32) + rsw, 0, W)
            we = jnp.clip(jnp.ceil(jnp.float32(pw + 1) * bin_w).astype(jnp.int32) + rsw, 0, W)
            wmask = (ww >= ws) & (ww < we)                # (1, W, 1)
            col = jnp.max(jnp.where(wmask, xv, neg_inf), axis=1)   # (H, C)
            col_maxes.append(col)
            w_empty.append(we <= ws)

        # ---- stage 2: masked max over H of the column maxima ----
        for ph in range(PH):
            hs = jnp.clip(jnp.floor(jnp.float32(ph) * bin_h).astype(jnp.int32) + rsh, 0, H)
            he = jnp.clip(jnp.ceil(jnp.float32(ph + 1) * bin_h).astype(jnp.int32) + rsh, 0, H)
            hmask = (hh >= hs) & (hh < he)                # (H, 1)
            h_empty = he <= hs
            for pw in range(PW):
                val = jnp.max(jnp.where(hmask, col_maxes[pw], neg_inf),
                              axis=0, keepdims=True)      # (1, C)
                is_empty = jnp.logical_or(h_empty, w_empty[pw])
                val = jnp.where(is_empty, zero, val)      # empty bin -> 0 (Caffe semantics)
                o_ref[tr, pl.ds(ph * PW + pw, 1), :] = val.astype(o_ref.dtype)


def roi_pooling_2d(x, rois, *, height, width, scale, rois_per_step=8):
    """x: (N, C, H, W) float, rois: (R, 5) float -> (R, C, height, width)."""
    N, C, H, W = x.shape
    R = rois.shape[0]
    PH, PW = height, width

    # RoI coordinate glue in plain JAX: scale + round half-away-from-zero
    # (matches Caffe/torchvision RoIPool, unlike jnp.round's banker rounding).
    bidx = rois[:, 0].astype(jnp.int32)
    v = rois[:, 1:5] * jnp.float32(scale)
    coords = (jnp.sign(v) * jnp.floor(jnp.abs(v) + 0.5)).astype(jnp.int32)
    x1, y1, x2, y2 = coords[:, 0], coords[:, 1], coords[:, 2], coords[:, 3]

    # Block several rois per grid step; pad R up to a multiple of the block.
    TR = max(1, min(rois_per_step, R))
    num_blocks = (R + TR - 1) // TR
    R_pad = num_blocks * TR
    pad = R_pad - R
    if pad:
        bidx = jnp.pad(bidx, (0, pad))    # padded rois: batch 0, box [0,0,0,0] (discarded)
        x1 = jnp.pad(x1, (0, pad))
        y1 = jnp.pad(y1, (0, pad))
        x2 = jnp.pad(x2, (0, pad))
        y2 = jnp.pad(y2, (0, pad))

    # Channels-last so C maps to TPU lanes; the whole feature map stays resident
    # in VMEM (constant block index -> no per-roi re-DMA of the feature slab).
    x_nhwc = jnp.transpose(x, (0, 2, 3, 1))               # (N, H, W, C)

    kernel = functools.partial(_roi_pool_kernel, H=H, W=W, PH=PH, PW=PW, TR=TR)

    out = pl.pallas_call(
        kernel,
        out_shape=jax.ShapeDtypeStruct((R_pad, PH * PW, C), x.dtype),
        grid_spec=pltpu.PrefetchScalarGridSpec(
            num_scalar_prefetch=5,
            grid=(num_blocks,),
            in_specs=[
                # Full feature map resident in VMEM; constant block index.
                pl.BlockSpec((N, H, W, C),
                             lambda g, b, x1, y1, x2, y2: (0, 0, 0, 0)),
            ],
            out_specs=pl.BlockSpec((TR, PH * PW, C),
                                   lambda g, b, x1, y1, x2, y2: (g, 0, 0)),
        ),
        compiler_params=pltpu.CompilerParams(
            dimension_semantics=("parallel",),            # shard roi blocks across TCs (v7x)
            vmem_limit_bytes=32 * 1024 * 1024),
    )(bidx, x1, y1, x2, y2, x_nhwc)

    out = out[:R]                                         # (R, PH*PW, C)
    return jnp.transpose(out, (0, 2, 1)).reshape(R, C, PH, PW)


def _roi_pool_reference(x, rois, height, width, scale):
    """Pure numpy reference with identical (Caffe) semantics."""
    x = np.asarray(x)
    rois = np.asarray(rois)
    N, C, H, W = x.shape
    R = rois.shape[0]
    out = np.zeros((R, C, height, width), x.dtype)
    for r in range(R):
        b = int(rois[r, 0])
        v = rois[r, 1:5] * scale
        x1, y1, x2, y2 = [int(np.sign(t) * np.floor(abs(t) + 0.5)) for t in v]
        roi_w = max(x2 - x1 + 1, 1)
        roi_h = max(y2 - y1 + 1, 1)
        bin_w = roi_w / float(width)
        bin_h = roi_h / float(height)
        for ph in range(height):
            hs = min(max(int(np.floor(ph * bin_h)) + y1, 0), H)
            he = min(max(int(np.ceil((ph + 1) * bin_h)) + y1, 0), H)
            for pw in range(width):
                ws = min(max(int(np.floor(pw * bin_w)) + x1, 0), W)
                we = min(max(int(np.ceil((pw + 1) * bin_w)) + x1, 0), W)
                if he <= hs or we <= ws:
                    continue
                out[r, :, ph, pw] = x[b, :, hs:he, ws:we].max(axis=(1, 2))
    return out


if __name__ == "__main__":
    key = jax.random.PRNGKey(0)

    N, C, H, W = 2, 4, 16, 16
    pooled_h, pooled_w = 4, 4
    spatial_scale = 1.0

    x = jax.random.normal(key, (N, C, H, W), dtype=jnp.float32)

    # [batch_idx, x1, y1, x2, y2]
    rois = jnp.array(
        [
            [0.0, 0.0, 0.0, 7.0, 7.0],
            [0.0, 4.0, 4.0, 15.0, 15.0],
            [1.0, 2.0, 3.0, 10.0, 12.0],
            [1.0, 0.0, 8.0, 15.0, 15.0],
        ],
        dtype=jnp.float32,
    )

    out = roi_pooling_2d(x, rois, height=pooled_h, width=pooled_w,
                         scale=spatial_scale)
    out = jax.block_until_ready(out)
    assert out.shape == (rois.shape[0], C, pooled_h, pooled_w)

    ref = _roi_pool_reference(x, rois, pooled_h, pooled_w, spatial_scale)
    np.testing.assert_allclose(np.asarray(out), ref, rtol=1e-6, atol=1e-6)

    print("KERNEL_OK")
</pallas_src>

<mosaic_0001>
module attributes {stable_mosaic.version = 11 : i64} {
  func.func @_roi_pool_kernel(%arg0: i32, %arg1: memref<4xi32, #tpu.memory_space<smem>>, %arg2: memref<4xi32, #tpu.memory_space<smem>>, %arg3: memref<4xi32, #tpu.memory_space<smem>>, %arg4: memref<4xi32, #tpu.memory_space<smem>>, %arg5: memref<4xi32, #tpu.memory_space<smem>>, %arg6: memref<2x16x16x4xf32, #tpu.memory_space<vmem>>, %arg7: memref<4x16x4xf32, #tpu.memory_space<vmem>>) attributes {dimension_semantics = [#tpu.dimension_semantics<parallel>], iteration_bounds = array<i64: 1>, scalar_prefetch = 5 : i64, scratch_operands = 0 : i64, tpu.core_type = #tpu.core_type<tc>, window_params = [{pipeline_mode = #tpu.pipeline_mode<synchronous>, transform_indices = @transform_0, window_bounds = array<i64: 2, 16, 16, 4>}, {transform_indices = @transform_1, window_bounds = array<i64: 4, 16, 4>}]} {
    %0 = tpu.iota {dimensions = array<i32: 1>} : vector<1x16x1xi32>
    %1 = tpu.iota {dimensions = array<i32: 0>} : vector<16x1xi32>
    %c4_i32 = arith.constant 4 : i32
    %2 = arith.muli %arg0, %c4_i32 : i32
    %c0_i32 = arith.constant 0 : i32
    %3 = arith.addi %2, %c0_i32 : i32
    %4 = arith.index_cast %3 : i32 to index
    %5 = memref.load %arg1[%4] : memref<4xi32, #tpu.memory_space<smem>>
    %6 = arith.index_cast %3 : i32 to index
    %7 = memref.load %arg2[%6] : memref<4xi32, #tpu.memory_space<smem>>
    %8 = arith.index_cast %3 : i32 to index
    %9 = memref.load %arg3[%8] : memref<4xi32, #tpu.memory_space<smem>>
    %10 = arith.index_cast %3 : i32 to index
    %11 = memref.load %arg4[%10] : memref<4xi32, #tpu.memory_space<smem>>
    %12 = arith.index_cast %3 : i32 to index
    %13 = memref.load %arg5[%12] : memref<4xi32, #tpu.memory_space<smem>>
    %14 = arith.subi %11, %7 : i32
    %c1_i32 = arith.constant 1 : i32
    %15 = arith.addi %14, %c1_i32 : i32
    %c1_i32_0 = arith.constant 1 : i32
    %16 = arith.maxsi %15, %c1_i32_0 : i32
    %17 = arith.subi %13, %9 : i32
    %c1_i32_1 = arith.constant 1 : i32
    %18 = arith.addi %17, %c1_i32_1 : i32
    %c1_i32_2 = arith.constant 1 : i32
    %19 = arith.maxsi %18, %c1_i32_2 : i32
    %20 = arith.sitofp %16 : i32 to f32
    %cst = arith.constant 4.000000e+00 : f32
    %21 = arith.divf %20, %cst : f32
    %22 = arith.sitofp %19 : i32 to f32
    %cst_3 = arith.constant 4.000000e+00 : f32
    %23 = arith.divf %22, %cst_3 : f32
    %24 = arith.index_cast %5 : i32 to index
    %c0 = arith.constant 0 : index
    %c0_4 = arith.constant 0 : index
    %c0_5 = arith.constant 0 : index
    %25 = vector.load %arg6[%24, %c0, %c0_4, %c0_5] : memref<2x16x16x4xf32, #tpu.memory_space<vmem>>, vector<1x16x16x4xf32>
    %26 = vector.shape_cast %25 : vector<1x16x16x4xf32> to vector<16x16x4xf32>
    %cst_6 = arith.constant 0.000000e+00 : f32
    %27 = arith.mulf %cst_6, %21 : f32
    %28 = math.floor %27 : f32
    %29 = arith.fptosi %28 : f32 to i32
    %30 = arith.addi %29, %7 : i32
    %c0_i32_7 = arith.constant 0 : i32
    %c16_i32 = arith.constant 16 : i32
    %31 = arith.maxsi %c0_i32_7, %30 : i32
    %32 = arith.minsi %c16_i32, %31 : i32
    %cst_8 = arith.constant 1.000000e+00 : f32
    %33 = arith.mulf %cst_8, %21 : f32
    %34 = math.ceil %33 : f32
    %35 = arith.fptosi %34 : f32 to i32
    %36 = arith.addi %35, %7 : i32
    %c0_i32_9 = arith.constant 0 : i32
    %c16_i32_10 = arith.constant 16 : i32
    %37 = arith.maxsi %c0_i32_9, %36 : i32
    %38 = arith.minsi %c16_i32_10, %37 : i32
    %39 = vector.broadcast %32 : i32 to vector<1x16x1xi32>
    %40 = arith.cmpi sge, %0, %39 : vector<1x16x1xi32>
    %41 = vector.broadcast %38 : i32 to vector<1x16x1xi32>
    %42 = arith.cmpi slt, %0, %41 : vector<1x16x1xi32>
    %43 = arith.andi %40, %42 : vector<1x16x1xi1>
    %cst_11 = arith.constant 0xFF800000 : f32
    %44 = vector.shape_cast %43 : vector<1x16x1xi1> to vector<1x16x1xi1>
    %45 = vector.broadcast %44 : vector<1x16x1xi1> to vector<16x16x4xi1>
    %46 = vector.broadcast %cst_11 : f32 to vector<16x16x4xf32>
    %47 = arith.select %45, %26, %46 : vector<16x16x4xi1>, vector<16x16x4xf32>
    %cst_12 = arith.constant dense<0xFF800000> : vector<16x4xf32>
    %48 = vector.multi_reduction <maximumf>, %47, %cst_12 [1] : vector<16x16x4xf32> to vector<16x4xf32>
    %49 = arith.cmpi sle, %38, %32 : i32
    %cst_13 = arith.constant 1.000000e+00 : f32
    %50 = arith.mulf %cst_13, %21 : f32
    %51 = math.floor %50 : f32
    %52 = arith.fptosi %51 : f32 to i32
    %53 = arith.addi %52, %7 : i32
    %c0_i32_14 = arith.constant 0 : i32
    %c16_i32_15 = arith.constant 16 : i32
    %54 = arith.maxsi %c0_i32_14, %53 : i32
    %55 = arith.minsi %c16_i32_15, %54 : i32
    %cst_16 = arith.constant 2.000000e+00 : f32
    %56 = arith.mulf %cst_16, %21 : f32
    %57 = math.ceil %56 : f32
    %58 = arith.fptosi %57 : f32 to i32
    %59 = arith.addi %58, %7 : i32
    %c0_i32_17 = arith.constant 0 : i32
    %c16_i32_18 = arith.constant 16 : i32
    %60 = arith.maxsi %c0_i32_17, %59 : i32
    %61 = arith.minsi %c16_i32_18, %60 : i32
    %62 = vector.broadcast %55 : i32 to vector<1x16x1xi32>
    %63 = arith.cmpi sge, %0, %62 : vector<1x16x1xi32>
    %64 = vector.broadcast %61 : i32 to vector<1x16x1xi32>
    %65 = arith.cmpi slt, %0, %64 : vector<1x16x1xi32>
    %66 = arith.andi %63, %65 : vector<1x16x1xi1>
    %cst_19 = arith.constant 0xFF800000 : f32
    %67 = vector.shape_cast %66 : vector<1x16x1xi1> to vector<1x16x1xi1>
    %68 = vector.broadcast %67 : vector<1x16x1xi1> to vector<16x16x4xi1>
    %69 = vector.broadcast %cst_19 : f32 to vector<16x16x4xf32>
    %70 = arith.select %68, %26, %69 : vector<16x16x4xi1>, vector<16x16x4xf32>
    %cst_20 = arith.constant dense<0xFF800000> : vector<16x4xf32>
    %71 = vector.multi_reduction <maximumf>, %70, %cst_20 [1] : vector<16x16x4xf32> to vector<16x4xf32>
    %72 = arith.cmpi sle, %61, %55 : i32
    %cst_21 = arith.constant 2.000000e+00 : f32
    %73 = arith.mulf %cst_21, %21 : f32
    %74 = math.floor %73 : f32
    %75 = arith.fptosi %74 : f32 to i32
    %76 = arith.addi %75, %7 : i32
    %c0_i32_22 = arith.constant 0 : i32
    %c16_i32_23 = arith.constant 16 : i32
    %77 = arith.maxsi %c0_i32_22, %76 : i32
    %78 = arith.minsi %c16_i32_23, %77 : i32
    %cst_24 = arith.constant 3.000000e+00 : f32
    %79 = arith.mulf %cst_24, %21 : f32
    %80 = math.ceil %79 : f32
    %81 = arith.fptosi %80 : f32 to i32
    %82 = arith.addi %81, %7 : i32
    %c0_i32_25 = arith.constant 0 : i32
    %c16_i32_26 = arith.constant 16 : i32
    %83 = arith.maxsi %c0_i32_25, %82 : i32
    %84 = arith.minsi %c16_i32_26, %83 : i32
    %85 = vector.broadcast %78 : i32 to vector<1x16x1xi32>
    %86 = arith.cmpi sge, %0, %85 : vector<1x16x1xi32>
    %87 = vector.broadcast %84 : i32 to vector<1x16x1xi32>
    %88 = arith.cmpi slt, %0, %87 : vector<1x16x1xi32>
    %89 = arith.andi %86, %88 : vector<1x16x1xi1>
    %cst_27 = arith.constant 0xFF800000 : f32
    %90 = vector.shape_cast %89 : vector<1x16x1xi1> to vector<1x16x1xi1>
    %91 = vector.broadcast %90 : vector<1x16x1xi1> to vector<16x16x4xi1>
    %92 = vector.broadcast %cst_27 : f32 to vector<16x16x4xf32>
    %93 = arith.select %91, %26, %92 : vector<16x16x4xi1>, vector<16x16x4xf32>
    %cst_28 = arith.constant dense<0xFF800000> : vector<16x4xf32>
    %94 = vector.multi_reduction <maximumf>, %93, %cst_28 [1] : vector<16x16x4xf32> to vector<16x4xf32>
    %95 = arith.cmpi sle, %84, %78 : i32
    %cst_29 = arith.constant 3.000000e+00 : f32
    %96 = arith.mulf %cst_29, %21 : f32
    %97 = math.floor %96 : f32
    %98 = arith.fptosi %97 : f32 to i32
    %99 = arith.addi %98, %7 : i32
    %c0_i32_30 = arith.constant 0 : i32
    %c16_i32_31 = arith.constant 16 : i32
    %100 = arith.maxsi %c0_i32_30, %99 : i32
    %101 = arith.minsi %c16_i32_31, %100 : i32
    %cst_32 = arith.constant 4.000000e+00 : f32
    %102 = arith.mulf %cst_32, %21 : f32
    %103 = math.ceil %102 : f32
    %104 = arith.fptosi %103 : f32 to i32
    %105 = arith.addi %104, %7 : i32
    %c0_i32_33 = arith.constant 0 : i32
    %c16_i32_34 = arith.constant 16 : i32
    %106 = arith.maxsi %c0_i32_33, %105 : i32
    %107 = arith.minsi %c16_i32_34, %106 : i32
    %108 = vector.broadcast %101 : i32 to vector<1x16x1xi32>
    %109 = arith.cmpi sge, %0, %108 : vector<1x16x1xi32>
    %110 = vector.broadcast %107 : i32 to vector<1x16x1xi32>
    %111 = arith.cmpi slt, %0, %110 : vector<1x16x1xi32>
    %112 = arith.andi %109, %111 : vector<1x16x1xi1>
    %cst_35 = arith.constant 0xFF800000 : f32
    %113 = vector.shape_cast %112 : vector<1x16x1xi1> to vector<1x16x1xi1>
    %114 = vector.broadcast %113 : vector<1x16x1xi1> to vector<16x16x4xi1>
    %115 = vector.broadcast %cst_35 : f32 to vector<16x16x4xf32>
    %116 = arith.select %114, %26, %115 : vector<16x16x4xi1>, vector<16x16x4xf32>
    %cst_36 = arith.constant dense<0xFF800000> : vector<16x4xf32>
    %117 = vector.multi_reduction <maximumf>, %116, %cst_36 [1] : vector<16x16x4xf32> to vector<16x4xf32>
    %118 = arith.cmpi sle, %107, %101 : i32
    %cst_37 = arith.constant 0.000000e+00 : f32
    %119 = arith.mulf %cst_37, %23 : f32
    %120 = math.floor %119 : f32
    %121 = arith.fptosi %120 : f32 to i32
    %122 = arith.addi %121, %9 : i32
    %c0_i32_38 = arith.constant 0 : i32
    %c16_i32_39 = arith.constant 16 : i32
    %123 = arith.maxsi %c0_i32_38, %122 : i32
    %124 = arith.minsi %c16_i32_39, %123 : i32
    %cst_40 = arith.constant 1.000000e+00 : f32
    %125 = arith.mulf %cst_40, %23 : f32
    %126 = math.ceil %125 : f32
    %127 = arith.fptosi %126 : f32 to i32
    %128 = arith.addi %127, %9 : i32
    %c0_i32_41 = arith.constant 0 : i32
    %c16_i32_42 = arith.constant 16 : i32
    %129 = arith.maxsi %c0_i32_41, %128 : i32
    %130 = arith.minsi %c16_i32_42, %129 : i32
    %131 = vector.broadcast %124 : i32 to vector<16x1xi32>
    %132 = arith.cmpi sge, %1, %131 : vector<16x1xi32>
    %133 = vector.broadcast %130 : i32 to vector<16x1xi32>
    %134 = arith.cmpi slt, %1, %133 : vector<16x1xi32>
    %135 = arith.andi %132, %134 : vector<16x1xi1>
    %136 = arith.cmpi sle, %130, %124 : i32
    %cst_43 = arith.constant 0xFF800000 : f32
    %137 = vector.shape_cast %135 : vector<16x1xi1> to vector<16x1xi1>
    %138 = vector.broadcast %137 : vector<16x1xi1> to vector<16x4xi1>
    %139 = vector.broadcast %cst_43 : f32 to vector<16x4xf32>
    %140 = arith.select %138, %48, %139 : vector<16x4xi1>, vector<16x4xf32>
    %cst_44 = arith.constant dense<0xFF800000> : vector<4xf32>
    %141 = vector.multi_reduction <maximumf>, %140, %cst_44 [0] : vector<16x4xf32> to vector<4xf32>
    %142 = vector.shape_cast %141 : vector<4xf32> to vector<1x4xf32>
    %143 = arith.ori %136, %49 : i1
    %cst_45 = arith.constant 0.000000e+00 : f32
    %144 = vector.broadcast %cst_45 : f32 to vector<1x4xf32>
    %145 = arith.select %143, %144, %142 : vector<1x4xf32>
    %c0_46 = arith.constant 0 : index
    %c0_47 = arith.constant 0 : index
    %c0_48 = arith.constant 0 : index
    %146 = vector.load %arg7[%c0_46, %c0_47, %c0_48] : memref<4x16x4xf32, #tpu.memory_space<vmem>>, vector<1x1x4xf32>
    %147 = vector.shape_cast %146 : vector<1x1x4xf32> to vector<1x4xf32>
    %148 = vector.shape_cast %145 : vector<1x4xf32> to vector<1x1x4xf32>
    tpu.vector_store %arg7[%c0_46, %c0_47, %c0_48], %148 {strides = array<i32>} : memref<4x16x4xf32, #tpu.memory_space<vmem>>, vector<1x1x4xf32>,
    %cst_49 = arith.constant 0xFF800000 : f32
    %149 = vector.shape_cast %135 : vector<16x1xi1> to vector<16x1xi1>
    %150 = vector.broadcast %149 : vector<16x1xi1> to vector<16x4xi1>
    %151 = vector.broadcast %cst_49 : f32 to vector<16x4xf32>
    %152 = arith.select %150, %71, %151 : vector<16x4xi1>, vector<16x4xf32>
    %cst_50 = arith.constant dense<0xFF800000> : vector<4xf32>
    %153 = vector.multi_reduction <maximumf>, %152, %cst_50 [0] : vector<16x4xf32> to vector<4xf32>
    %154 = vector.shape_cast %153 : vector<4xf32> to vector<1x4xf32>
    %155 = arith.ori %136, %72 : i1
    %cst_51 = arith.constant 0.000000e+00 : f32
    %156 = vector.broadcast %cst_51 : f32 to vector<1x4xf32>
    %157 = arith.select %155, %156, %154 : vector<1x4xf32>
    %c0_52 = arith.constant 0 : index
    %c1 = arith.constant 1 : index
    %c0_53 = arith.constant 0 : index
    %158 = vector.load %arg7[%c0_52, %c1, %c0_53] : memref<4x16x4xf32, #tpu.memory_space<vmem>>, vector<1x1x4xf32>
    %159 = vector.shape_cast %158 : vector<1x1x4xf32> to vector<1x4xf32>
    %160 = vector.shape_cast %157 : vector<1x4xf32> to vector<1x1x4xf32>
    tpu.vector_store %arg7[%c0_52, %c1, %c0_53], %160 {strides = array<i32>} : memref<4x16x4xf32, #tpu.memory_space<vmem>>, vector<1x1x4xf32>,
    %cst_54 = arith.constant 0xFF800000 : f32
    %161 = vector.shape_cast %135 : vector<16x1xi1> to vector<16x1xi1>
    %162 = vector.broadcast %161 : vector<16x1xi1> to vector<16x4xi1>
    %163 = vector.broadcast %cst_54 : f32 to vector<16x4xf32>
    %164 = arith.select %162, %94, %163 : vector<16x4xi1>, vector<16x4xf32>
    %cst_55 = arith.constant dense<0xFF800000> : vector<4xf32>
    %165 = vector.multi_reduction <maximumf>, %164, %cst_55 [0] : vector<16x4xf32> to vector<4xf32>
    %166 = vector.shape_cast %165 : vector<4xf32> to vector<1x4xf32>
    %167 = arith.ori %136, %95 : i1
    %cst_56 = arith.constant 0.000000e+00 : f32
    %168 = vector.broadcast %cst_56 : f32 to vector<1x4xf32>
    %169 = arith.select %167, %168, %166 : vector<1x4xf32>
    %c0_57 = arith.constant 0 : index
    %c2 = arith.constant 2 : index
    %c0_58 = arith.constant 0 : index
    %170 = vector.load %arg7[%c0_57, %c2, %c0_58] : memref<4x16x4xf32, #tpu.memory_space<vmem>>, vector<1x1x4xf32>
    %171 = vector.shape_cast %170 : vector<1x1x4xf32> to vector<1x4xf32>
    %172 = vector.shape_cast %169 : vector<1x4xf32> to vector<1x1x4xf32>
    tpu.vector_store %arg7[%c0_57, %c2, %c0_58], %172 {strides = array<i32>} : memref<4x16x4xf32, #tpu.memory_space<vmem>>, vector<1x1x4xf32>,
    %cst_59 = arith.constant 0xFF800000 : f32
    %173 = vector.shape_cast %135 : vector<16x1xi1> to vector<16x1xi1>
    %174 = vector.broadcast %173 : vector<16x1xi1> to vector<16x4xi1>
    %175 = vector.broadcast %cst_59 : f32 to vector<16x4xf32>
    %176 = arith.select %174, %117, %175 : vector<16x4xi1>, vector<16x4xf32>
    %cst_60 = arith.constant dense<0xFF800000> : vector<4xf32>
    %177 = vector.multi_reduction <maximumf>, %176, %cst_60 [0] : vector<16x4xf32> to vector<4xf32>
    %178 = vector.shape_cast %177 : vector<4xf32> to vector<1x4xf32>
    %179 = arith.ori %136, %118 : i1
    %cst_61 = arith.constant 0.000000e+00 : f32
    %180 = vector.broadcast %cst_61 : f32 to vector<1x4xf32>
    %181 = arith.select %179, %180, %178 : vector<1x4xf32>
    %c0_62 = arith.constant 0 : index
    %c3 = arith.constant 3 : index
    %c0_63 = arith.constant 0 : index
    %182 = vector.load %arg7[%c0_62, %c3, %c0_63] : memref<4x16x4xf32, #tpu.memory_space<vmem>>, vector<1x1x4xf32>
    %183 = vector.shape_cast %182 : vector<1x1x4xf32> to vector<1x4xf32>
    %184 = vector.shape_cast %181 : vector<1x4xf32> to vector<1x1x4xf32>
    tpu.vector_store %arg7[%c0_62, %c3, %c0_63], %184 {strides = array<i32>} : memref<4x16x4xf32, #tpu.memory_space<vmem>>, vector<1x1x4xf32>,
    %cst_64 = arith.constant 1.000000e+00 : f32
    %185 = arith.mulf %cst_64, %23 : f32
    %186 = math.floor %185 : f32
    %187 = arith.fptosi %186 : f32 to i32
    %188 = arith.addi %187, %9 : i32
    %c0_i32_65 = arith.constant 0 : i32
    %c16_i32_66 = arith.constant 16 : i32
    %189 = arith.maxsi %c0_i32_65, %188 : i32
    %190 = arith.minsi %c16_i32_66, %189 : i32
    %cst_67 = arith.constant 2.000000e+00 : f32
    %191 = arith.mulf %cst_67, %23 : f32
    %192 = math.ceil %191 : f32
    %193 = arith.fptosi %192 : f32 to i32
    %194 = arith.addi %193, %9 : i32
    %c0_i32_68 = arith.constant 0 : i32
    %c16_i32_69 = arith.constant 16 : i32
    %195 = arith.maxsi %c0_i32_68, %194 : i32
    %196 = arith.minsi %c16_i32_69, %195 : i32
    %197 = vector.broadcast %190 : i32 to vector<16x1xi32>
    %198 = arith.cmpi sge, %1, %197 : vector<16x1xi32>
    %199 = vector.broadcast %196 : i32 to vector<16x1xi32>
    %200 = arith.cmpi slt, %1, %199 : vector<16x1xi32>
    %201 = arith.andi %198, %200 : vector<16x1xi1>
    %202 = arith.cmpi sle, %196, %190 : i32
    %cst_70 = arith.constant 0xFF800000 : f32
    %203 = vector.shape_cast %201 : vector<16x1xi1> to vector<16x1xi1>
    %204 = vector.broadcast %203 : vector<16x1xi1> to vector<16x4xi1>
    %205 = vector.broadcast %cst_70 : f32 to vector<16x4xf32>
    %206 = arith.select %204, %48, %205 : vector<16x4xi1>, vector<16x4xf32>
    %cst_71 = arith.constant dense<0xFF800000> : vector<4xf32>
    %207 = vector.multi_reduction <maximumf>, %206, %cst_71 [0] : vector<16x4xf32> to vector<4xf32>
    %208 = vector.shape_cast %207 : vector<4xf32> to vector<1x4xf32>
    %209 = arith.ori %202, %49 : i1
    %cst_72 = arith.constant 0.000000e+00 : f32
    %210 = vector.broadcast %cst_72 : f32 to vector<1x4xf32>
    %211 = arith.select %209, %210, %208 : vector<1x4xf32>
    %c0_73 = arith.constant 0 : index
    %c4 = arith.constant 4 : index
    %c0_74 = arith.constant 0 : index
    %212 = vector.load %arg7[%c0_73, %c4, %c0_74] : memref<4x16x4xf32, #tpu.memory_space<vmem>>, vector<1x1x4xf32>
    %213 = vector.shape_cast %212 : vector<1x1x4xf32> to vector<1x4xf32>
    %214 = vector.shape_cast %211 : vector<1x4xf32> to vector<1x1x4xf32>
    tpu.vector_store %arg7[%c0_73, %c4, %c0_74], %214 {strides = array<i32>} : memref<4x16x4xf32, #tpu.memory_space<vmem>>, vector<1x1x4xf32>,
    %cst_75 = arith.constant 0xFF800000 : f32
    %215 = vector.shape_cast %201 : vector<16x1xi1> to vector<16x1xi1>
    %216 = vector.broadcast %215 : vector<16x1xi1> to vector<16x4xi1>
    %217 = vector.broadcast %cst_75 : f32 to vector<16x4xf32>
    %218 = arith.select %216, %71, %217 : vector<16x4xi1>, vector<16x4xf32>
    %cst_76 = arith.constant dense<0xFF800000> : vector<4xf32>
    %219 = vector.multi_reduction <maximumf>, %218, %cst_76 [0] : vector<16x4xf32> to vector<4xf32>
    %220 = vector.shape_cast %219 : vector<4xf32> to vector<1x4xf32>
    %221 = arith.ori %202, %72 : i1
    %cst_77 = arith.constant 0.000000e+00 : f32
    %222 = vector.broadcast %cst_77 : f32 to vector<1x4xf32>
    %223 = arith.select %221, %222, %220 : vector<1x4xf32>
    %c0_78 = arith.constant 0 : index
    %c5 = arith.constant 5 : index
    %c0_79 = arith.constant 0 : index
    %224 = vector.load %arg7[%c0_78, %c5, %c0_79] : memref<4x16x4xf32, #tpu.memory_space<vmem>>, vector<1x1x4xf32>
    %225 = vector.shape_cast %224 : vector<1x1x4xf32> to vector<1x4xf32>
    %226 = vector.shape_cast %223 : vector<1x4xf32> to vector<1x1x4xf32>
    tpu.vector_store %arg7[%c0_78, %c5, %c0_79], %226 {strides = array<i32>} : memref<4x16x4xf32, #tpu.memory_space<vmem>>, vector<1x1x4xf32>,
    %cst_80 = arith.constant 0xFF800000 : f32
    %227 = vector.shape_cast %201 : vector<16x1xi1> to vector<16x1xi1>
    %228 = vector.broadcast %227 : vector<16x1xi1> to vector<16x4xi1>
    %229 = vector.broadcast %cst_80 : f32 to vector<16x4xf32>
    %230 = arith.select %228, %94, %229 : vector<16x4xi1>, vector<16x4xf32>
    %cst_81 = arith.constant dense<0xFF800000> : vector<4xf32>
    %231 = vector.multi_reduction <maximumf>, %230, %cst_81 [0] : vector<16x4xf32> to vector<4xf32>
    %232 = vector.shape_cast %231 : vector<4xf32> to vector<1x4xf32>
    %233 = arith.ori %202, %95 : i1
    %cst_82 = arith.constant 0.000000e+00 : f32
    %234 = vector.broadcast %cst_82 : f32 to vector<1x4xf32>
    %235 = arith.select %233, %234, %232 : vector<1x4xf32>
    %c0_83 = arith.constant 0 : index
    %c6 = arith.constant 6 : index
    %c0_84 = arith.constant 0 : index
    %236 = vector.load %arg7[%c0_83, %c6, %c0_84] : memref<4x16x4xf32, #tpu.memory_space<vmem>>, vector<1x1x4xf32>
    %237 = vector.shape_cast %236 : vector<1x1x4xf32> to vector<1x4xf32>
    %238 = vector.shape_cast %235 : vector<1x4xf32> to vector<1x1x4xf32>
    tpu.vector_store %arg7[%c0_83, %c6, %c0_84], %238 {strides = array<i32>} : memref<4x16x4xf32, #tpu.memory_space<vmem>>, vector<1x1x4xf32>,
    %cst_85 = arith.constant 0xFF800000 : f32
    %239 = vector.shape_cast %201 : vector<16x1xi1> to vector<16x1xi1>
    %240 = vector.broadcast %239 : vector<16x1xi1> to vector<16x4xi1>
    %241 = vector.broadcast %cst_85 : f32 to vector<16x4xf32>
    %242 = arith.select %240, %117, %241 : vector<16x4xi1>, vector<16x4xf32>
    %cst_86 = arith.constant dense<0xFF800000> : vector<4xf32>
    %243 = vector.multi_reduction <maximumf>, %242, %cst_86 [0] : vector<16x4xf32> to vector<4xf32>
    %244 = vector.shape_cast %243 : vector<4xf32> to vector<1x4xf32>
    %245 = arith.ori %202, %118 : i1
    %cst_87 = arith.constant 0.000000e+00 : f32
    %246 = vector.broadcast %cst_87 : f32 to vector<1x4xf32>
    %247 = arith.select %245, %246, %244 : vector<1x4xf32>
    %c0_88 = arith.constant 0 : index
    %c7 = arith.constant 7 : index
    %c0_89 = arith.constant 0 : index
    %248 = vector.load %arg7[%c0_88, %c7, %c0_89] : memref<4x16x4xf32, #tpu.memory_space<vmem>>, vector<1x1x4xf32>
    %249 = vector.shape_cast %248 : vector<1x1x4xf32> to vector<1x4xf32>
    %250 = vector.shape_cast %247 : vector<1x4xf32> to vector<1x1x4xf32>
    tpu.vector_store %arg7[%c0_88, %c7, %c0_89], %250 {strides = array<i32>} : memref<4x16x4xf32, #tpu.memory_space<vmem>>, vector<1x1x4xf32>,
    %cst_90 = arith.constant 2.000000e+00 : f32
    %251 = arith.mulf %cst_90, %23 : f32
    %252 = math.floor %251 : f32
    %253 = arith.fptosi %252 : f32 to i32
    %254 = arith.addi %253, %9 : i32
    %c0_i32_91 = arith.constant 0 : i32
    %c16_i32_92 = arith.constant 16 : i32
    %255 = arith.maxsi %c0_i32_91, %254 : i32
    %256 = arith.minsi %c16_i32_92, %255 : i32
    %cst_93 = arith.constant 3.000000e+00 : f32
    %257 = arith.mulf %cst_93, %23 : f32
    %258 = math.ceil %257 : f32
    %259 = arith.fptosi %258 : f32 to i32
    %260 = arith.addi %259, %9 : i32
    %c0_i32_94 = arith.constant 0 : i32
    %c16_i32_95 = arith.constant 16 : i32
    %261 = arith.maxsi %c0_i32_94, %260 : i32
    %262 = arith.minsi %c16_i32_95, %261 : i32
    %263 = vector.broadcast %256 : i32 to vector<16x1xi32>
    %264 = arith.cmpi sge, %1, %263 : vector<16x1xi32>
    %265 = vector.broadcast %262 : i32 to vector<16x1xi32>
    %266 = arith.cmpi slt, %1, %265 : vector<16x1xi32>
    %267 = arith.andi %264, %266 : vector<16x1xi1>
    %268 = arith.cmpi sle, %262, %256 : i32
    %cst_96 = arith.constant 0xFF800000 : f32
    %269 = vector.shape_cast %267 : vector<16x1xi1> to vector<16x1xi1>
    %270 = vector.broadcast %269 : vector<16x1xi1> to vector<16x4xi1>
    %271 = vector.broadcast %cst_96 : f32 to vector<16x4xf32>
    %272 = arith.select %270, %48, %271 : vector<16x4xi1>, vector<16x4xf32>
    %cst_97 = arith.constant dense<0xFF800000> : vector<4xf32>
    %273 = vector.multi_reduction <maximumf>, %272, %cst_97 [0] : vector<16x4xf32> to vector<4xf32>
    %274 = vector.shape_cast %273 : vector<4xf32> to vector<1x4xf32>
    %275 = arith.ori %268, %49 : i1
    %cst_98 = arith.constant 0.000000e+00 : f32
    %276 = vector.broadcast %cst_98 : f32 to vector<1x4xf32>
    %277 = arith.select %275, %276, %274 : vector<1x4xf32>
    %c0_99 = arith.constant 0 : index
    %c8 = arith.constant 8 : index
    %c0_100 = arith.constant 0 : index
    %278 = vector.load %arg7[%c0_99, %c8, %c0_100] : memref<4x16x4xf32, #tpu.memory_space<vmem>>, vector<1x1x4xf32>
    %279 = vector.shape_cast %278 : vector<1x1x4xf32> to vector<1x4xf32>
    %280 = vector.shape_cast %277 : vector<1x4xf32> to vector<1x1x4xf32>
    tpu.vector_store %arg7[%c0_99, %c8, %c0_100], %280 {strides = array<i32>} : memref<4x16x4xf32, #tpu.memory_space<vmem>>, vector<1x1x4xf32>,
    %cst_101 = arith.constant 0xFF800000 : f32
    %281 = vector.shape_cast %267 : vector<16x1xi1> to vector<16x1xi1>
    %282 = vector.broadcast %281 : vector<16x1xi1> to vector<16x4xi1>
    %283 = vector.broadcast %cst_101 : f32 to vector<16x4xf32>
    %284 = arith.select %282, %71, %283 : vector<16x4xi1>, vector<16x4xf32>
    %cst_102 = arith.constant dense<0xFF800000> : vector<4xf32>
    %285 = vector.multi_reduction <maximumf>, %284, %cst_102 [0] : vector<16x4xf32> to vector<4xf32>
    %286 = vector.shape_cast %285 : vector<4xf32> to vector<1x4xf32>
    %287 = arith.ori %268, %72 : i1
    %cst_103 = arith.constant 0.000000e+00 : f32
    %288 = vector.broadcast %cst_103 : f32 to vector<1x4xf32>
    %289 = arith.select %287, %288, %286 : vector<1x4xf32>
    %c0_104 = arith.constant 0 : index
    %c9 = arith.constant 9 : index
    %c0_105 = arith.constant 0 : index
    %290 = vector.load %arg7[%c0_104, %c9, %c0_105] : memref<4x16x4xf32, #tpu.memory_space<vmem>>, vector<1x1x4xf32>
    %291 = vector.shape_cast %290 : vector<1x1x4xf32> to vector<1x4xf32>
    %292 = vector.shape_cast %289 : vector<1x4xf32> to vector<1x1x4xf32>
    tpu.vector_store %arg7[%c0_104, %c9, %c0_105], %292 {strides = array<i32>} : memref<4x16x4xf32, #tpu.memory_space<vmem>>, vector<1x1x4xf32>,
    %cst_106 = arith.constant 0xFF800000 : f32
    %293 = vector.shape_cast %267 : vector<16x1xi1> to vector<16x1xi1>
    %294 = vector.broadcast %293 : vector<16x1xi1> to vector<16x4xi1>
    %295 = vector.broadcast %cst_106 : f32 to vector<16x4xf32>
    %296 = arith.select %294, %94, %295 : vector<16x4xi1>, vector<16x4xf32>
    %cst_107 = arith.constant dense<0xFF800000> : vector<4xf32>
    %297 = vector.multi_reduction <maximumf>, %296, %cst_107 [0] : vector<16x4xf32> to vector<4xf32>
    %298 = vector.shape_cast %297 : vector<4xf32> to vector<1x4xf32>
    %299 = arith.ori %268, %95 : i1
    %cst_108 = arith.constant 0.000000e+00 : f32
    %300 = vector.broadcast %cst_108 : f32 to vector<1x4xf32>
    %301 = arith.select %299, %300, %298 : vector<1x4xf32>
    %c0_109 = arith.constant 0 : index
    %c10 = arith.constant 10 : index
    %c0_110 = arith.constant 0 : index
    %302 = vector.load %arg7[%c0_109, %c10, %c0_110] : memref<4x16x4xf32, #tpu.memory_space<vmem>>, vector<1x1x4xf32>
    %303 = vector.shape_cast %302 : vector<1x1x4xf32> to vector<1x4xf32>
    %304 = vector.shape_cast %301 : vector<1x4xf32> to vector<1x1x4xf32>
    tpu.vector_store %arg7[%c0_109, %c10, %c0_110], %304 {strides = array<i32>} : memref<4x16x4xf32, #tpu.memory_space<vmem>>, vector<1x1x4xf32>,
    %cst_111 = arith.constant 0xFF800000 : f32
    %305 = vector.shape_cast %267 : vector<16x1xi1> to vector<16x1xi1>
    %306 = vector.broadcast %305 : vector<16x1xi1> to vector<16x4xi1>
    %307 = vector.broadcast %cst_111 : f32 to vector<16x4xf32>
    %308 = arith.select %306, %117, %307 : vector<16x4xi1>, vector<16x4xf32>
    %cst_112 = arith.constant dense<0xFF800000> : vector<4xf32>
    %309 = vector.multi_reduction <maximumf>, %308, %cst_112 [0] : vector<16x4xf32> to vector<4xf32>
    %310 = vector.shape_cast %309 : vector<4xf32> to vector<1x4xf32>
    %311 = arith.ori %268, %118 : i1
    %cst_113 = arith.constant 0.000000e+00 : f32
    %312 = vector.broadcast %cst_113 : f32 to vector<1x4xf32>
    %313 = arith.select %311, %312, %310 : vector<1x4xf32>
    %c0_114 = arith.constant 0 : index
    %c11 = arith.constant 11 : index
    %c0_115 = arith.constant 0 : index
    %314 = vector.load %arg7[%c0_114, %c11, %c0_115] : memref<4x16x4xf32, #tpu.memory_space<vmem>>, vector<1x1x4xf32>
    %315 = vector.shape_cast %314 : vector<1x1x4xf32> to vector<1x4xf32>
    %316 = vector.shape_cast %313 : vector<1x4xf32> to vector<1x1x4xf32>
    tpu.vector_store %arg7[%c0_114, %c11, %c0_115], %316 {strides = array<i32>} : memref<4x16x4xf32, #tpu.memory_space<vmem>>, vector<1x1x4xf32>,
    %cst_116 = arith.constant 3.000000e+00 : f32
    %317 = arith.mulf %cst_116, %23 : f32
    %318 = math.floor %317 : f32
    %319 = arith.fptosi %318 : f32 to i32
    %320 = arith.addi %319, %9 : i32
    %c0_i32_117 = arith.constant 0 : i32
    %c16_i32_118 = arith.constant 16 : i32
    %321 = arith.maxsi %c0_i32_117, %320 : i32
    %322 = arith.minsi %c16_i32_118, %321 : i32
    %cst_119 = arith.constant 4.000000e+00 : f32
    %323 = arith.mulf %cst_119, %23 : f32
    %324 = math.ceil %323 : f32
    %325 = arith.fptosi %324 : f32 to i32
    %326 = arith.addi %325, %9 : i32
    %c0_i32_120 = arith.constant 0 : i32
    %c16_i32_121 = arith.constant 16 : i32
    %327 = arith.maxsi %c0_i32_120, %326 : i32
    %328 = arith.minsi %c16_i32_121, %327 : i32
    %329 = vector.broadcast %322 : i32 to vector<16x1xi32>
    %330 = arith.cmpi sge, %1, %329 : vector<16x1xi32>
    %331 = vector.broadcast %328 : i32 to vector<16x1xi32>
    %332 = arith.cmpi slt, %1, %331 : vector<16x1xi32>
    %333 = arith.andi %330, %332 : vector<16x1xi1>
    %334 = arith.cmpi sle, %328, %322 : i32
    %cst_122 = arith.constant 0xFF800000 : f32
    %335 = vector.shape_cast %333 : vector<16x1xi1> to vector<16x1xi1>
    %336 = vector.broadcast %335 : vector<16x1xi1> to vector<16x4xi1>
    %337 = vector.broadcast %cst_122 : f32 to vector<16x4xf32>
    %338 = arith.select %336, %48, %337 : vector<16x4xi1>, vector<16x4xf32>
    %cst_123 = arith.constant dense<0xFF800000> : vector<4xf32>
    %339 = vector.multi_reduction <maximumf>, %338, %cst_123 [0] : vector<16x4xf32> to vector<4xf32>
    %340 = vector.shape_cast %339 : vector<4xf32> to vector<1x4xf32>
    %341 = arith.ori %334, %49 : i1
    %cst_124 = arith.constant 0.000000e+00 : f32
    %342 = vector.broadcast %cst_124 : f32 to vector<1x4xf32>
    %343 = arith.select %341, %342, %340 : vector<1x4xf32>
    %c0_125 = arith.constant 0 : index
    %c12 = arith.constant 12 : index
    %c0_126 = arith.constant 0 : index
    %344 = vector.load %arg7[%c0_125, %c12, %c0_126] : memref<4x16x4xf32, #tpu.memory_space<vmem>>, vector<1x1x4xf32>
    %345 = vector.shape_cast %344 : vector<1x1x4xf32> to vector<1x4xf32>
    %346 = vector.shape_cast %343 : vector<1x4xf32> to vector<1x1x4xf32>
    tpu.vector_store %arg7[%c0_125, %c12, %c0_126], %346 {strides = array<i32>} : memref<4x16x4xf32, #tpu.memory_space<vmem>>, vector<1x1x4xf32>,
    %cst_127 = arith.constant 0xFF800000 : f32
    %347 = vector.shape_cast %333 : vector<16x1xi1> to vector<16x1xi1>
    %348 = vector.broadcast %347 : vector<16x1xi1> to vector<16x4xi1>
    %349 = vector.broadcast %cst_127 : f32 to vector<16x4xf32>
    %350 = arith.select %348, %71, %349 : vector<16x4xi1>, vector<16x4xf32>
    %cst_128 = arith.constant dense<0xFF800000> : vector<4xf32>
    %351 = vector.multi_reduction <maximumf>, %350, %cst_128 [0] : vector<16x4xf32> to vector<4xf32>
    %352 = vector.shape_cast %351 : vector<4xf32> to vector<1x4xf32>
    %353 = arith.ori %334, %72 : i1
    %cst_129 = arith.constant 0.000000e+00 : f32
    %354 = vector.broadcast %cst_129 : f32 to vector<1x4xf32>
    %355 = arith.select %353, %354, %352 : vector<1x4xf32>
    %c0_130 = arith.constant 0 : index
    %c13 = arith.constant 13 : index
    %c0_131 = arith.constant 0 : index
    %356 = vector.load %arg7[%c0_130, %c13, %c0_131] : memref<4x16x4xf32, #tpu.memory_space<vmem>>, vector<1x1x4xf32>
    %357 = vector.shape_cast %356 : vector<1x1x4xf32> to vector<1x4xf32>
    %358 = vector.shape_cast %355 : vector<1x4xf32> to vector<1x1x4xf32>
    tpu.vector_store %arg7[%c0_130, %c13, %c0_131], %358 {strides = array<i32>} : memref<4x16x4xf32, #tpu.memory_space<vmem>>, vector<1x1x4xf32>,
    %cst_132 = arith.constant 0xFF800000 : f32
    %359 = vector.shape_cast %333 : vector<16x1xi1> to vector<16x1xi1>
    %360 = vector.broadcast %359 : vector<16x1xi1> to vector<16x4xi1>
    %361 = vector.broadcast %cst_132 : f32 to vector<16x4xf32>
    %362 = arith.select %360, %94, %361 : vector<16x4xi1>, vector<16x4xf32>
    %cst_133 = arith.constant dense<0xFF800000> : vector<4xf32>
    %363 = vector.multi_reduction <maximumf>, %362, %cst_133 [0] : vector<16x4xf32> to vector<4xf32>
    %364 = vector.shape_cast %363 : vector<4xf32> to vector<1x4xf32>
    %365 = arith.ori %334, %95 : i1
    %cst_134 = arith.constant 0.000000e+00 : f32
    %366 = vector.broadcast %cst_134 : f32 to vector<1x4xf32>
    %367 = arith.select %365, %366, %364 : vector<1x4xf32>
    %c0_135 = arith.constant 0 : index
    %c14 = arith.constant 14 : index
    %c0_136 = arith.constant 0 : index
    %368 = vector.load %arg7[%c0_135, %c14, %c0_136] : memref<4x16x4xf32, #tpu.memory_space<vmem>>, vector<1x1x4xf32>
    %369 = vector.shape_cast %368 : vector<1x1x4xf32> to vector<1x4xf32>
    %370 = vector.shape_cast %367 : vector<1x4xf32> to vector<1x1x4xf32>
    tpu.vector_store %arg7[%c0_135, %c14, %c0_136], %370 {strides = array<i32>} : memref<4x16x4xf32, #tpu.memory_space<vmem>>, vector<1x1x4xf32>,
    %cst_137 = arith.constant 0xFF800000 : f32
    %371 = vector.shape_cast %333 : vector<16x1xi1> to vector<16x1xi1>
    %372 = vector.broadcast %371 : vector<16x1xi1> to vector<16x4xi1>
    %373 = vector.broadcast %cst_137 : f32 to vector<16x4xf32>
    %374 = arith.select %372, %117, %373 : vector<16x4xi1>, vector<16x4xf32>
    %cst_138 = arith.constant dense<0xFF800000> : vector<4xf32>
    %375 = vector.multi_reduction <maximumf>, %374, %cst_138 [0] : vector<16x4xf32> to vector<4xf32>
    %376 = vector.shape_cast %375 : vector<4xf32> to vector<1x4xf32>
    %377 = arith.ori %334, %118 : i1
    %cst_139 = arith.constant 0.000000e+00 : f32
    %378 = vector.broadcast %cst_139 : f32 to vector<1x4xf32>
    %379 = arith.select %377, %378, %376 : vector<1x4xf32>
    %c0_140 = arith.constant 0 : index
    %c15 = arith.constant 15 : index
    %c0_141 = arith.constant 0 : index
    %380 = vector.load %arg7[%c0_140, %c15, %c0_141] : memref<4x16x4xf32, #tpu.memory_space<vmem>>, vector<1x1x4xf32>
    %381 = vector.shape_cast %380 : vector<1x1x4xf32> to vector<1x4xf32>
    %382 = vector.shape_cast %379 : vector<1x4xf32> to vector<1x1x4xf32>
    tpu.vector_store %arg7[%c0_140, %c15, %c0_141], %382 {strides = array<i32>} : memref<4x16x4xf32, #tpu.memory_space<vmem>>, vector<1x1x4xf32>,
    %c4_i32_142 = arith.constant 4 : i32
    %383 = arith.muli %arg0, %c4_i32_142 : i32
    %c1_i32_143 = arith.constant 1 : i32
    %384 = arith.addi %383, %c1_i32_143 : i32
    %385 = arith.index_cast %384 : i32 to index
    %386 = memref.load %arg1[%385] : memref<4xi32, #tpu.memory_space<smem>>
    %387 = arith.index_cast %384 : i32 to index
    %388 = memref.load %arg2[%387] : memref<4xi32, #tpu.memory_space<smem>>
    %389 = arith.index_cast %384 : i32 to index
    %390 = memref.load %arg3[%389] : memref<4xi32, #tpu.memory_space<smem>>
    %391 = arith.index_cast %384 : i32 to index
    %392 = memref.load %arg4[%391] : memref<4xi32, #tpu.memory_space<smem>>
    %393 = arith.index_cast %384 : i32 to index
    %394 = memref.load %arg5[%393] : memref<4xi32, #tpu.memory_space<smem>>
    %395 = arith.subi %392, %388 : i32
    %c1_i32_144 = arith.constant 1 : i32
    %396 = arith.addi %395, %c1_i32_144 : i32
    %c1_i32_145 = arith.constant 1 : i32
    %397 = arith.maxsi %396, %c1_i32_145 : i32
    %398 = arith.subi %394, %390 : i32
    %c1_i32_146 = arith.constant 1 : i32
    %399 = arith.addi %398, %c1_i32_146 : i32
    %c1_i32_147 = arith.constant 1 : i32
    %400 = arith.maxsi %399, %c1_i32_147 : i32
    %401 = arith.sitofp %397 : i32 to f32
    %cst_148 = arith.constant 4.000000e+00 : f32
    %402 = arith.divf %401, %cst_148 : f32
    %403 = arith.sitofp %400 : i32 to f32
    %cst_149 = arith.constant 4.000000e+00 : f32
    %404 = arith.divf %403, %cst_149 : f32
    %405 = arith.index_cast %386 : i32 to index
    %c0_150 = arith.constant 0 : index
    %c0_151 = arith.constant 0 : index
    %c0_152 = arith.constant 0 : index
    %406 = vector.load %arg6[%405, %c0_150, %c0_151, %c0_152] : memref<2x16x16x4xf32, #tpu.memory_space<vmem>>, vector<1x16x16x4xf32>
    %407 = vector.shape_cast %406 : vector<1x16x16x4xf32> to vector<16x16x4xf32>
    %cst_153 = arith.constant 0.000000e+00 : f32
    %408 = arith.mulf %cst_153, %402 : f32
    %409 = math.floor %408 : f32
    %410 = arith.fptosi %409 : f32 to i32
    %411 = arith.addi %410, %388 : i32
    %c0_i32_154 = arith.constant 0 : i32
    %c16_i32_155 = arith.constant 16 : i32
    %412 = arith.maxsi %c0_i32_154, %411 : i32
    %413 = arith.minsi %c16_i32_155, %412 : i32
    %cst_156 = arith.constant 1.000000e+00 : f32
    %414 = arith.mulf %cst_156, %402 : f32
    %415 = math.ceil %414 : f32
    %416 = arith.fptosi %415 : f32 to i32
    %417 = arith.addi %416, %388 : i32
    %c0_i32_157 = arith.constant 0 : i32
    %c16_i32_158 = arith.constant 16 : i32
    %418 = arith.maxsi %c0_i32_157, %417 : i32
    %419 = arith.minsi %c16_i32_158, %418 : i32
    %420 = vector.broadcast %413 : i32 to vector<1x16x1xi32>
    %421 = arith.cmpi sge, %0, %420 : vector<1x16x1xi32>
    %422 = vector.broadcast %419 : i32 to vector<1x16x1xi32>
    %423 = arith.cmpi slt, %0, %422 : vector<1x16x1xi32>
    %424 = arith.andi %421, %423 : vector<1x16x1xi1>
    %cst_159 = arith.constant 0xFF800000 : f32
    %425 = vector.shape_cast %424 : vector<1x16x1xi1> to vector<1x16x1xi1>
    %426 = vector.broadcast %425 : vector<1x16x1xi1> to vector<16x16x4xi1>
    %427 = vector.broadcast %cst_159 : f32 to vector<16x16x4xf32>
    %428 = arith.select %426, %407, %427 : vector<16x16x4xi1>, vector<16x16x4xf32>
    %cst_160 = arith.constant dense<0xFF800000> : vector<16x4xf32>
    %429 = vector.multi_reduction <maximumf>, %428, %cst_160 [1] : vector<16x16x4xf32> to vector<16x4xf32>
    %430 = arith.cmpi sle, %419, %413 : i32
    %cst_161 = arith.constant 1.000000e+00 : f32
    %431 = arith.mulf %cst_161, %402 : f32
    %432 = math.floor %431 : f32
    %433 = arith.fptosi %432 : f32 to i32
    %434 = arith.addi %433, %388 : i32
    %c0_i32_162 = arith.constant 0 : i32
    %c16_i32_163 = arith.constant 16 : i32
    %435 = arith.maxsi %c0_i32_162, %434 : i32
    %436 = arith.minsi %c16_i32_163, %435 : i32
    %cst_164 = arith.constant 2.000000e+00 : f32
    %437 = arith.mulf %cst_164, %402 : f32
    %438 = math.ceil %437 : f32
    %439 = arith.fptosi %438 : f32 to i32
    %440 = arith.addi %439, %388 : i32
    %c0_i32_165 = arith.constant 0 : i32
    %c16_i32_166 = arith.constant 16 : i32
    %441 = arith.maxsi %c0_i32_165, %440 : i32
    %442 = arith.minsi %c16_i32_166, %441 : i32
    %443 = vector.broadcast %436 : i32 to vector<1x16x1xi32>
    %444 = arith.cmpi sge, %0, %443 : vector<1x16x1xi32>
    %445 = vector.broadcast %442 : i32 to vector<1x16x1xi32>
    %446 = arith.cmpi slt, %0, %445 : vector<1x16x1xi32>
    %447 = arith.andi %444, %446 : vector<1x16x1xi1>
    %cst_167 = arith.constant 0xFF800000 : f32
    %448 = vector.shape_cast %447 : vector<1x16x1xi1> to vector<1x16x1xi1>
    %449 = vector.broadcast %448 : vector<1x16x1xi1> to vector<16x16x4xi1>
    %450 = vector.broadcast %cst_167 : f32 to vector<16x16x4xf32>
    %451 = arith.select %449, %407, %450 : vector<16x16x4xi1>, vector<16x16x4xf32>
    %cst_168 = arith.constant dense<0xFF800000> : vector<16x4xf32>
    %452 = vector.multi_reduction <maximumf>, %451, %cst_168 [1] : vector<16x16x4xf32> to vector<16x4xf32>
    %453 = arith.cmpi sle, %442, %436 : i32
    %cst_169 = arith.constant 2.000000e+00 : f32
    %454 = arith.mulf %cst_169, %402 : f32
    %455 = math.floor %454 : f32
    %456 = arith.fptosi %455 : f32 to i32
    %457 = arith.addi %456, %388 : i32
    %c0_i32_170 = arith.constant 0 : i32
    %c16_i32_171 = arith.constant 16 : i32
    %458 = arith.maxsi %c0_i32_170, %457 : i32
    %459 = arith.minsi %c16_i32_171, %458 : i32
    %cst_172 = arith.constant 3.000000e+00 : f32
    %460 = arith.mulf %cst_172, %402 : f32
    %461 = math.ceil %460 : f32
    %462 = arith.fptosi %461 : f32 to i32
    %463 = arith.addi %462, %388 : i32
    %c0_i32_173 = arith.constant 0 : i32
    %c16_i32_174 = arith.constant 16 : i32
    %464 = arith.maxsi %c0_i32_173, %463 : i32
    %465 = arith.minsi %c16_i32_174, %464 : i32
    %466 = vector.broadcast %459 : i32 to vector<1x16x1xi32>
    %467 = arith.cmpi sge, %0, %466 : vector<1x16x1xi32>
    %468 = vector.broadcast %465 : i32 to vector<1x16x1xi32>
    %469 = arith.cmpi slt, %0, %468 : vector<1x16x1xi32>
    %470 = arith.andi %467, %469 : vector<1x16x1xi1>
    %cst_175 = arith.constant 0xFF800000 : f32
    %471 = vector.shape_cast %470 : vector<1x16x1xi1> to vector<1x16x1xi1>
    %472 = vector.broadcast %471 : vector<1x16x1xi1> to vector<16x16x4xi1>
    %473 = vector.broadcast %cst_175 : f32 to vector<16x16x4xf32>
    %474 = arith.select %472, %407, %473 : vector<16x16x4xi1>, vector<16x16x4xf32>
    %cst_176 = arith.constant dense<0xFF800000> : vector<16x4xf32>
    %475 = vector.multi_reduction <maximumf>, %474, %cst_176 [1] : vector<16x16x4xf32> to vector<16x4xf32>
    %476 = arith.cmpi sle, %465, %459 : i32
    %cst_177 = arith.constant 3.000000e+00 : f32
    %477 = arith.mulf %cst_177, %402 : f32
    %478 = math.floor %477 : f32
    %479 = arith.fptosi %478 : f32 to i32
    %480 = arith.addi %479, %388 : i32
    %c0_i32_178 = arith.constant 0 : i32
    %c16_i32_179 = arith.constant 16 : i32
    %481 = arith.maxsi %c0_i32_178, %480 : i32
    %482 = arith.minsi %c16_i32_179, %481 : i32
    %cst_180 = arith.constant 4.000000e+00 : f32
    %483 = arith.mulf %cst_180, %402 : f32
    %484 = math.ceil %483 : f32
    %485 = arith.fptosi %484 : f32 to i32
    %486 = arith.addi %485, %388 : i32
    %c0_i32_181 = arith.constant 0 : i32
    %c16_i32_182 = arith.constant 16 : i32
    %487 = arith.maxsi %c0_i32_181, %486 : i32
    %488 = arith.minsi %c16_i32_182, %487 : i32
    %489 = vector.broadcast %482 : i32 to vector<1x16x1xi32>
    %490 = arith.cmpi sge, %0, %489 : vector<1x16x1xi32>
    %491 = vector.broadcast %488 : i32 to vector<1x16x1xi32>
    %492 = arith.cmpi slt, %0, %491 : vector<1x16x1xi32>
    %493 = arith.andi %490, %492 : vector<1x16x1xi1>
    %cst_183 = arith.constant 0xFF800000 : f32
    %494 = vector.shape_cast %493 : vector<1x16x1xi1> to vector<1x16x1xi1>
    %495 = vector.broadcast %494 : vector<1x16x1xi1> to vector<16x16x4xi1>
    %496 = vector.broadcast %cst_183 : f32 to vector<16x16x4xf32>
    %497 = arith.select %495, %407, %496 : vector<16x16x4xi1>, vector<16x16x4xf32>
    %cst_184 = arith.constant dense<0xFF800000> : vector<16x4xf32>
    %498 = vector.multi_reduction <maximumf>, %497, %cst_184 [1] : vector<16x16x4xf32> to vector<16x4xf32>
    %499 = arith.cmpi sle, %488, %482 : i32
    %cst_185 = arith.constant 0.000000e+00 : f32
    %500 = arith.mulf %cst_185, %404 : f32
    %501 = math.floor %500 : f32
    %502 = arith.fptosi %501 : f32 to i32
    %503 = arith.addi %502, %390 : i32
    %c0_i32_186 = arith.constant 0 : i32
    %c16_i32_187 = arith.constant 16 : i32
    %504 = arith.maxsi %c0_i32_186, %503 : i32
    %505 = arith.minsi %c16_i32_187, %504 : i32
    %cst_188 = arith.constant 1.000000e+00 : f32
    %506 = arith.mulf %cst_188, %404 : f32
    %507 = math.ceil %506 : f32
    %508 = arith.fptosi %507 : f32 to i32
    %509 = arith.addi %508, %390 : i32
    %c0_i32_189 = arith.constant 0 : i32
    %c16_i32_190 = arith.constant 16 : i32
    %510 = arith.maxsi %c0_i32_189, %509 : i32
    %511 = arith.minsi %c16_i32_190, %510 : i32
    %512 = vector.broadcast %505 : i32 to vector<16x1xi32>
    %513 = arith.cmpi sge, %1, %512 : vector<16x1xi32>
    %514 = vector.broadcast %511 : i32 to vector<16x1xi32>
    %515 = arith.cmpi slt, %1, %514 : vector<16x1xi32>
    %516 = arith.andi %513, %515 : vector<16x1xi1>
    %517 = arith.cmpi sle, %511, %505 : i32
    %cst_191 = arith.constant 0xFF800000 : f32
    %518 = vector.shape_cast %516 : vector<16x1xi1> to vector<16x1xi1>
    %519 = vector.broadcast %518 : vector<16x1xi1> to vector<16x4xi1>
    %520 = vector.broadcast %cst_191 : f32 to vector<16x4xf32>
    %521 = arith.select %519, %429, %520 : vector<16x4xi1>, vector<16x4xf32>
    %cst_192 = arith.constant dense<0xFF800000> : vector<4xf32>
    %522 = vector.multi_reduction <maximumf>, %521, %cst_192 [0] : vector<16x4xf32> to vector<4xf32>
    %523 = vector.shape_cast %522 : vector<4xf32> to vector<1x4xf32>
    %524 = arith.ori %517, %430 : i1
    %cst_193 = arith.constant 0.000000e+00 : f32
    %525 = vector.broadcast %cst_193 : f32 to vector<1x4xf32>
    %526 = arith.select %524, %525, %523 : vector<1x4xf32>
    %c1_194 = arith.constant 1 : index
    %c0_195 = arith.constant 0 : index
    %c0_196 = arith.constant 0 : index
    %527 = vector.load %arg7[%c1_194, %c0_195, %c0_196] : memref<4x16x4xf32, #tpu.memory_space<vmem>>, vector<1x1x4xf32>
    %528 = vector.shape_cast %527 : vector<1x1x4xf32> to vector<1x4xf32>
    %529 = vector.shape_cast %526 : vector<1x4xf32> to vector<1x1x4xf32>
    tpu.vector_store %arg7[%c1_194, %c0_195, %c0_196], %529 {strides = array<i32>} : memref<4x16x4xf32, #tpu.memory_space<vmem>>, vector<1x1x4xf32>,
    %cst_197 = arith.constant 0xFF800000 : f32
    %530 = vector.shape_cast %516 : vector<16x1xi1> to vector<16x1xi1>
    %531 = vector.broadcast %530 : vector<16x1xi1> to vector<16x4xi1>
    %532 = vector.broadcast %cst_197 : f32 to vector<16x4xf32>
    %533 = arith.select %531, %452, %532 : vector<16x4xi1>, vector<16x4xf32>
    %cst_198 = arith.constant dense<0xFF800000> : vector<4xf32>
    %534 = vector.multi_reduction <maximumf>, %533, %cst_198 [0] : vector<16x4xf32> to vector<4xf32>
    %535 = vector.shape_cast %534 : vector<4xf32> to vector<1x4xf32>
    %536 = arith.ori %517, %453 : i1
    %cst_199 = arith.constant 0.000000e+00 : f32
    %537 = vector.broadcast %cst_199 : f32 to vector<1x4xf32>
    %538 = arith.select %536, %537, %535 : vector<1x4xf32>
    %c1_200 = arith.constant 1 : index
    %c1_201 = arith.constant 1 : index
    %c0_202 = arith.constant 0 : index
    %539 = vector.load %arg7[%c1_200, %c1_201, %c0_202] : memref<4x16x4xf32, #tpu.memory_space<vmem>>, vector<1x1x4xf32>
    %540 = vector.shape_cast %539 : vector<1x1x4xf32> to vector<1x4xf32>
    %541 = vector.shape_cast %538 : vector<1x4xf32> to vector<1x1x4xf32>
    tpu.vector_store %arg7[%c1_200, %c1_201, %c0_202], %541 {strides = array<i32>} : memref<4x16x4xf32, #tpu.memory_space<vmem>>, vector<1x1x4xf32>,
    %cst_203 = arith.constant 0xFF800000 : f32
    %542 = vector.shape_cast %516 : vector<16x1xi1> to vector<16x1xi1>
    %543 = vector.broadcast %542 : vector<16x1xi1> to vector<16x4xi1>
    %544 = vector.broadcast %cst_203 : f32 to vector<16x4xf32>
    %545 = arith.select %543, %475, %544 : vector<16x4xi1>, vector<16x4xf32>
    %cst_204 = arith.constant dense<0xFF800000> : vector<4xf32>
    %546 = vector.multi_reduction <maximumf>, %545, %cst_204 [0] : vector<16x4xf32> to vector<4xf32>
    %547 = vector.shape_cast %546 : vector<4xf32> to vector<1x4xf32>
    %548 = arith.ori %517, %476 : i1
    %cst_205 = arith.constant 0.000000e+00 : f32
    %549 = vector.broadcast %cst_205 : f32 to vector<1x4xf32>
    %550 = arith.select %548, %549, %547 : vector<1x4xf32>
    %c1_206 = arith.constant 1 : index
    %c2_207 = arith.constant 2 : index
    %c0_208 = arith.constant 0 : index
    %551 = vector.load %arg7[%c1_206, %c2_207, %c0_208] : memref<4x16x4xf32, #tpu.memory_space<vmem>>, vector<1x1x4xf32>
    %552 = vector.shape_cast %551 : vector<1x1x4xf32> to vector<1x4xf32>
    %553 = vector.shape_cast %550 : vector<1x4xf32> to vector<1x1x4xf32>
    tpu.vector_store %arg7[%c1_206, %c2_207, %c0_208], %553 {strides = array<i32>} : memref<4x16x4xf32, #tpu.memory_space<vmem>>, vector<1x1x4xf32>,
    %cst_209 = arith.constant 0xFF800000 : f32
    %554 = vector.shape_cast %516 : vector<16x1xi1> to vector<16x1xi1>
    %555 = vector.broadcast %554 : vector<16x1xi1> to vector<16x4xi1>
    %556 = vector.broadcast %cst_209 : f32 to vector<16x4xf32>
    %557 = arith.select %555, %498, %556 : vector<16x4xi1>, vector<16x4xf32>
    %cst_210 = arith.constant dense<0xFF800000> : vector<4xf32>
    %558 = vector.multi_reduction <maximumf>, %557, %cst_210 [0] : vector<16x4xf32> to vector<4xf32>
    %559 = vector.shape_cast %558 : vector<4xf32> to vector<1x4xf32>
    %560 = arith.ori %517, %499 : i1
    %cst_211 = arith.constant 0.000000e+00 : f32
    %561 = vector.broadcast %cst_211 : f32 to vector<1x4xf32>
    %562 = arith.select %560, %561, %559 : vector<1x4xf32>
    %c1_212 = arith.constant 1 : index
    %c3_213 = arith.constant 3 : index
    %c0_214 = arith.constant 0 : index
    %563 = vector.load %arg7[%c1_212, %c3_213, %c0_214] : memref<4x16x4xf32, #tpu.memory_space<vmem>>, vector<1x1x4xf32>
    %564 = vector.shape_cast %563 : vector<1x1x4xf32> to vector<1x4xf32>
    %565 = vector.shape_cast %562 : vector<1x4xf32> to vector<1x1x4xf32>
    tpu.vector_store %arg7[%c1_212, %c3_213, %c0_214], %565 {strides = array<i32>} : memref<4x16x4xf32, #tpu.memory_space<vmem>>, vector<1x1x4xf32>,
    %cst_215 = arith.constant 1.000000e+00 : f32
    %566 = arith.mulf %cst_215, %404 : f32
    %567 = math.floor %566 : f32
    %568 = arith.fptosi %567 : f32 to i32
    %569 = arith.addi %568, %390 : i32
    %c0_i32_216 = arith.constant 0 : i32
    %c16_i32_217 = arith.constant 16 : i32
    %570 = arith.maxsi %c0_i32_216, %569 : i32
    %571 = arith.minsi %c16_i32_217, %570 : i32
    %cst_218 = arith.constant 2.000000e+00 : f32
    %572 = arith.mulf %cst_218, %404 : f32
    %573 = math.ceil %572 : f32
    %574 = arith.fptosi %573 : f32 to i32
    %575 = arith.addi %574, %390 : i32
    %c0_i32_219 = arith.constant 0 : i32
    %c16_i32_220 = arith.constant 16 : i32
    %576 = arith.maxsi %c0_i32_219, %575 : i32
    %577 = arith.minsi %c16_i32_220, %576 : i32
    %578 = vector.broadcast %571 : i32 to vector<16x1xi32>
    %579 = arith.cmpi sge, %1, %578 : vector<16x1xi32>
    %580 = vector.broadcast %577 : i32 to vector<16x1xi32>
    %581 = arith.cmpi slt, %1, %580 : vector<16x1xi32>
    %582 = arith.andi %579, %581 : vector<16x1xi1>
    %583 = arith.cmpi sle, %577, %571 : i32
    %cst_221 = arith.constant 0xFF800000 : f32
    %584 = vector.shape_cast %582 : vector<16x1xi1> to vector<16x1xi1>
    %585 = vector.broadcast %584 : vector<16x1xi1> to vector<16x4xi1>
    %586 = vector.broadcast %cst_221 : f32 to vector<16x4xf32>
    %587 = arith.select %585, %429, %586 : vector<16x4xi1>, vector<16x4xf32>
    %cst_222 = arith.constant dense<0xFF800000> : vector<4xf32>
    %588 = vector.multi_reduction <maximumf>, %587, %cst_222 [0] : vector<16x4xf32> to vector<4xf32>
    %589 = vector.shape_cast %588 : vector<4xf32> to vector<1x4xf32>
    %590 = arith.ori %583, %430 : i1
    %cst_223 = arith.constant 0.000000e+00 : f32
    %591 = vector.broadcast %cst_223 : f32 to vector<1x4xf32>
    %592 = arith.select %590, %591, %589 : vector<1x4xf32>
    %c1_224 = arith.constant 1 : index
    %c4_225 = arith.constant 4 : index
    %c0_226 = arith.constant 0 : index
    %593 = vector.load %arg7[%c1_224, %c4_225, %c0_226] : memref<4x16x4xf32, #tpu.memory_space<vmem>>, vector<1x1x4xf32>
    %594 = vector.shape_cast %593 : vector<1x1x4xf32> to vector<1x4xf32>
    %595 = vector.shape_cast %592 : vector<1x4xf32> to vector<1x1x4xf32>
    tpu.vector_store %arg7[%c1_224, %c4_225, %c0_226], %595 {strides = array<i32>} : memref<4x16x4xf32, #tpu.memory_space<vmem>>, vector<1x1x4xf32>,
    %cst_227 = arith.constant 0xFF800000 : f32
    %596 = vector.shape_cast %582 : vector<16x1xi1> to vector<16x1xi1>
    %597 = vector.broadcast %596 : vector<16x1xi1> to vector<16x4xi1>
    %598 = vector.broadcast %cst_227 : f32 to vector<16x4xf32>
    %599 = arith.select %597, %452, %598 : vector<16x4xi1>, vector<16x4xf32>
    %cst_228 = arith.constant dense<0xFF800000> : vector<4xf32>
    %600 = vector.multi_reduction <maximumf>, %599, %cst_228 [0] : vector<16x4xf32> to vector<4xf32>
    %601 = vector.shape_cast %600 : vector<4xf32> to vector<1x4xf32>
    %602 = arith.ori %583, %453 : i1
    %cst_229 = arith.constant 0.000000e+00 : f32
    %603 = vector.broadcast %cst_229 : f32 to vector<1x4xf32>
    %604 = arith.select %602, %603, %601 : vector<1x4xf32>
    %c1_230 = arith.constant 1 : index
    %c5_231 = arith.constant 5 : index
    %c0_232 = arith.constant 0 : index
    %605 = vector.load %arg7[%c1_230, %c5_231, %c0_232] : memref<4x16x4xf32, #tpu.memory_space<vmem>>, vector<1x1x4xf32>
    %606 = vector.shape_cast %605 : vector<1x1x4xf32> to vector<1x4xf32>
    %607 = vector.shape_cast %604 : vector<1x4xf32> to vector<1x1x4xf32>
    tpu.vector_store %arg7[%c1_230, %c5_231, %c0_232], %607 {strides = array<i32>} : memref<4x16x4xf32, #tpu.memory_space<vmem>>, vector<1x1x4xf32>,
    %cst_233 = arith.constant 0xFF800000 : f32
    %608 = vector.shape_cast %582 : vector<16x1xi1> to vector<16x1xi1>
    %609 = vector.broadcast %608 : vector<16x1xi1> to vector<16x4xi1>
    %610 = vector.broadcast %cst_233 : f32 to vector<16x4xf32>
    %611 = arith.select %609, %475, %610 : vector<16x4xi1>, vector<16x4xf32>
    %cst_234 = arith.constant dense<0xFF800000> : vector<4xf32>
    %612 = vector.multi_reduction <maximumf>, %611, %cst_234 [0] : vector<16x4xf32> to vector<4xf32>
    %613 = vector.shape_cast %612 : vector<4xf32> to vector<1x4xf32>
    %614 = arith.ori %583, %476 : i1
    %cst_235 = arith.constant 0.000000e+00 : f32
    %615 = vector.broadcast %cst_235 : f32 to vector<1x4xf32>
    %616 = arith.select %614, %615, %613 : vector<1x4xf32>
    %c1_236 = arith.constant 1 : index
    %c6_237 = arith.constant 6 : index
    %c0_238 = arith.constant 0 : index
    %617 = vector.load %arg7[%c1_236, %c6_237, %c0_238] : memref<4x16x4xf32, #tpu.memory_space<vmem>>, vector<1x1x4xf32>
    %618 = vector.shape_cast %617 : vector<1x1x4xf32> to vector<1x4xf32>
    %619 = vector.shape_cast %616 : vector<1x4xf32> to vector<1x1x4xf32>
    tpu.vector_store %arg7[%c1_236, %c6_237, %c0_238], %619 {strides = array<i32>} : memref<4x16x4xf32, #tpu.memory_space<vmem>>, vector<1x1x4xf32>,
    %cst_239 = arith.constant 0xFF800000 : f32
    %620 = vector.shape_cast %582 : vector<16x1xi1> to vector<16x1xi1>
    %621 = vector.broadcast %620 : vector<16x1xi1> to vector<16x4xi1>
    %622 = vector.broadcast %cst_239 : f32 to vector<16x4xf32>
    %623 = arith.select %621, %498, %622 : vector<16x4xi1>, vector<16x4xf32>
    %cst_240 = arith.constant dense<0xFF800000> : vector<4xf32>
    %624 = vector.multi_reduction <maximumf>, %623, %cst_240 [0] : vector<16x4xf32> to vector<4xf32>
    %625 = vector.shape_cast %624 : vector<4xf32> to vector<1x4xf32>
    %626 = arith.ori %583, %499 : i1
    %cst_241 = arith.constant 0.000000e+00 : f32
    %627 = vector.broadcast %cst_241 : f32 to vector<1x4xf32>
    %628 = arith.select %626, %627, %625 : vector<1x4xf32>
    %c1_242 = arith.constant 1 : index
    %c7_243 = arith.constant 7 : index
    %c0_244 = arith.constant 0 : index
    %629 = vector.load %arg7[%c1_242, %c7_243, %c0_244] : memref<4x16x4xf32, #tpu.memory_space<vmem>>, vector<1x1x4xf32>
    %630 = vector.shape_cast %629 : vector<1x1x4xf32> to vector<1x4xf32>
    %631 = vector.shape_cast %628 : vector<1x4xf32> to vector<1x1x4xf32>
    tpu.vector_store %arg7[%c1_242, %c7_243, %c0_244], %631 {strides = array<i32>} : memref<4x16x4xf32, #tpu.memory_space<vmem>>, vector<1x1x4xf32>,
    %cst_245 = arith.constant 2.000000e+00 : f32
    %632 = arith.mulf %cst_245, %404 : f32
    %633 = math.floor %632 : f32
    %634 = arith.fptosi %633 : f32 to i32
    %635 = arith.addi %634, %390 : i32
    %c0_i32_246 = arith.constant 0 : i32
    %c16_i32_247 = arith.constant 16 : i32
    %636 = arith.maxsi %c0_i32_246, %635 : i32
    %637 = arith.minsi %c16_i32_247, %636 : i32
    %cst_248 = arith.constant 3.000000e+00 : f32
    %638 = arith.mulf %cst_248, %404 : f32
    %639 = math.ceil %638 : f32
    %640 = arith.fptosi %639 : f32 to i32
    %641 = arith.addi %640, %390 : i32
    %c0_i32_249 = arith.constant 0 : i32
    %c16_i32_250 = arith.constant 16 : i32
    %642 = arith.maxsi %c0_i32_249, %641 : i32
    %643 = arith.minsi %c16_i32_250, %642 : i32
    %644 = vector.broadcast %637 : i32 to vector<16x1xi32>
    %645 = arith.cmpi sge, %1, %644 : vector<16x1xi32>
    %646 = vector.broadcast %643 : i32 to vector<16x1xi32>
    %647 = arith.cmpi slt, %1, %646 : vector<16x1xi32>
    %648 = arith.andi %645, %647 : vector<16x1xi1>
    %649 = arith.cmpi sle, %643, %637 : i32
    %cst_251 = arith.constant 0xFF800000 : f32
    %650 = vector.shape_cast %648 : vector<16x1xi1> to vector<16x1xi1>
    %651 = vector.broadcast %650 : vector<16x1xi1> to vector<16x4xi1>
    %652 = vector.broadcast %cst_251 : f32 to vector<16x4xf32>
    %653 = arith.select %651, %429, %652 : vector<16x4xi1>, vector<16x4xf32>
    %cst_252 = arith.constant dense<0xFF800000> : vector<4xf32>
    %654 = vector.multi_reduction <maximumf>, %653, %cst_252 [0] : vector<16x4xf32> to vector<4xf32>
    %655 = vector.shape_cast %654 : vector<4xf32> to vector<1x4xf32>
    %656 = arith.ori %649, %430 : i1
    %cst_253 = arith.constant 0.000000e+00 : f32
    %657 = vector.broadcast %cst_253 : f32 to vector<1x4xf32>
    %658 = arith.select %656, %657, %655 : vector<1x4xf32>
    %c1_254 = arith.constant 1 : index
    %c8_255 = arith.constant 8 : index
    %c0_256 = arith.constant 0 : index
    %659 = vector.load %arg7[%c1_254, %c8_255, %c0_256] : memref<4x16x4xf32, #tpu.memory_space<vmem>>, vector<1x1x4xf32>
    %660 = vector.shape_cast %659 : vector<1x1x4xf32> to vector<1x4xf32>
    %661 = vector.shape_cast %658 : vector<1x4xf32> to vector<1x1x4xf32>
    tpu.vector_store %arg7[%c1_254, %c8_255, %c0_256], %661 {strides = array<i32>} : memref<4x16x4xf32, #tpu.memory_space<vmem>>, vector<1x1x4xf32>,
    %cst_257 = arith.constant 0xFF800000 : f32
    %662 = vector.shape_cast %648 : vector<16x1xi1> to vector<16x1xi1>
    %663 = vector.broadcast %662 : vector<16x1xi1> to vector<16x4xi1>
    %664 = vector.broadcast %cst_257 : f32 to vector<16x4xf32>
    %665 = arith.select %663, %452, %664 : vector<16x4xi1>, vector<16x4xf32>
    %cst_258 = arith.constant dense<0xFF800000> : vector<4xf32>
    %666 = vector.multi_reduction <maximumf>, %665, %cst_258 [0] : vector<16x4xf32> to vector<4xf32>
    %667 = vector.shape_cast %666 : vector<4xf32> to vector<1x4xf32>
    %668 = arith.ori %649, %453 : i1
    %cst_259 = arith.constant 0.000000e+00 : f32
    %669 = vector.broadcast %cst_259 : f32 to vector<1x4xf32>
    %670 = arith.select %668, %669, %667 : vector<1x4xf32>
    %c1_260 = arith.constant 1 : index
    %c9_261 = arith.constant 9 : index
    %c0_262 = arith.constant 0 : index
    %671 = vector.load %arg7[%c1_260, %c9_261, %c0_262] : memref<4x16x4xf32, #tpu.memory_space<vmem>>, vector<1x1x4xf32>
    %672 = vector.shape_cast %671 : vector<1x1x4xf32> to vector<1x4xf32>
    %673 = vector.shape_cast %670 : vector<1x4xf32> to vector<1x1x4xf32>
    tpu.vector_store %arg7[%c1_260, %c9_261, %c0_262], %673 {strides = array<i32>} : memref<4x16x4xf32, #tpu.memory_space<vmem>>, vector<1x1x4xf32>,
    %cst_263 = arith.constant 0xFF800000 : f32
    %674 = vector.shape_cast %648 : vector<16x1xi1> to vector<16x1xi1>
    %675 = vector.broadcast %674 : vector<16x1xi1> to vector<16x4xi1>
    %676 = vector.broadcast %cst_263 : f32 to vector<16x4xf32>
    %677 = arith.select %675, %475, %676 : vector<16x4xi1>, vector<16x4xf32>
    %cst_264 = arith.constant dense<0xFF800000> : vector<4xf32>
    %678 = vector.multi_reduction <maximumf>, %677, %cst_264 [0] : vector<16x4xf32> to vector<4xf32>
    %679 = vector.shape_cast %678 : vector<4xf32> to vector<1x4xf32>
    %680 = arith.ori %649, %476 : i1
    %cst_265 = arith.constant 0.000000e+00 : f32
    %681 = vector.broadcast %cst_265 : f32 to vector<1x4xf32>
    %682 = arith.select %680, %681, %679 : vector<1x4xf32>
    %c1_266 = arith.constant 1 : index
    %c10_267 = arith.constant 10 : index
    %c0_268 = arith.constant 0 : index
    %683 = vector.load %arg7[%c1_266, %c10_267, %c0_268] : memref<4x16x4xf32, #tpu.memory_space<vmem>>, vector<1x1x4xf32>
    %684 = vector.shape_cast %683 : vector<1x1x4xf32> to vector<1x4xf32>
    %685 = vector.shape_cast %682 : vector<1x4xf32> to vector<1x1x4xf32>
    tpu.vector_store %arg7[%c1_266, %c10_267, %c0_268], %685 {strides = array<i32>} : memref<4x16x4xf32, #tpu.memory_space<vmem>>, vector<1x1x4xf32>,
    %cst_269 = arith.constant 0xFF800000 : f32
    %686 = vector.shape_cast %648 : vector<16x1xi1> to vector<16x1xi1>
    %687 = vector.broadcast %686 : vector<16x1xi1> to vector<16x4xi1>
    %688 = vector.broadcast %cst_269 : f32 to vector<16x4xf32>
    %689 = arith.select %687, %498, %688 : vector<16x4xi1>, vector<16x4xf32>
    %cst_270 = arith.constant dense<0xFF800000> : vector<4xf32>
    %690 = vector.multi_reduction <maximumf>, %689, %cst_270 [0] : vector<16x4xf32> to vector<4xf32>
    %691 = vector.shape_cast %690 : vector<4xf32> to vector<1x4xf32>
    %692 = arith.ori %649, %499 : i1
    %cst_271 = arith.constant 0.000000e+00 : f32
    %693 = vector.broadcast %cst_271 : f32 to vector<1x4xf32>
    %694 = arith.select %692, %693, %691 : vector<1x4xf32>
    %c1_272 = arith.constant 1 : index
    %c11_273 = arith.constant 11 : index
    %c0_274 = arith.constant 0 : index
    %695 = vector.load %arg7[%c1_272, %c11_273, %c0_274] : memref<4x16x4xf32, #tpu.memory_space<vmem>>, vector<1x1x4xf32>
    %696 = vector.shape_cast %695 : vector<1x1x4xf32> to vector<1x4xf32>
    %697 = vector.shape_cast %694 : vector<1x4xf32> to vector<1x1x4xf32>
    tpu.vector_store %arg7[%c1_272, %c11_273, %c0_274], %697 {strides = array<i32>} : memref<4x16x4xf32, #tpu.memory_space<vmem>>, vector<1x1x4xf32>,
    %cst_275 = arith.constant 3.000000e+00 : f32
    %698 = arith.mulf %cst_275, %404 : f32
    %699 = math.floor %698 : f32
    %700 = arith.fptosi %699 : f32 to i32
    %701 = arith.addi %700, %390 : i32
    %c0_i32_276 = arith.constant 0 : i32
    %c16_i32_277 = arith.constant 16 : i32
    %702 = arith.maxsi %c0_i32_276, %701 : i32
    %703 = arith.minsi %c16_i32_277, %702 : i32
    %cst_278 = arith.constant 4.000000e+00 : f32
    %704 = arith.mulf %cst_278, %404 : f32
    %705 = math.ceil %704 : f32
    %706 = arith.fptosi %705 : f32 to i32
    %707 = arith.addi %706, %390 : i32
    %c0_i32_279 = arith.constant 0 : i32
    %c16_i32_280 = arith.constant 16 : i32
    %708 = arith.maxsi %c0_i32_279, %707 : i32
    %709 = arith.minsi %c16_i32_280, %708 : i32
    %710 = vector.broadcast %703 : i32 to vector<16x1xi32>
    %711 = arith.cmpi sge, %1, %710 : vector<16x1xi32>
    %712 = vector.broadcast %709 : i32 to vector<16x1xi32>
    %713 = arith.cmpi slt, %1, %712 : vector<16x1xi32>
    %714 = arith.andi %711, %713 : vector<16x1xi1>
    %715 = arith.cmpi sle, %709, %703 : i32
    %cst_281 = arith.constant 0xFF800000 : f32
    %716 = vector.shape_cast %714 : vector<16x1xi1> to vector<16x1xi1>
    %717 = vector.broadcast %716 : vector<16x1xi1> to vector<16x4xi1>
    %718 = vector.broadcast %cst_281 : f32 to vector<16x4xf32>
    %719 = arith.select %717, %429, %718 : vector<16x4xi1>, vector<16x4xf32>
    %cst_282 = arith.constant dense<0xFF800000> : vector<4xf32>
    %720 = vector.multi_reduction <maximumf>, %719, %cst_282 [0] : vector<16x4xf32> to vector<4xf32>
    %721 = vector.shape_cast %720 : vector<4xf32> to vector<1x4xf32>
    %722 = arith.ori %715, %430 : i1
    %cst_283 = arith.constant 0.000000e+00 : f32
    %723 = vector.broadcast %cst_283 : f32 to vector<1x4xf32>
    %724 = arith.select %722, %723, %721 : vector<1x4xf32>
    %c1_284 = arith.constant 1 : index
    %c12_285 = arith.constant 12 : index
    %c0_286 = arith.constant 0 : index
    %725 = vector.load %arg7[%c1_284, %c12_285, %c0_286] : memref<4x16x4xf32, #tpu.memory_space<vmem>>, vector<1x1x4xf32>
    %726 = vector.shape_cast %725 : vector<1x1x4xf32> to vector<1x4xf32>
    %727 = vector.shape_cast %724 : vector<1x4xf32> to vector<1x1x4xf32>
    tpu.vector_store %arg7[%c1_284, %c12_285, %c0_286], %727 {strides = array<i32>} : memref<4x16x4xf32, #tpu.memory_space<vmem>>, vector<1x1x4xf32>,
    %cst_287 = arith.constant 0xFF800000 : f32
    %728 = vector.shape_cast %714 : vector<16x1xi1> to vector<16x1xi1>
    %729 = vector.broadcast %728 : vector<16x1xi1> to vector<16x4xi1>
    %730 = vector.broadcast %cst_287 : f32 to vector<16x4xf32>
    %731 = arith.select %729, %452, %730 : vector<16x4xi1>, vector<16x4xf32>
    %cst_288 = arith.constant dense<0xFF800000> : vector<4xf32>
    %732 = vector.multi_reduction <maximumf>, %731, %cst_288 [0] : vector<16x4xf32> to vector<4xf32>
    %733 = vector.shape_cast %732 : vector<4xf32> to vector<1x4xf32>
    %734 = arith.ori %715, %453 : i1
    %cst_289 = arith.constant 0.000000e+00 : f32
    %735 = vector.broadcast %cst_289 : f32 to vector<1x4xf32>
    %736 = arith.select %734, %735, %733 : vector<1x4xf32>
    %c1_290 = arith.constant 1 : index
    %c13_291 = arith.constant 13 : index
    %c0_292 = arith.constant 0 : index
    %737 = vector.load %arg7[%c1_290, %c13_291, %c0_292] : memref<4x16x4xf32, #tpu.memory_space<vmem>>, vector<1x1x4xf32>
    %738 = vector.shape_cast %737 : vector<1x1x4xf32> to vector<1x4xf32>
    %739 = vector.shape_cast %736 : vector<1x4xf32> to vector<1x1x4xf32>
    tpu.vector_store %arg7[%c1_290, %c13_291, %c0_292], %739 {strides = array<i32>} : memref<4x16x4xf32, #tpu.memory_space<vmem>>, vector<1x1x4xf32>,
    %cst_293 = arith.constant 0xFF800000 : f32
    %740 = vector.shape_cast %714 : vector<16x1xi1> to vector<16x1xi1>
    %741 = vector.broadcast %740 : vector<16x1xi1> to vector<16x4xi1>
    %742 = vector.broadcast %cst_293 : f32 to vector<16x4xf32>
    %743 = arith.select %741, %475, %742 : vector<16x4xi1>, vector<16x4xf32>
    %cst_294 = arith.constant dense<0xFF800000> : vector<4xf32>
    %744 = vector.multi_reduction <maximumf>, %743, %cst_294 [0] : vector<16x4xf32> to vector<4xf32>
    %745 = vector.shape_cast %744 : vector<4xf32> to vector<1x4xf32>
    %746 = arith.ori %715, %476 : i1
    %cst_295 = arith.constant 0.000000e+00 : f32
    %747 = vector.broadcast %cst_295 : f32 to vector<1x4xf32>
    %748 = arith.select %746, %747, %745 : vector<1x4xf32>
    %c1_296 = arith.constant 1 : index
    %c14_297 = arith.constant 14 : index
    %c0_298 = arith.constant 0 : index
    %749 = vector.load %arg7[%c1_296, %c14_297, %c0_298] : memref<4x16x4xf32, #tpu.memory_space<vmem>>, vector<1x1x4xf32>
    %750 = vector.shape_cast %749 : vector<1x1x4xf32> to vector<1x4xf32>
    %751 = vector.shape_cast %748 : vector<1x4xf32> to vector<1x1x4xf32>
    tpu.vector_store %arg7[%c1_296, %c14_297, %c0_298], %751 {strides = array<i32>} : memref<4x16x4xf32, #tpu.memory_space<vmem>>, vector<1x1x4xf32>,
    %cst_299 = arith.constant 0xFF800000 : f32
    %752 = vector.shape_cast %714 : vector<16x1xi1> to vector<16x1xi1>
    %753 = vector.broadcast %752 : vector<16x1xi1> to vector<16x4xi1>
    %754 = vector.broadcast %cst_299 : f32 to vector<16x4xf32>
    %755 = arith.select %753, %498, %754 : vector<16x4xi1>, vector<16x4xf32>
    %cst_300 = arith.constant dense<0xFF800000> : vector<4xf32>
    %756 = vector.multi_reduction <maximumf>, %755, %cst_300 [0] : vector<16x4xf32> to vector<4xf32>
    %757 = vector.shape_cast %756 : vector<4xf32> to vector<1x4xf32>
    %758 = arith.ori %715, %499 : i1
    %cst_301 = arith.constant 0.000000e+00 : f32
    %759 = vector.broadcast %cst_301 : f32 to vector<1x4xf32>
    %760 = arith.select %758, %759, %757 : vector<1x4xf32>
    %c1_302 = arith.constant 1 : index
    %c15_303 = arith.constant 15 : index
    %c0_304 = arith.constant 0 : index
    %761 = vector.load %arg7[%c1_302, %c15_303, %c0_304] : memref<4x16x4xf32, #tpu.memory_space<vmem>>, vector<1x1x4xf32>
    %762 = vector.shape_cast %761 : vector<1x1x4xf32> to vector<1x4xf32>
    %763 = vector.shape_cast %760 : vector<1x4xf32> to vector<1x1x4xf32>
    tpu.vector_store %arg7[%c1_302, %c15_303, %c0_304], %763 {strides = array<i32>} : memref<4x16x4xf32, #tpu.memory_space<vmem>>, vector<1x1x4xf32>,
    %c4_i32_305 = arith.constant 4 : i32
    %764 = arith.muli %arg0, %c4_i32_305 : i32
    %c2_i32 = arith.constant 2 : i32
    %765 = arith.addi %764, %c2_i32 : i32
    %766 = arith.index_cast %765 : i32 to index
    %767 = memref.load %arg1[%766] : memref<4xi32, #tpu.memory_space<smem>>
    %768 = arith.index_cast %765 : i32 to index
    %769 = memref.load %arg2[%768] : memref<4xi32, #tpu.memory_space<smem>>
    %770 = arith.index_cast %765 : i32 to index
    %771 = memref.load %arg3[%770] : memref<4xi32, #tpu.memory_space<smem>>
    %772 = arith.index_cast %765 : i32 to index
    %773 = memref.load %arg4[%772] : memref<4xi32, #tpu.memory_space<smem>>
    %774 = arith.index_cast %765 : i32 to index
    %775 = memref.load %arg5[%774] : memref<4xi32, #tpu.memory_space<smem>>
    %776 = arith.subi %773, %769 : i32
    %c1_i32_306 = arith.constant 1 : i32
    %777 = arith.addi %776, %c1_i32_306 : i32
    %c1_i32_307 = arith.constant 1 : i32
    %778 = arith.maxsi %777, %c1_i32_307 : i32
    %779 = arith.subi %775, %771 : i32
    %c1_i32_308 = arith.constant 1 : i32
    %780 = arith.addi %779, %c1_i32_308 : i32
    %c1_i32_309 = arith.constant 1 : i32
    %781 = arith.maxsi %780, %c1_i32_309 : i32
    %782 = arith.sitofp %778 : i32 to f32
    %cst_310 = arith.constant 4.000000e+00 : f32
    %783 = arith.divf %782, %cst_310 : f32
    %784 = arith.sitofp %781 : i32 to f32
    %cst_311 = arith.constant 4.000000e+00 : f32
    %785 = arith.divf %784, %cst_311 : f32
    %786 = arith.index_cast %767 : i32 to index
    %c0_312 = arith.constant 0 : index
    %c0_313 = arith.constant 0 : index
    %c0_314 = arith.constant 0 : index
    %787 = vector.load %arg6[%786, %c0_312, %c0_313, %c0_314] : memref<2x16x16x4xf32, #tpu.memory_space<vmem>>, vector<1x16x16x4xf32>
    %788 = vector.shape_cast %787 : vector<1x16x16x4xf32> to vector<16x16x4xf32>
    %cst_315 = arith.constant 0.000000e+00 : f32
    %789 = arith.mulf %cst_315, %783 : f32
    %790 = math.floor %789 : f32
    %791 = arith.fptosi %790 : f32 to i32
    %792 = arith.addi %791, %769 : i32
    %c0_i32_316 = arith.constant 0 : i32
    %c16_i32_317 = arith.constant 16 : i32
    %793 = arith.maxsi %c0_i32_316, %792 : i32
    %794 = arith.minsi %c16_i32_317, %793 : i32
    %cst_318 = arith.constant 1.000000e+00 : f32
    %795 = arith.mulf %cst_318, %783 : f32
    %796 = math.ceil %795 : f32
    %797 = arith.fptosi %796 : f32 to i32
    %798 = arith.addi %797, %769 : i32
    %c0_i32_319 = arith.constant 0 : i32
    %c16_i32_320 = arith.constant 16 : i32
    %799 = arith.maxsi %c0_i32_319, %798 : i32
    %800 = arith.minsi %c16_i32_320, %799 : i32
    %801 = vector.broadcast %794 : i32 to vector<1x16x1xi32>
    %802 = arith.cmpi sge, %0, %801 : vector<1x16x1xi32>
    %803 = vector.broadcast %800 : i32 to vector<1x16x1xi32>
    %804 = arith.cmpi slt, %0, %803 : vector<1x16x1xi32>
    %805 = arith.andi %802, %804 : vector<1x16x1xi1>
    %cst_321 = arith.constant 0xFF800000 : f32
    %806 = vector.shape_cast %805 : vector<1x16x1xi1> to vector<1x16x1xi1>
    %807 = vector.broadcast %806 : vector<1x16x1xi1> to vector<16x16x4xi1>
    %808 = vector.broadcast %cst_321 : f32 to vector<16x16x4xf32>
    %809 = arith.select %807, %788, %808 : vector<16x16x4xi1>, vector<16x16x4xf32>
    %cst_322 = arith.constant dense<0xFF800000> : vector<16x4xf32>
    %810 = vector.multi_reduction <maximumf>, %809, %cst_322 [1] : vector<16x16x4xf32> to vector<16x4xf32>
    %811 = arith.cmpi sle, %800, %794 : i32
    %cst_323 = arith.constant 1.000000e+00 : f32
    %812 = arith.mulf %cst_323, %783 : f32
    %813 = math.floor %812 : f32
    %814 = arith.fptosi %813 : f32 to i32
    %815 = arith.addi %814, %769 : i32
    %c0_i32_324 = arith.constant 0 : i32
    %c16_i32_325 = arith.constant 16 : i32
    %816 = arith.maxsi %c0_i32_324, %815 : i32
    %817 = arith.minsi %c16_i32_325, %816 : i32
    %cst_326 = arith.constant 2.000000e+00 : f32
    %818 = arith.mulf %cst_326, %783 : f32
    %819 = math.ceil %818 : f32
    %820 = arith.fptosi %819 : f32 to i32
    %821 = arith.addi %820, %769 : i32
    %c0_i32_327 = arith.constant 0 : i32
    %c16_i32_328 = arith.constant 16 : i32
    %822 = arith.maxsi %c0_i32_327, %821 : i32
    %823 = arith.minsi %c16_i32_328, %822 : i32
    %824 = vector.broadcast %817 : i32 to vector<1x16x1xi32>
    %825 = arith.cmpi sge, %0, %824 : vector<1x16x1xi32>
    %826 = vector.broadcast %823 : i32 to vector<1x16x1xi32>
    %827 = arith.cmpi slt, %0, %826 : vector<1x16x1xi32>
    %828 = arith.andi %825, %827 : vector<1x16x1xi1>
    %cst_329 = arith.constant 0xFF800000 : f32
    %829 = vector.shape_cast %828 : vector<1x16x1xi1> to vector<1x16x1xi1>
    %830 = vector.broadcast %829 : vector<1x16x1xi1> to vector<16x16x4xi1>
    %831 = vector.broadcast %cst_329 : f32 to vector<16x16x4xf32>
    %832 = arith.select %830, %788, %831 : vector<16x16x4xi1>, vector<16x16x4xf32>
    %cst_330 = arith.constant dense<0xFF800000> : vector<16x4xf32>
    %833 = vector.multi_reduction <maximumf>, %832, %cst_330 [1] : vector<16x16x4xf32> to vector<16x4xf32>
    %834 = arith.cmpi sle, %823, %817 : i32
    %cst_331 = arith.constant 2.000000e+00 : f32
    %835 = arith.mulf %cst_331, %783 : f32
    %836 = math.floor %835 : f32
    %837 = arith.fptosi %836 : f32 to i32
    %838 = arith.addi %837, %769 : i32
    %c0_i32_332 = arith.constant 0 : i32
    %c16_i32_333 = arith.constant 16 : i32
    %839 = arith.maxsi %c0_i32_332, %838 : i32
    %840 = arith.minsi %c16_i32_333, %839 : i32
    %cst_334 = arith.constant 3.000000e+00 : f32
    %841 = arith.mulf %cst_334, %783 : f32
    %842 = math.ceil %841 : f32
    %843 = arith.fptosi %842 : f32 to i32
    %844 = arith.addi %843, %769 : i32
    %c0_i32_335 = arith.constant 0 : i32
    %c16_i32_336 = arith.constant 16 : i32
    %845 = arith.maxsi %c0_i32_335, %844 : i32
    %846 = arith.minsi %c16_i32_336, %845 : i32
    %847 = vector.broadcast %840 : i32 to vector<1x16x1xi32>
    %848 = arith.cmpi sge, %0, %847 : vector<1x16x1xi32>
    %849 = vector.broadcast %846 : i32 to vector<1x16x1xi32>
    %850 = arith.cmpi slt, %0, %849 : vector<1x16x1xi32>
    %851 = arith.andi %848, %850 : vector<1x16x1xi1>
    %cst_337 = arith.constant 0xFF800000 : f32
    %852 = vector.shape_cast %851 : vector<1x16x1xi1> to vector<1x16x1xi1>
    %853 = vector.broadcast %852 : vector<1x16x1xi1> to vector<16x16x4xi1>
    %854 = vector.broadcast %cst_337 : f32 to vector<16x16x4xf32>
    %855 = arith.select %853, %788, %854 : vector<16x16x4xi1>, vector<16x16x4xf32>
    %cst_338 = arith.constant dense<0xFF800000> : vector<16x4xf32>
    %856 = vector.multi_reduction <maximumf>, %855, %cst_338 [1] : vector<16x16x4xf32> to vector<16x4xf32>
    %857 = arith.cmpi sle, %846, %840 : i32
    %cst_339 = arith.constant 3.000000e+00 : f32
    %858 = arith.mulf %cst_339, %783 : f32
    %859 = math.floor %858 : f32
    %860 = arith.fptosi %859 : f32 to i32
    %861 = arith.addi %860, %769 : i32
    %c0_i32_340 = arith.constant 0 : i32
    %c16_i32_341 = arith.constant 16 : i32
    %862 = arith.maxsi %c0_i32_340, %861 : i32
    %863 = arith.minsi %c16_i32_341, %862 : i32
    %cst_342 = arith.constant 4.000000e+00 : f32
    %864 = arith.mulf %cst_342, %783 : f32
    %865 = math.ceil %864 : f32
    %866 = arith.fptosi %865 : f32 to i32
    %867 = arith.addi %866, %769 : i32
    %c0_i32_343 = arith.constant 0 : i32
    %c16_i32_344 = arith.constant 16 : i32
    %868 = arith.maxsi %c0_i32_343, %867 : i32
    %869 = arith.minsi %c16_i32_344, %868 : i32
    %870 = vector.broadcast %863 : i32 to vector<1x16x1xi32>
    %871 = arith.cmpi sge, %0, %870 : vector<1x16x1xi32>
    %872 = vector.broadcast %869 : i32 to vector<1x16x1xi32>
    %873 = arith.cmpi slt, %0, %872 : vector<1x16x1xi32>
    %874 = arith.andi %871, %873 : vector<1x16x1xi1>
    %cst_345 = arith.constant 0xFF800000 : f32
    %875 = vector.shape_cast %874 : vector<1x16x1xi1> to vector<1x16x1xi1>
    %876 = vector.broadcast %875 : vector<1x16x1xi1> to vector<16x16x4xi1>
    %877 = vector.broadcast %cst_345 : f32 to vector<16x16x4xf32>
    %878 = arith.select %876, %788, %877 : vector<16x16x4xi1>, vector<16x16x4xf32>
    %cst_346 = arith.constant dense<0xFF800000> : vector<16x4xf32>
    %879 = vector.multi_reduction <maximumf>, %878, %cst_346 [1] : vector<16x16x4xf32> to vector<16x4xf32>
    %880 = arith.cmpi sle, %869, %863 : i32
    %cst_347 = arith.constant 0.000000e+00 : f32
    %881 = arith.mulf %cst_347, %785 : f32
    %882 = math.floor %881 : f32
    %883 = arith.fptosi %882 : f32 to i32
    %884 = arith.addi %883, %771 : i32
    %c0_i32_348 = arith.constant 0 : i32
    %c16_i32_349 = arith.constant 16 : i32
    %885 = arith.maxsi %c0_i32_348, %884 : i32
    %886 = arith.minsi %c16_i32_349, %885 : i32
    %cst_350 = arith.constant 1.000000e+00 : f32
    %887 = arith.mulf %cst_350, %785 : f32
    %888 = math.ceil %887 : f32
    %889 = arith.fptosi %888 : f32 to i32
    %890 = arith.addi %889, %771 : i32
    %c0_i32_351 = arith.constant 0 : i32
    %c16_i32_352 = arith.constant 16 : i32
    %891 = arith.maxsi %c0_i32_351, %890 : i32
    %892 = arith.minsi %c16_i32_352, %891 : i32
    %893 = vector.broadcast %886 : i32 to vector<16x1xi32>
    %894 = arith.cmpi sge, %1, %893 : vector<16x1xi32>
    %895 = vector.broadcast %892 : i32 to vector<16x1xi32>
    %896 = arith.cmpi slt, %1, %895 : vector<16x1xi32>
    %897 = arith.andi %894, %896 : vector<16x1xi1>
    %898 = arith.cmpi sle, %892, %886 : i32
    %cst_353 = arith.constant 0xFF800000 : f32
    %899 = vector.shape_cast %897 : vector<16x1xi1> to vector<16x1xi1>
    %900 = vector.broadcast %899 : vector<16x1xi1> to vector<16x4xi1>
    %901 = vector.broadcast %cst_353 : f32 to vector<16x4xf32>
    %902 = arith.select %900, %810, %901 : vector<16x4xi1>, vector<16x4xf32>
    %cst_354 = arith.constant dense<0xFF800000> : vector<4xf32>
    %903 = vector.multi_reduction <maximumf>, %902, %cst_354 [0] : vector<16x4xf32> to vector<4xf32>
    %904 = vector.shape_cast %903 : vector<4xf32> to vector<1x4xf32>
    %905 = arith.ori %898, %811 : i1
    %cst_355 = arith.constant 0.000000e+00 : f32
    %906 = vector.broadcast %cst_355 : f32 to vector<1x4xf32>
    %907 = arith.select %905, %906, %904 : vector<1x4xf32>
    %c2_356 = arith.constant 2 : index
    %c0_357 = arith.constant 0 : index
    %c0_358 = arith.constant 0 : index
    %908 = vector.load %arg7[%c2_356, %c0_357, %c0_358] : memref<4x16x4xf32, #tpu.memory_space<vmem>>, vector<1x1x4xf32>
    %909 = vector.shape_cast %908 : vector<1x1x4xf32> to vector<1x4xf32>
    %910 = vector.shape_cast %907 : vector<1x4xf32> to vector<1x1x4xf32>
    tpu.vector_store %arg7[%c2_356, %c0_357, %c0_358], %910 {strides = array<i32>} : memref<4x16x4xf32, #tpu.memory_space<vmem>>, vector<1x1x4xf32>,
    %cst_359 = arith.constant 0xFF800000 : f32
    %911 = vector.shape_cast %897 : vector<16x1xi1> to vector<16x1xi1>
    %912 = vector.broadcast %911 : vector<16x1xi1> to vector<16x4xi1>
    %913 = vector.broadcast %cst_359 : f32 to vector<16x4xf32>
    %914 = arith.select %912, %833, %913 : vector<16x4xi1>, vector<16x4xf32>
    %cst_360 = arith.constant dense<0xFF800000> : vector<4xf32>
    %915 = vector.multi_reduction <maximumf>, %914, %cst_360 [0] : vector<16x4xf32> to vector<4xf32>
    %916 = vector.shape_cast %915 : vector<4xf32> to vector<1x4xf32>
    %917 = arith.ori %898, %834 : i1
    %cst_361 = arith.constant 0.000000e+00 : f32
    %918 = vector.broadcast %cst_361 : f32 to vector<1x4xf32>
    %919 = arith.select %917, %918, %916 : vector<1x4xf32>
    %c2_362 = arith.constant 2 : index
    %c1_363 = arith.constant 1 : index
    %c0_364 = arith.constant 0 : index
    %920 = vector.load %arg7[%c2_362, %c1_363, %c0_364] : memref<4x16x4xf32, #tpu.memory_space<vmem>>, vector<1x1x4xf32>
    %921 = vector.shape_cast %920 : vector<1x1x4xf32> to vector<1x4xf32>
    %922 = vector.shape_cast %919 : vector<1x4xf32> to vector<1x1x4xf32>
    tpu.vector_store %arg7[%c2_362, %c1_363, %c0_364], %922 {strides = array<i32>} : memref<4x16x4xf32, #tpu.memory_space<vmem>>, vector<1x1x4xf32>,
    %cst_365 = arith.constant 0xFF800000 : f32
    %923 = vector.shape_cast %897 : vector<16x1xi1> to vector<16x1xi1>
    %924 = vector.broadcast %923 : vector<16x1xi1> to vector<16x4xi1>
    %925 = vector.broadcast %cst_365 : f32 to vector<16x4xf32>
    %926 = arith.select %924, %856, %925 : vector<16x4xi1>, vector<16x4xf32>
    %cst_366 = arith.constant dense<0xFF800000> : vector<4xf32>
    %927 = vector.multi_reduction <maximumf>, %926, %cst_366 [0] : vector<16x4xf32> to vector<4xf32>
    %928 = vector.shape_cast %927 : vector<4xf32> to vector<1x4xf32>
    %929 = arith.ori %898, %857 : i1
    %cst_367 = arith.constant 0.000000e+00 : f32
    %930 = vector.broadcast %cst_367 : f32 to vector<1x4xf32>
    %931 = arith.select %929, %930, %928 : vector<1x4xf32>
    %c2_368 = arith.constant 2 : index
    %c2_369 = arith.constant 2 : index
    %c0_370 = arith.constant 0 : index
    %932 = vector.load %arg7[%c2_368, %c2_369, %c0_370] : memref<4x16x4xf32, #tpu.memory_space<vmem>>, vector<1x1x4xf32>
    %933 = vector.shape_cast %932 : vector<1x1x4xf32> to vector<1x4xf32>
    %934 = vector.shape_cast %931 : vector<1x4xf32> to vector<1x1x4xf32>
    tpu.vector_store %arg7[%c2_368, %c2_369, %c0_370], %934 {strides = array<i32>} : memref<4x16x4xf32, #tpu.memory_space<vmem>>, vector<1x1x4xf32>,
    %cst_371 = arith.constant 0xFF800000 : f32
    %935 = vector.shape_cast %897 : vector<16x1xi1> to vector<16x1xi1>
    %936 = vector.broadcast %935 : vector<16x1xi1> to vector<16x4xi1>
    %937 = vector.broadcast %cst_371 : f32 to vector<16x4xf32>
    %938 = arith.select %936, %879, %937 : vector<16x4xi1>, vector<16x4xf32>
    %cst_372 = arith.constant dense<0xFF800000> : vector<4xf32>
    %939 = vector.multi_reduction <maximumf>, %938, %cst_372 [0] : vector<16x4xf32> to vector<4xf32>
    %940 = vector.shape_cast %939 : vector<4xf32> to vector<1x4xf32>
    %941 = arith.ori %898, %880 : i1
    %cst_373 = arith.constant 0.000000e+00 : f32
    %942 = vector.broadcast %cst_373 : f32 to vector<1x4xf32>
    %943 = arith.select %941, %942, %940 : vector<1x4xf32>
    %c2_374 = arith.constant 2 : index
    %c3_375 = arith.constant 3 : index
    %c0_376 = arith.constant 0 : index
    %944 = vector.load %arg7[%c2_374, %c3_375, %c0_376] : memref<4x16x4xf32, #tpu.memory_space<vmem>>, vector<1x1x4xf32>
    %945 = vector.shape_cast %944 : vector<1x1x4xf32> to vector<1x4xf32>
    %946 = vector.shape_cast %943 : vector<1x4xf32> to vector<1x1x4xf32>
    tpu.vector_store %arg7[%c2_374, %c3_375, %c0_376], %946 {strides = array<i32>} : memref<4x16x4xf32, #tpu.memory_space<vmem>>, vector<1x1x4xf32>,
    %cst_377 = arith.constant 1.000000e+00 : f32
    %947 = arith.mulf %cst_377, %785 : f32
    %948 = math.floor %947 : f32
    %949 = arith.fptosi %948 : f32 to i32
    %950 = arith.addi %949, %771 : i32
    %c0_i32_378 = arith.constant 0 : i32
    %c16_i32_379 = arith.constant 16 : i32
    %951 = arith.maxsi %c0_i32_378, %950 : i32
    %952 = arith.minsi %c16_i32_379, %951 : i32
    %cst_380 = arith.constant 2.000000e+00 : f32
    %953 = arith.mulf %cst_380, %785 : f32
    %954 = math.ceil %953 : f32
    %955 = arith.fptosi %954 : f32 to i32
    %956 = arith.addi %955, %771 : i32
    %c0_i32_381 = arith.constant 0 : i32
    %c16_i32_382 = arith.constant 16 : i32
    %957 = arith.maxsi %c0_i32_381, %956 : i32
    %958 = arith.minsi %c16_i32_382, %957 : i32
    %959 = vector.broadcast %952 : i32 to vector<16x1xi32>
    %960 = arith.cmpi sge, %1, %959 : vector<16x1xi32>
    %961 = vector.broadcast %958 : i32 to vector<16x1xi32>
    %962 = arith.cmpi slt, %1, %961 : vector<16x1xi32>
    %963 = arith.andi %960, %962 : vector<16x1xi1>
    %964 = arith.cmpi sle, %958, %952 : i32
    %cst_383 = arith.constant 0xFF800000 : f32
    %965 = vector.shape_cast %963 : vector<16x1xi1> to vector<16x1xi1>
    %966 = vector.broadcast %965 : vector<16x1xi1> to vector<16x4xi1>
    %967 = vector.broadcast %cst_383 : f32 to vector<16x4xf32>
    %968 = arith.select %966, %810, %967 : vector<16x4xi1>, vector<16x4xf32>
    %cst_384 = arith.constant dense<0xFF800000> : vector<4xf32>
    %969 = vector.multi_reduction <maximumf>, %968, %cst_384 [0] : vector<16x4xf32> to vector<4xf32>
    %970 = vector.shape_cast %969 : vector<4xf32> to vector<1x4xf32>
    %971 = arith.ori %964, %811 : i1
    %cst_385 = arith.constant 0.000000e+00 : f32
    %972 = vector.broadcast %cst_385 : f32 to vector<1x4xf32>
    %973 = arith.select %971, %972, %970 : vector<1x4xf32>
    %c2_386 = arith.constant 2 : index
    %c4_387 = arith.constant 4 : index
    %c0_388 = arith.constant 0 : index
    %974 = vector.load %arg7[%c2_386, %c4_387, %c0_388] : memref<4x16x4xf32, #tpu.memory_space<vmem>>, vector<1x1x4xf32>
    %975 = vector.shape_cast %974 : vector<1x1x4xf32> to vector<1x4xf32>
    %976 = vector.shape_cast %973 : vector<1x4xf32> to vector<1x1x4xf32>
    tpu.vector_store %arg7[%c2_386, %c4_387, %c0_388], %976 {strides = array<i32>} : memref<4x16x4xf32, #tpu.memory_space<vmem>>, vector<1x1x4xf32>,
    %cst_389 = arith.constant 0xFF800000 : f32
    %977 = vector.shape_cast %963 : vector<16x1xi1> to vector<16x1xi1>
    %978 = vector.broadcast %977 : vector<16x1xi1> to vector<16x4xi1>
    %979 = vector.broadcast %cst_389 : f32 to vector<16x4xf32>
    %980 = arith.select %978, %833, %979 : vector<16x4xi1>, vector<16x4xf32>
    %cst_390 = arith.constant dense<0xFF800000> : vector<4xf32>
    %981 = vector.multi_reduction <maximumf>, %980, %cst_390 [0] : vector<16x4xf32> to vector<4xf32>
    %982 = vector.shape_cast %981 : vector<4xf32> to vector<1x4xf32>
    %983 = arith.ori %964, %834 : i1
    %cst_391 = arith.constant 0.000000e+00 : f32
    %984 = vector.broadcast %cst_391 : f32 to vector<1x4xf32>
    %985 = arith.select %983, %984, %982 : vector<1x4xf32>
    %c2_392 = arith.constant 2 : index
    %c5_393 = arith.constant 5 : index
    %c0_394 = arith.constant 0 : index
    %986 = vector.load %arg7[%c2_392, %c5_393, %c0_394] : memref<4x16x4xf32, #tpu.memory_space<vmem>>, vector<1x1x4xf32>
    %987 = vector.shape_cast %986 : vector<1x1x4xf32> to vector<1x4xf32>
    %988 = vector.shape_cast %985 : vector<1x4xf32> to vector<1x1x4xf32>
    tpu.vector_store %arg7[%c2_392, %c5_393, %c0_394], %988 {strides = array<i32>} : memref<4x16x4xf32, #tpu.memory_space<vmem>>, vector<1x1x4xf32>,
    %cst_395 = arith.constant 0xFF800000 : f32
    %989 = vector.shape_cast %963 : vector<16x1xi1> to vector<16x1xi1>
    %990 = vector.broadcast %989 : vector<16x1xi1> to vector<16x4xi1>
    %991 = vector.broadcast %cst_395 : f32 to vector<16x4xf32>
    %992 = arith.select %990, %856, %991 : vector<16x4xi1>, vector<16x4xf32>
    %cst_396 = arith.constant dense<0xFF800000> : vector<4xf32>
    %993 = vector.multi_reduction <maximumf>, %992, %cst_396 [0] : vector<16x4xf32> to vector<4xf32>
    %994 = vector.shape_cast %993 : vector<4xf32> to vector<1x4xf32>
    %995 = arith.ori %964, %857 : i1
    %cst_397 = arith.constant 0.000000e+00 : f32
    %996 = vector.broadcast %cst_397 : f32 to vector<1x4xf32>
    %997 = arith.select %995, %996, %994 : vector<1x4xf32>
    %c2_398 = arith.constant 2 : index
    %c6_399 = arith.constant 6 : index
    %c0_400 = arith.constant 0 : index
    %998 = vector.load %arg7[%c2_398, %c6_399, %c0_400] : memref<4x16x4xf32, #tpu.memory_space<vmem>>, vector<1x1x4xf32>
    %999 = vector.shape_cast %998 : vector<1x1x4xf32> to vector<1x4xf32>
    %1000 = vector.shape_cast %997 : vector<1x4xf32> to vector<1x1x4xf32>
    tpu.vector_store %arg7[%c2_398, %c6_399, %c0_400], %1000 {strides = array<i32>} : memref<4x16x4xf32, #tpu.memory_space<vmem>>, vector<1x1x4xf32>,
    %cst_401 = arith.constant 0xFF800000 : f32
    %1001 = vector.shape_cast %963 : vector<16x1xi1> to vector<16x1xi1>
    %1002 = vector.broadcast %1001 : vector<16x1xi1> to vector<16x4xi1>
    %1003 = vector.broadcast %cst_401 : f32 to vector<16x4xf32>
    %1004 = arith.select %1002, %879, %1003 : vector<16x4xi1>, vector<16x4xf32>
    %cst_402 = arith.constant dense<0xFF800000> : vector<4xf32>
    %1005 = vector.multi_reduction <maximumf>, %1004, %cst_402 [0] : vector<16x4xf32> to vector<4xf32>
    %1006 = vector.shape_cast %1005 : vector<4xf32> to vector<1x4xf32>
    %1007 = arith.ori %964, %880 : i1
    %cst_403 = arith.constant 0.000000e+00 : f32
    %1008 = vector.broadcast %cst_403 : f32 to vector<1x4xf32>
    %1009 = arith.select %1007, %1008, %1006 : vector<1x4xf32>
    %c2_404 = arith.constant 2 : index
    %c7_405 = arith.constant 7 : index
    %c0_406 = arith.constant 0 : index
    %1010 = vector.load %arg7[%c2_404, %c7_405, %c0_406] : memref<4x16x4xf32, #tpu.memory_space<vmem>>, vector<1x1x4xf32>
    %1011 = vector.shape_cast %1010 : vector<1x1x4xf32> to vector<1x4xf32>
    %1012 = vector.shape_cast %1009 : vector<1x4xf32> to vector<1x1x4xf32>
    tpu.vector_store %arg7[%c2_404, %c7_405, %c0_406], %1012 {strides = array<i32>} : memref<4x16x4xf32, #tpu.memory_space<vmem>>, vector<1x1x4xf32>,
    %cst_407 = arith.constant 2.000000e+00 : f32
    %1013 = arith.mulf %cst_407, %785 : f32
    %1014 = math.floor %1013 : f32
    %1015 = arith.fptosi %1014 : f32 to i32
    %1016 = arith.addi %1015, %771 : i32
    %c0_i32_408 = arith.constant 0 : i32
    %c16_i32_409 = arith.constant 16 : i32
    %1017 = arith.maxsi %c0_i32_408, %1016 : i32
    %1018 = arith.minsi %c16_i32_409, %1017 : i32
    %cst_410 = arith.constant 3.000000e+00 : f32
    %1019 = arith.mulf %cst_410, %785 : f32
    %1020 = math.ceil %1019 : f32
    %1021 = arith.fptosi %1020 : f32 to i32
    %1022 = arith.addi %1021, %771 : i32
    %c0_i32_411 = arith.constant 0 : i32
    %c16_i32_412 = arith.constant 16 : i32
    %1023 = arith.maxsi %c0_i32_411, %1022 : i32
    %1024 = arith.minsi %c16_i32_412, %1023 : i32
    %1025 = vector.broadcast %1018 : i32 to vector<16x1xi32>
    %1026 = arith.cmpi sge, %1, %1025 : vector<16x1xi32>
    %1027 = vector.broadcast %1024 : i32 to vector<16x1xi32>
    %1028 = arith.cmpi slt, %1, %1027 : vector<16x1xi32>
    %1029 = arith.andi %1026, %1028 : vector<16x1xi1>
    %1030 = arith.cmpi sle, %1024, %1018 : i32
    %cst_413 = arith.constant 0xFF800000 : f32
    %1031 = vector.shape_cast %1029 : vector<16x1xi1> to vector<16x1xi1>
    %1032 = vector.broadcast %1031 : vector<16x1xi1> to vector<16x4xi1>
    %1033 = vector.broadcast %cst_413 : f32 to vector<16x4xf32>
    %1034 = arith.select %1032, %810, %1033 : vector<16x4xi1>, vector<16x4xf32>
    %cst_414 = arith.constant dense<0xFF800000> : vector<4xf32>
    %1035 = vector.multi_reduction <maximumf>, %1034, %cst_414 [0] : vector<16x4xf32> to vector<4xf32>
    %1036 = vector.shape_cast %1035 : vector<4xf32> to vector<1x4xf32>
    %1037 = arith.ori %1030, %811 : i1
    %cst_415 = arith.constant 0.000000e+00 : f32
    %1038 = vector.broadcast %cst_415 : f32 to vector<1x4xf32>
    %1039 = arith.select %1037, %1038, %1036 : vector<1x4xf32>
    %c2_416 = arith.constant 2 : index
    %c8_417 = arith.constant 8 : index
    %c0_418 = arith.constant 0 : index
    %1040 = vector.load %arg7[%c2_416, %c8_417, %c0_418] : memref<4x16x4xf32, #tpu.memory_space<vmem>>, vector<1x1x4xf32>
    %1041 = vector.shape_cast %1040 : vector<1x1x4xf32> to vector<1x4xf32>
    %1042 = vector.shape_cast %1039 : vector<1x4xf32> to vector<1x1x4xf32>
    tpu.vector_store %arg7[%c2_416, %c8_417, %c0_418], %1042 {strides = array<i32>} : memref<4x16x4xf32, #tpu.memory_space<vmem>>, vector<1x1x4xf32>,
    %cst_419 = arith.constant 0xFF800000 : f32
    %1043 = vector.shape_cast %1029 : vector<16x1xi1> to vector<16x1xi1>
    %1044 = vector.broadcast %1043 : vector<16x1xi1> to vector<16x4xi1>
    %1045 = vector.broadcast %cst_419 : f32 to vector<16x4xf32>
    %1046 = arith.select %1044, %833, %1045 : vector<16x4xi1>, vector<16x4xf32>
    %cst_420 = arith.constant dense<0xFF800000> : vector<4xf32>
    %1047 = vector.multi_reduction <maximumf>, %1046, %cst_420 [0] : vector<16x4xf32> to vector<4xf32>
    %1048 = vector.shape_cast %1047 : vector<4xf32> to vector<1x4xf32>
    %1049 = arith.ori %1030, %834 : i1
    %cst_421 = arith.constant 0.000000e+00 : f32
    %1050 = vector.broadcast %cst_421 : f32 to vector<1x4xf32>
    %1051 = arith.select %1049, %1050, %1048 : vector<1x4xf32>
    %c2_422 = arith.constant 2 : index
    %c9_423 = arith.constant 9 : index
    %c0_424 = arith.constant 0 : index
    %1052 = vector.load %arg7[%c2_422, %c9_423, %c0_424] : memref<4x16x4xf32, #tpu.memory_space<vmem>>, vector<1x1x4xf32>
    %1053 = vector.shape_cast %1052 : vector<1x1x4xf32> to vector<1x4xf32>
    %1054 = vector.shape_cast %1051 : vector<1x4xf32> to vector<1x1x4xf32>
    tpu.vector_store %arg7[%c2_422, %c9_423, %c0_424], %1054 {strides = array<i32>} : memref<4x16x4xf32, #tpu.memory_space<vmem>>, vector<1x1x4xf32>,
    %cst_425 = arith.constant 0xFF800000 : f32
    %1055 = vector.shape_cast %1029 : vector<16x1xi1> to vector<16x1xi1>
    %1056 = vector.broadcast %1055 : vector<16x1xi1> to vector<16x4xi1>
    %1057 = vector.broadcast %cst_425 : f32 to vector<16x4xf32>
    %1058 = arith.select %1056, %856, %1057 : vector<16x4xi1>, vector<16x4xf32>
    %cst_426 = arith.constant dense<0xFF800000> : vector<4xf32>
    %1059 = vector.multi_reduction <maximumf>, %1058, %cst_426 [0] : vector<16x4xf32> to vector<4xf32>
    %1060 = vector.shape_cast %1059 : vector<4xf32> to vector<1x4xf32>
    %1061 = arith.ori %1030, %857 : i1
    %cst_427 = arith.constant 0.000000e+00 : f32
    %1062 = vector.broadcast %cst_427 : f32 to vector<1x4xf32>
    %1063 = arith.select %1061, %1062, %1060 : vector<1x4xf32>
    %c2_428 = arith.constant 2 : index
    %c10_429 = arith.constant 10 : index
    %c0_430 = arith.constant 0 : index
    %1064 = vector.load %arg7[%c2_428, %c10_429, %c0_430] : memref<4x16x4xf32, #tpu.memory_space<vmem>>, vector<1x1x4xf32>
    %1065 = vector.shape_cast %1064 : vector<1x1x4xf32> to vector<1x4xf32>
    %1066 = vector.shape_cast %1063 : vector<1x4xf32> to vector<1x1x4xf32>
    tpu.vector_store %arg7[%c2_428, %c10_429, %c0_430], %1066 {strides = array<i32>} : memref<4x16x4xf32, #tpu.memory_space<vmem>>, vector<1x1x4xf32>,
    %cst_431 = arith.constant 0xFF800000 : f32
    %1067 = vector.shape_cast %1029 : vector<16x1xi1> to vector<16x1xi1>
    %1068 = vector.broadcast %1067 : vector<16x1xi1> to vector<16x4xi1>
    %1069 = vector.broadcast %cst_431 : f32 to vector<16x4xf32>
    %1070 = arith.select %1068, %879, %1069 : vector<16x4xi1>, vector<16x4xf32>
    %cst_432 = arith.constant dense<0xFF800000> : vector<4xf32>
    %1071 = vector.multi_reduction <maximumf>, %1070, %cst_432 [0] : vector<16x4xf32> to vector<4xf32>
    %1072 = vector.shape_cast %1071 : vector<4xf32> to vector<1x4xf32>
    %1073 = arith.ori %1030, %880 : i1
    %cst_433 = arith.constant 0.000000e+00 : f32
    %1074 = vector.broadcast %cst_433 : f32 to vector<1x4xf32>
    %1075 = arith.select %1073, %1074, %1072 : vector<1x4xf32>
    %c2_434 = arith.constant 2 : index
    %c11_435 = arith.constant 11 : index
    %c0_436 = arith.constant 0 : index
    %1076 = vector.load %arg7[%c2_434, %c11_435, %c0_436] : memref<4x16x4xf32, #tpu.memory_space<vmem>>, vector<1x1x4xf32>
    %1077 = vector.shape_cast %1076 : vector<1x1x4xf32> to vector<1x4xf32>
    %1078 = vector.shape_cast %1075 : vector<1x4xf32> to vector<1x1x4xf32>
    tpu.vector_store %arg7[%c2_434, %c11_435, %c0_436], %1078 {strides = array<i32>} : memref<4x16x4xf32, #tpu.memory_space<vmem>>, vector<1x1x4xf32>,
    %cst_437 = arith.constant 3.000000e+00 : f32
    %1079 = arith.mulf %cst_437, %785 : f32
    %1080 = math.floor %1079 : f32
    %1081 = arith.fptosi %1080 : f32 to i32
    %1082 = arith.addi %1081, %771 : i32
    %c0_i32_438 = arith.constant 0 : i32
    %c16_i32_439 = arith.constant 16 : i32
    %1083 = arith.maxsi %c0_i32_438, %1082 : i32
    %1084 = arith.minsi %c16_i32_439, %1083 : i32
    %cst_440 = arith.constant 4.000000e+00 : f32
    %1085 = arith.mulf %cst_440, %785 : f32
    %1086 = math.ceil %1085 : f32
    %1087 = arith.fptosi %1086 : f32 to i32
    %1088 = arith.addi %1087, %771 : i32
    %c0_i32_441 = arith.constant 0 : i32
    %c16_i32_442 = arith.constant 16 : i32
    %1089 = arith.maxsi %c0_i32_441, %1088 : i32
    %1090 = arith.minsi %c16_i32_442, %1089 : i32
    %1091 = vector.broadcast %1084 : i32 to vector<16x1xi32>
    %1092 = arith.cmpi sge, %1, %1091 : vector<16x1xi32>
    %1093 = vector.broadcast %1090 : i32 to vector<16x1xi32>
    %1094 = arith.cmpi slt, %1, %1093 : vector<16x1xi32>
    %1095 = arith.andi %1092, %1094 : vector<16x1xi1>
    %1096 = arith.cmpi sle, %1090, %1084 : i32
    %cst_443 = arith.constant 0xFF800000 : f32
    %1097 = vector.shape_cast %1095 : vector<16x1xi1> to vector<16x1xi1>
    %1098 = vector.broadcast %1097 : vector<16x1xi1> to vector<16x4xi1>
    %1099 = vector.broadcast %cst_443 : f32 to vector<16x4xf32>
    %1100 = arith.select %1098, %810, %1099 : vector<16x4xi1>, vector<16x4xf32>
    %cst_444 = arith.constant dense<0xFF800000> : vector<4xf32>
    %1101 = vector.multi_reduction <maximumf>, %1100, %cst_444 [0] : vector<16x4xf32> to vector<4xf32>
    %1102 = vector.shape_cast %1101 : vector<4xf32> to vector<1x4xf32>
    %1103 = arith.ori %1096, %811 : i1
    %cst_445 = arith.constant 0.000000e+00 : f32
    %1104 = vector.broadcast %cst_445 : f32 to vector<1x4xf32>
    %1105 = arith.select %1103, %1104, %1102 : vector<1x4xf32>
    %c2_446 = arith.constant 2 : index
    %c12_447 = arith.constant 12 : index
    %c0_448 = arith.constant 0 : index
    %1106 = vector.load %arg7[%c2_446, %c12_447, %c0_448] : memref<4x16x4xf32, #tpu.memory_space<vmem>>, vector<1x1x4xf32>
    %1107 = vector.shape_cast %1106 : vector<1x1x4xf32> to vector<1x4xf32>
    %1108 = vector.shape_cast %1105 : vector<1x4xf32> to vector<1x1x4xf32>
    tpu.vector_store %arg7[%c2_446, %c12_447, %c0_448], %1108 {strides = array<i32>} : memref<4x16x4xf32, #tpu.memory_space<vmem>>, vector<1x1x4xf32>,
    %cst_449 = arith.constant 0xFF800000 : f32
    %1109 = vector.shape_cast %1095 : vector<16x1xi1> to vector<16x1xi1>
    %1110 = vector.broadcast %1109 : vector<16x1xi1> to vector<16x4xi1>
    %1111 = vector.broadcast %cst_449 : f32 to vector<16x4xf32>
    %1112 = arith.select %1110, %833, %1111 : vector<16x4xi1>, vector<16x4xf32>
    %cst_450 = arith.constant dense<0xFF800000> : vector<4xf32>
    %1113 = vector.multi_reduction <maximumf>, %1112, %cst_450 [0] : vector<16x4xf32> to vector<4xf32>
    %1114 = vector.shape_cast %1113 : vector<4xf32> to vector<1x4xf32>
    %1115 = arith.ori %1096, %834 : i1
    %cst_451 = arith.constant 0.000000e+00 : f32
    %1116 = vector.broadcast %cst_451 : f32 to vector<1x4xf32>
    %1117 = arith.select %1115, %1116, %1114 : vector<1x4xf32>
    %c2_452 = arith.constant 2 : index
    %c13_453 = arith.constant 13 : index
    %c0_454 = arith.constant 0 : index
    %1118 = vector.load %arg7[%c2_452, %c13_453, %c0_454] : memref<4x16x4xf32, #tpu.memory_space<vmem>>, vector<1x1x4xf32>
    %1119 = vector.shape_cast %1118 : vector<1x1x4xf32> to vector<1x4xf32>
    %1120 = vector.shape_cast %1117 : vector<1x4xf32> to vector<1x1x4xf32>
    tpu.vector_store %arg7[%c2_452, %c13_453, %c0_454], %1120 {strides = array<i32>} : memref<4x16x4xf32, #tpu.memory_space<vmem>>, vector<1x1x4xf32>,
    %cst_455 = arith.constant 0xFF800000 : f32
    %1121 = vector.shape_cast %1095 : vector<16x1xi1> to vector<16x1xi1>
    %1122 = vector.broadcast %1121 : vector<16x1xi1> to vector<16x4xi1>
    %1123 = vector.broadcast %cst_455 : f32 to vector<16x4xf32>
    %1124 = arith.select %1122, %856, %1123 : vector<16x4xi1>, vector<16x4xf32>
    %cst_456 = arith.constant dense<0xFF800000> : vector<4xf32>
    %1125 = vector.multi_reduction <maximumf>, %1124, %cst_456 [0] : vector<16x4xf32> to vector<4xf32>
    %1126 = vector.shape_cast %1125 : vector<4xf32> to vector<1x4xf32>
    %1127 = arith.ori %1096, %857 : i1
    %cst_457 = arith.constant 0.000000e+00 : f32
    %1128 = vector.broadcast %cst_457 : f32 to vector<1x4xf32>
    %1129 = arith.select %1127, %1128, %1126 : vector<1x4xf32>
    %c2_458 = arith.constant 2 : index
    %c14_459 = arith.constant 14 : index
    %c0_460 = arith.constant 0 : index
    %1130 = vector.load %arg7[%c2_458, %c14_459, %c0_460] : memref<4x16x4xf32, #tpu.memory_space<vmem>>, vector<1x1x4xf32>
    %1131 = vector.shape_cast %1130 : vector<1x1x4xf32> to vector<1x4xf32>
    %1132 = vector.shape_cast %1129 : vector<1x4xf32> to vector<1x1x4xf32>
    tpu.vector_store %arg7[%c2_458, %c14_459, %c0_460], %1132 {strides = array<i32>} : memref<4x16x4xf32, #tpu.memory_space<vmem>>, vector<1x1x4xf32>,
    %cst_461 = arith.constant 0xFF800000 : f32
    %1133 = vector.shape_cast %1095 : vector<16x1xi1> to vector<16x1xi1>
    %1134 = vector.broadcast %1133 : vector<16x1xi1> to vector<16x4xi1>
    %1135 = vector.broadcast %cst_461 : f32 to vector<16x4xf32>
    %1136 = arith.select %1134, %879, %1135 : vector<16x4xi1>, vector<16x4xf32>
    %cst_462 = arith.constant dense<0xFF800000> : vector<4xf32>
    %1137 = vector.multi_reduction <maximumf>, %1136, %cst_462 [0] : vector<16x4xf32> to vector<4xf32>
    %1138 = vector.shape_cast %1137 : vector<4xf32> to vector<1x4xf32>
    %1139 = arith.ori %1096, %880 : i1
    %cst_463 = arith.constant 0.000000e+00 : f32
    %1140 = vector.broadcast %cst_463 : f32 to vector<1x4xf32>
    %1141 = arith.select %1139, %1140, %1138 : vector<1x4xf32>
    %c2_464 = arith.constant 2 : index
    %c15_465 = arith.constant 15 : index
    %c0_466 = arith.constant 0 : index
    %1142 = vector.load %arg7[%c2_464, %c15_465, %c0_466] : memref<4x16x4xf32, #tpu.memory_space<vmem>>, vector<1x1x4xf32>
    %1143 = vector.shape_cast %1142 : vector<1x1x4xf32> to vector<1x4xf32>
    %1144 = vector.shape_cast %1141 : vector<1x4xf32> to vector<1x1x4xf32>
    tpu.vector_store %arg7[%c2_464, %c15_465, %c0_466], %1144 {strides = array<i32>} : memref<4x16x4xf32, #tpu.memory_space<vmem>>, vector<1x1x4xf32>,
    %c4_i32_467 = arith.constant 4 : i32
    %1145 = arith.muli %arg0, %c4_i32_467 : i32
    %c3_i32 = arith.constant 3 : i32
    %1146 = arith.addi %1145, %c3_i32 : i32
    %1147 = arith.index_cast %1146 : i32 to index
    %1148 = memref.load %arg1[%1147] : memref<4xi32, #tpu.memory_space<smem>>
    %1149 = arith.index_cast %1146 : i32 to index
    %1150 = memref.load %arg2[%1149] : memref<4xi32, #tpu.memory_space<smem>>
    %1151 = arith.index_cast %1146 : i32 to index
    %1152 = memref.load %arg3[%1151] : memref<4xi32, #tpu.memory_space<smem>>
    %1153 = arith.index_cast %1146 : i32 to index
    %1154 = memref.load %arg4[%1153] : memref<4xi32, #tpu.memory_space<smem>>
    %1155 = arith.index_cast %1146 : i32 to index
    %1156 = memref.load %arg5[%1155] : memref<4xi32, #tpu.memory_space<smem>>
    %1157 = arith.subi %1154, %1150 : i32
    %c1_i32_468 = arith.constant 1 : i32
    %1158 = arith.addi %1157, %c1_i32_468 : i32
    %c1_i32_469 = arith.constant 1 : i32
    %1159 = arith.maxsi %1158, %c1_i32_469 : i32
    %1160 = arith.subi %1156, %1152 : i32
    %c1_i32_470 = arith.constant 1 : i32
    %1161 = arith.addi %1160, %c1_i32_470 : i32
    %c1_i32_471 = arith.constant 1 : i32
    %1162 = arith.maxsi %1161, %c1_i32_471 : i32
    %1163 = arith.sitofp %1159 : i32 to f32
    %cst_472 = arith.constant 4.000000e+00 : f32
    %1164 = arith.divf %1163, %cst_472 : f32
    %1165 = arith.sitofp %1162 : i32 to f32
    %cst_473 = arith.constant 4.000000e+00 : f32
    %1166 = arith.divf %1165, %cst_473 : f32
    %1167 = arith.index_cast %1148 : i32 to index
    %c0_474 = arith.constant 0 : index
    %c0_475 = arith.constant 0 : index
    %c0_476 = arith.constant 0 : index
    %1168 = vector.load %arg6[%1167, %c0_474, %c0_475, %c0_476] : memref<2x16x16x4xf32, #tpu.memory_space<vmem>>, vector<1x16x16x4xf32>
    %1169 = vector.shape_cast %1168 : vector<1x16x16x4xf32> to vector<16x16x4xf32>
    %cst_477 = arith.constant 0.000000e+00 : f32
    %1170 = arith.mulf %cst_477, %1164 : f32
    %1171 = math.floor %1170 : f32
    %1172 = arith.fptosi %1171 : f32 to i32
    %1173 = arith.addi %1172, %1150 : i32
    %c0_i32_478 = arith.constant 0 : i32
    %c16_i32_479 = arith.constant 16 : i32
    %1174 = arith.maxsi %c0_i32_478, %1173 : i32
    %1175 = arith.minsi %c16_i32_479, %1174 : i32
    %cst_480 = arith.constant 1.000000e+00 : f32
    %1176 = arith.mulf %cst_480, %1164 : f32
    %1177 = math.ceil %1176 : f32
    %1178 = arith.fptosi %1177 : f32 to i32
    %1179 = arith.addi %1178, %1150 : i32
    %c0_i32_481 = arith.constant 0 : i32
    %c16_i32_482 = arith.constant 16 : i32
    %1180 = arith.maxsi %c0_i32_481, %1179 : i32
    %1181 = arith.minsi %c16_i32_482, %1180 : i32
    %1182 = vector.broadcast %1175 : i32 to vector<1x16x1xi32>
    %1183 = arith.cmpi sge, %0, %1182 : vector<1x16x1xi32>
    %1184 = vector.broadcast %1181 : i32 to vector<1x16x1xi32>
    %1185 = arith.cmpi slt, %0, %1184 : vector<1x16x1xi32>
    %1186 = arith.andi %1183, %1185 : vector<1x16x1xi1>
    %cst_483 = arith.constant 0xFF800000 : f32
    %1187 = vector.shape_cast %1186 : vector<1x16x1xi1> to vector<1x16x1xi1>
    %1188 = vector.broadcast %1187 : vector<1x16x1xi1> to vector<16x16x4xi1>
    %1189 = vector.broadcast %cst_483 : f32 to vector<16x16x4xf32>
    %1190 = arith.select %1188, %1169, %1189 : vector<16x16x4xi1>, vector<16x16x4xf32>
    %cst_484 = arith.constant dense<0xFF800000> : vector<16x4xf32>
    %1191 = vector.multi_reduction <maximumf>, %1190, %cst_484 [1] : vector<16x16x4xf32> to vector<16x4xf32>
    %1192 = arith.cmpi sle, %1181, %1175 : i32
    %cst_485 = arith.constant 1.000000e+00 : f32
    %1193 = arith.mulf %cst_485, %1164 : f32
    %1194 = math.floor %1193 : f32
    %1195 = arith.fptosi %1194 : f32 to i32
    %1196 = arith.addi %1195, %1150 : i32
    %c0_i32_486 = arith.constant 0 : i32
    %c16_i32_487 = arith.constant 16 : i32
    %1197 = arith.maxsi %c0_i32_486, %1196 : i32
    %1198 = arith.minsi %c16_i32_487, %1197 : i32
    %cst_488 = arith.constant 2.000000e+00 : f32
    %1199 = arith.mulf %cst_488, %1164 : f32
    %1200 = math.ceil %1199 : f32
    %1201 = arith.fptosi %1200 : f32 to i32
    %1202 = arith.addi %1201, %1150 : i32
    %c0_i32_489 = arith.constant 0 : i32
    %c16_i32_490 = arith.constant 16 : i32
    %1203 = arith.maxsi %c0_i32_489, %1202 : i32
    %1204 = arith.minsi %c16_i32_490, %1203 : i32
    %1205 = vector.broadcast %1198 : i32 to vector<1x16x1xi32>
    %1206 = arith.cmpi sge, %0, %1205 : vector<1x16x1xi32>
    %1207 = vector.broadcast %1204 : i32 to vector<1x16x1xi32>
    %1208 = arith.cmpi slt, %0, %1207 : vector<1x16x1xi32>
    %1209 = arith.andi %1206, %1208 : vector<1x16x1xi1>
    %cst_491 = arith.constant 0xFF800000 : f32
    %1210 = vector.shape_cast %1209 : vector<1x16x1xi1> to vector<1x16x1xi1>
    %1211 = vector.broadcast %1210 : vector<1x16x1xi1> to vector<16x16x4xi1>
    %1212 = vector.broadcast %cst_491 : f32 to vector<16x16x4xf32>
    %1213 = arith.select %1211, %1169, %1212 : vector<16x16x4xi1>, vector<16x16x4xf32>
    %cst_492 = arith.constant dense<0xFF800000> : vector<16x4xf32>
    %1214 = vector.multi_reduction <maximumf>, %1213, %cst_492 [1] : vector<16x16x4xf32> to vector<16x4xf32>
    %1215 = arith.cmpi sle, %1204, %1198 : i32
    %cst_493 = arith.constant 2.000000e+00 : f32
    %1216 = arith.mulf %cst_493, %1164 : f32
    %1217 = math.floor %1216 : f32
    %1218 = arith.fptosi %1217 : f32 to i32
    %1219 = arith.addi %1218, %1150 : i32
    %c0_i32_494 = arith.constant 0 : i32
    %c16_i32_495 = arith.constant 16 : i32
    %1220 = arith.maxsi %c0_i32_494, %1219 : i32
    %1221 = arith.minsi %c16_i32_495, %1220 : i32
    %cst_496 = arith.constant 3.000000e+00 : f32
    %1222 = arith.mulf %cst_496, %1164 : f32
    %1223 = math.ceil %1222 : f32
    %1224 = arith.fptosi %1223 : f32 to i32
    %1225 = arith.addi %1224, %1150 : i32
    %c0_i32_497 = arith.constant 0 : i32
    %c16_i32_498 = arith.constant 16 : i32
    %1226 = arith.maxsi %c0_i32_497, %1225 : i32
    %1227 = arith.minsi %c16_i32_498, %1226 : i32
    %1228 = vector.broadcast %1221 : i32 to vector<1x16x1xi32>
    %1229 = arith.cmpi sge, %0, %1228 : vector<1x16x1xi32>
    %1230 = vector.broadcast %1227 : i32 to vector<1x16x1xi32>
    %1231 = arith.cmpi slt, %0, %1230 : vector<1x16x1xi32>
    %1232 = arith.andi %1229, %1231 : vector<1x16x1xi1>
    %cst_499 = arith.constant 0xFF800000 : f32
    %1233 = vector.shape_cast %1232 : vector<1x16x1xi1> to vector<1x16x1xi1>
    %1234 = vector.broadcast %1233 : vector<1x16x1xi1> to vector<16x16x4xi1>
    %1235 = vector.broadcast %cst_499 : f32 to vector<16x16x4xf32>
    %1236 = arith.select %1234, %1169, %1235 : vector<16x16x4xi1>, vector<16x16x4xf32>
    %cst_500 = arith.constant dense<0xFF800000> : vector<16x4xf32>
    %1237 = vector.multi_reduction <maximumf>, %1236, %cst_500 [1] : vector<16x16x4xf32> to vector<16x4xf32>
    %1238 = arith.cmpi sle, %1227, %1221 : i32
    %cst_501 = arith.constant 3.000000e+00 : f32
    %1239 = arith.mulf %cst_501, %1164 : f32
    %1240 = math.floor %1239 : f32
    %1241 = arith.fptosi %1240 : f32 to i32
    %1242 = arith.addi %1241, %1150 : i32
    %c0_i32_502 = arith.constant 0 : i32
    %c16_i32_503 = arith.constant 16 : i32
    %1243 = arith.maxsi %c0_i32_502, %1242 : i32
    %1244 = arith.minsi %c16_i32_503, %1243 : i32
    %cst_504 = arith.constant 4.000000e+00 : f32
    %1245 = arith.mulf %cst_504, %1164 : f32
    %1246 = math.ceil %1245 : f32
    %1247 = arith.fptosi %1246 : f32 to i32
    %1248 = arith.addi %1247, %1150 : i32
    %c0_i32_505 = arith.constant 0 : i32
    %c16_i32_506 = arith.constant 16 : i32
    %1249 = arith.maxsi %c0_i32_505, %1248 : i32
    %1250 = arith.minsi %c16_i32_506, %1249 : i32
    %1251 = vector.broadcast %1244 : i32 to vector<1x16x1xi32>
    %1252 = arith.cmpi sge, %0, %1251 : vector<1x16x1xi32>
    %1253 = vector.broadcast %1250 : i32 to vector<1x16x1xi32>
    %1254 = arith.cmpi slt, %0, %1253 : vector<1x16x1xi32>
    %1255 = arith.andi %1252, %1254 : vector<1x16x1xi1>
    %cst_507 = arith.constant 0xFF800000 : f32
    %1256 = vector.shape_cast %1255 : vector<1x16x1xi1> to vector<1x16x1xi1>
    %1257 = vector.broadcast %1256 : vector<1x16x1xi1> to vector<16x16x4xi1>
    %1258 = vector.broadcast %cst_507 : f32 to vector<16x16x4xf32>
    %1259 = arith.select %1257, %1169, %1258 : vector<16x16x4xi1>, vector<16x16x4xf32>
    %cst_508 = arith.constant dense<0xFF800000> : vector<16x4xf32>
    %1260 = vector.multi_reduction <maximumf>, %1259, %cst_508 [1] : vector<16x16x4xf32> to vector<16x4xf32>
    %1261 = arith.cmpi sle, %1250, %1244 : i32
    %cst_509 = arith.constant 0.000000e+00 : f32
    %1262 = arith.mulf %cst_509, %1166 : f32
    %1263 = math.floor %1262 : f32
    %1264 = arith.fptosi %1263 : f32 to i32
    %1265 = arith.addi %1264, %1152 : i32
    %c0_i32_510 = arith.constant 0 : i32
    %c16_i32_511 = arith.constant 16 : i32
    %1266 = arith.maxsi %c0_i32_510, %1265 : i32
    %1267 = arith.minsi %c16_i32_511, %1266 : i32
    %cst_512 = arith.constant 1.000000e+00 : f32
    %1268 = arith.mulf %cst_512, %1166 : f32
    %1269 = math.ceil %1268 : f32
    %1270 = arith.fptosi %1269 : f32 to i32
    %1271 = arith.addi %1270, %1152 : i32
    %c0_i32_513 = arith.constant 0 : i32
    %c16_i32_514 = arith.constant 16 : i32
    %1272 = arith.maxsi %c0_i32_513, %1271 : i32
    %1273 = arith.minsi %c16_i32_514, %1272 : i32
    %1274 = vector.broadcast %1267 : i32 to vector<16x1xi32>
    %1275 = arith.cmpi sge, %1, %1274 : vector<16x1xi32>
    %1276 = vector.broadcast %1273 : i32 to vector<16x1xi32>
    %1277 = arith.cmpi slt, %1, %1276 : vector<16x1xi32>
    %1278 = arith.andi %1275, %1277 : vector<16x1xi1>
    %1279 = arith.cmpi sle, %1273, %1267 : i32
    %cst_515 = arith.constant 0xFF800000 : f32
    %1280 = vector.shape_cast %1278 : vector<16x1xi1> to vector<16x1xi1>
    %1281 = vector.broadcast %1280 : vector<16x1xi1> to vector<16x4xi1>
    %1282 = vector.broadcast %cst_515 : f32 to vector<16x4xf32>
    %1283 = arith.select %1281, %1191, %1282 : vector<16x4xi1>, vector<16x4xf32>
    %cst_516 = arith.constant dense<0xFF800000> : vector<4xf32>
    %1284 = vector.multi_reduction <maximumf>, %1283, %cst_516 [0] : vector<16x4xf32> to vector<4xf32>
    %1285 = vector.shape_cast %1284 : vector<4xf32> to vector<1x4xf32>
    %1286 = arith.ori %1279, %1192 : i1
    %cst_517 = arith.constant 0.000000e+00 : f32
    %1287 = vector.broadcast %cst_517 : f32 to vector<1x4xf32>
    %1288 = arith.select %1286, %1287, %1285 : vector<1x4xf32>
    %c3_518 = arith.constant 3 : index
    %c0_519 = arith.constant 0 : index
    %c0_520 = arith.constant 0 : index
    %1289 = vector.load %arg7[%c3_518, %c0_519, %c0_520] : memref<4x16x4xf32, #tpu.memory_space<vmem>>, vector<1x1x4xf32>
    %1290 = vector.shape_cast %1289 : vector<1x1x4xf32> to vector<1x4xf32>
    %1291 = vector.shape_cast %1288 : vector<1x4xf32> to vector<1x1x4xf32>
    tpu.vector_store %arg7[%c3_518, %c0_519, %c0_520], %1291 {strides = array<i32>} : memref<4x16x4xf32, #tpu.memory_space<vmem>>, vector<1x1x4xf32>,
    %cst_521 = arith.constant 0xFF800000 : f32
    %1292 = vector.shape_cast %1278 : vector<16x1xi1> to vector<16x1xi1>
    %1293 = vector.broadcast %1292 : vector<16x1xi1> to vector<16x4xi1>
    %1294 = vector.broadcast %cst_521 : f32 to vector<16x4xf32>
    %1295 = arith.select %1293, %1214, %1294 : vector<16x4xi1>, vector<16x4xf32>
    %cst_522 = arith.constant dense<0xFF800000> : vector<4xf32>
    %1296 = vector.multi_reduction <maximumf>, %1295, %cst_522 [0] : vector<16x4xf32> to vector<4xf32>
    %1297 = vector.shape_cast %1296 : vector<4xf32> to vector<1x4xf32>
    %1298 = arith.ori %1279, %1215 : i1
    %cst_523 = arith.constant 0.000000e+00 : f32
    %1299 = vector.broadcast %cst_523 : f32 to vector<1x4xf32>
    %1300 = arith.select %1298, %1299, %1297 : vector<1x4xf32>
    %c3_524 = arith.constant 3 : index
    %c1_525 = arith.constant 1 : index
    %c0_526 = arith.constant 0 : index
    %1301 = vector.load %arg7[%c3_524, %c1_525, %c0_526] : memref<4x16x4xf32, #tpu.memory_space<vmem>>, vector<1x1x4xf32>
    %1302 = vector.shape_cast %1301 : vector<1x1x4xf32> to vector<1x4xf32>
    %1303 = vector.shape_cast %1300 : vector<1x4xf32> to vector<1x1x4xf32>
    tpu.vector_store %arg7[%c3_524, %c1_525, %c0_526], %1303 {strides = array<i32>} : memref<4x16x4xf32, #tpu.memory_space<vmem>>, vector<1x1x4xf32>,
    %cst_527 = arith.constant 0xFF800000 : f32
    %1304 = vector.shape_cast %1278 : vector<16x1xi1> to vector<16x1xi1>
    %1305 = vector.broadcast %1304 : vector<16x1xi1> to vector<16x4xi1>
    %1306 = vector.broadcast %cst_527 : f32 to vector<16x4xf32>
    %1307 = arith.select %1305, %1237, %1306 : vector<16x4xi1>, vector<16x4xf32>
    %cst_528 = arith.constant dense<0xFF800000> : vector<4xf32>
    %1308 = vector.multi_reduction <maximumf>, %1307, %cst_528 [0] : vector<16x4xf32> to vector<4xf32>
    %1309 = vector.shape_cast %1308 : vector<4xf32> to vector<1x4xf32>
    %1310 = arith.ori %1279, %1238 : i1
    %cst_529 = arith.constant 0.000000e+00 : f32
    %1311 = vector.broadcast %cst_529 : f32 to vector<1x4xf32>
    %1312 = arith.select %1310, %1311, %1309 : vector<1x4xf32>
    %c3_530 = arith.constant 3 : index
    %c2_531 = arith.constant 2 : index
    %c0_532 = arith.constant 0 : index
    %1313 = vector.load %arg7[%c3_530, %c2_531, %c0_532] : memref<4x16x4xf32, #tpu.memory_space<vmem>>, vector<1x1x4xf32>
    %1314 = vector.shape_cast %1313 : vector<1x1x4xf32> to vector<1x4xf32>
    %1315 = vector.shape_cast %1312 : vector<1x4xf32> to vector<1x1x4xf32>
    tpu.vector_store %arg7[%c3_530, %c2_531, %c0_532], %1315 {strides = array<i32>} : memref<4x16x4xf32, #tpu.memory_space<vmem>>, vector<1x1x4xf32>,
    %cst_533 = arith.constant 0xFF800000 : f32
    %1316 = vector.shape_cast %1278 : vector<16x1xi1> to vector<16x1xi1>
    %1317 = vector.broadcast %1316 : vector<16x1xi1> to vector<16x4xi1>
    %1318 = vector.broadcast %cst_533 : f32 to vector<16x4xf32>
    %1319 = arith.select %1317, %1260, %1318 : vector<16x4xi1>, vector<16x4xf32>
    %cst_534 = arith.constant dense<0xFF800000> : vector<4xf32>
    %1320 = vector.multi_reduction <maximumf>, %1319, %cst_534 [0] : vector<16x4xf32> to vector<4xf32>
    %1321 = vector.shape_cast %1320 : vector<4xf32> to vector<1x4xf32>
    %1322 = arith.ori %1279, %1261 : i1
    %cst_535 = arith.constant 0.000000e+00 : f32
    %1323 = vector.broadcast %cst_535 : f32 to vector<1x4xf32>
    %1324 = arith.select %1322, %1323, %1321 : vector<1x4xf32>
    %c3_536 = arith.constant 3 : index
    %c3_537 = arith.constant 3 : index
    %c0_538 = arith.constant 0 : index
    %1325 = vector.load %arg7[%c3_536, %c3_537, %c0_538] : memref<4x16x4xf32, #tpu.memory_space<vmem>>, vector<1x1x4xf32>
    %1326 = vector.shape_cast %1325 : vector<1x1x4xf32> to vector<1x4xf32>
    %1327 = vector.shape_cast %1324 : vector<1x4xf32> to vector<1x1x4xf32>
    tpu.vector_store %arg7[%c3_536, %c3_537, %c0_538], %1327 {strides = array<i32>} : memref<4x16x4xf32, #tpu.memory_space<vmem>>, vector<1x1x4xf32>,
    %cst_539 = arith.constant 1.000000e+00 : f32
    %1328 = arith.mulf %cst_539, %1166 : f32
    %1329 = math.floor %1328 : f32
    %1330 = arith.fptosi %1329 : f32 to i32
    %1331 = arith.addi %1330, %1152 : i32
    %c0_i32_540 = arith.constant 0 : i32
    %c16_i32_541 = arith.constant 16 : i32
    %1332 = arith.maxsi %c0_i32_540, %1331 : i32
    %1333 = arith.minsi %c16_i32_541, %1332 : i32
    %cst_542 = arith.constant 2.000000e+00 : f32
    %1334 = arith.mulf %cst_542, %1166 : f32
    %1335 = math.ceil %1334 : f32
    %1336 = arith.fptosi %1335 : f32 to i32
    %1337 = arith.addi %1336, %1152 : i32
    %c0_i32_543 = arith.constant 0 : i32
    %c16_i32_544 = arith.constant 16 : i32
    %1338 = arith.maxsi %c0_i32_543, %1337 : i32
    %1339 = arith.minsi %c16_i32_544, %1338 : i32
    %1340 = vector.broadcast %1333 : i32 to vector<16x1xi32>
    %1341 = arith.cmpi sge, %1, %1340 : vector<16x1xi32>
    %1342 = vector.broadcast %1339 : i32 to vector<16x1xi32>
    %1343 = arith.cmpi slt, %1, %1342 : vector<16x1xi32>
    %1344 = arith.andi %1341, %1343 : vector<16x1xi1>
    %1345 = arith.cmpi sle, %1339, %1333 : i32
    %cst_545 = arith.constant 0xFF800000 : f32
    %1346 = vector.shape_cast %1344 : vector<16x1xi1> to vector<16x1xi1>
    %1347 = vector.broadcast %1346 : vector<16x1xi1> to vector<16x4xi1>
    %1348 = vector.broadcast %cst_545 : f32 to vector<16x4xf32>
    %1349 = arith.select %1347, %1191, %1348 : vector<16x4xi1>, vector<16x4xf32>
    %cst_546 = arith.constant dense<0xFF800000> : vector<4xf32>
    %1350 = vector.multi_reduction <maximumf>, %1349, %cst_546 [0] : vector<16x4xf32> to vector<4xf32>
    %1351 = vector.shape_cast %1350 : vector<4xf32> to vector<1x4xf32>
    %1352 = arith.ori %1345, %1192 : i1
    %cst_547 = arith.constant 0.000000e+00 : f32
    %1353 = vector.broadcast %cst_547 : f32 to vector<1x4xf32>
    %1354 = arith.select %1352, %1353, %1351 : vector<1x4xf32>
    %c3_548 = arith.constant 3 : index
    %c4_549 = arith.constant 4 : index
    %c0_550 = arith.constant 0 : index
    %1355 = vector.load %arg7[%c3_548, %c4_549, %c0_550] : memref<4x16x4xf32, #tpu.memory_space<vmem>>, vector<1x1x4xf32>
    %1356 = vector.shape_cast %1355 : vector<1x1x4xf32> to vector<1x4xf32>
    %1357 = vector.shape_cast %1354 : vector<1x4xf32> to vector<1x1x4xf32>
    tpu.vector_store %arg7[%c3_548, %c4_549, %c0_550], %1357 {strides = array<i32>} : memref<4x16x4xf32, #tpu.memory_space<vmem>>, vector<1x1x4xf32>,
    %cst_551 = arith.constant 0xFF800000 : f32
    %1358 = vector.shape_cast %1344 : vector<16x1xi1> to vector<16x1xi1>
    %1359 = vector.broadcast %1358 : vector<16x1xi1> to vector<16x4xi1>
    %1360 = vector.broadcast %cst_551 : f32 to vector<16x4xf32>
    %1361 = arith.select %1359, %1214, %1360 : vector<16x4xi1>, vector<16x4xf32>
    %cst_552 = arith.constant dense<0xFF800000> : vector<4xf32>
    %1362 = vector.multi_reduction <maximumf>, %1361, %cst_552 [0] : vector<16x4xf32> to vector<4xf32>
    %1363 = vector.shape_cast %1362 : vector<4xf32> to vector<1x4xf32>
    %1364 = arith.ori %1345, %1215 : i1
    %cst_553 = arith.constant 0.000000e+00 : f32
    %1365 = vector.broadcast %cst_553 : f32 to vector<1x4xf32>
    %1366 = arith.select %1364, %1365, %1363 : vector<1x4xf32>
    %c3_554 = arith.constant 3 : index
    %c5_555 = arith.constant 5 : index
    %c0_556 = arith.constant 0 : index
    %1367 = vector.load %arg7[%c3_554, %c5_555, %c0_556] : memref<4x16x4xf32, #tpu.memory_space<vmem>>, vector<1x1x4xf32>
    %1368 = vector.shape_cast %1367 : vector<1x1x4xf32> to vector<1x4xf32>
    %1369 = vector.shape_cast %1366 : vector<1x4xf32> to vector<1x1x4xf32>
    tpu.vector_store %arg7[%c3_554, %c5_555, %c0_556], %1369 {strides = array<i32>} : memref<4x16x4xf32, #tpu.memory_space<vmem>>, vector<1x1x4xf32>,
    %cst_557 = arith.constant 0xFF800000 : f32
    %1370 = vector.shape_cast %1344 : vector<16x1xi1> to vector<16x1xi1>
    %1371 = vector.broadcast %1370 : vector<16x1xi1> to vector<16x4xi1>
    %1372 = vector.broadcast %cst_557 : f32 to vector<16x4xf32>
    %1373 = arith.select %1371, %1237, %1372 : vector<16x4xi1>, vector<16x4xf32>
    %cst_558 = arith.constant dense<0xFF800000> : vector<4xf32>
    %1374 = vector.multi_reduction <maximumf>, %1373, %cst_558 [0] : vector<16x4xf32> to vector<4xf32>
    %1375 = vector.shape_cast %1374 : vector<4xf32> to vector<1x4xf32>
    %1376 = arith.ori %1345, %1238 : i1
    %cst_559 = arith.constant 0.000000e+00 : f32
    %1377 = vector.broadcast %cst_559 : f32 to vector<1x4xf32>
    %1378 = arith.select %1376, %1377, %1375 : vector<1x4xf32>
    %c3_560 = arith.constant 3 : index
    %c6_561 = arith.constant 6 : index
    %c0_562 = arith.constant 0 : index
    %1379 = vector.load %arg7[%c3_560, %c6_561, %c0_562] : memref<4x16x4xf32, #tpu.memory_space<vmem>>, vector<1x1x4xf32>
    %1380 = vector.shape_cast %1379 : vector<1x1x4xf32> to vector<1x4xf32>
    %1381 = vector.shape_cast %1378 : vector<1x4xf32> to vector<1x1x4xf32>
    tpu.vector_store %arg7[%c3_560, %c6_561, %c0_562], %1381 {strides = array<i32>} : memref<4x16x4xf32, #tpu.memory_space<vmem>>, vector<1x1x4xf32>,
    %cst_563 = arith.constant 0xFF800000 : f32
    %1382 = vector.shape_cast %1344 : vector<16x1xi1> to vector<16x1xi1>
    %1383 = vector.broadcast %1382 : vector<16x1xi1> to vector<16x4xi1>
    %1384 = vector.broadcast %cst_563 : f32 to vector<16x4xf32>
    %1385 = arith.select %1383, %1260, %1384 : vector<16x4xi1>, vector<16x4xf32>
    %cst_564 = arith.constant dense<0xFF800000> : vector<4xf32>
    %1386 = vector.multi_reduction <maximumf>, %1385, %cst_564 [0] : vector<16x4xf32> to vector<4xf32>
    %1387 = vector.shape_cast %1386 : vector<4xf32> to vector<1x4xf32>
    %1388 = arith.ori %1345, %1261 : i1
    %cst_565 = arith.constant 0.000000e+00 : f32
    %1389 = vector.broadcast %cst_565 : f32 to vector<1x4xf32>
    %1390 = arith.select %1388, %1389, %1387 : vector<1x4xf32>
    %c3_566 = arith.constant 3 : index
    %c7_567 = arith.constant 7 : index
    %c0_568 = arith.constant 0 : index
    %1391 = vector.load %arg7[%c3_566, %c7_567, %c0_568] : memref<4x16x4xf32, #tpu.memory_space<vmem>>, vector<1x1x4xf32>
    %1392 = vector.shape_cast %1391 : vector<1x1x4xf32> to vector<1x4xf32>
    %1393 = vector.shape_cast %1390 : vector<1x4xf32> to vector<1x1x4xf32>
    tpu.vector_store %arg7[%c3_566, %c7_567, %c0_568], %1393 {strides = array<i32>} : memref<4x16x4xf32, #tpu.memory_space<vmem>>, vector<1x1x4xf32>,
    %cst_569 = arith.constant 2.000000e+00 : f32
    %1394 = arith.mulf %cst_569, %1166 : f32
    %1395 = math.floor %1394 : f32
    %1396 = arith.fptosi %1395 : f32 to i32
    %1397 = arith.addi %1396, %1152 : i32
    %c0_i32_570 = arith.constant 0 : i32
    %c16_i32_571 = arith.constant 16 : i32
    %1398 = arith.maxsi %c0_i32_570, %1397 : i32
    %1399 = arith.minsi %c16_i32_571, %1398 : i32
    %cst_572 = arith.constant 3.000000e+00 : f32
    %1400 = arith.mulf %cst_572, %1166 : f32
    %1401 = math.ceil %1400 : f32
    %1402 = arith.fptosi %1401 : f32 to i32
    %1403 = arith.addi %1402, %1152 : i32
    %c0_i32_573 = arith.constant 0 : i32
    %c16_i32_574 = arith.constant 16 : i32
    %1404 = arith.maxsi %c0_i32_573, %1403 : i32
    %1405 = arith.minsi %c16_i32_574, %1404 : i32
    %1406 = vector.broadcast %1399 : i32 to vector<16x1xi32>
    %1407 = arith.cmpi sge, %1, %1406 : vector<16x1xi32>
    %1408 = vector.broadcast %1405 : i32 to vector<16x1xi32>
    %1409 = arith.cmpi slt, %1, %1408 : vector<16x1xi32>
    %1410 = arith.andi %1407, %1409 : vector<16x1xi1>
    %1411 = arith.cmpi sle, %1405, %1399 : i32
    %cst_575 = arith.constant 0xFF800000 : f32
    %1412 = vector.shape_cast %1410 : vector<16x1xi1> to vector<16x1xi1>
    %1413 = vector.broadcast %1412 : vector<16x1xi1> to vector<16x4xi1>
    %1414 = vector.broadcast %cst_575 : f32 to vector<16x4xf32>
    %1415 = arith.select %1413, %1191, %1414 : vector<16x4xi1>, vector<16x4xf32>
    %cst_576 = arith.constant dense<0xFF800000> : vector<4xf32>
    %1416 = vector.multi_reduction <maximumf>, %1415, %cst_576 [0] : vector<16x4xf32> to vector<4xf32>
    %1417 = vector.shape_cast %1416 : vector<4xf32> to vector<1x4xf32>
    %1418 = arith.ori %1411, %1192 : i1
    %cst_577 = arith.constant 0.000000e+00 : f32
    %1419 = vector.broadcast %cst_577 : f32 to vector<1x4xf32>
    %1420 = arith.select %1418, %1419, %1417 : vector<1x4xf32>
    %c3_578 = arith.constant 3 : index
    %c8_579 = arith.constant 8 : index
    %c0_580 = arith.constant 0 : index
    %1421 = vector.load %arg7[%c3_578, %c8_579, %c0_580] : memref<4x16x4xf32, #tpu.memory_space<vmem>>, vector<1x1x4xf32>
    %1422 = vector.shape_cast %1421 : vector<1x1x4xf32> to vector<1x4xf32>
    %1423 = vector.shape_cast %1420 : vector<1x4xf32> to vector<1x1x4xf32>
    tpu.vector_store %arg7[%c3_578, %c8_579, %c0_580], %1423 {strides = array<i32>} : memref<4x16x4xf32, #tpu.memory_space<vmem>>, vector<1x1x4xf32>,
    %cst_581 = arith.constant 0xFF800000 : f32
    %1424 = vector.shape_cast %1410 : vector<16x1xi1> to vector<16x1xi1>
    %1425 = vector.broadcast %1424 : vector<16x1xi1> to vector<16x4xi1>
    %1426 = vector.broadcast %cst_581 : f32 to vector<16x4xf32>
    %1427 = arith.select %1425, %1214, %1426 : vector<16x4xi1>, vector<16x4xf32>
    %cst_582 = arith.constant dense<0xFF800000> : vector<4xf32>
    %1428 = vector.multi_reduction <maximumf>, %1427, %cst_582 [0] : vector<16x4xf32> to vector<4xf32>
    %1429 = vector.shape_cast %1428 : vector<4xf32> to vector<1x4xf32>
    %1430 = arith.ori %1411, %1215 : i1
    %cst_583 = arith.constant 0.000000e+00 : f32
    %1431 = vector.broadcast %cst_583 : f32 to vector<1x4xf32>
    %1432 = arith.select %1430, %1431, %1429 : vector<1x4xf32>
    %c3_584 = arith.constant 3 : index
    %c9_585 = arith.constant 9 : index
    %c0_586 = arith.constant 0 : index
    %1433 = vector.load %arg7[%c3_584, %c9_585, %c0_586] : memref<4x16x4xf32, #tpu.memory_space<vmem>>, vector<1x1x4xf32>
    %1434 = vector.shape_cast %1433 : vector<1x1x4xf32> to vector<1x4xf32>
    %1435 = vector.shape_cast %1432 : vector<1x4xf32> to vector<1x1x4xf32>
    tpu.vector_store %arg7[%c3_584, %c9_585, %c0_586], %1435 {strides = array<i32>} : memref<4x16x4xf32, #tpu.memory_space<vmem>>, vector<1x1x4xf32>,
    %cst_587 = arith.constant 0xFF800000 : f32
    %1436 = vector.shape_cast %1410 : vector<16x1xi1> to vector<16x1xi1>
    %1437 = vector.broadcast %1436 : vector<16x1xi1> to vector<16x4xi1>
    %1438 = vector.broadcast %cst_587 : f32 to vector<16x4xf32>
    %1439 = arith.select %1437, %1237, %1438 : vector<16x4xi1>, vector<16x4xf32>
    %cst_588 = arith.constant dense<0xFF800000> : vector<4xf32>
    %1440 = vector.multi_reduction <maximumf>, %1439, %cst_588 [0] : vector<16x4xf32> to vector<4xf32>
    %1441 = vector.shape_cast %1440 : vector<4xf32> to vector<1x4xf32>
    %1442 = arith.ori %1411, %1238 : i1
    %cst_589 = arith.constant 0.000000e+00 : f32
    %1443 = vector.broadcast %cst_589 : f32 to vector<1x4xf32>
    %1444 = arith.select %1442, %1443, %1441 : vector<1x4xf32>
    %c3_590 = arith.constant 3 : index
    %c10_591 = arith.constant 10 : index
    %c0_592 = arith.constant 0 : index
    %1445 = vector.load %arg7[%c3_590, %c10_591, %c0_592] : memref<4x16x4xf32, #tpu.memory_space<vmem>>, vector<1x1x4xf32>
    %1446 = vector.shape_cast %1445 : vector<1x1x4xf32> to vector<1x4xf32>
    %1447 = vector.shape_cast %1444 : vector<1x4xf32> to vector<1x1x4xf32>
    tpu.vector_store %arg7[%c3_590, %c10_591, %c0_592], %1447 {strides = array<i32>} : memref<4x16x4xf32, #tpu.memory_space<vmem>>, vector<1x1x4xf32>,
    %cst_593 = arith.constant 0xFF800000 : f32
    %1448 = vector.shape_cast %1410 : vector<16x1xi1> to vector<16x1xi1>
    %1449 = vector.broadcast %1448 : vector<16x1xi1> to vector<16x4xi1>
    %1450 = vector.broadcast %cst_593 : f32 to vector<16x4xf32>
    %1451 = arith.select %1449, %1260, %1450 : vector<16x4xi1>, vector<16x4xf32>
    %cst_594 = arith.constant dense<0xFF800000> : vector<4xf32>
    %1452 = vector.multi_reduction <maximumf>, %1451, %cst_594 [0] : vector<16x4xf32> to vector<4xf32>
    %1453 = vector.shape_cast %1452 : vector<4xf32> to vector<1x4xf32>
    %1454 = arith.ori %1411, %1261 : i1
    %cst_595 = arith.constant 0.000000e+00 : f32
    %1455 = vector.broadcast %cst_595 : f32 to vector<1x4xf32>
    %1456 = arith.select %1454, %1455, %1453 : vector<1x4xf32>
    %c3_596 = arith.constant 3 : index
    %c11_597 = arith.constant 11 : index
    %c0_598 = arith.constant 0 : index
    %1457 = vector.load %arg7[%c3_596, %c11_597, %c0_598] : memref<4x16x4xf32, #tpu.memory_space<vmem>>, vector<1x1x4xf32>
    %1458 = vector.shape_cast %1457 : vector<1x1x4xf32> to vector<1x4xf32>
    %1459 = vector.shape_cast %1456 : vector<1x4xf32> to vector<1x1x4xf32>
    tpu.vector_store %arg7[%c3_596, %c11_597, %c0_598], %1459 {strides = array<i32>} : memref<4x16x4xf32, #tpu.memory_space<vmem>>, vector<1x1x4xf32>,
    %cst_599 = arith.constant 3.000000e+00 : f32
    %1460 = arith.mulf %cst_599, %1166 : f32
    %1461 = math.floor %1460 : f32
    %1462 = arith.fptosi %1461 : f32 to i32
    %1463 = arith.addi %1462, %1152 : i32
    %c0_i32_600 = arith.constant 0 : i32
    %c16_i32_601 = arith.constant 16 : i32
    %1464 = arith.maxsi %c0_i32_600, %1463 : i32
    %1465 = arith.minsi %c16_i32_601, %1464 : i32
    %cst_602 = arith.constant 4.000000e+00 : f32
    %1466 = arith.mulf %cst_602, %1166 : f32
    %1467 = math.ceil %1466 : f32
    %1468 = arith.fptosi %1467 : f32 to i32
    %1469 = arith.addi %1468, %1152 : i32
    %c0_i32_603 = arith.constant 0 : i32
    %c16_i32_604 = arith.constant 16 : i32
    %1470 = arith.maxsi %c0_i32_603, %1469 : i32
    %1471 = arith.minsi %c16_i32_604, %1470 : i32
    %1472 = vector.broadcast %1465 : i32 to vector<16x1xi32>
    %1473 = arith.cmpi sge, %1, %1472 : vector<16x1xi32>
    %1474 = vector.broadcast %1471 : i32 to vector<16x1xi32>
    %1475 = arith.cmpi slt, %1, %1474 : vector<16x1xi32>
    %1476 = arith.andi %1473, %1475 : vector<16x1xi1>
    %1477 = arith.cmpi sle, %1471, %1465 : i32
    %cst_605 = arith.constant 0xFF800000 : f32
    %1478 = vector.shape_cast %1476 : vector<16x1xi1> to vector<16x1xi1>
    %1479 = vector.broadcast %1478 : vector<16x1xi1> to vector<16x4xi1>
    %1480 = vector.broadcast %cst_605 : f32 to vector<16x4xf32>
    %1481 = arith.select %1479, %1191, %1480 : vector<16x4xi1>, vector<16x4xf32>
    %cst_606 = arith.constant dense<0xFF800000> : vector<4xf32>
    %1482 = vector.multi_reduction <maximumf>, %1481, %cst_606 [0] : vector<16x4xf32> to vector<4xf32>
    %1483 = vector.shape_cast %1482 : vector<4xf32> to vector<1x4xf32>
    %1484 = arith.ori %1477, %1192 : i1
    %cst_607 = arith.constant 0.000000e+00 : f32
    %1485 = vector.broadcast %cst_607 : f32 to vector<1x4xf32>
    %1486 = arith.select %1484, %1485, %1483 : vector<1x4xf32>
    %c3_608 = arith.constant 3 : index
    %c12_609 = arith.constant 12 : index
    %c0_610 = arith.constant 0 : index
    %1487 = vector.load %arg7[%c3_608, %c12_609, %c0_610] : memref<4x16x4xf32, #tpu.memory_space<vmem>>, vector<1x1x4xf32>
    %1488 = vector.shape_cast %1487 : vector<1x1x4xf32> to vector<1x4xf32>
    %1489 = vector.shape_cast %1486 : vector<1x4xf32> to vector<1x1x4xf32>
    tpu.vector_store %arg7[%c3_608, %c12_609, %c0_610], %1489 {strides = array<i32>} : memref<4x16x4xf32, #tpu.memory_space<vmem>>, vector<1x1x4xf32>,
    %cst_611 = arith.constant 0xFF800000 : f32
    %1490 = vector.shape_cast %1476 : vector<16x1xi1> to vector<16x1xi1>
    %1491 = vector.broadcast %1490 : vector<16x1xi1> to vector<16x4xi1>
    %1492 = vector.broadcast %cst_611 : f32 to vector<16x4xf32>
    %1493 = arith.select %1491, %1214, %1492 : vector<16x4xi1>, vector<16x4xf32>
    %cst_612 = arith.constant dense<0xFF800000> : vector<4xf32>
    %1494 = vector.multi_reduction <maximumf>, %1493, %cst_612 [0] : vector<16x4xf32> to vector<4xf32>
    %1495 = vector.shape_cast %1494 : vector<4xf32> to vector<1x4xf32>
    %1496 = arith.ori %1477, %1215 : i1
    %cst_613 = arith.constant 0.000000e+00 : f32
    %1497 = vector.broadcast %cst_613 : f32 to vector<1x4xf32>
    %1498 = arith.select %1496, %1497, %1495 : vector<1x4xf32>
    %c3_614 = arith.constant 3 : index
    %c13_615 = arith.constant 13 : index
    %c0_616 = arith.constant 0 : index
    %1499 = vector.load %arg7[%c3_614, %c13_615, %c0_616] : memref<4x16x4xf32, #tpu.memory_space<vmem>>, vector<1x1x4xf32>
    %1500 = vector.shape_cast %1499 : vector<1x1x4xf32> to vector<1x4xf32>
    %1501 = vector.shape_cast %1498 : vector<1x4xf32> to vector<1x1x4xf32>
    tpu.vector_store %arg7[%c3_614, %c13_615, %c0_616], %1501 {strides = array<i32>} : memref<4x16x4xf32, #tpu.memory_space<vmem>>, vector<1x1x4xf32>,
    %cst_617 = arith.constant 0xFF800000 : f32
    %1502 = vector.shape_cast %1476 : vector<16x1xi1> to vector<16x1xi1>
    %1503 = vector.broadcast %1502 : vector<16x1xi1> to vector<16x4xi1>
    %1504 = vector.broadcast %cst_617 : f32 to vector<16x4xf32>
    %1505 = arith.select %1503, %1237, %1504 : vector<16x4xi1>, vector<16x4xf32>
    %cst_618 = arith.constant dense<0xFF800000> : vector<4xf32>
    %1506 = vector.multi_reduction <maximumf>, %1505, %cst_618 [0] : vector<16x4xf32> to vector<4xf32>
    %1507 = vector.shape_cast %1506 : vector<4xf32> to vector<1x4xf32>
    %1508 = arith.ori %1477, %1238 : i1
    %cst_619 = arith.constant 0.000000e+00 : f32
    %1509 = vector.broadcast %cst_619 : f32 to vector<1x4xf32>
    %1510 = arith.select %1508, %1509, %1507 : vector<1x4xf32>
    %c3_620 = arith.constant 3 : index
    %c14_621 = arith.constant 14 : index
    %c0_622 = arith.constant 0 : index
    %1511 = vector.load %arg7[%c3_620, %c14_621, %c0_622] : memref<4x16x4xf32, #tpu.memory_space<vmem>>, vector<1x1x4xf32>
    %1512 = vector.shape_cast %1511 : vector<1x1x4xf32> to vector<1x4xf32>
    %1513 = vector.shape_cast %1510 : vector<1x4xf32> to vector<1x1x4xf32>
    tpu.vector_store %arg7[%c3_620, %c14_621, %c0_622], %1513 {strides = array<i32>} : memref<4x16x4xf32, #tpu.memory_space<vmem>>, vector<1x1x4xf32>,
    %cst_623 = arith.constant 0xFF800000 : f32
    %1514 = vector.shape_cast %1476 : vector<16x1xi1> to vector<16x1xi1>
    %1515 = vector.broadcast %1514 : vector<16x1xi1> to vector<16x4xi1>
    %1516 = vector.broadcast %cst_623 : f32 to vector<16x4xf32>
    %1517 = arith.select %1515, %1260, %1516 : vector<16x4xi1>, vector<16x4xf32>
    %cst_624 = arith.constant dense<0xFF800000> : vector<4xf32>
    %1518 = vector.multi_reduction <maximumf>, %1517, %cst_624 [0] : vector<16x4xf32> to vector<4xf32>
    %1519 = vector.shape_cast %1518 : vector<4xf32> to vector<1x4xf32>
    %1520 = arith.ori %1477, %1261 : i1
    %cst_625 = arith.constant 0.000000e+00 : f32
    %1521 = vector.broadcast %cst_625 : f32 to vector<1x4xf32>
    %1522 = arith.select %1520, %1521, %1519 : vector<1x4xf32>
    %c3_626 = arith.constant 3 : index
    %c15_627 = arith.constant 15 : index
    %c0_628 = arith.constant 0 : index
    %1523 = vector.load %arg7[%c3_626, %c15_627, %c0_628] : memref<4x16x4xf32, #tpu.memory_space<vmem>>, vector<1x1x4xf32>
    %1524 = vector.shape_cast %1523 : vector<1x1x4xf32> to vector<1x4xf32>
    %1525 = vector.shape_cast %1522 : vector<1x4xf32> to vector<1x1x4xf32>
    tpu.vector_store %arg7[%c3_626, %c15_627, %c0_628], %1525 {strides = array<i32>} : memref<4x16x4xf32, #tpu.memory_space<vmem>>, vector<1x1x4xf32>,
    return
  }
  func.func @transform_0(%arg0: i32, %arg1: memref<4xi32, #tpu.memory_space<smem>>, %arg2: memref<4xi32, #tpu.memory_space<smem>>, %arg3: memref<4xi32, #tpu.memory_space<smem>>, %arg4: memref<4xi32, #tpu.memory_space<smem>>, %arg5: memref<4xi32, #tpu.memory_space<smem>>) -> (i32, i32, i32, i32) {
    %c0_i32 = arith.constant 0 : i32
    %c0_i32_0 = arith.constant 0 : i32
    %c0_i32_1 = arith.constant 0 : i32
    %c0_i32_2 = arith.constant 0 : i32
    %c0_i32_3 = arith.constant 0 : i32
    return %c0_i32, %c0_i32_0, %c0_i32_1, %c0_i32_2 : i32, i32, i32, i32
  }
  func.func @transform_1(%arg0: i32, %arg1: memref<4xi32, #tpu.memory_space<smem>>, %arg2: memref<4xi32, #tpu.memory_space<smem>>, %arg3: memref<4xi32, #tpu.memory_space<smem>>, %arg4: memref<4xi32, #tpu.memory_space<smem>>, %arg5: memref<4xi32, #tpu.memory_space<smem>>) -> (i32, i32, i32) {
    %c0_i32 = arith.constant 0 : i32
    %c0_i32_0 = arith.constant 0 : i32
    %c0_i32_1 = arith.constant 0 : i32
    return %arg0, %c0_i32, %c0_i32_0 : i32, i32, i32
  }
}

</mosaic_0001>

<bundles_post_ra>
// kernel: tpu_custom_call.1
= control target key start
LH: loop header
LB: loop body
LE: loop exit
PB: predicated region body
PF: predicated region fallthrough
CT: control target
= control target key end

     0   :  { %s15061_s0 = inlined_call_operand.vmem [shape: s32[4], index: 0, kind: input, shape index: {}]   ;;  %s15062_s5 = inlined_call_operand.vmem [shape: f32[2,16,16,4], index: 5, kind: input, shape index: {}]   ;;  %s15063_s6 = inlined_call_operand.vmem [shape: f32[4,16,4], index: 6, kind: output, shape index: {}]   ;;  %s15064_s1 = inlined_call_operand.vmem [shape: s32[4], index: 1, kind: input, shape index: {}]   ;;  %s15065_s2 = inlined_call_operand.vmem [shape: s32[4], index: 2, kind: input, shape index: {}]   ;;  %s15066_s3 = inlined_call_operand.vmem [shape: s32[4], index: 3, kind: input, shape index: {}]   ;;  %s15067_s4 = inlined_call_operand.vmem [shape: s32[4], index: 4, kind: input, shape index: {}]  }
   0x1   :  { %s11_s23 = sshll.u32 %s15061_s0, 4  ;;  %s15_s26 = sshll.u32 %s15064_s1, 4  ;;  %s12_s23 = int_to_ptr.vmem [resolvable:$true] %s11_s23  ;;  %s16_s26 = int_to_ptr.vmem [resolvable:$true] %s15_s26 }
   0x2   :  { %s6374_s27 = scalar_lea.vmem %s12_s23, 16  ;;  %p6379_p1 = scmp.lt.s32.totalorder %s12_s23, %s12_s23 }
   0x3   :  { %p6375_p0 = scmp.ne.s32.totalorder %s12_s23, %s6374_s27  ;;  %p6380_p2 = scmp.lt.s32.totalorder %s6374_s27, %s6374_s27 }
   0x5   :  { %p6381_p3 = por %p6380_p2, %p6379_p1 }
   0x7   :  { %p6382_p4 = pnand %p6381_p3, %p6375_p0 }
   0x9   :  { %6385 = shalt.err (!%p6382_p4)  }
   0xa   :  { %s6436_s28 = smov [#allocation3]   ;;  %s6386_s29 = scalar_lea.vmem %s16_s26, 16 }
   0xb   :  { %14 = dma.vmem_to_smem %s12_s23, 16, %s6436_s28, [#allocation2] }
   0xc   :  { %p6387_p5 = scmp.ne.s32.totalorder %s16_s26, %s6386_s29  ;;  %p6391_p6 = scmp.lt.s32.totalorder %s16_s26, %s16_s26 }
   0xd   :  { %p6392_p7 = scmp.lt.s32.totalorder %s6386_s29, %s6386_s29 }
   0xf   :  { %p6393_p8 = por %p6392_p7, %p6391_p6 }
  0x11   :  { %p6394_p9 = pnand %p6393_p8, %p6387_p5 }
  0x13   :  { %6397 = shalt.err (!%p6394_p9)  }
  0x14   :  { %s6437_s0 = smov [#allocation4]   ;;  %s19_s7 = sshll.u32 %s15065_s2, 4  ;;  %s20_s7 = int_to_ptr.vmem [resolvable:$true] %s19_s7 }
  0x15   :  { %18 = dma.vmem_to_smem %s16_s26, 16, %s6437_s0, [#allocation2] }
  0x16   :  { %s23_s10 = sshll.u32 %s15066_s3, 4  ;;  %s6398_s11 = scalar_lea.vmem %s20_s7, 16  ;;  %s24_s10 = int_to_ptr.vmem [resolvable:$true] %s23_s10 }
  0x17   :  { %p6399_p10 = scmp.ne.s32.totalorder %s20_s7, %s6398_s11  ;;  %p6403_p11 = scmp.lt.s32.totalorder %s20_s7, %s20_s7 }
  0x18   :  { %p6404_p12 = scmp.lt.s32.totalorder %s6398_s11, %s6398_s11 }
  0x1a   :  { %p6405_p13 = por %p6404_p12, %p6403_p11 }
  0x1c   :  { %p6406_p0 = pnand %p6405_p13, %p6399_p10 }
  0x1e   :  { %6409 = shalt.err (!%p6406_p0)  }
  0x1f   :  { %s6438_s12 = smov [#allocation5]   ;;  %s6410_s13 = scalar_lea.vmem %s24_s10, 16 }
  0x20   :  { %22 = dma.vmem_to_smem %s20_s7, 16, %s6438_s12, [#allocation2] }
  0x21   :  { %p6411_p1 = scmp.ne.s32.totalorder %s24_s10, %s6410_s13  ;;  %p6415_p2 = scmp.lt.s32.totalorder %s24_s10, %s24_s10 }
  0x22   :  { %p6416_p3 = scmp.lt.s32.totalorder %s6410_s13, %s6410_s13 }
  0x24   :  { %p6417_p4 = por %p6416_p3, %p6415_p2 }
  0x26   :  { %p6418_p5 = pnand %p6417_p4, %p6411_p1 }
  0x28   :  { %6421 = shalt.err (!%p6418_p5)  }
  0x29   :  { %s6439_s2 = smov [#allocation6]   ;;  %s27_s15 = sshll.u32 %s15067_s4, 4  ;;  %s28_s15 = int_to_ptr.vmem [resolvable:$true] %s27_s15 }
  0x2a   :  { %26 = dma.vmem_to_smem %s24_s10, 16, %s6439_s2, [#allocation2] }
  0x2b   :  { %s6422_s16 = scalar_lea.vmem %s28_s15, 16  ;;  %p6427_p7 = scmp.lt.s32.totalorder %s28_s15, %s28_s15 }
  0x2c   :  { %p6423_p6 = scmp.ne.s32.totalorder %s28_s15, %s6422_s16  ;;  %p6428_p8 = scmp.lt.s32.totalorder %s6422_s16, %s6422_s16 }
  0x2e   :  { %p6429_p9 = por %p6428_p8, %p6427_p7 }
  0x30   :  { %p6430_p10 = pnand %p6429_p9, %p6423_p6 }
  0x32   :  { %6433 = shalt.err (!%p6430_p10)  }
  0x33   :  { %s6440_s17 = smov [#allocation7]  }
  0x34   :  { %30 = dma.vmem_to_smem %s28_s15, 16, %s6440_s17, [#allocation2] }
  0x35   :  { %6434 = dma.done.wait [#allocation2], 80 }
  0x36   :  { %6435 = vsyncadd [#allocation2], 4294967216 }
  0x37   :  { %32 = sfence }
  0x38   :  { %s6491_s18 = sld [smem:[#allocation4]]  ;;  %v35_v0 = vlaneseq  ;;  %vm153_vm6 = vcmask 31744  }
  0x39   :  { %s42_s19 = sld [smem:[#allocation6]] }
  0x3a   :  { %s39_s21 = sld [smem:[#allocation3]]  ;;  %v6499_v1 = vshrl.u32 %v35_v0, 7 }
  0x3b   :  { %s7125_s1 = sld [smem:[#allocation7]] }
  0x3c   :  { %v6508_v2 = vadd.s32 8, %v6499_v1 }
  0x3f   :  { %s44_s20 = ssub.s32 %s42_s19, %s6491_s18 }
  0x40   :  { %s45_s4 = sadd.s32 1, %s44_s20  ;;  %s5598_s26 = sshll.u32 %s39_s21, 8 }
  0x41   :  { %p46_p11 = scmp.gt.s32.totalorder %s45_s4, 1  ;;  %s6504_s7 = scalar_lea.vmem %s15062_s5, %s5598_s26 }
  0x42   :  { %v6516_v4 = vld [vmem:[%s6504_s7] sm:$0xff]  ;;  %v6519_v5 = vld [vmem:[%s6504_s7 + $0x10] sm:$0xff]  ;;  %v6532_v9 = vld [vmem:[%s6504_s7 + $0x8] sm:$0xff] }
  0x43   :  { %s15937_s4 = smov (!%p46_p11, %s45_s4), 1  ;;  %v6522_v6 = vld [vmem:[%s6504_s7 + $0x20] sm:$0xff]  ;;  %v6535_v10 = vld [vmem:[%s6504_s7 + $0x18] sm:$0xff]  ;;  %v6538_v11 = vld [vmem:[%s6504_s7 + $0x28] sm:$0xff] }
  0x44   :  { %s52_s22 = scvt.s32.f32 %s15937_s4  ;;  %v6541_v12 = vld [vmem:[%s6504_s7 + $0x30] sm:$0xff]  ;;  %v6544_v13 = vld [vmem:[%s6504_s7 + $0x38] sm:$0xff]  ;;  %v6549_v14 = vld [vmem:[%s6504_s7 + $0x40] sm:$0xff] }
  0x45   :  { %v6552_v15 = vld [vmem:[%s6504_s7 + $0x48] sm:$0xff]  ;;  %v6555_v16 = vld [vmem:[%s6504_s7 + $0x50] sm:$0xff]  ;;  %v6558_v17 = vld [vmem:[%s6504_s7 + $0x58] sm:$0xff] }
  0x46   :  { %s6494_s23 = smul.f32 0.25, %s52_s22  ;;  %v6565_v19 = vld [vmem:[%s6504_s7 + $0x60] sm:$0xff]  ;;  %v6568_v20 = vld [vmem:[%s6504_s7 + $0x68] sm:$0xff]  ;;  %v6571_v21 = vld [vmem:[%s6504_s7 + $0x70] sm:$0xff] }
  0x47   :  { %v6580_v23 = vld [vmem:[%s6504_s7 + $0x78] sm:$0xff]  ;;  %v6583_v24 = vld [vmem:[%s6504_s7 + $0x80] sm:$0xff]  ;;  %v6586_v25 = vld [vmem:[%s6504_s7 + $0x88] sm:$0xff] }
  0x48   :  { %s94_s24 = smul.f32 0.0, %s6494_s23  ;;  %s102_s25 = sceil.f32 %s6494_s23  ;;  %v6589_v26 = vld [vmem:[%s6504_s7 + $0x90] sm:$0xff]  ;;  %v6592_v27 = vld [vmem:[%s6504_s7 + $0x98] sm:$0xff]  ;;  %v6607_v32 = vld [vmem:[%s6504_s7 + $0xa0] sm:$0xff] }
  0x49   :  { %s6116_s27 = scvt.f32.s32 %s102_s25  ;;  %v6610_v33 = vld [vmem:[%s6504_s7 + $0xa8] sm:$0xff]  ;;  %v6625_v38 = vld [vmem:[%s6504_s7 + $0xb0] sm:$0xff]  ;;  %v6628_v39 = vld [vmem:[%s6504_s7 + $0xb8] sm:$0xff]  ;;  %s306_s9 = smul.f32 2.0, %s6494_s23 }
  0x4a   :  { %s95_s28 = sfloor.f32 %s94_s24  ;;  %s299_s10 = sfloor.f32 %s6494_s23 }
  0x4b   :  { %s6114_s29 = scvt.f32.s32 %s95_s28  ;;  %s104_s0 = sadd.s32 %s6116_s27, %s6491_s18 }
  0x4c   :  { %p105_p12 = scmp.gt.s32.totalorder %s104_s0, 0  ;;  %p5604_p13 = scmp.lt.s32.totalorder %s104_s0, 16 }
  0x4d   :  { %s97_s8 = sadd.s32 %s6114_s29, %s6491_s18  ;;  %s6118_s11 = scvt.f32.s32 %s299_s10 }
  0x4e   :  { %p98_p0 = scmp.gt.s32.totalorder %s97_s8, 0  ;;  %p5599_p1 = scmp.lt.s32.totalorder %s97_s8, 16 }
  0x4f   :  { %s15939_s0 = smov (!%p105_p12, %s104_s0), 0  ;;  %s6731_s12 = sceil.f32 %s306_s9 }
  0x50   :  { %s15941_s8 = smov (!%p98_p0, %s97_s8), 0  ;;  %s15943_s0 = smov (!%p5604_p13, %s15939_s0), 16 }
  0x51   :  { %s15945_s8 = smov (!%p5599_p1, %s15941_s8), 16  ;;  %v112_v3 = vstv %s15943_s0  ;;  %s6120_s13 = scvt.f32.s32 %s6731_s12 }
  0x52   :  { %v109_v7 = vstv %s15945_s8  ;;  %vm113_vm0 = vcmp.lt.s32.totalorder %v6499_v1, %v112_v3  ;;  %vm6527_vm1 = vcmp.lt.s32.totalorder %v6508_v2, %v112_v3  ;;  %s6765_s2 = sfloor.f32 %s306_s9  ;;  %s6772_s3 = sadd.s32 %s6118_s11, %s6491_s18 }
  0x53   :  { %vm110_vm2 = vcmp.ge.s32.totalorder %v6499_v1, %v109_v7  ;;  %vm111_vm3 = vcmp.ge.s32.totalorder %v6508_v2, %v109_v7  ;;  %s6122_s14 = scvt.f32.s32 %s6765_s2  ;;  %p302_p2 = scmp.gt.s32.totalorder %s6772_s3, 0 }
  0x54   :  { %vm6560_vm4 = vmand %vm110_vm2, %vm113_vm0  ;;  %s6811_s15 = sadd.s32 %s6120_s13, %s6491_s18  ;;  %p5609_p3 = scmp.lt.s32.totalorder %s6772_s3, 16 }
  0x55   :  { %vm6575_vm5 = vmand %vm111_vm3, %vm6527_vm1  ;;  %v121_v28 = vsel %vm6560_vm4, %v6516_v4, -inf  ;;  %v123_v29 = vsel %vm6560_vm4, %v6519_v5, -inf  ;;  %v125_v30 = vsel %vm6560_vm4, %v6522_v6, -inf  ;;  %v127_v31 = vsel %vm6560_vm4, %v6541_v12, -inf  ;;  %p310_p4 = scmp.gt.s32.totalorder %s6811_s15, 0  ;;  %s6820_s16 = sadd.s32 %s6122_s14, %s6491_s18 }
  0x56   :  { %v122_v34 = vsel %vm6575_vm5, %v6532_v9, -inf  ;;  %v124_v35 = vsel %vm6575_vm5, %v6535_v10, -inf  ;;  %v126_v36 = vsel %vm6575_vm5, %v6538_v11, -inf  ;;  %v128_v37 = vsel %vm6575_vm5, %v6544_v13, -inf  ;;  %s303_s17 = scalar_select %p302_p2, %s6772_s3, 0 }
  0x57   :  { %v129_v40 = vsel %vm6560_vm4, %v6549_v14, -inf  ;;  %v130_v41 = vsel %vm6575_vm5, %v6552_v15, -inf  ;;  %v131_v42 = vsel %vm6560_vm4, %v6555_v16, -inf  ;;  %v132_v43 = vsel %vm6575_vm5, %v6558_v17, -inf  ;;  %p5614_p5 = scmp.lt.s32.totalorder %s6811_s15, 16  ;;  %p506_p6 = scmp.gt.s32.totalorder %s6820_s16, 0 }
  0x58   :  { %v133_v44 = vsel %vm6560_vm4, %v6565_v19, -inf  ;;  %v134_v45 = vsel %vm6575_vm5, %v6568_v20, -inf  ;;  %v135_v46 = vsel %vm6560_vm4, %v6571_v21, -inf  ;;  %v136_v47 = vsel %vm6575_vm5, %v6580_v23, -inf  ;;  %s311_s19 = scalar_select %p310_p4, %s6811_s15, 0 }
  0x59   :  { %v137_v48 = vsel %vm6560_vm4, %v6583_v24, -inf  ;;  %v154_v56 = vsel %vm153_vm6, %v121_v28, -inf  ;;  %v155_v57 = vsel %vm153_vm6, %v122_v34, -inf  ;;  %v163_v58 = vsel %vm153_vm6, %v123_v29, -inf  ;;  %s15947_s17 = smov (!%p5609_p3, %s303_s17), 16  ;;  %p5619_p7 = scmp.lt.s32.totalorder %s6820_s16, 16 }
  0x5a   :  { %v164_v59 = vsel %vm153_vm6, %v124_v35, -inf  ;;  %v156_v60 = vmax.f32 %v154_v56, %v155_v57  ;;  %v172_v62 = vsel %vm153_vm6, %v125_v30, -inf  ;;  %v173_v63 = vsel %vm153_vm6, %v126_v36, -inf  ;;  %s507_s20 = scalar_select %p506_p6, %s6820_s16, 0 }
  0x5b   :  { %v165_v61 = vmax.f32 %v163_v58, %v164_v59  ;;  %v174_v0 = vmax.f32 %v172_v62, %v173_v63  ;;  %v181_v3 = vsel %vm153_vm6, %v127_v31, -inf  ;;  %v182_v7 = vsel %vm153_vm6, %v128_v37, -inf  ;;  %s15949_s19 = smov (!%p5614_p5, %s311_s19), 16  ;;  %s510_s4 = smul.f32 3.0, %s6494_s23 }
  0x5c   :  { %v190_v8 = vsel %vm153_vm6, %v129_v40, -inf  ;;  %v157_v28 = vrot.slane %v156_v60, 4  ;;  %v183_v55 = vmax.f32 %v181_v3, %v182_v7  ;;  %v191_v29 = vsel %vm153_vm6, %v130_v41, -inf  ;;  %v6693_v41 = vld [vmem:[%s6504_s7 + $0xc0] sm:$0xff]  ;;  %s15951_s20 = smov (!%p5619_p7, %s507_s20), 16  ;;  %s7123_s29 = sld [smem:[#allocation5]] }
  0x5d   :  { %v166_v34 = vrot.slane %v165_v61, 4  ;;  %v175_v35 = vrot.slane %v174_v0, 4  ;;  %v192_v56 = vmax.f32 %v190_v8, %v191_v29  ;;  %v199_v30 = vsel %vm153_vm6, %v131_v42, -inf  ;;  %s7004_s21 = sceil.f32 %s510_s4  ;;  %s7027_s24 = sfloor.f32 %s510_s4 }
  0x5e   :  { %v200_v36 = vsel %vm153_vm6, %v132_v43, -inf  ;;  %v158_v57 = vmax.f32 %v156_v60, %v157_v28  ;;  %v184_v58 = vrot.slane %v183_v55, 4  ;;  %v208_v62 = vsel %vm153_vm6, %v133_v44, -inf  ;;  %v6696_v60 = vld [vmem:[%s6504_s7 + $0xc8] sm:$0xff]  ;;  %s6124_s22 = scvt.f32.s32 %s7004_s21  ;;  %s6126_s26 = scvt.f32.s32 %s7027_s24 }
  0x5f   :  { %v167_v31 = vmax.f32 %v165_v61, %v166_v34  ;;  %v201_v37 = vmax.f32 %v199_v30, %v200_v36  ;;  %v176_v40 = vmax.f32 %v174_v0, %v175_v35  ;;  %v193_v59 = vrot.slane %v192_v56, 4  ;;  %v6699_v61 = vld [vmem:[%s6504_s7 + $0xd0] sm:$0xff]  ;;  %v6708_v30 = vld [vmem:[%s6504_s7 + $0xe0] sm:$0xff]  ;;  %v6711_v36 = vld [vmem:[%s6504_s7 + $0xe8] sm:$0xff]  ;;  %s714_s12 = smul.f32 4.0, %s6494_s23  ;;  %p298_p5 = scmp.le.s32.totalorder %s15943_s0, %s15945_s8 }
  0x60   :  { %v209_v63 = vsel %vm153_vm6, %v134_v45, -inf  ;;  %v159_v3 = vrot.slane %v158_v57, 2  ;;  %v185_v7 = vmax.f32 %v183_v55, %v184_v58  ;;  %15120 = vst [vmem:[#allocation9_spill] sm:$0xff] %v6699_v61  ;;  %v217_v45 = vsel %vm153_vm6, %v135_v46, -inf  ;;  %v6705_v55 = vld [vmem:[%s6504_s7 + $0xd8] sm:$0xff]  ;;  %15122 = vst [vmem:[#allocation11_spill] sm:$0xff] %v6708_v30  ;;  %s7051_s25 = sadd.s32 %s6124_s22, %s6491_s18  ;;  %s7094_s27 = sadd.s32 %s6126_s26, %s6491_s18 }
  0x61   :  { %v168_v42 = vrot.slane %v167_v31, 2  ;;  %v202_v43 = vrot.slane %v201_v37, 4  ;;  %v177_v0 = vrot.slane %v176_v40, 2  ;;  %v194_v8 = vmax.f32 %v192_v56, %v193_v59  ;;  %15121 = vst [vmem:[#allocation10_spill] sm:$0xff] %v6705_v55  ;;  %15123 = vst [vmem:[#allocation12_spill] sm:$0xff] %v6711_v36  ;;  %p514_p8 = scmp.gt.s32.totalorder %s7051_s25, 0  ;;  %s7304_s23 = sceil.f32 %s714_s12 }
  0x62   :  { %v210_v44 = vmax.f32 %v208_v62, %v209_v63  ;;  %v160_v28 = vmax.f32 %v158_v57, %v159_v3  ;;  %v186_v29 = vrot.slane %v185_v7, 2  ;;  %v145_v56 = vsel %vm6560_vm4, %v6693_v41, -inf  ;;  %v6718_v57 = vld [vmem:[%s6504_s7 + $0xf0] sm:$0xff]  ;;  %p5624_p9 = scmp.lt.s32.totalorder %s7051_s25, 16  ;;  %p710_p10 = scmp.gt.s32.totalorder %s7094_s27, 0 }
  0x63   :  { %v169_v34 = vmax.f32 %v167_v31, %v168_v42  ;;  %v203_v35 = vmax.f32 %v201_v37, %v202_v43  ;;  %v178_v58 = vmax.f32 %v176_v40, %v177_v0  ;;  %v195_v59 = vrot.slane %v194_v8, 2  ;;  %15124 = vst [vmem:[#allocation13_spill] sm:$0xff] %v6718_v57  ;;  %v6721_v31 = vld [vmem:[%s6504_s7 + $0xf8] sm:$0xff]  ;;  %s515_s28 = scalar_select %p514_p8, %s7051_s25, 0 }
  0x64   :  { %v218_v46 = vsel %vm153_vm6, %v136_v47, -inf  ;;  %15125 = vst [vmem:[#allocation14_spill] sm:$0xff] %v6721_v31  ;;  %v146_v37 = vsel %vm6575_vm5, %v6696_v60, -inf  ;;  %v147_v62 = vsel %vm6560_vm4, %v6699_v61, -inf  ;;  %v161_v63 = vrot.slane %v160_v28, 1  ;;  %p5629_p11 = scmp.lt.s32.totalorder %s7094_s27, 16  ;;  %s48_s9 = ssub.s32 %s7125_s1, %s7123_s29 }
  0x65   :  { %v211_v3 = vrot.slane %v210_v44, 4  ;;  %v170_v42 = vrot.slane %v169_v34, 1  ;;  %v187_v43 = vmax.f32 %v185_v7, %v186_v29  ;;  %v204_v40 = vrot.slane %v203_v35, 2  ;;  %s15953_s28 = smov (!%p5624_p9, %s515_s28), 16  ;;  %s7187_s10 = sadd.s32 1, %s48_s9 }
  0x66   :  { %v219_v0 = vmax.f32 %v217_v45, %v218_v46  ;;  %v148_v47 = vsel %vm6575_vm5, %v6705_v55, -inf  ;;  %v149_v54 = vsel %vm6560_vm4, %v6708_v30, -inf  ;;  %v150_v7 = vsel %vm6575_vm5, %v6711_v36, -inf  ;;  %s711_s30 = scalar_select %p710_p10, %s7094_s27, 0 }
  0x67   :  { %v179_v45 = vrot.slane %v178_v58, 1  ;;  %v6748_v53 = vmax.f32 %v194_v8, %v195_v59  ;;  %v6750_v51 = vmax.f32 %v160_v28, %v161_v63  ;;  %v212_v50 = vmax.f32 %v210_v44, %v211_v3  ;;  %p50_p12 = scmp.gt.s32.totalorder %s7187_s10, 1  ;;  %s6128_s3 = scvt.f32.s32 %s7304_s23 }
  0x68   :  { %v220_v52 = vrot.slane %v219_v0, 4  ;;  %v226_v49 = vsel %vm153_vm6, %v137_v48, -inf  ;;  %v15127_v29 = vsel %vm6575_vm5, %v6586_v25, -inf  ;;  %v6767_v8 = vmax.f32 %v169_v34, %v170_v42  ;;  %s15955_s30 = smov (!%p5629_p11, %s711_s30), 16  ;;  %p502_p9 = scmp.le.s32.totalorder %s15949_s19, %s15947_s17 }
  0x69   :  { %15126 = vst [vmem:[#allocation15_spill] sm:$0xff] %v6750_v51  ;;  %v227_v36 = vsel %vm153_vm6, %v15127_v29, -inf  ;;  %v188_v44 = vrot.slane %v187_v43, 1  ;;  %v6769_v28 = vmax.f32 %v203_v35, %v204_v40  ;;  %v6774_v48 = vmax.f32 %v178_v58, %v179_v45  ;;  %s15957_s10 = smov (!%p50_p12, %s7187_s10), 1  ;;  %s7350_s15 = sadd.s32 %s6128_s3, %s6491_s18 }
  0x6a   :  { %15128 = vst [vmem:[#allocation16_spill] sm:$0xff] %v6767_v8  ;;  %v228_v59 = vmax.f32 %v226_v49, %v227_v36  ;;  %v221_v63 = vmax.f32 %v219_v0, %v220_v52  ;;  %v15130_v3 = vsel %vm6560_vm4, %v6589_v26, -inf  ;;  %v15131_v34 = vsel %vm6575_vm5, %v6592_v27, -inf  ;;  %s56_s11 = scvt.s32.f32 %s15957_s10  ;;  %p718_p13 = scmp.gt.s32.totalorder %s7350_s15, 0 }
  0x6b   :  { %15129 = vst [vmem:[#allocation17_spill] sm:$0xff] %v6774_v48  ;;  %v235_v29 = vsel %vm153_vm6, %v15130_v3, -inf  ;;  %v236_v35 = vsel %vm153_vm6, %v15131_v34, -inf  ;;  %v197_v49 = vrot.slane %v6748_v53, 1  ;;  %v15132_v52 = vsel %vm6560_vm4, %v6607_v32, -inf  ;;  %p5634_p0 = scmp.lt.s32.totalorder %s7350_s15, 16 }
  0x6c   :  { %v229_v36 = vrot.slane %v228_v59, 4  ;;  %v237_v42 = vmax.f32 %v235_v29, %v236_v35  ;;  %v244_v58 = vsel %vm153_vm6, %v15132_v52, -inf  ;;  %v15133_v40 = vsel %vm6575_vm5, %v6610_v33, -inf  ;;  %s7299_s13 = smul.f32 0.25, %s56_s11  ;;  %s9270_s8 = sld [smem:[#allocation7 + $0x1]] }
  0x6d   :  { %v245_v0 = vsel %vm153_vm6, %v15133_v40, -inf  ;;  %v15134_v45 = vsel %vm6560_vm4, %v6625_v38, -inf  ;;  %v15135_v29 = vsel %vm6575_vm5, %v6628_v39, -inf  ;;  %v262_v35 = vsel %vm153_vm6, %v145_v56, -inf  ;;  %s719_s4 = scalar_select %p718_p13, %s7350_s15, 0 }
  0x6e   :  { %v253_v3 = vsel %vm153_vm6, %v15134_v45, -inf  ;;  %v254_v34 = vsel %vm153_vm6, %v15135_v29, -inf  ;;  %v6813_v52 = vmax.f32 %v187_v43, %v188_v44  ;;  %v213_v40 = vrot.slane %v212_v50, 2  ;;  %s911_s2 = smul.f32 0.0, %s7299_s13  ;;  %s919_s22 = sceil.f32 %s7299_s13 }
  0x6f   :  { %v230_v46 = vmax.f32 %v228_v59, %v229_v36  ;;  %v238_v48 = vrot.slane %v237_v42, 4  ;;  %v222_v45 = vrot.slane %v221_v63, 2  ;;  %v246_v8 = vmax.f32 %v244_v58, %v245_v0  ;;  %s15959_s4 = smov (!%p5634_p0, %s719_s4), 16  ;;  %s6132_s24 = scvt.f32.s32 %s919_s22 }
  0x70   :  { %15136 = vst [vmem:[#allocation18_spill] sm:$0xff] %v6813_v52  ;;  %v255_v51 = vmax.f32 %v253_v3, %v254_v34  ;;  %v263_v30 = vsel %vm153_vm6, %v146_v37, -inf  ;;  %v271_v61 = vsel %vm153_vm6, %v147_v62, -inf  ;;  %v272_v59 = vsel %vm153_vm6, %v148_v47, -inf  ;;  %s7326_s14 = sfloor.f32 %s911_s2  ;;  %s1143_s26 = sfloor.f32 %s7299_s13 }
  0x71   :  { %v231_v29 = vrot.slane %v230_v46, 2  ;;  %v239_v56 = vmax.f32 %v237_v42, %v238_v48  ;;  %v264_v55 = vmax.f32 %v262_v35, %v263_v30  ;;  %v247_v43 = vrot.slane %v246_v8, 4  ;;  %s6130_s16 = scvt.f32.s32 %s7326_s14  ;;  %s7606_s25 = sadd.s32 %s6132_s24, %s7123_s29 }
  0x72   :  { %v256_v44 = vrot.slane %v255_v51, 4  ;;  %v280_v36 = vsel %vm153_vm6, %v149_v54, -inf  ;;  %v206_v37 = vrot.slane %v6769_v28, 1  ;;  %v214_v30 = vmax.f32 %v212_v50, %v213_v40  ;;  %p922_p3 = scmp.gt.s32.totalorder %s7606_s25, 0  ;;  %p5644_p4 = scmp.lt.s32.totalorder %s7606_s25, 16 }
  0x73   :  { %v240_v48 = vrot.slane %v239_v56, 2  ;;  %v265_v62 = vrot.slane %v264_v55, 4  ;;  %v248_v42 = vmax.f32 %v246_v8, %v247_v43  ;;  %v273_v0 = vmax.f32 %v271_v61, %v272_v59  ;;  %s7389_s18 = sadd.s32 %s6130_s16, %s7123_s29  ;;  %s1150_s1 = smul.f32 2.0, %s7299_s13 }
  0x74   :  { %v257_v58 = vmax.f32 %v255_v51, %v256_v44  ;;  %v281_v3 = vsel %vm153_vm6, %v150_v7, -inf  ;;  %v223_v47 = vmax.f32 %v221_v63, %v222_v45  ;;  %v232_v54 = vmax.f32 %v230_v46, %v231_v29  ;;  %p915_p1 = scmp.gt.s32.totalorder %s7389_s18, 0  ;;  %p5639_p2 = scmp.lt.s32.totalorder %s7389_s18, 16 }
  0x75   :  { %v266_v34 = vmax.f32 %v264_v55, %v265_v62  ;;  %v282_v35 = vmax.f32 %v280_v36, %v281_v3  ;;  %v249_v50 = vrot.slane %v248_v42, 2  ;;  %v274_v52 = vrot.slane %v273_v0, 4  ;;  %s923_s27 = scalar_select %p922_p3, %s7606_s25, 0 }
  0x76   :  { %v258_v40 = vrot.slane %v257_v58, 2  ;;  %v15137_v51 = vsel %vm6560_vm4, %v6718_v57, -inf  ;;  %v6844_v55 = vmax.f32 %v6748_v53, %v197_v49  ;;  %v241_v7 = vmax.f32 %v239_v56, %v240_v48  ;;  %s916_s21 = scalar_select %p915_p1, %s7389_s18, 0 }
  0x77   :  { %v289_v61 = vsel %vm153_vm6, %v15137_v51, -inf  ;;  %v267_v46 = vrot.slane %v266_v34, 2  ;;  %v283_v8 = vrot.slane %v282_v35, 4  ;;  %v250_v63 = vmax.f32 %v248_v42, %v249_v50  ;;  %s6134_s9 = scvt.f32.s32 %s1143_s26  ;;  %s15963_s27 = smov (!%p5644_p4, %s923_s27), 16 }
  0x78   :  { %15138 = vst [vmem:[#allocation19_spill] sm:$0xff] %v6844_v55  ;;  %v259_v45 = vmax.f32 %v257_v58, %v258_v40  ;;  %v275_v29 = vmax.f32 %v273_v0, %v274_v52  ;;  %v15139_v18 = vsel %vm6575_vm5, %v6721_v31, -inf  ;;  %v215_v44 = vrot.slane %v214_v30, 1  ;;  %s15961_s21 = smov (!%p5639_p2, %s916_s21), 16  ;;  %s7777_s14 = sfloor.f32 %s1150_s1 }
  0x79   :  { %v290_v43 = vsel %vm153_vm6, %v15139_v18, -inf  ;;  %v268_v59 = vmax.f32 %v266_v34, %v267_v46  ;;  %v284_v53 = vmax.f32 %v282_v35, %v283_v8  ;;  %v224_v56 = vrot.slane %v223_v47, 1  ;;  %p934_p6 = scmp.le.s32.totalorder %s15963_s27, %s15961_s21  ;;  %s7705_s10 = sadd.s32 %s6134_s9, %s7123_s29 }
  0x7a   :  { %v291_v49 = vmax.f32 %v289_v61, %v290_v43  ;;  %v233_v36 = vrot.slane %v232_v54, 1  ;;  %v276_v52 = vrot.slane %v275_v29, 2  ;;  %v314_v48 = vstv %s15947_s17  ;;  %p1146_p7 = scmp.gt.s32.totalorder %s7705_s10, 0  ;;  %p5649_p10 = scmp.lt.s32.totalorder %s7705_s10, 16 }
  0x7b   :  { %v242_v22 = vrot.slane %v241_v7, 1  ;;  %v251_v62 = vrot.slane %v250_v63, 1  ;;  %v285_v42 = vrot.slane %v284_v53, 2  ;;  %v260_v0 = vrot.slane %v259_v45, 1  ;;  %p7746_p8 = por %p934_p6, %p298_p5  ;;  %p7785_p11 = por %p934_p6, %p502_p9 }
  0x7c   :  { %v292_v58 = vrot.slane %v291_v49, 4  ;;  %v269_v3 = vrot.slane %v268_v59, 1  ;;  %v277_v50 = vmax.f32 %v275_v29, %v276_v52  ;;  %vm315_vm7 = vcmp.ge.s32.totalorder %v6499_v1, %v314_v48  ;;  %s7765_s2 = scalar_select %p1146_p7, %s7705_s10, 0 }
  0x7d   :  { %v286_v34 = vmax.f32 %v284_v53, %v285_v42  ;;  %vm6862_vm8 = vcmp.ge.s32.totalorder %v6508_v2, %v314_v48  ;;  %v317_v51 = vstv %s15949_s19  ;;  %v6872_v61 = vmax.f32 %v6769_v28, %v206_v37  ;;  %s990_s3 = scalar_select %p7746_p8, 1, 0 }
  0x7e   :  { %v293_v35 = vmax.f32 %v291_v49, %v292_v58  ;;  %v278_v46 = vrot.slane %v277_v50, 1  ;;  %vm318_vm9 = vcmp.lt.s32.totalorder %v6499_v1, %v317_v51  ;;  %vm319_vm10 = vcmp.lt.s32.totalorder %v6508_v2, %v317_v51  ;;  %s1246_s16 = smul.f32 3.0, %s7299_s13  ;;  %s6138_s18 = scvt.f32.s32 %s7777_s14 }
  0x7f   :  { %15142 = vst [vmem:[#allocation20_spill] sm:$0xff] %v6872_v61  ;;  %v6876_v8 = vmax.f32 %v214_v30, %v215_v44  ;;  %v6878_v29 = vmax.f32 %v223_v47, %v224_v56  ;;  %v287_v18 = vrot.slane %v286_v34, 1  ;;  %vm6880_vm11 = vmand %vm315_vm7, %vm318_vm9  ;;  %v6884_v49 = vmax.f32 %v232_v54, %v233_v36  ;;  %s15965_s2 = smov (!%p5649_p10, %s7765_s2), 16  ;;  %p706_p13 = scmp.le.s32.totalorder %s15953_s28, %s15951_s20 }
  0x80   :  { %v294_v43 = vrot.slane %v293_v35, 2  ;;  %v6886_v28 = vmax.f32 %v241_v7, %v242_v22  ;;  %v6888_v37 = vmax.f32 %v250_v63, %v251_v62  ;;  %v6890_v52 = vmax.f32 %v259_v45, %v260_v0  ;;  %vm6894_vm12 = vmand %vm6862_vm8, %vm319_vm10  ;;  %s1040_s22 = scalar_select %p7785_p11, 1, 0 }
  0x81   :  { %15143 = vst [vmem:[#allocation21_spill] sm:$0xff] %v6876_v8  ;;  %15144 = vst [vmem:[#allocation22_spill] sm:$0xff] %v6878_v29  ;;  %v6898_v47 = vmax.f32 %v268_v59, %v269_v3  ;;  %v6900_v44 = vmax.f32 %v277_v50, %v278_v46  ;;  %v6903_v54 = vmax.f32 %v286_v34, %v287_v18  ;;  %v326_v7 = vsel %vm6880_vm11, %v6516_v4, -inf  ;;  %s7838_s24 = sceil.f32 %s1246_s16  ;;  %s7843_s25 = sadd.s32 %s6138_s18, %s7123_s29 }
  0x82   :  { %15147 = vst [vmem:[#allocation23_spill] sm:$0xff] %v6884_v49  ;;  %15148 = vst [vmem:[#allocation24_spill] sm:$0xff] %v6886_v28  ;;  %v295_v56 = vmax.f32 %v293_v35, %v294_v43  ;;  %v328_v63 = vsel %vm6880_vm11, %v6519_v5, -inf  ;;  %v330_v45 = vsel %vm6880_vm11, %v6522_v6, -inf  ;;  %v327_v36 = vsel %vm6894_vm12, %v6532_v9, -inf  ;;  %p1242_p1 = scmp.gt.s32.totalorder %s7843_s25, 0  ;;  %p910_p2 = scmp.le.s32.totalorder %s15959_s4, %s15955_s30 }
  0x83   :  { %15149 = vst [vmem:[#allocation25_spill] sm:$0xff] %v6888_v37  ;;  %15150 = vst [vmem:[#allocation26_spill] sm:$0xff] %v6890_v52  ;;  %v329_v22 = vsel %vm6894_vm12, %v6535_v10, -inf  ;;  %v331_v62 = vsel %vm6894_vm12, %v6538_v11, -inf  ;;  %v332_v42 = vsel %vm6880_vm11, %v6541_v12, -inf  ;;  %v333_v58 = vsel %vm6894_vm12, %v6544_v13, -inf  ;;  %p7876_p3 = por %p934_p6, %p706_p13 }
  0x84   :  { %15153 = vst [vmem:[#allocation27_spill] sm:$0xff] %v6898_v47  ;;  %15154 = vst [vmem:[#allocation28_spill] sm:$0xff] %v6900_v44  ;;  %v296_v59 = vrot.slane %v295_v56, 1  ;;  %v334_v0 = vsel %vm6880_vm11, %v6549_v14, -inf  ;;  %v335_v3 = vsel %vm6894_vm12, %v6552_v15, -inf  ;;  %v336_v50 = vsel %vm6880_vm11, %v6555_v16, -inf  ;;  %p7960_p7 = por %p934_p6, %p910_p2 }
  0x85   :  { %15155 = vst [vmem:[#allocation29_spill] sm:$0xff] %v6903_v54  ;;  %v337_v34 = vsel %vm6894_vm12, %v6558_v17, -inf  ;;  %v338_v35 = vsel %vm6880_vm11, %v6565_v19, -inf  ;;  %v339_v40 = vsel %vm6894_vm12, %v6568_v20, -inf  ;;  %v340_v46 = vsel %vm6880_vm11, %v6571_v21, -inf  ;;  %p5659_p4 = scmp.lt.s32.totalorder %s7843_s25, 16 }
  0x86   :  { %v6947_v51 = vmax.f32 %v295_v56, %v296_v59  ;;  %v341_v18 = vsel %vm6894_vm12, %v6580_v23, -inf  ;;  %v358_v54 = vsel %vm153_vm6, %v326_v7, -inf  ;;  %v359_v43 = vsel %vm153_vm6, %v327_v36, -inf  ;;  %s1243_s10 = scalar_select %p1242_p1, %s7843_s25, 0 }
  0x87   :  { %v367_v44 = vsel %vm153_vm6, %v328_v63, -inf  ;;  %v360_v47 = vmax.f32 %v358_v54, %v359_v43  ;;  %v368_v48 = vsel %vm153_vm6, %v329_v22, -inf  ;;  %v376_v29 = vsel %vm153_vm6, %v330_v45, -inf  ;;  %s1138_s12 = scalar_select %p7960_p7, 1, 0 }
  0x88   :  { %15156 = vst [vmem:[#allocation30_spill] sm:$0xff] %v6947_v51  ;;  %v377_v56 = vsel %vm153_vm6, %v331_v62, -inf  ;;  %v369_v52 = vmax.f32 %v367_v44, %v368_v48  ;;  %v385_v8 = vsel %vm153_vm6, %v332_v42, -inf  ;;  %v386_v51 = vsel %vm153_vm6, %v333_v58, -inf  ;;  %s15969_s10 = smov (!%p5659_p4, %s1243_s10), 16  ;;  %s1342_s15 = smul.f32 4.0, %s7299_s13 }
  0x89   :  { %v378_v59 = vmax.f32 %v376_v29, %v377_v56  ;;  %v361_v37 = vrot.slane %v360_v47, 4  ;;  %v387_v7 = vmax.f32 %v385_v8, %v386_v51  ;;  %v394_v36 = vsel %vm153_vm6, %v334_v0, -inf }
  0x8a   :  { %v395_v63 = vsel %vm153_vm6, %v335_v3, -inf  ;;  %v370_v54 = vrot.slane %v369_v52, 4  ;;  %v403_v45 = vsel %vm153_vm6, %v336_v50, -inf  ;;  %v404_v44 = vsel %vm153_vm6, %v337_v34, -inf }
  0x8b   :  { %v379_v43 = vrot.slane %v378_v59, 4  ;;  %v396_v22 = vmax.f32 %v394_v36, %v395_v63  ;;  %v362_v61 = vmax.f32 %v360_v47, %v361_v37  ;;  %v388_v62 = vrot.slane %v387_v7, 4 }
  0x8c   :  { %v412_v29 = vsel %vm153_vm6, %v338_v35, -inf  ;;  %v371_v48 = vmax.f32 %v369_v52, %v370_v54  ;;  %v405_v58 = vmax.f32 %v403_v45, %v404_v44  ;;  %v413_v3 = vsel %vm153_vm6, %v339_v40, -inf }
  0x8d   :  { %v380_v42 = vmax.f32 %v378_v59, %v379_v43  ;;  %v397_v8 = vrot.slane %v396_v22, 4  ;;  %v363_v0 = vrot.slane %v362_v61, 2  ;;  %v389_v51 = vmax.f32 %v387_v7, %v388_v62  ;;  %v15158_v62 = vld [vmem:[#allocation10_spill] sm:$0xff] }
  0x8e   :  { %v421_v56 = vsel %vm153_vm6, %v340_v46, -inf  ;;  %v372_v36 = vrot.slane %v371_v48, 2  ;;  %v406_v47 = vrot.slane %v405_v58, 4  ;;  %v414_v28 = vmax.f32 %v412_v29, %v413_v3 }
  0x8f   :  { %v381_v50 = vrot.slane %v380_v42, 2  ;;  %v398_v37 = vmax.f32 %v396_v22, %v397_v8  ;;  %v364_v63 = vmax.f32 %v362_v61, %v363_v0  ;;  %v390_v34 = vrot.slane %v389_v51, 2  ;;  %v15157_v22 = vld [vmem:[#allocation9_spill] sm:$0xff] }
  0x90   :  { %v422_v35 = vsel %vm153_vm6, %v341_v18, -inf  ;;  %v373_v52 = vmax.f32 %v371_v48, %v372_v36  ;;  %v407_v54 = vmax.f32 %v405_v58, %v406_v47  ;;  %v415_v46 = vrot.slane %v414_v28, 4  ;;  %v15159_v48 = vld [vmem:[#allocation11_spill] sm:$0xff] }
  0x91   :  { %v382_v59 = vmax.f32 %v380_v42, %v381_v50  ;;  %v399_v7 = vrot.slane %v398_v37, 2  ;;  %v365_v40 = vrot.slane %v364_v63, 1  ;;  %v391_v43 = vmax.f32 %v389_v51, %v390_v34  ;;  %v15160_v51 = vld [vmem:[#allocation12_spill] sm:$0xff] }
  0x92   :  { %v423_v45 = vmax.f32 %v421_v56, %v422_v35  ;;  %v352_v61 = vsel %vm6880_vm11, %v15157_v22, -inf  ;;  %v353_v18 = vsel %vm6894_vm12, %v15158_v62, -inf  ;;  %v374_v44 = vrot.slane %v373_v52, 1 }
  0x93   :  { %v383_v29 = vrot.slane %v382_v59, 1  ;;  %v354_v42 = vsel %vm6880_vm11, %v15159_v48, -inf  ;;  %v400_v8 = vmax.f32 %v398_v37, %v399_v7  ;;  %v416_v58 = vmax.f32 %v414_v28, %v415_v46 }
  0x94   :  { %v424_v0 = vrot.slane %v423_v45, 4  ;;  %v408_v50 = vrot.slane %v407_v54, 2  ;;  %v7029_v37 = vmax.f32 %v364_v63, %v365_v40  ;;  %v392_v28 = vrot.slane %v391_v43, 1 }
  0x95   :  { %v15162_v34 = vsel %vm6880_vm11, %v6583_v24, -inf  ;;  %v7036_v7 = vmax.f32 %v373_v52, %v374_v44  ;;  %v7038_v46 = vmax.f32 %v382_v59, %v383_v29  ;;  %v15165_v36 = vsel %vm6894_vm12, %v6586_v25, -inf }
  0x96   :  { %15161 = vst [vmem:[#allocation9_spill] sm:$0xff] %v7029_v37  ;;  %v425_v47 = vmax.f32 %v423_v45, %v424_v0  ;;  %v430_v35 = vsel %vm153_vm6, %v15162_v34, -inf  ;;  %v431_v56 = vsel %vm153_vm6, %v15165_v36, -inf  ;;  %v15166_v63 = vsel %vm6880_vm11, %v6589_v26, -inf }
  0x97   :  { %15163 = vst [vmem:[#allocation10_spill] sm:$0xff] %v7036_v7  ;;  %15164 = vst [vmem:[#allocation31_spill] sm:$0xff] %v7038_v46  ;;  %v439_v40 = vsel %vm153_vm6, %v15166_v63, -inf  ;;  %v401_v45 = vrot.slane %v400_v8, 1  ;;  %v417_v52 = vrot.slane %v416_v58, 2  ;;  %v432_v44 = vmax.f32 %v430_v35, %v431_v56 }
  0x98   :  { %v15167_v59 = vsel %vm6894_vm12, %v6592_v27, -inf  ;;  %v7059_v0 = vmax.f32 %v407_v54, %v408_v50  ;;  %v15168_v34 = vsel %vm6880_vm11, %v6607_v32, -inf  ;;  %v15169_v56 = vsel %vm6894_vm12, %v6610_v33, -inf }
  0x99   :  { %v440_v29 = vsel %vm153_vm6, %v15167_v59, -inf  ;;  %v448_v63 = vsel %vm153_vm6, %v15168_v34, -inf  ;;  %v449_v35 = vsel %vm153_vm6, %v15169_v56, -inf  ;;  %v7071_v3 = vmax.f32 %v391_v43, %v392_v28 }
  0x9a   :  { %v441_v36 = vmax.f32 %v439_v40, %v440_v29  ;;  %v426_v59 = vrot.slane %v425_v47, 2  ;;  %v433_v46 = vrot.slane %v432_v44, 4  ;;  %v450_v54 = vmax.f32 %v448_v63, %v449_v35 }
  0x9b   :  { %15170 = vst [vmem:[#allocation32_spill] sm:$0xff] %v7071_v3  ;;  %v15171_v40 = vsel %vm6880_vm11, %v6625_v38, -inf  ;;  %v15172_v34 = vsel %vm6894_vm12, %v6628_v39, -inf  ;;  %v15173_v28 = vsel %vm6880_vm11, %v6693_v41, -inf  ;;  %v7089_v56 = vmax.f32 %v400_v8, %v401_v45 }
  0x9c   :  { %v442_v50 = vrot.slane %v441_v36, 4  ;;  %v457_v29 = vsel %vm153_vm6, %v15171_v40, -inf  ;;  %v458_v43 = vsel %vm153_vm6, %v15172_v34, -inf  ;;  %v466_v63 = vsel %vm153_vm6, %v15173_v28, -inf }
  0x9d   :  { %15174 = vst [vmem:[#allocation33_spill] sm:$0xff] %v7089_v56  ;;  %v7091_v35 = vmax.f32 %v416_v58, %v417_v52  ;;  %v434_v40 = vmax.f32 %v432_v44, %v433_v46  ;;  %v451_v3 = vrot.slane %v450_v54, 4  ;;  %v459_v34 = vmax.f32 %v457_v29, %v458_v43 }
  0x9e   :  { %v443_v7 = vmax.f32 %v441_v36, %v442_v50  ;;  %v15175_v37 = vsel %vm6894_vm12, %v6696_v60, -inf  ;;  %v475_v49 = vsel %vm153_vm6, %v352_v61, -inf  ;;  %v15176_v8 = vstv %s15951_s20 }
  0x9f   :  { %v467_v28 = vsel %vm153_vm6, %v15175_v37, -inf  ;;  %vm7106_vm13 = vcmp.ge.s32.totalorder %v6499_v1, %v15176_v8  ;;  %v427_v46 = vmax.f32 %v425_v47, %v426_v59  ;;  %v435_v45 = vrot.slane %v434_v40, 2 }
  0xa0   :  { %v452_v52 = vmax.f32 %v450_v54, %v451_v3  ;;  %v468_v44 = vmax.f32 %v466_v63, %v467_v28  ;;  %v15179_v36 = vmov %v15176_v8  ;;  %v444_v61 = vrot.slane %v443_v7, 2 }
  0xa1   :  { %vm7116_vm14 = vcmp.ge.s32.totalorder %v6508_v2, %v15179_v36  ;;  %v460_v37 = vrot.slane %v459_v34, 4  ;;  %v476_v29 = vsel %vm153_vm6, %v353_v18, -inf  ;;  %v484_v43 = vsel %vm153_vm6, %v354_v42, -inf }
  0xa2   :  { %v436_v3 = vmax.f32 %v434_v40, %v435_v45  ;;  %v453_v47 = vrot.slane %v452_v52, 2  ;;  %v469_v59 = vrot.slane %v468_v44, 4  ;;  %v477_v54 = vmax.f32 %v475_v49, %v476_v29 }
  0xa3   :  { %v410_v63 = vrot.slane %v7059_v0, 1  ;;  %v445_v28 = vmax.f32 %v443_v7, %v444_v61  ;;  %v461_v8 = vmax.f32 %v459_v34, %v460_v37  ;;  %v15182_v18 = vsel %vm6894_vm12, %v15160_v51, -inf }
  0xa4   :  { %v485_v42 = vsel %vm153_vm6, %v15182_v18, -inf  ;;  %v454_v36 = vmax.f32 %v452_v52, %v453_v47  ;;  %v470_v56 = vmax.f32 %v468_v44, %v469_v59  ;;  %v478_v55 = vrot.slane %v477_v54, 4 }
  0xa5   :  { %v15183_v40 = vsel %vm6880_vm11, %v6718_v57, -inf  ;;  %v419_v7 = vrot.slane %v7091_v35, 1  ;;  %v462_v34 = vrot.slane %v461_v8, 2  ;;  %v486_v45 = vmax.f32 %v484_v43, %v485_v42 }
  0xa6   :  { %v493_v49 = vsel %vm153_vm6, %v15183_v40, -inf  ;;  %v15184_v52 = vsel %vm6894_vm12, %v6721_v31, -inf  ;;  %v428_v53 = vrot.slane %v427_v46, 1  ;;  %v437_v61 = vrot.slane %v436_v3, 1 }
  0xa7   :  { %v494_v44 = vsel %vm153_vm6, %v15184_v52, -inf  ;;  %v471_v37 = vrot.slane %v470_v56, 2  ;;  %v479_v29 = vmax.f32 %v477_v54, %v478_v55  ;;  %v446_v47 = vrot.slane %v445_v28, 1 }
  0xa8   :  { %v463_v59 = vmax.f32 %v461_v8, %v462_v34  ;;  %v487_v18 = vrot.slane %v486_v45, 4  ;;  %v495_v40 = vmax.f32 %v493_v49, %v494_v44  ;;  %v455_v43 = vrot.slane %v454_v36, 1 }
  0xa9   :  { %v472_v42 = vmax.f32 %v470_v56, %v471_v37  ;;  %v480_v30 = vrot.slane %v479_v29, 2  ;;  %v521_v57 = vstv %s15953_s28  ;;  %v7161_v48 = vmax.f32 %v7059_v0, %v410_v63 }
  0xaa   :  { %v464_v31 = vrot.slane %v463_v59, 1  ;;  %v488_v51 = vmax.f32 %v486_v45, %v487_v18  ;;  %v496_v52 = vrot.slane %v495_v40, 4  ;;  %vm522_vm15 = vcmp.lt.s32.totalorder %v6499_v1, %v521_v57 }
  0xab   :  { %v473_v55 = vrot.slane %v472_v42, 1  ;;  %v481_v54 = vmax.f32 %v479_v29, %v480_v30  ;;  %vm523_vm0 = vcmp.lt.s32.totalorder %v6508_v2, %v521_v57  ;;  %vm7166_vm1 = vmand %vm7106_vm13, %vm522_vm15  ;;  %v7171_v8 = vmax.f32 %v7091_v35, %v419_v7 }
  0xac   :  { %v7173_v49 = vmax.f32 %v427_v46, %v428_v53  ;;  %v489_v34 = vrot.slane %v488_v51, 2  ;;  %v497_v45 = vmax.f32 %v495_v40, %v496_v52  ;;  %vm7177_vm2 = vmand %vm7116_vm14, %vm523_vm0  ;;  %v7181_v57 = vmax.f32 %v436_v3, %v437_v61 }
  0xad   :  { %v7183_v58 = vmax.f32 %v445_v28, %v446_v47  ;;  %v7185_v63 = vmax.f32 %v454_v36, %v455_v43  ;;  %v482_v44 = vrot.slane %v481_v54, 1  ;;  %v7189_v35 = vmax.f32 %v463_v59, %v464_v31 }
  0xae   :  { %v490_v46 = vmax.f32 %v488_v51, %v489_v34  ;;  %v498_v7 = vrot.slane %v497_v45, 2  ;;  %v7192_v50 = vmax.f32 %v472_v42, %v473_v55  ;;  %v530_v3 = vsel %vm7166_vm1, %v6516_v4, -inf }
  0xaf   :  { %v531_v28 = vsel %vm7177_vm2, %v6532_v9, -inf  ;;  %v532_v36 = vsel %vm7166_vm1, %v6519_v5, -inf  ;;  %v533_v51 = vsel %vm7177_vm2, %v6535_v10, -inf  ;;  %v534_v37 = vsel %vm7166_vm1, %v6522_v6, -inf }
  0xb0   :  { %v491_v61 = vrot.slane %v490_v46, 1  ;;  %v499_v31 = vmax.f32 %v497_v45, %v498_v7  ;;  %v7210_v4 = vmax.f32 %v481_v54, %v482_v44  ;;  %v535_v9 = vsel %vm7177_vm2, %v6538_v11, -inf }
  0xb1   :  { %v536_v5 = vsel %vm7166_vm1, %v6541_v12, -inf  ;;  %v537_v10 = vsel %vm7177_vm2, %v6544_v13, -inf  ;;  %v538_v6 = vsel %vm7166_vm1, %v6549_v14, -inf  ;;  %v539_v47 = vsel %vm7177_vm2, %v6552_v15, -inf }
  0xb2   :  { %v500_v29 = vrot.slane %v499_v31, 1  ;;  %v540_v11 = vsel %vm7166_vm1, %v6555_v16, -inf  ;;  %v7230_v59 = vmax.f32 %v490_v46, %v491_v61  ;;  %v541_v12 = vsel %vm7177_vm2, %v6558_v17, -inf }
  0xb3   :  { %v542_v13 = vsel %vm7166_vm1, %v6565_v19, -inf  ;;  %v543_v14 = vsel %vm7177_vm2, %v6568_v20, -inf  ;;  %v544_v15 = vsel %vm7166_vm1, %v6571_v21, -inf  ;;  %v545_v16 = vsel %vm7177_vm2, %v6580_v23, -inf }
  0xb4   :  { %v546_v17 = vsel %vm7166_vm1, %v6583_v24, -inf  ;;  %v547_v19 = vsel %vm7177_vm2, %v6586_v25, -inf  ;;  %v7258_v20 = vmax.f32 %v499_v31, %v500_v29  ;;  %v548_v21 = vsel %vm7166_vm1, %v6589_v26, -inf }
  0xb5   :  { %v549_v23 = vsel %vm7177_vm2, %v6592_v27, -inf  ;;  %v550_v18 = vsel %vm7166_vm1, %v6607_v32, -inf  ;;  %v551_v40 = vsel %vm7177_vm2, %v6610_v33, -inf  ;;  %v552_v43 = vsel %vm7166_vm1, %v6625_v38, -inf }
  0xb6   :  { %v562_v55 = vsel %vm153_vm6, %v530_v3, -inf  ;;  %v563_v54 = vsel %vm153_vm6, %v531_v28, -inf  ;;  %v571_v34 = vsel %vm153_vm6, %v532_v36, -inf  ;;  %v572_v44 = vsel %vm153_vm6, %v533_v51, -inf }
  0xb7   :  { %v564_v45 = vmax.f32 %v562_v55, %v563_v54  ;;  %v580_v46 = vsel %vm153_vm6, %v534_v37, -inf  ;;  %v581_v7 = vsel %vm153_vm6, %v535_v9, -inf  ;;  %v573_v61 = vmax.f32 %v571_v34, %v572_v44 }
  0xb8   :  { %v582_v31 = vmax.f32 %v580_v46, %v581_v7  ;;  %v589_v29 = vsel %vm153_vm6, %v536_v5, -inf  ;;  %v590_v53 = vsel %vm153_vm6, %v537_v10, -inf  ;;  %v598_v28 = vsel %vm153_vm6, %v538_v6, -inf }
  0xb9   :  { %v565_v3 = vrot.slane %v564_v45, 4  ;;  %v591_v52 = vmax.f32 %v589_v29, %v590_v53  ;;  %v599_v36 = vsel %vm153_vm6, %v539_v47, -inf  ;;  %v574_v55 = vrot.slane %v573_v61, 4 }
  0xba   :  { %v583_v51 = vrot.slane %v582_v31, 4  ;;  %v600_v54 = vmax.f32 %v598_v28, %v599_v36  ;;  %v607_v37 = vsel %vm153_vm6, %v540_v11, -inf  ;;  %v608_v34 = vsel %vm153_vm6, %v541_v12, -inf }
  0xbb   :  { %v566_v9 = vmax.f32 %v564_v45, %v565_v3  ;;  %v592_v30 = vrot.slane %v591_v52, 4  ;;  %v616_v44 = vsel %vm153_vm6, %v542_v13, -inf  ;;  %v575_v5 = vmax.f32 %v573_v61, %v574_v55 }
  0xbc   :  { %v584_v53 = vmax.f32 %v582_v31, %v583_v51  ;;  %v601_v10 = vrot.slane %v600_v54, 4  ;;  %v609_v6 = vmax.f32 %v607_v37, %v608_v34  ;;  %v617_v7 = vsel %vm153_vm6, %v543_v14, -inf  ;;  %v15189_v34 = vld [vmem:[#allocation11_spill] sm:$0xff] }
  0xbd   :  { %v567_v46 = vrot.slane %v566_v9, 2  ;;  %v593_v47 = vmax.f32 %v591_v52, %v592_v30  ;;  %v625_v11 = vsel %vm153_vm6, %v544_v15, -inf  ;;  %v576_v45 = vrot.slane %v575_v5, 2 }
  0xbe   :  { %v585_v29 = vrot.slane %v584_v53, 2  ;;  %v602_v3 = vmax.f32 %v600_v54, %v601_v10  ;;  %v610_v12 = vrot.slane %v609_v6, 4  ;;  %v618_v36 = vmax.f32 %v616_v44, %v617_v7 }
  0xbf   :  { %v568_v28 = vmax.f32 %v566_v9, %v567_v46  ;;  %v594_v13 = vrot.slane %v593_v47, 2  ;;  %v626_v42 = vsel %vm153_vm6, %v545_v16, -inf  ;;  %v577_v61 = vmax.f32 %v575_v5, %v576_v45 }
  0xc0   :  { %v586_v31 = vmax.f32 %v584_v53, %v585_v29  ;;  %v603_v30 = vrot.slane %v602_v3, 2  ;;  %v611_v52 = vmax.f32 %v609_v6, %v610_v12  ;;  %v619_v15 = vrot.slane %v618_v36, 4 }
  0xc1   :  { %v569_v14 = vrot.slane %v568_v28, 1  ;;  %v595_v55 = vmax.f32 %v593_v47, %v594_v13  ;;  %v627_v51 = vmax.f32 %v625_v11, %v626_v42  ;;  %v556_v54 = vsel %vm7166_vm1, %v15157_v22, -inf  ;;  %v15190_v42 = vld [vmem:[#allocation12_spill] sm:$0xff]  ;;  %v15191_v22 = vld [vmem:[#allocation13_spill] sm:$0xff] }
  0xc2   :  { %v557_v16 = vsel %vm7177_vm2, %v15158_v62, -inf  ;;  %v578_v37 = vrot.slane %v577_v61, 1  ;;  %v587_v9 = vrot.slane %v586_v31, 1  ;;  %v558_v44 = vsel %vm7166_vm1, %v15189_v34, -inf  ;;  %v15192_v62 = vld [vmem:[#allocation14_spill] sm:$0xff] }
  0xc3   :  { %v604_v5 = vmax.f32 %v602_v3, %v603_v30  ;;  %v612_v53 = vrot.slane %v611_v52, 2  ;;  %v628_v10 = vrot.slane %v627_v51, 4  ;;  %v559_v6 = vsel %vm7177_vm2, %v15190_v42, -inf }
  0xc4   :  { %v560_v46 = vsel %vm7166_vm1, %v15191_v22, -inf  ;;  %v561_v47 = vsel %vm7177_vm2, %v15192_v62, -inf  ;;  %v596_v7 = vrot.slane %v595_v55, 1  ;;  %v7328_v11 = vmax.f32 %v568_v28, %v569_v14 }
  0xc5   :  { %v620_v45 = vmax.f32 %v618_v36, %v619_v15  ;;  %v629_v29 = vmax.f32 %v627_v51, %v628_v10  ;;  %v634_v3 = vsel %vm153_vm6, %v546_v17, -inf  ;;  %v7335_v12 = vmax.f32 %v577_v61, %v578_v37 }
  0xc6   :  { %v7337_v13 = vmax.f32 %v586_v31, %v587_v9  ;;  %v635_v30 = vsel %vm153_vm6, %v547_v19, -inf  ;;  %v643_v28 = vsel %vm153_vm6, %v548_v21, -inf  ;;  %v605_v24 = vrot.slane %v604_v5, 1 }
  0xc7   :  { %v613_v17 = vmax.f32 %v611_v52, %v612_v53  ;;  %v636_v36 = vmax.f32 %v634_v3, %v635_v30  ;;  %v644_v25 = vsel %vm153_vm6, %v549_v23, -inf  ;;  %v7358_v19 = vmax.f32 %v595_v55, %v596_v7 }
  0xc8   :  { %v645_v61 = vmax.f32 %v643_v28, %v644_v25  ;;  %v652_v26 = vsel %vm153_vm6, %v550_v18, -inf  ;;  %v653_v21 = vsel %vm153_vm6, %v551_v40, -inf  ;;  %v621_v27 = vrot.slane %v620_v45, 2 }
  0xc9   :  { %v630_v31 = vrot.slane %v629_v29, 2  ;;  %v637_v23 = vrot.slane %v636_v36, 4  ;;  %v654_v52 = vmax.f32 %v652_v26, %v653_v21  ;;  %v661_v32 = vsel %vm153_vm6, %v552_v43, -inf }
  0xca   :  { %v646_v14 = vrot.slane %v645_v61, 4  ;;  %v15193_v18 = vsel %vm7177_vm2, %v6628_v39, -inf  ;;  %v15194_v40 = vsel %vm7166_vm1, %v6693_v41, -inf  ;;  %v7386_v15 = vmax.f32 %v604_v5, %v605_v24 }
  0xcb   :  { %v662_v33 = vsel %vm153_vm6, %v15193_v18, -inf  ;;  %v670_v55 = vsel %vm153_vm6, %v15194_v40, -inf  ;;  %v614_v51 = vrot.slane %v613_v17, 1  ;;  %v638_v38 = vmax.f32 %v636_v36, %v637_v23 }
  0xcc   :  { %v655_v37 = vrot.slane %v654_v52, 4  ;;  %v647_v43 = vmax.f32 %v645_v61, %v646_v14  ;;  %v663_v39 = vmax.f32 %v661_v32, %v662_v33  ;;  %v15195_v56 = vsel %vm7177_vm2, %v6696_v60, -inf }
  0xcd   :  { %v671_v41 = vsel %vm153_vm6, %v15195_v56, -inf  ;;  %v679_v9 = vsel %vm153_vm6, %v556_v54, -inf  ;;  %v622_v34 = vmax.f32 %v620_v45, %v621_v27  ;;  %v639_v5 = vrot.slane %v638_v38, 2 }
  0xce   :  { %v656_v53 = vmax.f32 %v654_v52, %v655_v37  ;;  %v672_v10 = vmax.f32 %v670_v55, %v671_v41  ;;  %v631_v42 = vmax.f32 %v629_v29, %v630_v31  ;;  %v648_v22 = vrot.slane %v647_v43, 2 }
  0xcf   :  { %v664_v7 = vrot.slane %v663_v39, 4  ;;  %v680_v3 = vsel %vm153_vm6, %v557_v16, -inf  ;;  %v688_v54 = vsel %vm153_vm6, %v558_v44, -inf  ;;  %v640_v45 = vmax.f32 %v638_v38, %v639_v5 }
  0xd0   :  { %v657_v30 = vrot.slane %v656_v53, 2  ;;  %v673_v60 = vrot.slane %v672_v10, 4  ;;  %v681_v28 = vmax.f32 %v679_v9, %v680_v3  ;;  %v649_v24 = vmax.f32 %v647_v43, %v648_v22 }
  0xd1   :  { %v665_v36 = vmax.f32 %v663_v39, %v664_v7  ;;  %v689_v25 = vsel %vm153_vm6, %v559_v6, -inf  ;;  %v697_v21 = vsel %vm153_vm6, %v560_v46, -inf  ;;  %v7410_v16 = vmax.f32 %v613_v17, %v614_v51 }
  0xd2   :  { %v658_v29 = vmax.f32 %v656_v53, %v657_v30  ;;  %v674_v61 = vmax.f32 %v672_v10, %v673_v60  ;;  %v682_v26 = vrot.slane %v681_v28, 4  ;;  %v690_v31 = vmax.f32 %v688_v54, %v689_v25  ;;  %v7570_v25 = vld [vmem:[%s6504_s7 + $0xb8] sm:$0xff] }
  0xd3   :  { %v666_v27 = vrot.slane %v665_v36, 2  ;;  %v698_v44 = vsel %vm153_vm6, %v561_v47, -inf  ;;  %v623_v6 = vrot.slane %v622_v34, 1  ;;  %v632_v23 = vrot.slane %v631_v42, 1 }
  0xd4   :  { %v675_v52 = vrot.slane %v674_v61, 2  ;;  %v683_v46 = vmax.f32 %v681_v28, %v682_v26  ;;  %v641_v17 = vrot.slane %v640_v45, 1  ;;  %v691_v32 = vrot.slane %v690_v31, 4 }
  0xd5   :  { %v667_v14 = vmax.f32 %v665_v36, %v666_v27  ;;  %v699_v18 = vmax.f32 %v697_v21, %v698_v44  ;;  %v650_v0 = vrot.slane %v649_v24, 1  ;;  %v659_v33 = vrot.slane %v658_v29, 1  ;;  %v7463_v36 = vld [vmem:[%s6504_s7] sm:$0xff]  ;;  %v6247_v21 = vld [vmem:[%s6504_s7 + $0x10] sm:$0xff] }
  0xd6   :  { %v676_v62 = vmax.f32 %v674_v61, %v675_v52  ;;  %v684_v40 = vrot.slane %v683_v46, 2  ;;  %v692_v55 = vmax.f32 %v690_v31, %v691_v32  ;;  %v15196_v38 = vstv %s15955_s30  ;;  %v6248_v31 = vld [vmem:[%s6504_s7 + $0x8] sm:$0xff]  ;;  %v6250_v52 = vld [vmem:[%s6504_s7 + $0x20] sm:$0xff] }
  0xd7   :  { %v668_v47 = vrot.slane %v667_v14, 1  ;;  %v700_v51 = vrot.slane %v699_v18, 4  ;;  %vm723_vm3 = vcmp.ge.s32.totalorder %v6499_v1, %v15196_v38  ;;  %v15197_v39 = vmov %v15196_v38 }
  0xd8   :  { %v677_v37 = vrot.slane %v676_v62, 1  ;;  %v685_v43 = vmax.f32 %v683_v46, %v684_v40  ;;  %vm7427_vm4 = vcmp.ge.s32.totalorder %v6508_v2, %v15197_v39  ;;  %v725_v41 = vstv %s15959_s4  ;;  %v6254_v40 = vld [vmem:[%s6504_s7 + $0x40] sm:$0xff]  ;;  %v6257_v39 = vld [vmem:[%s6504_s7 + $0x58] sm:$0xff] }
  0xd9   :  { %v7436_v9 = vmax.f32 %v622_v34, %v623_v6  ;;  %v693_v5 = vrot.slane %v692_v55, 2  ;;  %v701_v53 = vmax.f32 %v699_v18, %v700_v51  ;;  %vm726_vm5 = vcmp.lt.s32.totalorder %v6499_v1, %v725_v41  ;;  %v6249_v6 = vld [vmem:[%s6504_s7 + $0x18] sm:$0xff]  ;;  %v6252_v18 = vld [vmem:[%s6504_s7 + $0x30] sm:$0xff]  ;;  %v6255_v51 = vld [vmem:[%s6504_s7 + $0x48] sm:$0xff] }
  0xda   :  { %v7439_v10 = vmax.f32 %v631_v42, %v632_v23  ;;  %v7441_v22 = vmax.f32 %v640_v45, %v641_v17  ;;  %v686_v7 = vrot.slane %v685_v43, 1  ;;  %vm727_vm7 = vcmp.lt.s32.totalorder %v6508_v2, %v725_v41  ;;  %vm7444_vm8 = vmand %vm723_vm3, %vm726_vm5  ;;  %v6251_v17 = vld [vmem:[%s6504_s7 + $0x28] sm:$0xff]  ;;  %v6258_v41 = vld [vmem:[%s6504_s7 + $0x60] sm:$0xff] }
  0xdb   :  { %15200 = vst [vmem:[#allocation11_spill] sm:$0xff] %v7436_v9  ;;  %v7448_v34 = vmax.f32 %v649_v24, %v650_v0  ;;  %v7450_v30 = vmax.f32 %v658_v29, %v659_v33  ;;  %v694_v60 = vmax.f32 %v692_v55, %v693_v5  ;;  %v702_v28 = vrot.slane %v701_v53, 2  ;;  %vm7454_vm9 = vmand %vm7427_vm4, %vm727_vm7  ;;  %v6253_v33 = vld [vmem:[%s6504_s7 + $0x38] sm:$0xff] }
  0xdc   :  { %15201 = vst [vmem:[#allocation12_spill] sm:$0xff] %v7439_v10  ;;  %v7458_v54 = vmax.f32 %v667_v14, %v668_v47  ;;  %v7460_v45 = vmax.f32 %v676_v62, %v677_v37  ;;  %v734_v24 = vsel %vm7444_vm8, %v7463_v36, -inf  ;;  %v7469_v29 = vmax.f32 %v685_v43, %v686_v7  ;;  %v6256_v37 = vld [vmem:[%s6504_s7 + $0x50] sm:$0xff]  ;;  %v7519_v36 = vld [vmem:[%s6504_s7 + $0x78] sm:$0xff] }
  0xdd   :  { %v695_v61 = vrot.slane %v694_v60, 1  ;;  %v703_v26 = vmax.f32 %v701_v53, %v702_v28  ;;  %v736_v27 = vsel %vm7444_vm8, %v6247_v21, -inf  ;;  %v735_v44 = vsel %vm7454_vm9, %v6248_v31, -inf  ;;  %v6259_v53 = vld [vmem:[%s6504_s7 + $0x68] sm:$0xff]  ;;  %v7527_v31 = vld [vmem:[%s6504_s7 + $0x80] sm:$0xff] }
  0xde   :  { %15206 = vst [vmem:[#allocation13_spill] sm:$0xff] %v7458_v54  ;;  %15207 = vst [vmem:[#allocation14_spill] sm:$0xff] %v7460_v45  ;;  %v737_v23 = vsel %vm7454_vm9, %v6249_v6, -inf  ;;  %v738_v46 = vsel %vm7444_vm8, %v6250_v52, -inf  ;;  %v739_v14 = vsel %vm7454_vm9, %v6251_v17, -inf  ;;  %v740_v0 = vsel %vm7444_vm8, %v6252_v18, -inf }
  0xdf   :  { %15208 = vst [vmem:[#allocation34_spill] sm:$0xff] %v7469_v29  ;;  %v704_v32 = vrot.slane %v703_v26, 1  ;;  %v741_v62 = vsel %vm7454_vm9, %v6253_v33, -inf  ;;  %v742_v47 = vsel %vm7444_vm8, %v6254_v40, -inf  ;;  %v7495_v55 = vmax.f32 %v694_v60, %v695_v61  ;;  %v7513_v60 = vld [vmem:[%s6504_s7 + $0x70] sm:$0xff]  ;;  %v7533_v52 = vld [vmem:[%s6504_s7 + $0x88] sm:$0xff] }
  0xe0   :  { %v743_v38 = vsel %vm7454_vm9, %v6255_v51, -inf  ;;  %v744_v43 = vsel %vm7444_vm8, %v6256_v37, -inf  ;;  %v745_v56 = vsel %vm7454_vm9, %v6257_v39, -inf  ;;  %v746_v5 = vsel %vm7444_vm8, %v6258_v41, -inf  ;;  %v7539_v18 = vld [vmem:[%s6504_s7 + $0x90] sm:$0xff]  ;;  %v7551_v40 = vld [vmem:[%s6504_s7 + $0xa0] sm:$0xff] }
  0xe1   :  { %15209 = vst [vmem:[#allocation35_spill] sm:$0xff] %v7495_v55  ;;  %v747_v7 = vsel %vm7454_vm9, %v6259_v53, -inf  ;;  %v7524_v21 = vmax.f32 %v703_v26, %v704_v32  ;;  %v7545_v32 = vld [vmem:[%s6504_s7 + $0x98] sm:$0xff]  ;;  %v7557_v37 = vld [vmem:[%s6504_s7 + $0xa8] sm:$0xff]  ;;  %v7563_v41 = vld [vmem:[%s6504_s7 + $0xb0] sm:$0xff]  ;;  %v766_v33 = vsel %vm153_vm6, %v734_v24, -inf }
  0xe2   :  { %v7576_v51 = vld [vmem:[%s6504_s7 + $0xc0] sm:$0xff]  ;;  %v7582_v39 = vld [vmem:[%s6504_s7 + $0xc8] sm:$0xff]  ;;  %v7588_v53 = vld [vmem:[%s6504_s7 + $0xd0] sm:$0xff]  ;;  %v767_v61 = vsel %vm153_vm6, %v735_v44, -inf  ;;  %v775_v28 = vsel %vm153_vm6, %v736_v27, -inf  ;;  %v776_v26 = vsel %vm153_vm6, %v737_v23, -inf }
  0xe3   :  { %15210 = vst [vmem:[#allocation36_spill] sm:$0xff] %v7524_v21  ;;  %v768_v21 = vmax.f32 %v766_v33, %v767_v61  ;;  %v777_v55 = vmax.f32 %v775_v28, %v776_v26  ;;  %v784_v29 = vsel %vm153_vm6, %v738_v46, -inf  ;;  %v785_v17 = vsel %vm153_vm6, %v739_v14, -inf }
  0xe4   :  { %v786_v10 = vmax.f32 %v784_v29, %v785_v17  ;;  %v793_v45 = vsel %vm153_vm6, %v740_v0, -inf  ;;  %v794_v6 = vsel %vm153_vm6, %v741_v62, -inf  ;;  %v802_v24 = vsel %vm153_vm6, %v742_v47, -inf }
  0xe5   :  { %v769_v44 = vrot.slane %v768_v21, 4  ;;  %v778_v9 = vrot.slane %v777_v55, 4  ;;  %v795_v27 = vmax.f32 %v793_v45, %v794_v6  ;;  %v803_v23 = vsel %vm153_vm6, %v743_v38, -inf }
  0xe6   :  { %v787_v61 = vrot.slane %v786_v10, 4  ;;  %v804_v28 = vmax.f32 %v802_v24, %v803_v23  ;;  %v811_v46 = vsel %vm153_vm6, %v744_v43, -inf  ;;  %v812_v14 = vsel %vm153_vm6, %v745_v56, -inf }
  0xe7   :  { %v770_v26 = vmax.f32 %v768_v21, %v769_v44  ;;  %v779_v29 = vmax.f32 %v777_v55, %v778_v9  ;;  %v796_v17 = vrot.slane %v795_v27, 4  ;;  %v813_v33 = vmax.f32 %v811_v46, %v812_v14 }
  0xe8   :  { %v788_v0 = vmax.f32 %v786_v10, %v787_v61  ;;  %v805_v62 = vrot.slane %v804_v28, 4  ;;  %v820_v47 = vsel %vm153_vm6, %v746_v5, -inf  ;;  %v821_v45 = vsel %vm153_vm6, %v747_v7, -inf }
  0xe9   :  { %v771_v38 = vrot.slane %v770_v26, 2  ;;  %v780_v6 = vrot.slane %v779_v29, 2  ;;  %v797_v24 = vmax.f32 %v795_v27, %v796_v17  ;;  %v814_v23 = vrot.slane %v813_v33, 4 }
  0xea   :  { %v789_v43 = vrot.slane %v788_v0, 2  ;;  %v806_v54 = vmax.f32 %v804_v28, %v805_v62  ;;  %v822_v56 = vmax.f32 %v820_v47, %v821_v45  ;;  %v15211_v9 = vsel %vm7444_vm8, %v7513_v60, -inf  ;;  %v6274_v47 = vld [vmem:[%s6504_s7 + $0xe0] sm:$0xff] }
  0xeb   :  { %v829_v10 = vsel %vm153_vm6, %v15211_v9, -inf  ;;  %v772_v55 = vmax.f32 %v770_v26, %v771_v38  ;;  %v781_v5 = vmax.f32 %v779_v29, %v780_v6  ;;  %v798_v7 = vrot.slane %v797_v24, 2  ;;  %v7624_v29 = vld [vmem:[%s6504_s7 + $0xd8] sm:$0xff]  ;;  %v7636_v38 = vld [vmem:[%s6504_s7 + $0xe8] sm:$0xff] }
  0xec   :  { %v815_v21 = vmax.f32 %v813_v33, %v814_v23  ;;  %v790_v44 = vmax.f32 %v788_v0, %v789_v43  ;;  %v807_v27 = vrot.slane %v806_v54, 2  ;;  %v823_v61 = vrot.slane %v822_v56, 4  ;;  %v7645_v43 = vld [vmem:[%s6504_s7 + $0xf0] sm:$0xff]  ;;  %v7651_v9 = vld [vmem:[%s6504_s7 + $0xf8] sm:$0xff]  ;;  %s7695_s7 = sceil.f32 %s1150_s1  ;;  %s6140_s1 = scvt.f32.s32 %s7838_s24 }
  0xed   :  { %v15212_v28 = vsel %vm7454_vm9, %v7519_v36, -inf  ;;  %v773_v46 = vrot.slane %v772_v55, 1  ;;  %v782_v14 = vrot.slane %v781_v5, 1  ;;  %v799_v17 = vmax.f32 %v797_v24, %v798_v7  ;;  %s6136_s11 = scvt.f32.s32 %s7695_s7 }
  0xee   :  { %v830_v60 = vsel %vm153_vm6, %v15212_v28, -inf  ;;  %v816_v26 = vrot.slane %v815_v21, 2  ;;  %v761_v33 = vsel %vm7454_vm9, %v7624_v29, -inf  ;;  %v791_v0 = vrot.slane %v790_v44, 1  ;;  %s7912_s7 = sadd.s32 %s6140_s1, %s7123_s29 }
  0xef   :  { %v824_v36 = vmax.f32 %v822_v56, %v823_v61  ;;  %v831_v62 = vmax.f32 %v829_v10, %v830_v60  ;;  %v762_v45 = vsel %vm7444_vm8, %v6274_v47, -inf  ;;  %v763_v6 = vsel %vm7454_vm9, %v7636_v38, -inf  ;;  %s7755_s23 = sadd.s32 %s6136_s11, %s7123_s29  ;;  %p1250_p10 = scmp.gt.s32.totalorder %s7912_s7, 0 }
  0xf0   :  { %v800_v24 = vrot.slane %v799_v17, 1  ;;  %v7641_v23 = vmax.f32 %v806_v54, %v807_v27  ;;  %v764_v56 = vsel %vm7444_vm8, %v7645_v43, -inf  ;;  %v765_v10 = vsel %vm7454_vm9, %v7651_v9, -inf  ;;  %p1154_p12 = scmp.gt.s32.totalorder %s7755_s23, 0  ;;  %p5654_p0 = scmp.lt.s32.totalorder %s7755_s23, 16 }
  0xf1   :  { %v7656_v7 = vmax.f32 %v772_v55, %v773_v46  ;;  %v832_v54 = vrot.slane %v831_v62, 4  ;;  %v7658_v27 = vmax.f32 %v781_v5, %v782_v14  ;;  %v7660_v61 = vmax.f32 %v815_v21, %v816_v26  ;;  %s1089_s11 = scalar_select %p7876_p3, 1, 0 }
  0xf2   :  { %v15213_v28 = vsel %vm7444_vm8, %v7527_v31, -inf  ;;  %v15214_v29 = vsel %vm7454_vm9, %v7533_v52, -inf  ;;  %v7672_v46 = vmax.f32 %v790_v44, %v791_v0  ;;  %v825_v5 = vrot.slane %v824_v36, 2  ;;  %s1155_s26 = scalar_select %p1154_p12, %s7755_s23, 0 }
  0xf3   :  { %v838_v60 = vsel %vm153_vm6, %v15213_v28, -inf  ;;  %v839_v55 = vsel %vm153_vm6, %v15214_v29, -inf  ;;  %v833_v14 = vmax.f32 %v831_v62, %v832_v54  ;;  %v7680_v31 = vmax.f32 %v799_v17, %v800_v24  ;;  %p5664_p8 = scmp.lt.s32.totalorder %s7912_s7, 16 }
  0xf4   :  { %v840_v21 = vmax.f32 %v838_v60, %v839_v55  ;;  %v15215_v52 = vsel %vm7444_vm8, %v7539_v18, -inf  ;;  %v15216_v0 = vsel %vm7454_vm9, %v7545_v32, -inf  ;;  %v15217_v54 = vsel %vm7444_vm8, %v7551_v40, -inf  ;;  %s15967_s26 = smov (!%p5654_p0, %s1155_s26), 16 }
  0xf5   :  { %v847_v44 = vsel %vm153_vm6, %v15215_v52, -inf  ;;  %v848_v62 = vsel %vm153_vm6, %v15216_v0, -inf  ;;  %v834_v17 = vrot.slane %v833_v14, 2  ;;  %v856_v18 = vsel %vm153_vm6, %v15217_v54, -inf  ;;  %p1166_p6 = scmp.le.s32.totalorder %s15967_s26, %s15965_s2 }
  0xf6   :  { %v841_v47 = vrot.slane %v840_v21, 4  ;;  %v849_v24 = vmax.f32 %v847_v44, %v848_v62  ;;  %v15218_v32 = vsel %vm7454_vm9, %v7557_v37, -inf  ;;  %v15219_v60 = vsel %vm7444_vm8, %v7563_v41, -inf  ;;  %s1251_s14 = scalar_select %p1250_p10, %s7912_s7, 0 }
  0xf7   :  { %v857_v28 = vsel %vm153_vm6, %v15218_v32, -inf  ;;  %v865_v29 = vsel %vm153_vm6, %v15219_v60, -inf  ;;  %v15220_v40 = vsel %vm7454_vm9, %v7570_v25, -inf  ;;  %v15221_v52 = vsel %vm7444_vm8, %v7576_v51, -inf  ;;  %p8051_p12 = por %p1166_p6, %p298_p5  ;;  %p8078_p0 = por %p1166_p6, %p502_p9 }
  0xf8   :  { %v866_v55 = vsel %vm153_vm6, %v15220_v40, -inf  ;;  %v874_v37 = vsel %vm153_vm6, %v15221_v52, -inf  ;;  %v818_v41 = vrot.slane %v7660_v61, 1  ;;  %v826_v44 = vmax.f32 %v824_v36, %v825_v5  ;;  %s15971_s14 = smov (!%p5664_p8, %s1251_s14), 16  ;;  %p8118_p11 = por %p1166_p6, %p706_p13 }
  0xf9   :  { %v842_v0 = vmax.f32 %v840_v21, %v841_v47  ;;  %v850_v62 = vrot.slane %v849_v24, 4  ;;  %v835_v25 = vmax.f32 %v833_v14, %v834_v17  ;;  %v858_v54 = vmax.f32 %v856_v18, %v857_v28  ;;  %s1183_s13 = scalar_select %p8051_p12, 1, 0 }
  0xfa   :  { %v867_v32 = vmax.f32 %v865_v29, %v866_v55  ;;  %v15222_v51 = vsel %vm7454_vm9, %v7582_v39, -inf  ;;  %v15223_v36 = vsel %vm7444_vm8, %v7588_v53, -inf  ;;  %v884_v21 = vsel %vm153_vm6, %v761_v33, -inf  ;;  %s1200_s1 = scalar_select %p8078_p0, 1, 0 }
  0xfb   :  { %v875_v60 = vsel %vm153_vm6, %v15222_v51, -inf  ;;  %v843_v40 = vrot.slane %v842_v0, 2  ;;  %v851_v52 = vmax.f32 %v849_v24, %v850_v62  ;;  %v883_v5 = vsel %vm153_vm6, %v15223_v36, -inf  ;;  %s8140_s7 = sceil.f32 %s1342_s15  ;;  %p8154_p1 = por %p1166_p6, %p910_p2 }
  0xfc   :  { %v876_v26 = vmax.f32 %v874_v37, %v875_v60  ;;  %v859_v39 = vrot.slane %v858_v54, 4  ;;  %v868_v14 = vrot.slane %v867_v32, 4  ;;  %v892_v17 = vsel %vm153_vm6, %v762_v45, -inf  ;;  %s6144_s15 = scvt.f32.s32 %s8140_s7  ;;  %p1262_p7 = scmp.le.s32.totalorder %s15971_s14, %s15969_s10 }
  0xfd   :  { %v827_v47 = vrot.slane %v826_v44, 1  ;;  %v844_v53 = vmax.f32 %v842_v0, %v843_v40  ;;  %v852_v24 = vrot.slane %v851_v52, 2  ;;  %v885_v55 = vmax.f32 %v883_v5, %v884_v21 }
  0xfe   :  { %v877_v18 = vrot.slane %v876_v26, 4  ;;  %v860_v28 = vmax.f32 %v858_v54, %v859_v39  ;;  %v869_v29 = vmax.f32 %v867_v32, %v868_v14  ;;  %v893_v33 = vsel %vm153_vm6, %v763_v6, -inf  ;;  %s8220_s23 = sadd.s32 %s6144_s15, %s7123_s29  ;;  %p8283_p8 = por %p1262_p7, %p298_p5 }
  0xff   :  { %v836_v45 = vrot.slane %v835_v25, 1  ;;  %v853_v37 = vmax.f32 %v851_v52, %v852_v24  ;;  %v894_v62 = vmax.f32 %v892_v17, %v893_v33  ;;  %v886_v38 = vrot.slane %v885_v55, 4  ;;  %v15261_v33 = vld [vmem:[#allocation29_spill] sm:$0xff]  ;;  %p1346_p6 = scmp.gt.s32.totalorder %s8220_s23, 0  ;;  %p8296_p12 = por %p1262_p7, %p502_p9 }
 0x100   :  { %v878_v0 = vmax.f32 %v876_v26, %v877_v18  ;;  %v861_v54 = vrot.slane %v860_v28, 2  ;;  %v870_v32 = vrot.slane %v869_v29, 2  ;;  %v901_v6 = vsel %vm153_vm6, %v764_v56, -inf  ;;  %s15285_s15 = scalar_select %p8118_p11, 1, 0 }
 0x101   :  { %v845_v26 = vrot.slane %v844_v53, 1  ;;  %v854_v51 = vrot.slane %v853_v37, 1  ;;  %v895_v40 = vrot.slane %v894_v62, 4  ;;  %v887_v56 = vmax.f32 %v885_v55, %v886_v38  ;;  %v15234_v38 = vld [vmem:[#allocation16_spill] sm:$0xff]  ;;  %p8365_p11 = por %p1262_p7, %p706_p13 }
 0x102   :  { %v879_v60 = vrot.slane %v878_v0, 2  ;;  %v862_v3 = vmax.f32 %v860_v28, %v861_v54  ;;  %v871_v43 = vmax.f32 %v869_v29, %v870_v32  ;;  %v902_v52 = vsel %vm153_vm6, %v765_v10, -inf  ;;  %v15233_v32 = vld [vmem:[#allocation15_spill] sm:$0xff] }
 0x103   :  { %v15226_v36 = vstv %s15961_s21  ;;  %v15229_v39 = vrot.slane %v7641_v23, 1  ;;  %v896_v21 = vmax.f32 %v894_v62, %v895_v40  ;;  %v903_v9 = vmax.f32 %v901_v6, %v902_v52  ;;  %v15238_v52 = vld [vmem:[#allocation18_spill] sm:$0xff]  ;;  %s7976_s21 = sld [smem:[#allocation4 + $0x1]] }
 0x104   :  { %vm7797_vm10 = vcmp.ge.s32.totalorder %v6499_v1, %v15226_v36  ;;  %v880_v42 = vmax.f32 %v878_v0, %v879_v60  ;;  %v7810_v10 = vmax.f32 %v7660_v61, %v818_v41  ;;  %v7812_v17 = vmax.f32 %v826_v44, %v827_v47  ;;  %v15237_v60 = vld [vmem:[#allocation17_spill] sm:$0xff] }
 0x105   :  { %v7805_v14 = vmax.f32 %v7641_v23, %v15229_v39  ;;  %v863_v24 = vrot.slane %v862_v3, 1  ;;  %v888_v18 = vrot.slane %v887_v56, 2  ;;  %v7819_v23 = vmax.f32 %v835_v25, %v836_v45  ;;  %v15242_v39 = vld [vmem:[#allocation19_spill] sm:$0xff] }
 0x106   :  { %v7821_v28 = vmax.f32 %v844_v53, %v845_v26  ;;  %v897_v29 = vrot.slane %v896_v21, 2  ;;  %v904_v55 = vrot.slane %v903_v9, 4  ;;  %v7827_v61 = vmax.f32 %v853_v37, %v854_v51 }
 0x107   :  { %v872_v41 = vrot.slane %v871_v43, 1  ;;  %v889_v44 = vmax.f32 %v887_v56, %v888_v18  ;;  %v15230_v47 = vmov %v15226_v36  ;;  %v881_v25 = vrot.slane %v880_v42, 1 }
 0x108   :  { %vm7832_vm11 = vcmp.ge.s32.totalorder %v6508_v2, %v15230_v47  ;;  %v898_v53 = vmax.f32 %v896_v21, %v897_v29  ;;  %v905_v45 = vmax.f32 %v903_v9, %v904_v55  ;;  %v929_v0 = vstv %s15963_s27  ;;  %v15243_v21 = vld [vmem:[#allocation23_spill] sm:$0xff]  ;;  %v15244_v9 = vld [vmem:[#allocation24_spill] sm:$0xff]  ;;  %s8000_s27 = sld [smem:[#allocation6 + $0x1]] }
 0x109   :  { %v7845_v37 = vmax.f32 %v862_v3, %v863_v24  ;;  %vm955_vm12 = vcmask 1041409   ;;  %vm957_vm13 = vcmask 1042434   ;;  %vm959_vm14 = vcmask 1043459  }
 0x10a   :  { %v890_v62 = vrot.slane %v889_v44, 1  ;;  %v899_v54 = vrot.slane %v898_v53, 1  ;;  %v956_v6 = vsel %vm955_vm12, %v15234_v38, %v15233_v32  ;;  %vm961_vm15 = vcmask 1044484   ;;  %v15252_v32 = vld [vmem:[#allocation10_spill] sm:$0xff] }
 0x10b   :  { %v7854_v26 = vmax.f32 %v871_v43, %v872_v41  ;;  %vm7857_vm0 = vcmp.lt.s32.totalorder %v6499_v1, %v929_v0  ;;  %v958_v40 = vsel %vm957_vm13, %v15237_v60, %v956_v6  ;;  %vm963_vm1 = vcmask 1045509   ;;  %v15247_v41 = vld [vmem:[#allocation20_spill] sm:$0xff]  ;;  %v15253_v60 = vld [vmem:[#allocation22_spill] sm:$0xff] }
 0x10c   :  { %v7864_v3 = vmax.f32 %v880_v42, %v881_v25  ;;  %v906_v56 = vrot.slane %v905_v45, 2  ;;  %v960_v43 = vsel %vm959_vm14, %v15238_v52, %v958_v40  ;;  %vm15081_vm2 = vcmask 1046534   ;;  %vm7902_vm5 = vmand %vm7797_vm10, %vm7857_vm0  ;;  %v15248_v25 = vld [vmem:[#allocation25_spill] sm:$0xff]  ;;  %v15254_v52 = vld [vmem:[#allocation27_spill] sm:$0xff] }
 0x10d   :  { %vm7881_vm3 = vcmp.lt.s32.totalorder %v6508_v2, %v929_v0  ;;  %v962_v42 = vsel %vm961_vm15, %v15242_v39, %v960_v43  ;;  %vm15080_vm4 = vcmask 1047559   ;;  %v969_v24 = vsel %vm955_vm12, %v15244_v9, %v15243_v21  ;;  %v15255_v39 = vld [vmem:[#allocation31_spill] sm:$0xff]  ;;  %v15259_v21 = vld [vmem:[#allocation32_spill] sm:$0xff] }
 0x10e   :  { %v7894_v18 = vmax.f32 %v889_v44, %v890_v62  ;;  %v7896_v29 = vmax.f32 %v898_v53, %v899_v54  ;;  %v964_v47 = vsel %vm963_vm1, %v15247_v41, %v962_v42  ;;  %v970_v0 = vsel %vm957_vm13, %v15248_v25, %v969_v24  ;;  %v15249_v44 = vld [vmem:[#allocation21_spill] sm:$0xff]  ;;  %v15250_v53 = vld [vmem:[#allocation26_spill] sm:$0xff]  ;;  %vm7941_vm7 = vmand %vm7832_vm11, %vm7881_vm3 }
 0x10f   :  { %v966_v5 = vsel %vm15081_vm2, %v15249_v44, %v964_v47  ;;  %v971_v62 = vsel %vm959_vm14, %v15250_v53, %v970_v0  ;;  %v15251_v54 = vld [vmem:[#allocation9_spill] sm:$0xff]  ;;  %v1019_v6 = vsel %vm955_vm12, %v7183_v58, %v7181_v57  ;;  %v907_v51 = vmax.f32 %v905_v45, %v906_v56  ;;  %v15258_v58 = vld [vmem:[#allocation28_spill] sm:$0xff]  ;;  %v15263_v0 = vld [vmem:[#allocation30_spill] sm:$0xff] }
 0x110   :  { %v1012_v38 = vsel %vm955_vm12, %v15252_v32, %v15251_v54  ;;  %v7929_v40 = vsel %vm15080_vm4, %v15253_v60, %v966_v5  ;;  %v972_v43 = vsel %vm961_vm15, %v15254_v52, %v971_v62  ;;  %v1020_v36 = vsel %vm957_vm13, %v7185_v63, %v1019_v6  ;;  %v15262_v47 = vld [vmem:[#allocation33_spill] sm:$0xff] }
 0x111   :  { %v1013_v42 = vsel %vm957_vm13, %v15255_v39, %v1012_v38  ;;  %v973_v45 = vsel %vm963_vm1, %v15258_v58, %v972_v43  ;;  %v978_v56 = vsel %vm7902_vm5, %v7929_v40, -inf  ;;  %v7969_v41 = vstv %s990_s3  ;;  %s8026_s3 = sfloor.f32 %s1246_s16  ;;  %v15265_v58 = vld [vmem:[#allocation13_spill] sm:$0xff] }
 0x112   :  { %v1014_v9 = vsel %vm959_vm14, %v15259_v21, %v1013_v42  ;;  %v974_v24 = vsel %vm15081_vm2, %v15261_v33, %v973_v45  ;;  %v1021_v63 = vsel %vm959_vm14, %v7189_v35, %v1020_v36  ;;  %v980_v5 = vsel %vm153_vm6, %v978_v56, -inf  ;;  %s6142_s18 = scvt.f32.s32 %s8026_s3  ;;  %v15267_v21 = vld [vmem:[#allocation14_spill] sm:$0xff]  ;;  %v15269_v36 = vld [vmem:[#allocation12_spill] sm:$0xff]  ;;  %s1437_s3 = ssub.s32 %s8000_s27, %s7976_s21 }
 0x113   :  { %v1015_v25 = vsel %vm961_vm15, %v15262_v47, %v1014_v9  ;;  %v7980_v44 = vsel %vm15080_vm4, %v15263_v0, %v974_v24  ;;  %v1022_v62 = vsel %vm961_vm15, %v7192_v50, %v1021_v63  ;;  %v908_v35 = vrot.slane %v907_v51, 1  ;;  %v15270_v24 = vld [vmem:[#allocation34_spill] sm:$0xff]  ;;  %v15271_v0 = vld [vmem:[#allocation35_spill] sm:$0xff]  ;;  %s8181_s27 = sadd.s32 1, %s1437_s3 }
 0x114   :  { %v1016_v53 = vsel %vm963_vm1, %v7161_v48, %v1015_v25  ;;  %v979_v54 = vsel %vm7941_vm7, %v7980_v44, -inf  ;;  %v1023_v38 = vsel %vm963_vm1, %v7210_v4, %v1022_v62  ;;  %v1068_v52 = vsel %vm955_vm12, %v7448_v34, %v7441_v22  ;;  %s8123_s25 = sadd.s32 %s6142_s18, %s7123_s29  ;;  %p1439_p3 = scmp.gt.s32.totalorder %s8181_s27, 1 }
 0x115   :  { %v1017_v32 = vsel %vm15081_vm2, %v7171_v8, %v1016_v53  ;;  %v981_v48 = vsel %vm153_vm6, %v979_v54, -inf  ;;  %v1024_v6 = vsel %vm15081_vm2, %v7230_v59, %v1023_v38  ;;  %v1061_v8 = vsel %vm955_vm12, %v7335_v12, %v7328_v11  ;;  %v15272_v54 = vld [vmem:[#allocation36_spill] sm:$0xff]  ;;  %p1338_p4 = scmp.gt.s32.totalorder %s8123_s25, 0  ;;  %p5669_p10 = scmp.lt.s32.totalorder %s8123_s25, 16 }
 0x116   :  { %v8005_v50 = vsel %vm15080_vm4, %v7173_v49, %v1017_v32  ;;  %v982_v4 = vmax.f32 %v980_v5, %v981_v48  ;;  %v8016_v60 = vsel %vm15080_vm4, %v7258_v20, %v1024_v6  ;;  %v1062_v59 = vsel %vm957_vm13, %v7337_v13, %v1061_v8  ;;  %s15975_s27 = smov (!%p1439_p3, %s8181_s27), 1 }
 0x117   :  { %v1028_v49 = vsel %vm7902_vm5, %v8005_v50, -inf  ;;  %v1029_v11 = vsel %vm7941_vm7, %v8016_v60, -inf  ;;  %v1063_v20 = vsel %vm959_vm14, %v7358_v19, %v1062_v59  ;;  %v1069_v19 = vsel %vm957_vm13, %v7450_v30, %v1068_v52  ;;  %s1339_s9 = scalar_select %p1338_p4, %s8123_s25, 0 }
 0x118   :  { %v1030_v12 = vsel %vm153_vm6, %v1028_v49, -inf  ;;  %v983_v13 = vrot.slane %v982_v4, 4  ;;  %v1031_v43 = vsel %vm153_vm6, %v1029_v11, -inf  ;;  %v1064_v39 = vsel %vm961_vm15, %v7386_v15, %v1063_v20  ;;  %p5674_p4 = scmp.lt.s32.totalorder %s8220_s23, 16  ;;  %s1445_s24 = scvt.s32.f32 %s15975_s27 }
 0x119   :  { %v8055_v22 = vmax.f32 %v907_v51, %v908_v35  ;;  %vm992_vm8 = vcmp.eq.s32.totalorder %v7969_v41, 1  ;;  %v1032_v34 = vmax.f32 %v1030_v12, %v1031_v43  ;;  %v1065_v42 = vsel %vm963_vm1, %v7410_v16, %v1064_v39  ;;  %v15266_v51 = vld [vmem:[#allocation11_spill] sm:$0xff]  ;;  %s15973_s9 = smov (!%p5669_p10, %s1339_s9), 16  ;;  %p8378_p10 = por %p1262_p7, %p910_p2 }
 0x11a   :  { %v1070_v15 = vsel %vm959_vm14, %v15265_v58, %v1069_v19  ;;  %v984_v30 = vmax.f32 %v982_v4, %v983_v13  ;;  %vm994_vm9 = vcmask 24576   ;;  %v8066_v45 = vstv %s1040_s22  ;;  %s1347_s16 = scalar_select %p1346_p6, %s8220_s23, 0 }
 0x11b   :  { %v1066_v56 = vsel %vm15081_vm2, %v15266_v51, %v1065_v42  ;;  %v1071_v9 = vsel %vm961_vm15, %v15267_v21, %v1070_v15  ;;  %v1033_v16 = vrot.slane %v1032_v34, 4  ;;  %v1110_v25 = vsel %vm955_vm12, %v7658_v27, %v7656_v7  ;;  %s1296_s27 = scalar_select %p8296_p12, 1, 0 }
 0x11c   :  { %v8085_v33 = vsel %vm15080_vm4, %v15269_v36, %v1066_v56  ;;  %v1072_v47 = vsel %vm963_vm1, %v15270_v24, %v1071_v9  ;;  %v985_v63 = vrot.slane %v984_v30, 2  ;;  %v1111_v62 = vsel %vm957_vm13, %v7672_v46, %v1110_v25  ;;  %s15977_s16 = smov (!%p5674_p4, %s1347_s16), 16  ;;  %s8344_s22 = smul.f32 0.25, %s1445_s24 }
 0x11d   :  { %v1073_v5 = vsel %vm15081_vm2, %v15271_v0, %v1072_v47  ;;  %v1077_v53 = vsel %vm7902_vm5, %v8085_v33, -inf  ;;  %v1034_v35 = vmax.f32 %v1032_v34, %v1033_v16  ;;  %v1112_v32 = vsel %vm959_vm14, %v7680_v31, %v1111_v62  ;;  %p1358_p0 = scmp.le.s32.totalorder %s15977_s16, %s15973_s9  ;;  %s8522_s24 = sld [smem:[#allocation3 + $0x1]] }
 0x11e   :  { %v8107_v7 = vsel %vm15080_vm4, %v15272_v54, %v1073_v5  ;;  %v1079_v27 = vsel %vm153_vm6, %v1077_v53, -inf  ;;  %v986_v46 = vmax.f32 %v984_v30, %v985_v63  ;;  %v1113_v31 = vsel %vm961_vm15, %v7805_v14, %v1112_v32  ;;  %s1313_s18 = scalar_select %p8365_p11, 1, 0 }
 0x11f   :  { %v1078_v38 = vsel %vm7941_vm7, %v8107_v7, -inf  ;;  %v1117_v48 = vsel %vm955_vm12, %v7827_v61, %v7821_v28  ;;  %v1035_v6 = vrot.slane %v1034_v35, 2  ;;  %v1114_v4 = vsel %vm963_vm1, %v7810_v10, %v1113_v31  ;;  %p8413_p3 = por %p1358_p0, %p298_p5  ;;  %p8442_p5 = por %p1358_p0, %p502_p9 }
 0x120   :  { %v1080_v8 = vsel %vm153_vm6, %v1078_v38, -inf  ;;  %v1118_v49 = vsel %vm957_vm13, %v7845_v37, %v1117_v48  ;;  %v987_v14 = vrot.slane %v986_v46, 1  ;;  %v1115_v28 = vsel %vm15081_vm2, %v7812_v17, %v1114_v4  ;;  %s1330_s0 = scalar_select %p8378_p10, 1, 0 }
 0x121   :  { %v1081_v59 = vmax.f32 %v1079_v27, %v1080_v8  ;;  %v1119_v61 = vsel %vm959_vm14, %v7854_v26, %v1118_v49  ;;  %v1036_v10 = vmax.f32 %v1034_v35, %v1035_v6  ;;  %vm1042_vm10 = vcmp.eq.s32.totalorder %v8066_v45, 1  ;;  %s1375_s17 = scalar_select %p8413_p3, 1, 0 }
 0x122   :  { %v8162_v37 = vsel %vm15080_vm4, %v7819_v23, %v1115_v28  ;;  %v1120_v17 = vsel %vm961_vm15, %v7864_v3, %v1119_v61  ;;  %v988_v26 = vmax.f32 %v986_v46, %v987_v14  ;;  %v1090_v3 = vstv %s1089_s11  ;;  %p8469_p9 = por %p1358_p0, %p706_p13  ;;  %p8552_p7 = por %p1358_p0, %p910_p2 }
 0x123   :  { %v1082_v11 = vrot.slane %v1081_v59, 4  ;;  %v1121_v12 = vsel %vm963_vm1, %v7894_v18, %v1120_v17  ;;  %v1126_v20 = vsel %vm7902_vm5, %v8162_v37, -inf  ;;  %v1037_v23 = vrot.slane %v1036_v10, 1  ;;  %s1392_s29 = scalar_select %p8442_p5, 1, 0 }
 0x124   :  { %v1122_v52 = vsel %vm15081_vm2, %v7896_v29, %v1121_v12  ;;  %v1128_v13 = vsel %vm153_vm6, %v1126_v20, -inf  ;;  %v993_v18 = vsel %vm992_vm8, 0.0, %v988_v26  ;;  %v1158_v39 = vstv %s15965_s2  ;;  %s1234_s2 = scalar_select %p8154_p1, 1, 0 }
 0x125   :  { %v1083_v55 = vmax.f32 %v1081_v59, %v1082_v11  ;;  %v8187_v43 = vsel %vm15080_vm4, %v8055_v22, %v1122_v52  ;;  %995 = vst.msk [vmem:[%s15063_s6] sm:$0x1] %vm994_vm9, %v993_v18  ;;  %v1038_v29 = vmax.f32 %v1036_v10, %v1037_v23  ;;  %v8203_v19 = vstv %s1138_s12  ;;  %s5684_s25 = sshll.u32 %s8522_s24, 8  ;;  %s9268_s12 = sld [smem:[#allocation5 + $0x1]] }
 0x126   :  { %v1127_v41 = vsel %vm7941_vm7, %v8187_v43, -inf  ;;  %vm8206_vm11 = vcmp.ge.s32.totalorder %v6499_v1, %v1158_v39  ;;  %vm8214_vm0 = vcmp.ge.s32.totalorder %v6508_v2, %v1158_v39  ;;  %v1161_v57 = vstv %s15967_s26  ;;  %s1409_s26 = scalar_select %p8469_p9, 1, 0 }
 0x127   :  { %v1084_v34 = vrot.slane %v1083_v55, 2  ;;  %v1129_v42 = vsel %vm153_vm6, %v1127_v41, -inf  ;;  %v1043_v15 = vsel %vm1042_vm10, 0.0, %v1038_v29  ;;  %vm1162_vm3 = vcmp.lt.s32.totalorder %v6499_v1, %v1161_v57 }
 0x128   :  { %v1130_v30 = vmax.f32 %v1128_v13, %v1129_v42  ;;  %vm1163_vm5 = vcmp.lt.s32.totalorder %v6508_v2, %v1161_v57  ;;  %1044 = vst.msk [vmem:[%s15063_s6 + $0x1] sm:$0x1] %vm994_vm9, %v1043_v15  ;;  %vm1091_vm7 = vcmp.eq.s32.totalorder %v1090_v3, 1  ;;  %vm8235_vm8 = vmand %vm8206_vm11, %vm1162_vm3  ;;  %v8255_v16 = vstv %s1183_s13 }
 0x129   :  { %v1085_v51 = vmax.f32 %v1083_v55, %v1084_v34  ;;  %vm8245_vm10 = vmand %vm8214_vm0, %vm1163_vm5  ;;  %v1171_v9 = vsel %vm8235_vm8, %v7929_v40, -inf  ;;  %v1188_v36 = vsel %vm8235_vm8, %v8005_v50, -inf  ;;  %vm1140_vm11 = vcmp.eq.s32.totalorder %v8203_v19, 1 }
 0x12a   :  { %v1131_v56 = vrot.slane %v1130_v30, 4  ;;  %v1172_v47 = vsel %vm8245_vm10, %v7980_v44, -inf  ;;  %v1173_v25 = vsel %vm153_vm6, %v1171_v9, -inf  ;;  %v1189_v63 = vsel %vm8245_vm10, %v8016_v60, -inf }
 0x12b   :  { %v1086_v24 = vrot.slane %v1085_v51, 1  ;;  %v1174_v5 = vsel %vm153_vm6, %v1172_v47, -inf  ;;  %v1190_v53 = vsel %vm153_vm6, %v1188_v36, -inf  ;;  %v1191_v62 = vsel %vm153_vm6, %v1189_v63, -inf  ;;  %s1441_s19 = ssub.s32 %s9270_s8, %s9268_s12 }
 0x12c   :  { %v1132_v0 = vmax.f32 %v1130_v30, %v1131_v56  ;;  %v1175_v54 = vmax.f32 %v1173_v25, %v1174_v5  ;;  %v1192_v27 = vmax.f32 %v1190_v53, %v1191_v62  ;;  %v1205_v32 = vsel %vm8235_vm8, %v8085_v33, -inf }
 0x12d   :  { %v1087_v35 = vmax.f32 %v1085_v51, %v1086_v24  ;;  %v8304_v38 = vstv %s1200_s1  ;;  %v1206_v31 = vsel %vm8245_vm10, %v8107_v7, -inf  ;;  %v1207_v48 = vsel %vm153_vm6, %v1205_v32, -inf  ;;  %s1279_s1 = scalar_select %p8283_p8, 1, 0 }
 0x12e   :  { %v1133_v46 = vrot.slane %v1132_v0, 2  ;;  %v1176_v8 = vrot.slane %v1175_v54, 4  ;;  %v1193_v4 = vrot.slane %v1192_v27, 4  ;;  %v1208_v49 = vsel %vm153_vm6, %v1206_v31, -inf }
 0x12f   :  { %v1092_v6 = vsel %vm1091_vm7, 0.0, %v1087_v35  ;;  %vm1185_vm0 = vcmp.eq.s32.totalorder %v8255_v16, 1  ;;  %v1209_v59 = vmax.f32 %v1207_v48, %v1208_v49  ;;  %v1222_v28 = vsel %vm8235_vm8, %v8162_v37, -inf }
 0x130   :  { %1093 = vst.msk [vmem:[%s15063_s6 + $0x2] sm:$0x1] %vm994_vm9, %v1092_v6  ;;  %v1134_v14 = vmax.f32 %v1132_v0, %v1133_v46  ;;  %v1223_v61 = vsel %vm8245_vm10, %v8187_v43, -inf  ;;  %v1177_v10 = vmax.f32 %v1175_v54, %v1176_v8  ;;  %v1194_v17 = vmax.f32 %v1192_v27, %v1193_v4 }
 0x131   :  { %v1224_v26 = vsel %vm153_vm6, %v1222_v28, -inf  ;;  %v1225_v11 = vsel %vm153_vm6, %v1223_v61, -inf  ;;  %v1210_v20 = vrot.slane %v1209_v59, 4  ;;  %v8336_v23 = vstv %s15285_s15  ;;  %s1495_s15 = sceil.f32 %s8344_s22 }
 0x132   :  { %v1135_v12 = vrot.slane %v1134_v14, 1  ;;  %v1226_v3 = vmax.f32 %v1224_v26, %v1225_v11  ;;  %v1178_v52 = vrot.slane %v1177_v10, 2  ;;  %v1195_v13 = vrot.slane %v1194_v17, 2 }
 0x133   :  { %vm1202_vm3 = vcmp.eq.s32.totalorder %v8304_v38, 1  ;;  %v1254_v18 = vstv %s15969_s10  ;;  %v1211_v39 = vmax.f32 %v1209_v59, %v1210_v20  ;;  %v1257_v58 = vstv %s15971_s14  ;;  %s1487_s10 = smul.f32 0.0, %s8344_s22 }
 0x134   :  { %v1136_v55 = vmax.f32 %v1134_v14, %v1135_v12  ;;  %v1227_v29 = vrot.slane %v1226_v3, 4  ;;  %vm8347_vm5 = vcmp.ge.s32.totalorder %v6499_v1, %v1254_v18  ;;  %v1179_v22 = vmax.f32 %v1177_v10, %v1178_v52  ;;  %s1426_s14 = scalar_select %p8552_p7, 1, 0 }
 0x135   :  { %v1196_v34 = vmax.f32 %v1194_v17, %v1195_v13  ;;  %vm8354_vm7 = vcmp.ge.s32.totalorder %v6508_v2, %v1254_v18  ;;  %v1212_v15 = vrot.slane %v1211_v39, 2  ;;  %vm1258_vm8 = vcmp.lt.s32.totalorder %v6499_v1, %v1257_v58 }
 0x136   :  { %v1141_v57 = vsel %vm1140_vm11, 0.0, %v1136_v55  ;;  %v1228_v30 = vmax.f32 %v1226_v3, %v1227_v29  ;;  %v1180_v19 = vrot.slane %v1179_v22, 1  ;;  %vm1219_vm10 = vcmp.eq.s32.totalorder %v8336_v23, 1  ;;  %vm8390_vm4 = vmand %vm8347_vm5, %vm1258_vm8 }
 0x137   :  { %1142 = vst.msk [vmem:[%s15063_s6 + $0x3] sm:$0x1] %vm994_vm9, %v1141_v57  ;;  %v1197_v51 = vrot.slane %v1196_v34, 1  ;;  %vm1259_vm11 = vcmp.lt.s32.totalorder %v6508_v2, %v1257_v58  ;;  %v1213_v56 = vmax.f32 %v1211_v39, %v1212_v15  ;;  %v1235_v9 = vstv %s1234_s2  ;;  %s8446_s2 = sfloor.f32 %s1487_s10  ;;  %s8638_s10 = scalar_lea.vmem %s15062_s5, %s5684_s25 }
 0x138   :  { %v1229_v21 = vrot.slane %v1228_v30, 2  ;;  %vm8400_vm2 = vmand %vm8354_vm7, %vm1259_vm11  ;;  %v1267_v24 = vsel %vm8390_vm4, %v7929_v40, -inf  ;;  %v1181_v47 = vmax.f32 %v1179_v22, %v1180_v19  ;;  %v1284_v35 = vsel %vm8390_vm4, %v8005_v50, -inf  ;;  %s6146_s23 = scvt.f32.s32 %s8446_s2  ;;  %s1691_s2 = sfloor.f32 %s8344_s22 }
 0x139   :  { %v1198_v25 = vmax.f32 %v1196_v34, %v1197_v51  ;;  %v1268_v63 = vsel %vm8400_vm2, %v7980_v44, -inf  ;;  %v1269_v0 = vsel %vm153_vm6, %v1267_v24, -inf  ;;  %v1214_v5 = vrot.slane %v1213_v56, 1  ;;  %s6150_s11 = scvt.f32.s32 %s1691_s2 }
 0x13a   :  { %v1230_v53 = vmax.f32 %v1228_v30, %v1229_v21  ;;  %v1270_v62 = vsel %vm153_vm6, %v1268_v63, -inf  ;;  %v1186_v54 = vsel %vm1185_vm0, 0.0, %v1181_v47  ;;  %v1285_v46 = vsel %vm8400_vm2, %v8016_v60, -inf  ;;  %v8682_v47 = vld [vmem:[%s8638_s10 + $0x18] sm:$0xff] }
 0x13b   :  { %v1203_v27 = vsel %vm1202_vm3, 0.0, %v1198_v25  ;;  %v1271_v32 = vmax.f32 %v1269_v0, %v1270_v62  ;;  %1187 = vst.msk [vmem:[%s15063_s6 + $0x4] sm:$0x1] %vm994_vm9, %v1186_v54  ;;  %v1215_v16 = vmax.f32 %v1213_v56, %v1214_v5  ;;  %v1286_v31 = vsel %vm153_vm6, %v1284_v35, -inf  ;;  %s8574_s4 = sadd.s32 %s6150_s11, %s7976_s21  ;;  %s1698_s11 = smul.f32 2.0, %s8344_s22 }
 0x13c   :  { %1204 = vst.msk [vmem:[%s15063_s6 + $0x5] sm:$0x1] %vm994_vm9, %v1203_v27  ;;  %v1231_v38 = vrot.slane %v1230_v53, 1  ;;  %v1287_v48 = vsel %vm153_vm6, %v1285_v46, -inf  ;;  %vm1236_vm0 = vcmp.eq.s32.totalorder %v1235_v9, 1  ;;  %v1301_v4 = vsel %vm8390_vm4, %v8085_v33, -inf }
 0x13d   :  { %v1272_v6 = vrot.slane %v1271_v32, 4  ;;  %v1288_v8 = vmax.f32 %v1286_v31, %v1287_v48  ;;  %v1220_v49 = vsel %vm1219_vm10, 0.0, %v1215_v16  ;;  %v1280_v59 = vstv %s1279_s1  ;;  %s6148_s1 = scvt.f32.s32 %s1495_s15  ;;  %p1694_p8 = scmp.gt.s32.totalorder %s8574_s4, 0  ;;  %v8673_v9 = vld [vmem:[%s8638_s10 + $0x8] sm:$0xff] }
 0x13e   :  { %v1232_v14 = vmax.f32 %v1230_v53, %v1231_v38  ;;  %v1302_v28 = vsel %vm8400_vm2, %v8107_v7, -inf  ;;  %1221 = vst.msk [vmem:[%s15063_s6 + $0x6] sm:$0x1] %vm994_vm9, %v1220_v49  ;;  %v1303_v17 = vsel %vm153_vm6, %v1301_v4, -inf  ;;  %v1297_v12 = vstv %s1296_s27  ;;  %s8510_s27 = sadd.s32 %s6146_s23, %s7976_s21  ;;  %p5695_p12 = scmp.lt.s32.totalorder %s8574_s4, 16 }
 0x13f   :  { %v1273_v61 = vmax.f32 %v1271_v32, %v1272_v6  ;;  %v1289_v10 = vrot.slane %v1288_v8, 4  ;;  %v1304_v26 = vsel %vm153_vm6, %v1302_v28, -inf  ;;  %v1318_v23 = vsel %vm8390_vm4, %v8162_v37, -inf  ;;  %s8519_s3 = sadd.s32 %s6148_s1, %s7976_s21  ;;  %p1491_p13 = scmp.gt.s32.totalorder %s8510_s27, 0 }
 0x140   :  { %v1237_v11 = vsel %vm1236_vm0, 0.0, %v1232_v14  ;;  %v1305_v20 = vmax.f32 %v1303_v17, %v1304_v26  ;;  %v1319_v13 = vsel %vm8400_vm2, %v8187_v43, -inf  ;;  %vm1281_vm4 = vcmp.eq.s32.totalorder %v1280_v59, 1  ;;  %p1498_p1 = scmp.gt.s32.totalorder %s8519_s3, 0  ;;  %p5685_p2 = scmp.lt.s32.totalorder %s8510_s27, 16 }
 0x141   :  { %1238 = vst.msk [vmem:[%s15063_s6 + $0x7] sm:$0x1] %vm994_vm9, %v1237_v11  ;;  %v1274_v3 = vrot.slane %v1273_v61, 2  ;;  %v1290_v52 = vmax.f32 %v1288_v8, %v1289_v10  ;;  %v1320_v55 = vsel %vm153_vm6, %v1318_v23, -inf  ;;  %v1321_v39 = vsel %vm153_vm6, %v1319_v13, -inf  ;;  %p5690_p6 = scmp.lt.s32.totalorder %s8519_s3, 16  ;;  %s8875_s7 = sceil.f32 %s1698_s11 }
 0x142   :  { %v1306_v18 = vrot.slane %v1305_v20, 4  ;;  %vm1298_vm3 = vcmp.eq.s32.totalorder %v1297_v12, 1  ;;  %v1322_v22 = vmax.f32 %v1320_v55, %v1321_v39  ;;  %v1314_v42 = vstv %s1313_s18  ;;  %s1492_s18 = scalar_select %p1491_p13, %s8510_s27, 0 }
 0x143   :  { %v1275_v29 = vmax.f32 %v1273_v61, %v1274_v3  ;;  %v1291_v41 = vrot.slane %v1290_v52, 2  ;;  %v1350_v58 = vstv %s15973_s9  ;;  %v1353_v57 = vstv %s15977_s16  ;;  %s1499_s9 = scalar_select %p1498_p1, %s8519_s3, 0 }
 0x144   :  { %v1307_v34 = vmax.f32 %v1305_v20, %v1306_v18  ;;  %v1323_v19 = vrot.slane %v1322_v22, 4  ;;  %vm1351_vm2 = vcmp.ge.s32.totalorder %v6499_v1, %v1350_v58  ;;  %vm1352_vm5 = vcmp.ge.s32.totalorder %v6508_v2, %v1350_v58  ;;  %s15979_s18 = smov (!%p5685_p2, %s1492_s18), 16  ;;  %s8919_s30 = sfloor.f32 %s1698_s11 }
 0x145   :  { %v1276_v15 = vrot.slane %v1275_v29, 1  ;;  %v1292_v30 = vmax.f32 %v1290_v52, %v1291_v41  ;;  %vm1354_vm7 = vcmp.lt.s32.totalorder %v6499_v1, %v1353_v57  ;;  %vm1355_vm8 = vcmp.lt.s32.totalorder %v6508_v2, %v1353_v57  ;;  %s15981_s9 = smov (!%p5690_p6, %s1499_s9), 16  ;;  %s6154_s16 = scvt.f32.s32 %s8919_s30 }
 0x146   :  { %v1308_v51 = vrot.slane %v1307_v34, 2  ;;  %vm1315_vm10 = vcmp.eq.s32.totalorder %v1314_v42, 1  ;;  %v1324_v21 = vmax.f32 %v1322_v22, %v1323_v19  ;;  %vm8528_vm11 = vmand %vm1351_vm2, %vm1354_vm7  ;;  %v1331_v24 = vstv %s1330_s0  ;;  %s6152_s0 = scvt.f32.s32 %s8875_s7  ;;  %s1902_s23 = smul.f32 3.0, %s8344_s22 }
 0x147   :  { %v1277_v45 = vmax.f32 %v1275_v29, %v1276_v15  ;;  %v1293_v56 = vrot.slane %v1292_v30, 1  ;;  %vm8536_vm0 = vmand %vm1352_vm5, %vm1355_vm8  ;;  %v1363_v25 = vsel %vm8528_vm11, %v7929_v40, -inf  ;;  %v1380_v63 = vsel %vm8528_vm11, %v8005_v50, -inf  ;;  %v8655_v15 = vld [vmem:[%s8638_s10] sm:$0xff]  ;;  %s8982_s13 = sadd.s32 %s6154_s16, %s7976_s21  ;;  %s2106_s27 = smul.f32 4.0, %s8344_s22 }
 0x148   :  { %v1309_v36 = vmax.f32 %v1307_v34, %v1308_v51  ;;  %v1325_v53 = vrot.slane %v1324_v21, 2  ;;  %v1364_v40 = vsel %vm8536_vm0, %v7980_v44, -inf  ;;  %v1365_v62 = vsel %vm153_vm6, %v1363_v25, -inf  ;;  %v8685_v25 = vld [vmem:[%s8638_s10 + $0x28] sm:$0xff]  ;;  %p1898_p11 = scmp.gt.s32.totalorder %s8982_s13, 0  ;;  %p5705_p10 = scmp.lt.s32.totalorder %s8982_s13, 16 }
 0x149   :  { %v1282_v0 = vsel %vm1281_vm4, 0.0, %v1277_v45  ;;  %v1294_v5 = vmax.f32 %v1292_v30, %v1293_v56  ;;  %v1366_v35 = vsel %vm153_vm6, %v1364_v40, -inf  ;;  %v1381_v54 = vsel %vm8536_vm0, %v8016_v60, -inf  ;;  %s9435_s3 = sfloor.f32 %s1902_s23  ;;  %s9440_s22 = sceil.f32 %s2106_s27 }
 0x14a   :  { %1283 = vst.msk [vmem:[%s15063_s6 + $0x8] sm:$0x1] %vm994_vm9, %v1282_v0  ;;  %v1310_v50 = vrot.slane %v1309_v36, 1  ;;  %v1326_v27 = vmax.f32 %v1324_v21, %v1325_v53  ;;  %v1367_v32 = vmax.f32 %v1365_v62, %v1366_v35  ;;  %v1382_v46 = vsel %vm153_vm6, %v1380_v63, -inf  ;;  %v8688_v63 = vld [vmem:[%s8638_s10 + $0x30] sm:$0xff]  ;;  %v8698_v62 = vld [vmem:[%s8638_s10 + $0x38] sm:$0xff]  ;;  %s6158_s24 = scvt.f32.s32 %s9435_s3  ;;  %s6160_s7 = scvt.f32.s32 %s9440_s22 }
 0x14b   :  { %v1299_v44 = vsel %vm1298_vm3, 0.0, %v1294_v5  ;;  %vm1332_vm4 = vcmp.eq.s32.totalorder %v1331_v24, 1  ;;  %v1383_v16 = vsel %vm153_vm6, %v1381_v54, -inf  ;;  %v1397_v38 = vsel %vm8528_vm11, %v8085_v33, -inf  ;;  %v8679_v24 = vld [vmem:[%s8638_s10 + $0x20] sm:$0xff]  ;;  %s1899_s15 = scalar_select %p1898_p11, %s8982_s13, 0 }
 0x14c   :  { %1300 = vst.msk [vmem:[%s15063_s6 + $0x9] sm:$0x1] %vm994_vm9, %v1299_v44  ;;  %v1311_v60 = vmax.f32 %v1309_v36, %v1310_v50  ;;  %v1327_v31 = vrot.slane %v1326_v27, 1  ;;  %v1368_v48 = vrot.slane %v1367_v32, 4  ;;  %v1384_v6 = vmax.f32 %v1382_v46, %v1383_v16  ;;  %v8676_v36 = vld [vmem:[%s8638_s10 + $0x10] sm:$0xff]  ;;  %v8701_v35 = vld [vmem:[%s8638_s10 + $0x40] sm:$0xff] }
 0x14d   :  { %v1398_v8 = vsel %vm8536_vm0, %v8107_v7, -inf  ;;  %v1376_v49 = vstv %s1375_s17  ;;  %v1399_v14 = vsel %vm153_vm6, %v1397_v38, -inf  ;;  %v1414_v10 = vsel %vm8528_vm11, %v8162_v37, -inf  ;;  %s1695_s17 = scalar_select %p1694_p8, %s8574_s4, 0  ;;  %v8717_v44 = vld [vmem:[%s8638_s10 + $0x48] sm:$0xff] }
 0x14e   :  { %v1316_v4 = vsel %vm1315_vm10, 0.0, %v1311_v60  ;;  %v1400_v33 = vsel %vm153_vm6, %v1398_v8, -inf  ;;  %v1328_v7 = vmax.f32 %v1326_v27, %v1327_v31  ;;  %v1369_v59 = vmax.f32 %v1367_v32, %v1368_v48  ;;  %v8720_v27 = vld [vmem:[%s8638_s10 + $0x50] sm:$0xff]  ;;  %v8723_v32 = vld [vmem:[%s8638_s10 + $0x58] sm:$0xff]  ;;  %v8728_v31 = vld [vmem:[%s8638_s10 + $0x60] sm:$0xff]  ;;  %s8939_s4 = sadd.s32 %s6152_s0, %s7976_s21  ;;  %s15987_s15 = smov (!%p5705_p10, %s1899_s15), 16 }
 0x14f   :  { %1317 = vst.msk [vmem:[%s15063_s6 + $0xa] sm:$0x1] %vm994_vm9, %v1316_v4  ;;  %v1385_v28 = vrot.slane %v1384_v6, 4  ;;  %v1401_v61 = vmax.f32 %v1399_v14, %v1400_v33  ;;  %v1415_v17 = vsel %vm8536_vm0, %v8187_v43, -inf  ;;  %vm1377_vm3 = vcmp.eq.s32.totalorder %v1376_v49, 1  ;;  %s15983_s17 = smov (!%p5695_p12, %s1695_s17), 16  ;;  %s9466_s0 = sadd.s32 %s6158_s24, %s7976_s21 }
 0x150   :  { %v1333_v26 = vsel %vm1332_vm4, 0.0, %v1328_v7  ;;  %v1370_v11 = vrot.slane %v1369_v59, 2  ;;  %v1416_v37 = vsel %vm153_vm6, %v1414_v10, -inf  ;;  %v1417_v43 = vsel %vm153_vm6, %v1415_v17, -inf  ;;  %v8731_v48 = vld [vmem:[%s8638_s10 + $0x68] sm:$0xff]  ;;  %v8744_v4 = vld [vmem:[%s8638_s10 + $0x78] sm:$0xff] }
 0x151   :  { %v1386_v12 = vmax.f32 %v1384_v6, %v1385_v28  ;;  %v1402_v20 = vrot.slane %v1401_v61, 4  ;;  %1334 = vst.msk [vmem:[%s15063_s6 + $0xb] sm:$0x1] %vm994_vm9, %v1333_v26  ;;  %v1502_v23 = vstv %s15979_s18  ;;  %v1418_v18 = vmax.f32 %v1416_v37, %v1417_v43  ;;  %v8734_v6 = vld [vmem:[%s8638_s10 + $0x70] sm:$0xff]  ;;  %v8747_v49 = vld [vmem:[%s8638_s10 + $0x80] sm:$0xff]  ;;  %p1702_p4 = scmp.gt.s32.totalorder %s8939_s4, 0 }
 0x152   :  { %v1371_v3 = vmax.f32 %v1369_v59, %v1370_v11  ;;  %v1393_v55 = vstv %s1392_s29  ;;  %v1410_v39 = vstv %s1409_s26  ;;  %vm8647_vm2 = vcmp.ge.s32.totalorder %v6499_v1, %v1502_v23  ;;  %v8763_v10 = vld [vmem:[%s8638_s10 + $0x88] sm:$0xff]  ;;  %v8766_v17 = vld [vmem:[%s8638_s10 + $0x90] sm:$0xff]  ;;  %p5700_p0 = scmp.lt.s32.totalorder %s8939_s4, 16  ;;  %s9322_s29 = sadd.s32 1, %s1441_s19 }
 0x153   :  { %v1387_v52 = vrot.slane %v1386_v12, 2  ;;  %v1403_v13 = vmax.f32 %v1401_v61, %v1402_v20  ;;  %v1505_v41 = vstv %s15981_s9  ;;  %v1419_v58 = vrot.slane %v1418_v18, 4  ;;  %v8782_v20 = vld [vmem:[%s8638_s10 + $0xa0] sm:$0xff]  ;;  %s1703_s25 = scalar_select %p1702_p4, %s8939_s4, 0 }
 0x154   :  { %v1372_v22 = vrot.slane %v1371_v3, 1  ;;  %v8652_v57 = vstv %s1426_s14  ;;  %vm8658_vm5 = vcmp.ge.s32.totalorder %v6508_v2, %v1502_v23  ;;  %vm1506_vm7 = vcmp.lt.s32.totalorder %v6499_v1, %v1505_v41  ;;  %s9165_s14 = sceil.f32 %s1902_s23  ;;  %p1443_p9 = scmp.gt.s32.totalorder %s9322_s29, 1 }
 0x155   :  { %v1388_v34 = vmax.f32 %v1386_v12, %v1387_v52  ;;  %v1404_v42 = vrot.slane %v1403_v13, 2  ;;  %vm8664_vm8 = vcmp.lt.s32.totalorder %v6508_v2, %v1505_v41  ;;  %v1420_v21 = vmax.f32 %v1418_v18, %v1419_v58  ;;  %vm8692_vm11 = vmand %vm8647_vm2, %vm1506_vm7  ;;  %v8779_v12 = vld [vmem:[%s8638_s10 + $0x98] sm:$0xff]  ;;  %v8800_v18 = vld [vmem:[%s8638_s10 + $0xb0] sm:$0xff]  ;;  %s15985_s25 = smov (!%p5700_p0, %s1703_s25), 16  ;;  %s6156_s20 = scvt.f32.s32 %s9165_s14 }
 0x156   :  { %v1373_v51 = vmax.f32 %v1371_v3, %v1372_v22  ;;  %vm1394_vm10 = vcmp.eq.s32.totalorder %v1393_v55, 1  ;;  %vm8707_vm0 = vmand %vm8658_vm5, %vm8664_vm8  ;;  %vm1411_vm4 = vcmp.eq.s32.totalorder %v1410_v39, 1  ;;  %v1514_v8 = vsel %vm8692_vm11, %v8655_v15, -inf  ;;  %v8803_v55 = vld [vmem:[%s8638_s10 + $0xb8] sm:$0xff]  ;;  %s15991_s29 = smov (!%p1443_p9, %s9322_s29), 1  ;;  %p2102_p13 = scmp.gt.s32.totalorder %s9466_s0, 0 }
 0x157   :  { %v1389_v45 = vrot.slane %v1388_v34, 1  ;;  %v1405_v56 = vmax.f32 %v1403_v13, %v1404_v42  ;;  %v1421_v50 = vrot.slane %v1420_v21, 2  ;;  %v1515_v14 = vsel %vm8707_vm0, %v8673_v9, -inf  ;;  %v8797_v13 = vld [vmem:[%s8638_s10 + $0xa8] sm:$0xff]  ;;  %s9221_s28 = sadd.s32 %s6156_s20, %s7976_s21  ;;  %s1449_s26 = scvt.s32.f32 %s15991_s29 }
 0x158   :  { %v1378_v5 = vsel %vm1377_vm3, 0.0, %v1373_v51  ;;  %vm1428_vm3 = vcmp.eq.s32.totalorder %v8652_v57, 1  ;;  %v1516_v33 = vsel %vm8692_vm11, %v8676_v36, -inf  ;;  %v1518_v7 = vsel %vm8692_vm11, %v8679_v24, -inf  ;;  %p1906_p3 = scmp.gt.s32.totalorder %s9221_s28, 0  ;;  %p5710_p5 = scmp.lt.s32.totalorder %s9221_s28, 16 }
 0x159   :  { %v1390_v53 = vmax.f32 %v1388_v34, %v1389_v45  ;;  %v1406_v40 = vrot.slane %v1405_v56, 1  ;;  %1379 = vst.msk [vmem:[%s15063_s6 + $0xc] sm:$0x1] %vm994_vm9, %v1378_v5  ;;  %v1422_v38 = vmax.f32 %v1420_v21, %v1421_v50  ;;  %v1520_v59 = vsel %vm8692_vm11, %v8688_v63, -inf  ;;  %s9431_s2 = smul.f32 0.25, %s1449_s26  ;;  %s9498_s4 = sadd.s32 %s6160_s7, %s7976_s21 }
 0x15a   :  { %v1517_v26 = vsel %vm8707_vm0, %v8682_v47, -inf  ;;  %v1519_v11 = vsel %vm8707_vm0, %v8685_v25, -inf  ;;  %v1521_v37 = vsel %vm8707_vm0, %v8698_v62, -inf  ;;  %v1522_v43 = vsel %vm8692_vm11, %v8701_v35, -inf  ;;  %s1907_s1 = scalar_select %p1906_p3, %s9221_s28, 0 }
 0x15b   :  { %v1395_v60 = vsel %vm1394_vm10, 0.0, %v1390_v53  ;;  %v1407_v16 = vmax.f32 %v1405_v56, %v1406_v40  ;;  %v1423_v61 = vrot.slane %v1422_v38, 1  ;;  %v1523_v23 = vsel %vm8707_vm0, %v8717_v44, -inf  ;;  %s2303_s11 = smul.f32 0.0, %s9431_s2  ;;  %p2110_p1 = scmp.gt.s32.totalorder %s9498_s4, 0 }
 0x15c   :  { %1396 = vst.msk [vmem:[%s15063_s6 + $0xd] sm:$0x1] %vm994_vm9, %v1395_v60  ;;  %v1524_v3 = vsel %vm8692_vm11, %v8720_v27, -inf  ;;  %v1525_v39 = vsel %vm8707_vm0, %v8723_v32, -inf  ;;  %v1526_v29 = vsel %vm8692_vm11, %v8728_v31, -inf  ;;  %v1527_v41 = vsel %vm8707_vm0, %v8731_v48, -inf  ;;  %s2311_s20 = sceil.f32 %s9431_s2  ;;  %s2528_s19 = sfloor.f32 %s9431_s2 }
 0x15d   :  { %v1412_v28 = vsel %vm1411_vm4, 0.0, %v1407_v16  ;;  %v1424_v52 = vmax.f32 %v1422_v38, %v1423_v61  ;;  %v1528_v22 = vsel %vm8692_vm11, %v8734_v6, -inf  ;;  %v1529_v34 = vsel %vm8707_vm0, %v8744_v4, -inf  ;;  %s15989_s1 = smov (!%p5710_p5, %s1907_s1), 16  ;;  %s9482_s30 = sfloor.f32 %s2303_s11 }
 0x15e   :  { %1413 = vst.msk [vmem:[%s15063_s6 + $0xe] sm:$0x1] %vm994_vm9, %v1412_v28  ;;  %v1530_v42 = vsel %vm8692_vm11, %v8747_v49, -inf  ;;  %v1531_v58 = vsel %vm8707_vm0, %v8763_v10, -inf  ;;  %v1546_v5 = vsel %vm153_vm6, %v1514_v8, -inf  ;;  %v1547_v53 = vsel %vm153_vm6, %v1515_v14, -inf  ;;  %s6162_s16 = scvt.f32.s32 %s9482_s30  ;;  %s6164_s28 = scvt.f32.s32 %s2311_s20 }
 0x15f   :  { %v1429_v30 = vsel %vm1428_vm3, 0.0, %v1424_v52  ;;  %v1555_v40 = vsel %vm153_vm6, %v1516_v33, -inf  ;;  %v1556_v50 = vsel %vm153_vm6, %v1517_v26, -inf  ;;  %v1564_v60 = vsel %vm153_vm6, %v1518_v7, -inf  ;;  %s9533_s21 = scalar_select %p2102_p13, %s9466_s0, 0 }
 0x160   :  { %1430 = vst.msk [vmem:[%s15063_s6 + $0xf] sm:$0x1] %vm994_vm9, %v1429_v30  ;;  %v1548_v16 = vmax.f32 %v1546_v5, %v1547_v53  ;;  %v1557_v38 = vmax.f32 %v1555_v40, %v1556_v50  ;;  %v1565_v28 = vsel %vm153_vm6, %v1519_v11, -inf  ;;  %v1573_v61 = vsel %vm153_vm6, %v1520_v59, -inf  ;;  %s9537_s13 = sadd.s32 %s6162_s16, %s9268_s12  ;;  %p5715_p7 = scmp.lt.s32.totalorder %s9466_s0, 16 }
 0x161   :  { %v1566_v52 = vmax.f32 %v1564_v60, %v1565_v28  ;;  %v1574_v30 = vsel %vm153_vm6, %v1521_v37, -inf  ;;  %v1582_v8 = vsel %vm153_vm6, %v1522_v43, -inf  ;;  %v1583_v14 = vsel %vm153_vm6, %v1523_v23, -inf  ;;  %p5720_p2 = scmp.lt.s32.totalorder %s9498_s4, 16  ;;  %p2307_p6 = scmp.gt.s32.totalorder %s9537_s13, 0 }
 0x162   :  { %v1549_v46 = vrot.slane %v1548_v16, 4  ;;  %v1558_v33 = vrot.slane %v1557_v38, 4  ;;  %v1575_v21 = vmax.f32 %v1573_v61, %v1574_v30  ;;  %v1584_v26 = vmax.f32 %v1582_v8, %v1583_v14  ;;  %s2111_s23 = scalar_select %p2110_p1, %s9498_s4, 0 }
 0x163   :  { %v1567_v56 = vrot.slane %v1566_v52, 4  ;;  %v1591_v7 = vsel %vm153_vm6, %v1524_v3, -inf  ;;  %v1592_v5 = vsel %vm153_vm6, %v1525_v39, -inf  ;;  %v1600_v59 = vsel %vm153_vm6, %v1526_v29, -inf  ;;  %s15993_s21 = smov (!%p5715_p7, %s9533_s21), 16  ;;  %p5725_p8 = scmp.lt.s32.totalorder %s9537_s13, 16 }
 0x164   :  { %v1550_v11 = vmax.f32 %v1548_v16, %v1549_v46  ;;  %v1559_v37 = vmax.f32 %v1557_v38, %v1558_v33  ;;  %v1576_v53 = vrot.slane %v1575_v21, 4  ;;  %v1585_v43 = vrot.slane %v1584_v26, 4  ;;  %v8867_v46 = vld [vmem:[%s8638_s10 + $0xc0] sm:$0xff]  ;;  %v8870_v16 = vld [vmem:[%s8638_s10 + $0xc8] sm:$0xff]  ;;  %s15995_s23 = smov (!%p5720_p2, %s2111_s23), 16  ;;  %s9752_s8 = sadd.s32 %s6164_s28, %s9268_s12 }
 0x165   :  { %v1568_v23 = vmax.f32 %v1566_v52, %v1567_v56  ;;  %v1593_v40 = vmax.f32 %v1591_v7, %v1592_v5  ;;  %v1601_v50 = vsel %vm153_vm6, %v1527_v41, -inf  ;;  %v1609_v3 = vsel %vm153_vm6, %v1528_v22, -inf  ;;  %v8878_v41 = vld [vmem:[%s8638_s10 + $0xd0] sm:$0xff]  ;;  %v8881_v22 = vld [vmem:[%s8638_s10 + $0xd8] sm:$0xff]  ;;  %v8884_v33 = vld [vmem:[%s8638_s10 + $0xe0] sm:$0xff]  ;;  %s2308_s14 = scalar_select %p2307_p6, %s9537_s13, 0 }
 0x166   :  { %v1551_v60 = vrot.slane %v1550_v11, 2  ;;  %v1560_v28 = vrot.slane %v1559_v37, 2  ;;  %v1577_v39 = vmax.f32 %v1575_v21, %v1576_v53  ;;  %v1586_v29 = vmax.f32 %v1584_v26, %v1585_v43  ;;  %15314 = vst [vmem:[#allocation15_spill] sm:$0xff] %v8878_v41  ;;  %15315 = vst [vmem:[#allocation16_spill] sm:$0xff] %v8881_v22  ;;  %v8887_v26 = vld [vmem:[%s8638_s10 + $0xe8] sm:$0xff]  ;;  %v8890_v7 = vld [vmem:[%s8638_s10 + $0xf0] sm:$0xff]  ;;  %s6166_s27 = scvt.f32.s32 %s2528_s19  ;;  %p1690_p0 = scmp.le.s32.totalorder %s15981_s9, %s15979_s18 }
 0x167   :  { %v1569_v38 = vrot.slane %v1568_v23, 2  ;;  %v1594_v61 = vrot.slane %v1593_v40, 4  ;;  %v1602_v56 = vmax.f32 %v1600_v59, %v1601_v50  ;;  %v1610_v52 = vsel %vm153_vm6, %v1529_v34, -inf  ;;  %15316 = vst [vmem:[#allocation17_spill] sm:$0xff] %v8884_v33  ;;  %15317 = vst [vmem:[#allocation18_spill] sm:$0xff] %v8887_v26  ;;  %v8893_v43 = vld [vmem:[%s8638_s10 + $0xf8] sm:$0xff]  ;;  %p1894_p5 = scmp.le.s32.totalorder %s15985_s25, %s15983_s17  ;;  %p2098_p7 = scmp.le.s32.totalorder %s15989_s1, %s15987_s15 }
 0x168   :  { %v1552_v21 = vmax.f32 %v1550_v11, %v1551_v60  ;;  %v1561_v30 = vmax.f32 %v1559_v37, %v1560_v28  ;;  %v1578_v8 = vrot.slane %v1577_v39, 2  ;;  %v1587_v14 = vrot.slane %v1586_v29, 2  ;;  %15318 = vst [vmem:[#allocation19_spill] sm:$0xff] %v8890_v7  ;;  %s15997_s14 = smov (!%p5725_p8, %s2308_s14), 16  ;;  %p2314_p12 = scmp.gt.s32.totalorder %s9752_s8, 0 }
 0x169   :  { %v1570_v5 = vmax.f32 %v1568_v23, %v1569_v38  ;;  %v1595_v34 = vmax.f32 %v1593_v40, %v1594_v61  ;;  %v1603_v59 = vrot.slane %v1602_v56, 4  ;;  %v1611_v53 = vmax.f32 %v1609_v3, %v1610_v52  ;;  %p5730_p4 = scmp.lt.s32.totalorder %s9752_s8, 16  ;;  %s2535_s29 = smul.f32 2.0, %s9431_s2 }
 0x16a   :  { %v1538_v11 = vsel %vm8692_vm11, %v8867_v46, -inf  ;;  %v1539_v37 = vsel %vm8707_vm0, %v8870_v16, -inf  ;;  %v1553_v50 = vrot.slane %v1552_v21, 1  ;;  %v1562_v60 = vrot.slane %v1561_v30, 1  ;;  %s2315_s26 = scalar_select %p2314_p12, %s9752_s8, 0 }
 0x16b   :  { %v1540_v23 = vsel %vm8692_vm11, %v8878_v41, -inf  ;;  %v1571_v40 = vrot.slane %v1570_v5, 1  ;;  %v1579_v3 = vmax.f32 %v1577_v39, %v1578_v8  ;;  %v1588_v28 = vmax.f32 %v1586_v29, %v1587_v14  ;;  %s9835_s3 = sadd.s32 %s6166_s27, %s9268_s12  ;;  %s9909_s0 = sfloor.f32 %s2535_s29 }
 0x16c   :  { %v1541_v38 = vsel %vm8707_vm0, %v8881_v22, -inf  ;;  %v1542_v61 = vsel %vm8692_vm11, %v8884_v33, -inf  ;;  %v1543_v52 = vsel %vm8707_vm0, %v8887_v26, -inf  ;;  %v1596_v29 = vrot.slane %v1595_v34, 2  ;;  %s15999_s26 = smov (!%p5730_p4, %s2315_s26), 16  ;;  %p2531_p10 = scmp.gt.s32.totalorder %s9835_s3, 0 }
 0x16d   :  { %v1604_v8 = vmax.f32 %v1602_v56, %v1603_v59  ;;  %v1612_v14 = vrot.slane %v1611_v53, 4  ;;  %v8924_v45 = vmax.f32 %v1552_v21, %v1553_v50  ;;  %v8926_v51 = vmax.f32 %v1561_v30, %v1562_v60  ;;  %p2326_p11 = scmp.le.s32.totalorder %s15999_s26, %s15997_s14  ;;  %p5739_p1 = scmp.lt.s32.totalorder %s9835_s3, 16 }
 0x16e   :  { %v1618_v57 = vsel %vm153_vm6, %v1530_v42, -inf  ;;  %v1619_v19 = vsel %vm153_vm6, %v1531_v58, -inf  ;;  %v8941_v56 = vmax.f32 %v1570_v5, %v1571_v40  ;;  %v1580_v21 = vrot.slane %v1579_v3, 1  ;;  %s9904_s7 = scalar_select %p2531_p10, %s9835_s3, 0 }
 0x16f   :  { %15319 = vst [vmem:[#allocation23_spill] sm:$0xff] %v8924_v45  ;;  %15320 = vst [vmem:[#allocation24_spill] sm:$0xff] %v8926_v51  ;;  %v1589_v30 = vrot.slane %v1588_v28, 1  ;;  %v1620_v59 = vmax.f32 %v1618_v57, %v1619_v19  ;;  %v15322_v50 = vsel %vm8692_vm11, %v8766_v17, -inf  ;;  %v15323_v60 = vsel %vm8707_vm0, %v8779_v12, -inf  ;;  %p9886_p3 = por %p2326_p11, %p1690_p0  ;;  %p9936_p13 = por %p2326_p11, %p1894_p5 }
 0x170   :  { %15321 = vst [vmem:[#allocation20_spill] sm:$0xff] %v8941_v56  ;;  %v1627_v42 = vsel %vm153_vm6, %v15322_v50, -inf  ;;  %v1628_v58 = vsel %vm153_vm6, %v15323_v60, -inf  ;;  %v15324_v5 = vsel %vm8692_vm11, %v8782_v20, -inf  ;;  %v15325_v57 = vsel %vm8707_vm0, %v8797_v13, -inf  ;;  %s6170_s16 = scvt.f32.s32 %s9909_s0  ;;  %s2631_s20 = smul.f32 3.0, %s9431_s2 }
 0x171   :  { %v1636_v19 = vsel %vm153_vm6, %v15324_v5, -inf  ;;  %v1637_v40 = vsel %vm153_vm6, %v15325_v57, -inf  ;;  %v8964_v50 = vmax.f32 %v1595_v34, %v1596_v29  ;;  %v1605_v39 = vrot.slane %v1604_v8, 2  ;;  %s2375_s30 = scalar_select %p9886_p3, 1, 0 }
 0x172   :  { %v1613_v56 = vmax.f32 %v1611_v53, %v1612_v14  ;;  %v1621_v51 = vrot.slane %v1620_v59, 4  ;;  %v1629_v60 = vmax.f32 %v1627_v42, %v1628_v58  ;;  %v1638_v45 = vmax.f32 %v1636_v19, %v1637_v40  ;;  %s2425_s28 = scalar_select %p9936_p13, 1, 0 }
 0x173   :  { %v15326_v26 = vsel %vm8692_vm11, %v8800_v18, -inf  ;;  %v15327_v33 = vsel %vm8707_vm0, %v8803_v55, -inf  ;;  %v8977_v53 = vmax.f32 %v1579_v3, %v1580_v21  ;;  %v8979_v29 = vmax.f32 %v1588_v28, %v1589_v30  ;;  %s9975_s8 = sadd.s32 %s6170_s16, %s9268_s12  ;;  %s16001_s7 = smov (!%p5739_p1, %s9904_s7), 16 }
 0x174   :  { %v1645_v5 = vsel %vm153_vm6, %v15326_v26, -inf  ;;  %v1646_v34 = vsel %vm153_vm6, %v15327_v33, -inf  ;;  %v1622_v14 = vmax.f32 %v1620_v59, %v1621_v51  ;;  %v1630_v58 = vrot.slane %v1629_v60, 4  ;;  %p2302_p6 = scmp.le.s32.totalorder %s15995_s23, %s15993_s21  ;;  %s9996_s19 = sceil.f32 %s2631_s20 }
 0x175   :  { %15328 = vst [vmem:[#allocation25_spill] sm:$0xff] %v8977_v53  ;;  %15329 = vst [vmem:[#allocation21_spill] sm:$0xff] %v8979_v29  ;;  %v1647_v42 = vmax.f32 %v1645_v5, %v1646_v34  ;;  %v1639_v26 = vrot.slane %v1638_v45, 4  ;;  %v1654_v19 = vsel %vm153_vm6, %v1538_v11, -inf  ;;  %v1655_v57 = vsel %vm153_vm6, %v1539_v37, -inf  ;;  %p10014_p8 = por %p2326_p11, %p2098_p7  ;;  %p2627_p12 = scmp.gt.s32.totalorder %s9975_s8, 0 }
 0x176   :  { %v1614_v40 = vrot.slane %v1613_v56, 2  ;;  %v1623_v33 = vrot.slane %v1622_v14, 2  ;;  %v1656_v21 = vmax.f32 %v1654_v19, %v1655_v57  ;;  %v1631_v51 = vmax.f32 %v1629_v60, %v1630_v58  ;;  %s6172_s27 = scvt.f32.s32 %s9996_s19  ;;  %p5753_p4 = scmp.lt.s32.totalorder %s9975_s8, 16 }
 0x177   :  { %v1648_v3 = vrot.slane %v1647_v42, 4  ;;  %v1640_v28 = vmax.f32 %v1638_v45, %v1639_v26  ;;  %v1663_v30 = vsel %vm153_vm6, %v1540_v23, -inf  ;;  %v1664_v59 = vsel %vm153_vm6, %v1541_v38, -inf  ;;  %s10056_s3 = sld [smem:[#allocation6 + $0x2]]  ;;  %p10103_p10 = por %p2326_p11, %p2302_p6 }
 0x178   :  { %v15330_v5 = vstv %s15983_s17  ;;  %v1606_v37 = vmax.f32 %v1604_v8, %v1605_v39  ;;  %v1657_v29 = vrot.slane %v1656_v21, 4  ;;  %v1665_v19 = vmax.f32 %v1663_v30, %v1664_v59  ;;  %s10108_s16 = sadd.s32 %s6172_s27, %s9268_s12  ;;  %s2727_s19 = smul.f32 4.0, %s9431_s2 }
 0x179   :  { %vm8995_vm2 = vcmp.ge.s32.totalorder %v6499_v1, %v15330_v5  ;;  %v1649_v34 = vmax.f32 %v1647_v42, %v1648_v3  ;;  %v15333_v60 = vmov %v15330_v5  ;;  %v1632_v23 = vrot.slane %v1631_v51, 2  ;;  %p2635_p3 = scmp.gt.s32.totalorder %s10108_s16, 0 }
 0x17a   :  { %vm9003_vm5 = vcmp.ge.s32.totalorder %v6508_v2, %v15333_v60  ;;  %v1641_v38 = vrot.slane %v1640_v28, 2  ;;  %v1672_v58 = vsel %vm153_vm6, %v1542_v61, -inf  ;;  %v1673_v26 = vsel %vm153_vm6, %v1543_v52, -inf }
 0x17b   :  { %v1615_v57 = vmax.f32 %v1613_v56, %v1614_v40  ;;  %v1650_v39 = vrot.slane %v1649_v34, 2  ;;  %v1658_v8 = vmax.f32 %v1656_v21, %v1657_v29  ;;  %v1666_v42 = vrot.slane %v1665_v19, 4  ;;  %s10217_s27 = scalar_select %p2635_p3, %s10108_s16, 0 }
 0x17c   :  { %v1624_v3 = vmax.f32 %v1622_v14, %v1623_v33  ;;  %v1633_v30 = vmax.f32 %v1631_v51, %v1632_v23  ;;  %v1674_v59 = vmax.f32 %v1672_v58, %v1673_v26  ;;  %v15336_v5 = vsel %vm8692_vm11, %v8890_v7, -inf }
 0x17d   :  { %v1681_v60 = vsel %vm153_vm6, %v15336_v5, -inf  ;;  %v1642_v61 = vmax.f32 %v1640_v28, %v1641_v38  ;;  %v1651_v52 = vmax.f32 %v1649_v34, %v1650_v39  ;;  %v1659_v56 = vrot.slane %v1658_v8, 2 }
 0x17e   :  { %v1667_v29 = vmax.f32 %v1665_v19, %v1666_v42  ;;  %v1598_v40 = vrot.slane %v8964_v50, 1  ;;  %v1607_v14 = vrot.slane %v1606_v37, 1  ;;  %v1675_v33 = vrot.slane %v1674_v59, 4 }
 0x17f   :  { %v15337_v0 = vsel %vm8707_vm0, %v8893_v43, -inf  ;;  %v1616_v51 = vrot.slane %v1615_v57, 1  ;;  %v1660_v23 = vmax.f32 %v1658_v8, %v1659_v56  ;;  %v1625_v38 = vrot.slane %v1624_v3, 1 }
 0x180   :  { %v1682_v21 = vsel %vm153_vm6, %v15337_v0, -inf  ;;  %v1668_v58 = vrot.slane %v1667_v29, 2  ;;  %v1634_v34 = vrot.slane %v1633_v30, 1  ;;  %v1676_v26 = vmax.f32 %v1674_v59, %v1675_v33 }
 0x181   :  { %v1683_v28 = vmax.f32 %v1681_v60, %v1682_v21  ;;  %v1709_v19 = vstv %s15985_s25  ;;  %v1643_v39 = vrot.slane %v1642_v61, 1  ;;  %v1652_v42 = vrot.slane %v1651_v52, 1 }
 0x182   :  { %v1669_v5 = vmax.f32 %v1667_v29, %v1668_v58  ;;  %v1661_v54 = vrot.slane %v1660_v23, 1  ;;  %v1677_v7 = vrot.slane %v1676_v26, 2  ;;  %vm1710_vm7 = vcmp.lt.s32.totalorder %v6499_v1, %v1709_v19 }
 0x183   :  { %v1684_v53 = vrot.slane %v1683_v28, 4  ;;  %vm1711_vm8 = vcmp.lt.s32.totalorder %v6508_v2, %v1709_v19  ;;  %v9036_v8 = vmax.f32 %v8964_v50, %v1598_v40  ;;  %v9038_v60 = vmax.f32 %v1606_v37, %v1607_v14  ;;  %vm9042_vm10 = vmand %vm8995_vm2, %vm1710_vm7 }
 0x184   :  { %v1670_v59 = vrot.slane %v1669_v5, 1  ;;  %v9046_v33 = vmax.f32 %v1615_v57, %v1616_v51  ;;  %v9048_v0 = vmax.f32 %v1624_v3, %v1625_v38  ;;  %v9050_v21 = vmax.f32 %v1633_v30, %v1634_v34  ;;  %vm9054_vm11 = vmand %vm9003_vm5, %vm1711_vm8 }
 0x185   :  { %15338 = vst [vmem:[#allocation26_spill] sm:$0xff] %v9036_v8  ;;  %15339 = vst [vmem:[#allocation9_spill] sm:$0xff] %v9038_v60  ;;  %v1685_v56 = vmax.f32 %v1683_v28, %v1684_v53  ;;  %v1678_v58 = vmax.f32 %v1676_v26, %v1677_v7  ;;  %v9058_v53 = vmax.f32 %v1642_v61, %v1643_v39  ;;  %v1718_v3 = vsel %vm9042_vm10, %v8655_v15, -inf }
 0x186   :  { %15342 = vst [vmem:[#allocation10_spill] sm:$0xff] %v9046_v33  ;;  %15343 = vst [vmem:[#allocation22_spill] sm:$0xff] %v9048_v0  ;;  %v9060_v11 = vmax.f32 %v1651_v52, %v1652_v42  ;;  %v9063_v14 = vmax.f32 %v1660_v23, %v1661_v54  ;;  %v1720_v7 = vsel %vm9042_vm10, %v8676_v36, -inf  ;;  %v9071_v45 = vmax.f32 %v1669_v5, %v1670_v59 }
 0x187   :  { %15344 = vst [vmem:[#allocation27_spill] sm:$0xff] %v9050_v21  ;;  %15347 = vst [vmem:[#allocation31_spill] sm:$0xff] %v9058_v53  ;;  %v1686_v37 = vrot.slane %v1685_v56, 2  ;;  %v1679_v57 = vrot.slane %v1678_v58, 1  ;;  %v1719_v61 = vsel %vm9054_vm11, %v8673_v9, -inf  ;;  %v1722_v52 = vsel %vm9042_vm10, %v8679_v24, -inf }
 0x188   :  { %15348 = vst [vmem:[#allocation28_spill] sm:$0xff] %v9060_v11  ;;  %15349 = vst [vmem:[#allocation32_spill] sm:$0xff] %v9063_v14  ;;  %v1721_v51 = vsel %vm9054_vm11, %v8682_v47, -inf  ;;  %v1723_v23 = vsel %vm9054_vm11, %v8685_v25, -inf  ;;  %v1724_v28 = vsel %vm9042_vm10, %v8688_v63, -inf  ;;  %v1725_v38 = vsel %vm9054_vm11, %v8698_v62, -inf }
 0x189   :  { %15350 = vst [vmem:[#allocation29_spill] sm:$0xff] %v9071_v45  ;;  %v1687_v30 = vmax.f32 %v1685_v56, %v1686_v37  ;;  %v1726_v26 = vsel %vm9042_vm10, %v8701_v35, -inf  ;;  %v1727_v19 = vsel %vm9054_vm11, %v8717_v44, -inf  ;;  %v1728_v39 = vsel %vm9042_vm10, %v8720_v27, -inf }
 0x18a   :  { %v9100_v42 = vmax.f32 %v1678_v58, %v1679_v57  ;;  %v1729_v5 = vsel %vm9054_vm11, %v8723_v32, -inf  ;;  %v1730_v54 = vsel %vm9042_vm10, %v8728_v31, -inf  ;;  %v1731_v59 = vsel %vm9054_vm11, %v8731_v48, -inf }
 0x18b   :  { %v1688_v34 = vrot.slane %v1687_v30, 1  ;;  %v1732_v56 = vsel %vm9042_vm10, %v8734_v6, -inf  ;;  %v1733_v58 = vsel %vm9054_vm11, %v8744_v4, -inf  ;;  %v1751_v33 = vsel %vm153_vm6, %v1719_v61, -inf }
 0x18c   :  { %15351 = vst [vmem:[#allocation33_spill] sm:$0xff] %v9100_v42  ;;  %v1750_v42 = vsel %vm153_vm6, %v1718_v3, -inf  ;;  %v1759_v57 = vsel %vm153_vm6, %v1720_v7, -inf  ;;  %v1760_v37 = vsel %vm153_vm6, %v1721_v51, -inf  ;;  %v1769_v60 = vsel %vm153_vm6, %v1723_v23, -inf }
 0x18d   :  { %v9123_v40 = vmax.f32 %v1687_v30, %v1688_v34  ;;  %v1761_v14 = vmax.f32 %v1759_v57, %v1760_v37  ;;  %v1768_v30 = vsel %vm153_vm6, %v1722_v52, -inf  ;;  %v1777_v34 = vsel %vm153_vm6, %v1724_v28, -inf }
 0x18e   :  { %v1770_v11 = vmax.f32 %v1768_v30, %v1769_v60  ;;  %v1778_v8 = vsel %vm153_vm6, %v1725_v38, -inf  ;;  %v1786_v45 = vsel %vm153_vm6, %v1726_v26, -inf  ;;  %v1787_v7 = vsel %vm153_vm6, %v1727_v19, -inf }
 0x18f   :  { %15352 = vst [vmem:[#allocation30_spill] sm:$0xff] %v9123_v40  ;;  %v1752_v40 = vmax.f32 %v1750_v42, %v1751_v33  ;;  %v1762_v61 = vrot.slane %v1761_v14, 4  ;;  %v1779_v53 = vmax.f32 %v1777_v34, %v1778_v8  ;;  %v1788_v33 = vmax.f32 %v1786_v45, %v1787_v7 }
 0x190   :  { %v1771_v51 = vrot.slane %v1770_v11, 4  ;;  %v1795_v42 = vsel %vm153_vm6, %v1728_v39, -inf  ;;  %v1796_v52 = vsel %vm153_vm6, %v1729_v5, -inf  ;;  %v1804_v26 = vsel %vm153_vm6, %v1730_v54, -inf }
 0x191   :  { %v1753_v3 = vrot.slane %v1752_v40, 4  ;;  %v1763_v60 = vmax.f32 %v1761_v14, %v1762_v61  ;;  %v1780_v37 = vrot.slane %v1779_v53, 4  ;;  %v1797_v28 = vmax.f32 %v1795_v42, %v1796_v52 }
 0x192   :  { %v1772_v57 = vmax.f32 %v1770_v11, %v1771_v51  ;;  %v1789_v38 = vrot.slane %v1788_v33, 4  ;;  %v1805_v30 = vsel %vm153_vm6, %v1731_v59, -inf  ;;  %v1814_v59 = vsel %vm153_vm6, %v1733_v58, -inf }
 0x193   :  { %v1754_v23 = vmax.f32 %v1752_v40, %v1753_v3  ;;  %v1764_v19 = vrot.slane %v1763_v60, 2  ;;  %v1781_v34 = vmax.f32 %v1779_v53, %v1780_v37  ;;  %v1798_v45 = vrot.slane %v1797_v28, 4  ;;  %v15353_v37 = vld [vmem:[#allocation17_spill] sm:$0xff] }
 0x194   :  { %v1773_v7 = vrot.slane %v1772_v57, 2  ;;  %v1790_v39 = vmax.f32 %v1788_v33, %v1789_v38  ;;  %v1806_v21 = vmax.f32 %v1804_v26, %v1805_v30  ;;  %v1813_v40 = vsel %vm153_vm6, %v1732_v56, -inf }
 0x195   :  { %v1755_v8 = vrot.slane %v1754_v23, 2  ;;  %v1765_v5 = vmax.f32 %v1763_v60, %v1764_v19  ;;  %v1782_v3 = vrot.slane %v1781_v34, 2  ;;  %v1799_v11 = vmax.f32 %v1797_v28, %v1798_v45 }
 0x196   :  { %v1774_v61 = vmax.f32 %v1772_v57, %v1773_v7  ;;  %v1791_v51 = vrot.slane %v1790_v39, 2  ;;  %v1807_v54 = vrot.slane %v1806_v21, 4  ;;  %v1743_v53 = vsel %vm9054_vm11, %v8870_v16, -inf  ;;  %v15354_v57 = vld [vmem:[#allocation18_spill] sm:$0xff] }
 0x197   :  { %v1756_v14 = vmax.f32 %v1754_v23, %v1755_v8  ;;  %v1744_v56 = vsel %vm9042_vm10, %v8878_v41, -inf  ;;  %v1766_v42 = vrot.slane %v1765_v5, 1  ;;  %v1745_v52 = vsel %vm9054_vm11, %v8881_v22, -inf  ;;  %v15355_v8 = vld [vmem:[#allocation19_spill] sm:$0xff] }
 0x198   :  { %v1783_v23 = vmax.f32 %v1781_v34, %v1782_v3  ;;  %v1800_v58 = vrot.slane %v1799_v11, 2  ;;  %v1815_v60 = vmax.f32 %v1813_v40, %v1814_v59  ;;  %v1746_v28 = vsel %vm9042_vm10, %v15353_v37, -inf }
 0x199   :  { %v1757_v33 = vrot.slane %v1756_v14, 1  ;;  %v1747_v38 = vsel %vm9054_vm11, %v15354_v57, -inf  ;;  %v1775_v26 = vrot.slane %v1774_v61, 1  ;;  %v9182_v30 = vmax.f32 %v1790_v39, %v1791_v51 }
 0x19a   :  { %v1748_v19 = vsel %vm9042_vm10, %v15355_v8, -inf  ;;  %v1808_v45 = vmax.f32 %v1806_v21, %v1807_v54  ;;  %v1816_v7 = vrot.slane %v1815_v60, 4  ;;  %v9193_v3 = vmax.f32 %v1765_v5, %v1766_v42 }
 0x19b   :  { %v9191_v40 = vmax.f32 %v1756_v14, %v1757_v33  ;;  %v15358_v39 = vsel %vm9042_vm10, %v8747_v49, -inf  ;;  %v15359_v59 = vsel %vm9054_vm11, %v8763_v10, -inf  ;;  %v1784_v8 = vrot.slane %v1783_v23, 1 }
 0x19c   :  { %15357 = vst [vmem:[#allocation11_spill] sm:$0xff] %v9193_v3  ;;  %v1822_v51 = vsel %vm153_vm6, %v15358_v39, -inf  ;;  %v1823_v0 = vsel %vm153_vm6, %v15359_v59, -inf  ;;  %v9205_v34 = vmax.f32 %v1799_v11, %v1800_v58  ;;  %v1817_v21 = vmax.f32 %v1815_v60, %v1816_v7 }
 0x19d   :  { %15356 = vst [vmem:[#allocation13_spill] sm:$0xff] %v9191_v40  ;;  %v1824_v14 = vmax.f32 %v1822_v51, %v1823_v0  ;;  %v9207_v54 = vmax.f32 %v1774_v61, %v1775_v26  ;;  %v1793_v5 = vrot.slane %v9182_v30, 1  ;;  %v15361_v33 = vsel %vm9042_vm10, %v8766_v17, -inf }
 0x19e   :  { %v1831_v42 = vsel %vm153_vm6, %v15361_v33, -inf  ;;  %v15362_v39 = vsel %vm9054_vm11, %v8779_v12, -inf  ;;  %v1809_v0 = vrot.slane %v1808_v45, 2  ;;  %v15363_v58 = vsel %vm9042_vm10, %v8782_v20, -inf }
 0x19f   :  { %15360 = vst [vmem:[#allocation14_spill] sm:$0xff] %v9207_v54  ;;  %v1832_v59 = vsel %vm153_vm6, %v15362_v39, -inf  ;;  %v1825_v11 = vrot.slane %v1824_v14, 4  ;;  %v1840_v60 = vsel %vm153_vm6, %v15363_v58, -inf  ;;  %v15364_v26 = vsel %vm9054_vm11, %v8797_v13, -inf }
 0x1a0   :  { %v1833_v61 = vmax.f32 %v1831_v42, %v1832_v59  ;;  %v1841_v7 = vsel %vm153_vm6, %v15364_v26, -inf  ;;  %v15365_v51 = vsel %vm9042_vm10, %v8800_v18, -inf  ;;  %v15366_v42 = vsel %vm9054_vm11, %v8803_v55, -inf }
 0x1a1   :  { %v1849_v33 = vsel %vm153_vm6, %v15365_v51, -inf  ;;  %v1850_v39 = vsel %vm153_vm6, %v15366_v42, -inf  ;;  %v15367_v59 = vsel %vm9042_vm10, %v8867_v46, -inf  ;;  %v9248_v54 = vmax.f32 %v1783_v23, %v1784_v8 }
 0x1a2   :  { %v1858_v58 = vsel %vm153_vm6, %v15367_v59, -inf  ;;  %v1818_v26 = vrot.slane %v1817_v21, 2  ;;  %v1826_v3 = vmax.f32 %v1824_v14, %v1825_v11  ;;  %v1834_v40 = vrot.slane %v1833_v61, 4 }
 0x1a3   :  { %15368 = vst [vmem:[#allocation12_spill] sm:$0xff] %v9248_v54  ;;  %v1802_v51 = vrot.slane %v9205_v34, 1  ;;  %v1842_v57 = vmax.f32 %v1840_v60, %v1841_v7  ;;  %v1851_v37 = vmax.f32 %v1849_v33, %v1850_v39  ;;  %v1859_v29 = vsel %vm153_vm6, %v1743_v53, -inf }
 0x1a4   :  { %v1827_v42 = vrot.slane %v1826_v3, 2  ;;  %v1835_v22 = vmax.f32 %v1833_v61, %v1834_v40  ;;  %v1860_v41 = vmax.f32 %v1858_v58, %v1859_v29  ;;  %v1867_v23 = vsel %vm153_vm6, %v1744_v56, -inf }
 0x1a5   :  { %v1843_v8 = vrot.slane %v1842_v57, 4  ;;  %v1852_v59 = vrot.slane %v1851_v37, 4  ;;  %v1868_v14 = vsel %vm153_vm6, %v1745_v52, -inf  ;;  %v1876_v11 = vsel %vm153_vm6, %v1746_v28, -inf }
 0x1a6   :  { %v15369_v54 = vstv %s15987_s15  ;;  %v1810_v7 = vmax.f32 %v1808_v45, %v1809_v0  ;;  %v1819_v53 = vmax.f32 %v1817_v21, %v1818_v26  ;;  %v1836_v33 = vrot.slane %v1835_v22, 2 }
 0x1a7   :  { %vm9260_vm0 = vcmp.ge.s32.totalorder %v6499_v1, %v15369_v54  ;;  %v1861_v40 = vrot.slane %v1860_v41, 4  ;;  %v1844_v56 = vmax.f32 %v1842_v57, %v1843_v8  ;;  %v1853_v61 = vmax.f32 %v1851_v37, %v1852_v59 }
 0x1a8   :  { %v1869_v39 = vmax.f32 %v1867_v23, %v1868_v14  ;;  %v1877_v52 = vsel %vm153_vm6, %v1747_v38, -inf  ;;  %v1828_v28 = vmax.f32 %v1826_v3, %v1827_v42  ;;  %v1837_v54 = vmax.f32 %v1835_v22, %v1836_v33 }
 0x1a9   :  { %v1862_v58 = vmax.f32 %v1860_v41, %v1861_v40  ;;  %v1878_v29 = vmax.f32 %v1876_v11, %v1877_v52  ;;  %v1845_v45 = vrot.slane %v1844_v56, 2  ;;  %v1854_v21 = vrot.slane %v1853_v61, 2 }
 0x1aa   :  { %v1870_v0 = vrot.slane %v1869_v39, 4  ;;  %v1885_v26 = vsel %vm153_vm6, %v1748_v19, -inf  ;;  %v9274_v57 = vmax.f32 %v9182_v30, %v1793_v5  ;;  %v1811_v37 = vrot.slane %v1810_v7, 1 }
 0x1ab   :  { %v1863_v23 = vrot.slane %v1862_v58, 2  ;;  %v1879_v8 = vrot.slane %v1878_v29, 4  ;;  %v1846_v38 = vmax.f32 %v1844_v56, %v1845_v45  ;;  %v1855_v22 = vmax.f32 %v1853_v61, %v1854_v21 }
 0x1ac   :  { %v1871_v41 = vmax.f32 %v1869_v39, %v1870_v0  ;;  %v15372_v3 = vsel %vm9054_vm11, %v8893_v43, -inf  ;;  %v1820_v42 = vrot.slane %v1819_v53, 1  ;;  %v1829_v14 = vrot.slane %v1828_v28, 1 }
 0x1ad   :  { %v1886_v19 = vsel %vm153_vm6, %v15372_v3, -inf  ;;  %v1864_v30 = vmax.f32 %v1862_v58, %v1863_v23  ;;  %v1880_v5 = vmax.f32 %v1878_v29, %v1879_v8  ;;  %v1838_v11 = vrot.slane %v1837_v54, 1 }
 0x1ae   :  { %v1887_v59 = vmax.f32 %v1885_v26, %v1886_v19  ;;  %v1847_v33 = vrot.slane %v1846_v38, 1  ;;  %v1872_v40 = vrot.slane %v1871_v41, 2  ;;  %v15373_v61 = vstv %s15987_s15 }
 0x1af   :  { %v1881_v52 = vrot.slane %v1880_v5, 2  ;;  %vm9288_vm4 = vcmp.ge.s32.totalorder %v6508_v2, %v15373_v61  ;;  %v1913_v39 = vstv %s15989_s1  ;;  %v1856_v45 = vrot.slane %v1855_v22, 1 }
 0x1b0   :  { %v1888_v56 = vrot.slane %v1887_v59, 4  ;;  %v1865_v21 = vrot.slane %v1864_v30, 1  ;;  %v1873_v0 = vmax.f32 %v1871_v41, %v1872_v40  ;;  %vm1914_vm3 = vcmp.lt.s32.totalorder %v6499_v1, %v1913_v39 }
 0x1b1   :  { %v9297_v58 = vmax.f32 %v9205_v34, %v1802_v51  ;;  %v1882_v29 = vmax.f32 %v1880_v5, %v1881_v52  ;;  %vm1915_vm2 = vcmp.lt.s32.totalorder %v6508_v2, %v1913_v39  ;;  %vm9302_vm5 = vmand %vm9260_vm0, %vm1914_vm3  ;;  %v9306_v8 = vmax.f32 %v1810_v7, %v1811_v37 }
 0x1b2   :  { %v1889_v26 = vmax.f32 %v1887_v59, %v1888_v56  ;;  %v9308_v3 = vmax.f32 %v1819_v53, %v1820_v42  ;;  %v9310_v41 = vmax.f32 %v1828_v28, %v1829_v14  ;;  %v1874_v19 = vrot.slane %v1873_v0, 1  ;;  %vm9314_vm7 = vmand %vm9288_vm4, %vm1915_vm2 }
 0x1b3   :  { %v9318_v51 = vmax.f32 %v1837_v54, %v1838_v11  ;;  %v9320_v60 = vmax.f32 %v1846_v38, %v1847_v33  ;;  %v1883_v5 = vrot.slane %v1882_v29, 1  ;;  %v9324_v7 = vmax.f32 %v1855_v22, %v1856_v45 }
 0x1b4   :  { %v1890_v59 = vrot.slane %v1889_v26, 2  ;;  %v9326_v53 = vmax.f32 %v1864_v30, %v1865_v21  ;;  %v1922_v28 = vsel %vm9302_vm5, %v8655_v15, -inf  ;;  %v1924_v54 = vsel %vm9302_vm5, %v8676_v36, -inf }
 0x1b5   :  { %v1923_v38 = vsel %vm9314_vm7, %v8673_v9, -inf  ;;  %v1925_v22 = vsel %vm9314_vm7, %v8682_v47, -inf  ;;  %v1926_v42 = vsel %vm9302_vm5, %v8679_v24, -inf  ;;  %v9343_v30 = vmax.f32 %v1873_v0, %v1874_v19 }
 0x1b6   :  { %v1891_v37 = vmax.f32 %v1889_v26, %v1890_v59  ;;  %v1927_v15 = vsel %vm9314_vm7, %v8685_v25, -inf  ;;  %v1928_v36 = vsel %vm9302_vm5, %v8688_v63, -inf  ;;  %v1929_v9 = vsel %vm9314_vm7, %v8698_v62, -inf }
 0x1b7   :  { %v9355_v47 = vmax.f32 %v1882_v29, %v1883_v5  ;;  %v1930_v14 = vsel %vm9302_vm5, %v8701_v35, -inf  ;;  %v1931_v25 = vsel %vm9314_vm7, %v8717_v44, -inf  ;;  %v1932_v63 = vsel %vm9302_vm5, %v8720_v27, -inf }
 0x1b8   :  { %v1892_v24 = vrot.slane %v1891_v37, 1  ;;  %v1933_v62 = vsel %vm9314_vm7, %v8723_v32, -inf  ;;  %v1934_v11 = vsel %vm9302_vm5, %v8728_v31, -inf  ;;  %v1935_v35 = vsel %vm9314_vm7, %v8731_v48, -inf }
 0x1b9   :  { %v1936_v44 = vsel %vm9302_vm5, %v8734_v6, -inf  ;;  %v1937_v27 = vsel %vm9314_vm7, %v8744_v4, -inf  ;;  %v1938_v32 = vsel %vm9302_vm5, %v8747_v49, -inf  ;;  %v1939_v31 = vsel %vm9314_vm7, %v8763_v10, -inf }
 0x1ba   :  { %v9387_v33 = vmax.f32 %v1891_v37, %v1892_v24  ;;  %v1940_v48 = vsel %vm9302_vm5, %v8766_v17, -inf  ;;  %v1941_v6 = vsel %vm9314_vm7, %v8779_v12, -inf  ;;  %v1942_v4 = vsel %vm9302_vm5, %v8782_v20, -inf }
 0x1bb   :  { %v1943_v40 = vsel %vm9314_vm7, %v8797_v13, -inf  ;;  %v1944_v52 = vsel %vm9302_vm5, %v8800_v18, -inf  ;;  %v1945_v56 = vsel %vm9314_vm7, %v8803_v55, -inf  ;;  %v1954_v50 = vsel %vm153_vm6, %v1922_v28, -inf }
 0x1bc   :  { %v1955_v39 = vsel %vm153_vm6, %v1923_v38, -inf  ;;  %v1963_v45 = vsel %vm153_vm6, %v1924_v54, -inf  ;;  %v1964_v21 = vsel %vm153_vm6, %v1925_v22, -inf  ;;  %v1972_v26 = vsel %vm153_vm6, %v1926_v42, -inf }
 0x1bd   :  { %v1956_v0 = vmax.f32 %v1954_v50, %v1955_v39  ;;  %v1965_v29 = vmax.f32 %v1963_v45, %v1964_v21  ;;  %v1973_v19 = vsel %vm153_vm6, %v1927_v15, -inf  ;;  %v1981_v59 = vsel %vm153_vm6, %v1928_v36, -inf }
 0x1be   :  { %v1974_v5 = vmax.f32 %v1972_v26, %v1973_v19  ;;  %v1982_v37 = vsel %vm153_vm6, %v1929_v9, -inf  ;;  %v1990_v24 = vsel %vm153_vm6, %v1930_v14, -inf  ;;  %v1991_v22 = vsel %vm153_vm6, %v1931_v25, -inf }
 0x1bf   :  { %v1957_v28 = vrot.slane %v1956_v0, 4  ;;  %v1966_v38 = vrot.slane %v1965_v29, 4  ;;  %v1983_v54 = vmax.f32 %v1981_v59, %v1982_v37  ;;  %v1992_v39 = vmax.f32 %v1990_v24, %v1991_v22 }
 0x1c0   :  { %v1975_v50 = vrot.slane %v1974_v5, 4  ;;  %v1999_v42 = vsel %vm153_vm6, %v1932_v63, -inf  ;;  %v2000_v15 = vsel %vm153_vm6, %v1933_v62, -inf  ;;  %v2008_v19 = vsel %vm153_vm6, %v1934_v11, -inf }
 0x1c1   :  { %v1958_v45 = vmax.f32 %v1956_v0, %v1957_v28  ;;  %v1967_v36 = vmax.f32 %v1965_v29, %v1966_v38  ;;  %v1984_v21 = vrot.slane %v1983_v54, 4  ;;  %v2001_v9 = vmax.f32 %v1999_v42, %v2000_v15 }
 0x1c2   :  { %v1976_v26 = vmax.f32 %v1974_v5, %v1975_v50  ;;  %v1993_v14 = vrot.slane %v1992_v39, 4  ;;  %v2009_v61 = vsel %vm153_vm6, %v1935_v35, -inf  ;;  %v2017_v5 = vsel %vm153_vm6, %v1936_v44, -inf }
 0x1c3   :  { %v1959_v25 = vrot.slane %v1958_v45, 2  ;;  %v1968_v59 = vrot.slane %v1967_v36, 2  ;;  %v1985_v37 = vmax.f32 %v1983_v54, %v1984_v21  ;;  %v2002_v63 = vrot.slane %v2001_v9, 4 }
 0x1c4   :  { %v1977_v62 = vrot.slane %v1976_v26, 2  ;;  %v1994_v0 = vmax.f32 %v1992_v39, %v1993_v14  ;;  %v2010_v29 = vmax.f32 %v2008_v19, %v2009_v61  ;;  %v2018_v54 = vsel %vm153_vm6, %v1937_v27, -inf  ;;  %v15380_v39 = vld [vmem:[#allocation15_spill] sm:$0xff]  ;;  %v15382_v14 = vld [vmem:[#allocation17_spill] sm:$0xff]  ;;  %v15383_v19 = vld [vmem:[#allocation18_spill] sm:$0xff] }
 0x1c5   :  { %v1960_v11 = vmax.f32 %v1958_v45, %v1959_v25  ;;  %v1969_v24 = vmax.f32 %v1967_v36, %v1968_v59  ;;  %v1986_v35 = vrot.slane %v1985_v37, 2  ;;  %v2003_v28 = vmax.f32 %v2001_v9, %v2002_v63  ;;  %v15381_v9 = vld [vmem:[#allocation16_spill] sm:$0xff]  ;;  %v15384_v63 = vld [vmem:[#allocation19_spill] sm:$0xff] }
 0x1c6   :  { %v1978_v38 = vmax.f32 %v1976_v26, %v1977_v62  ;;  %v1995_v22 = vrot.slane %v1994_v0, 2  ;;  %v2011_v50 = vrot.slane %v2010_v29, 4  ;;  %v1947_v61 = vsel %vm9314_vm7, %v8870_v16, -inf }
 0x1c7   :  { %v1948_v44 = vsel %vm9302_vm5, %v15380_v39, -inf  ;;  %v1961_v42 = vrot.slane %v1960_v11, 1  ;;  %v1970_v15 = vrot.slane %v1969_v24, 1  ;;  %v1987_v36 = vmax.f32 %v1985_v37, %v1986_v35 }
 0x1c8   :  { %v1979_v45 = vrot.slane %v1978_v38, 1  ;;  %v2004_v21 = vrot.slane %v2003_v28, 2  ;;  %v2019_v27 = vmax.f32 %v2017_v5, %v2018_v54  ;;  %v1949_v26 = vsel %vm9314_vm7, %v15381_v9, -inf }
 0x1c9   :  { %v1950_v16 = vsel %vm9302_vm5, %v15382_v14, -inf  ;;  %v1951_v25 = vsel %vm9314_vm7, %v15383_v19, -inf  ;;  %v1996_v59 = vmax.f32 %v1994_v0, %v1995_v22  ;;  %v1952_v37 = vsel %vm9302_vm5, %v15384_v63, -inf }
 0x1ca   :  { %v1953_v62 = vsel %vm9314_vm7, %v8893_v43, -inf  ;;  %v2012_v5 = vmax.f32 %v2010_v29, %v2011_v50  ;;  %v2020_v35 = vrot.slane %v2019_v27, 4  ;;  %v9468_v54 = vmax.f32 %v1960_v11, %v1961_v42 }
 0x1cb   :  { %v9470_v39 = vmax.f32 %v1969_v24, %v1970_v15  ;;  %v2026_v0 = vsel %vm153_vm6, %v1938_v32, -inf  ;;  %v2027_v29 = vsel %vm153_vm6, %v1939_v31, -inf  ;;  %v9484_v22 = vmax.f32 %v1978_v38, %v1979_v45 }
 0x1cc   :  { %v1988_v11 = vrot.slane %v1987_v36, 1  ;;  %v2005_v24 = vmax.f32 %v2003_v28, %v2004_v21  ;;  %v2028_v50 = vmax.f32 %v2026_v0, %v2027_v29  ;;  %v1997_v42 = vrot.slane %v1996_v59, 1 }
 0x1cd   :  { %v2021_v15 = vmax.f32 %v2019_v27, %v2020_v35  ;;  %v2035_v49 = vsel %vm153_vm6, %v1940_v48, -inf  ;;  %v2036_v10 = vsel %vm153_vm6, %v1941_v6, -inf  ;;  %v2013_v32 = vrot.slane %v2012_v5, 2 }
 0x1ce   :  { %v2029_v31 = vrot.slane %v2028_v50, 4  ;;  %v2037_v28 = vmax.f32 %v2035_v49, %v2036_v10  ;;  %v2044_v17 = vsel %vm153_vm6, %v1942_v4, -inf  ;;  %v2045_v12 = vsel %vm153_vm6, %v1943_v40, -inf }
 0x1cf   :  { %v2053_v48 = vsel %vm153_vm6, %v1944_v52, -inf  ;;  %v2054_v20 = vsel %vm153_vm6, %v1945_v56, -inf  ;;  %v15385_v6 = vsel %vm9302_vm5, %v8867_v46, -inf  ;;  %v9526_v4 = vmax.f32 %v1987_v36, %v1988_v11 }
 0x1d0   :  { %v2062_v13 = vsel %vm153_vm6, %v15385_v6, -inf  ;;  %v2006_v40 = vrot.slane %v2005_v24, 1  ;;  %v2030_v38 = vmax.f32 %v2028_v50, %v2029_v31  ;;  %v2038_v18 = vrot.slane %v2037_v28, 4 }
 0x1d1   :  { %v2022_v52 = vrot.slane %v2021_v15, 2  ;;  %v2046_v45 = vmax.f32 %v2044_v17, %v2045_v12  ;;  %v2055_v55 = vmax.f32 %v2053_v48, %v2054_v20  ;;  %v2063_v56 = vsel %vm153_vm6, %v1947_v61, -inf }
 0x1d2   :  { %v2031_v46 = vrot.slane %v2030_v38, 2  ;;  %v2039_v21 = vmax.f32 %v2037_v28, %v2038_v18  ;;  %v2064_v36 = vmax.f32 %v2062_v13, %v2063_v56  ;;  %v2071_v27 = vsel %vm153_vm6, %v1948_v44, -inf }
 0x1d3   :  { %v2047_v9 = vrot.slane %v2046_v45, 4  ;;  %v2056_v14 = vrot.slane %v2055_v55, 4  ;;  %v2072_v19 = vsel %vm153_vm6, %v1949_v26, -inf  ;;  %v2080_v35 = vsel %vm153_vm6, %v1950_v16, -inf }
 0x1d4   :  { %v9543_v61 = vmax.f32 %v1996_v59, %v1997_v42  ;;  %v2014_v0 = vmax.f32 %v2012_v5, %v2013_v32  ;;  %v2040_v29 = vrot.slane %v2039_v21, 2  ;;  %v2065_v11 = vrot.slane %v2064_v36, 4 }
 0x1d5   :  { %v2048_v44 = vmax.f32 %v2046_v45, %v2047_v9  ;;  %v2057_v50 = vmax.f32 %v2055_v55, %v2056_v14  ;;  %v2073_v49 = vmax.f32 %v2071_v27, %v2072_v19  ;;  %v2081_v10 = vsel %vm153_vm6, %v1951_v25, -inf }
 0x1d6   :  { %v2023_v26 = vmax.f32 %v2021_v15, %v2022_v52  ;;  %v2032_v16 = vmax.f32 %v2030_v38, %v2031_v46  ;;  %v2066_v31 = vmax.f32 %v2064_v36, %v2065_v11  ;;  %v2082_v59 = vmax.f32 %v2080_v35, %v2081_v10 }
 0x1d7   :  { %v2049_v5 = vrot.slane %v2048_v44, 2  ;;  %v2058_v42 = vrot.slane %v2057_v50, 2  ;;  %v2074_v32 = vrot.slane %v2073_v49, 4  ;;  %v2089_v28 = vsel %vm153_vm6, %v1952_v37, -inf }
 0x1d8   :  { %v9560_v25 = vmax.f32 %v2005_v24, %v2006_v40  ;;  %v2041_v15 = vmax.f32 %v2039_v21, %v2040_v29  ;;  %v2067_v17 = vrot.slane %v2066_v31, 2  ;;  %v2083_v12 = vrot.slane %v2082_v59, 4 }
 0x1d9   :  { %v2050_v48 = vmax.f32 %v2048_v44, %v2049_v5  ;;  %v2059_v20 = vmax.f32 %v2057_v50, %v2058_v42  ;;  %v2075_v23 = vmax.f32 %v2073_v49, %v2074_v32  ;;  %v2090_v63 = vsel %vm153_vm6, %v1953_v62, -inf  ;;  %v6278_v5 = vld [vmem:[%s8638_s10] sm:$0xff]  ;;  %v9715_v32 = vld [vmem:[%s8638_s10 + $0xb8] sm:$0xff] }
 0x1da   :  { %15386 = vst [vmem:[#allocation34_spill] sm:$0xff] %v9560_v25  ;;  %v2015_v37 = vrot.slane %v2014_v0, 1  ;;  %v2068_v24 = vmax.f32 %v2066_v31, %v2067_v17  ;;  %v2084_v6 = vmax.f32 %v2082_v59, %v2083_v12  ;;  %v2091_v13 = vmax.f32 %v2089_v28, %v2090_v63  ;;  %v6280_v12 = vld [vmem:[%s8638_s10 + $0x10] sm:$0xff] }
 0x1db   :  { %v2024_v40 = vrot.slane %v2023_v26, 1  ;;  %v2033_v38 = vrot.slane %v2032_v16, 1  ;;  %v2076_v18 = vrot.slane %v2075_v23, 2  ;;  %v2114_v52 = vstv %s15993_s21 }
 0x1dc   :  { %v2042_v45 = vrot.slane %v2041_v15, 1  ;;  %v2051_v55 = vrot.slane %v2050_v48, 1  ;;  %v2085_v34 = vrot.slane %v2084_v6, 2  ;;  %v2092_v56 = vrot.slane %v2091_v13, 4 }
 0x1dd   :  { %v2060_v43 = vrot.slane %v2059_v20, 1  ;;  %v2069_v46 = vrot.slane %v2068_v24, 1  ;;  %v2077_v62 = vmax.f32 %v2075_v23, %v2076_v18  ;;  %vm2115_vm8 = vcmp.ge.s32.totalorder %v6499_v1, %v2114_v52  ;;  %v6285_v18 = vld [vmem:[%s8638_s10 + $0x38] sm:$0xff] }
 0x1de   :  { %v2086_v21 = vmax.f32 %v2084_v6, %v2085_v34  ;;  %v2093_v36 = vmax.f32 %v2091_v13, %v2092_v56  ;;  %vm9578_vm10 = vcmp.ge.s32.totalorder %v6508_v2, %v2114_v52  ;;  %v2117_v9 = vstv %s15995_s23  ;;  %v6283_v6 = vld [vmem:[%s8638_s10 + $0x28] sm:$0xff]  ;;  %s11426_s23 = sld [smem:[#allocation5 + $0x2]] }
 0x1df   :  { %v9587_v14 = vmax.f32 %v2014_v0, %v2015_v37  ;;  %v2078_v19 = vrot.slane %v2077_v62, 1  ;;  %vm2118_vm11 = vcmp.lt.s32.totalorder %v6499_v1, %v2117_v9  ;;  %vm2119_vm0 = vcmp.lt.s32.totalorder %v6508_v2, %v2117_v9  ;;  %v6282_v37 = vld [vmem:[%s8638_s10 + $0x18] sm:$0xff]  ;;  %v6287_v34 = vld [vmem:[%s8638_s10 + $0x48] sm:$0xff] }
 0x1e0   :  { %v9591_v35 = vmax.f32 %v2023_v26, %v2024_v40  ;;  %v9593_v29 = vmax.f32 %v2032_v16, %v2033_v38  ;;  %v2087_v11 = vrot.slane %v2086_v21, 1  ;;  %v2094_v44 = vrot.slane %v2093_v36, 2  ;;  %vm9595_vm4 = vmand %vm2115_vm8, %vm2118_vm11  ;;  %v6284_v40 = vld [vmem:[%s8638_s10 + $0x30] sm:$0xff]  ;;  %v6291_v9 = vld [vmem:[%s8638_s10 + $0x68] sm:$0xff] }
 0x1e1   :  { %15389 = vst [vmem:[#allocation35_spill] sm:$0xff] %v9587_v14  ;;  %v9599_v0 = vmax.f32 %v2041_v15, %v2042_v45  ;;  %v9601_v49 = vmax.f32 %v2050_v48, %v2051_v55  ;;  %v9603_v10 = vmax.f32 %v2059_v20, %v2060_v43  ;;  %v9605_v26 = vmax.f32 %v2068_v24, %v2069_v46  ;;  %vm9609_vm3 = vmand %vm9578_vm10, %vm2119_vm0  ;;  %v6279_v15 = vld [vmem:[%s8638_s10 + $0x8] sm:$0xff]  ;;  %v6281_v20 = vld [vmem:[%s8638_s10 + $0x20] sm:$0xff] }
 0x1e2   :  { %15390 = vst [vmem:[#allocation36_spill] sm:$0xff] %v9591_v35  ;;  %v9613_v31 = vmax.f32 %v2077_v62, %v2078_v19  ;;  %v2095_v59 = vmax.f32 %v2093_v36, %v2094_v44  ;;  %v2126_v42 = vsel %vm9595_vm4, %v6278_v5, -inf  ;;  %v9619_v28 = vmax.f32 %v2086_v21, %v2087_v11  ;;  %v6286_v45 = vld [vmem:[%s8638_s10 + $0x40] sm:$0xff]  ;;  %v6288_v43 = vld [vmem:[%s8638_s10 + $0x50] sm:$0xff]  ;;  %v6289_v62 = vld [vmem:[%s8638_s10 + $0x58] sm:$0xff] }
 0x1e3   :  { %15393 = vst [vmem:[#allocation15_spill] sm:$0xff] %v9603_v10  ;;  %15394 = vst [vmem:[#allocation16_spill] sm:$0xff] %v9605_v26  ;;  %v2127_v17 = vsel %vm9609_vm3, %v6279_v15, -inf  ;;  %v2128_v48 = vsel %vm9595_vm4, %v6280_v12, -inf  ;;  %v2130_v23 = vsel %vm9595_vm4, %v6281_v20, -inf  ;;  %v2129_v24 = vsel %vm9609_vm3, %v6282_v37, -inf }
 0x1e4   :  { %15397 = vst [vmem:[#allocation17_spill] sm:$0xff] %v9613_v31  ;;  %15398 = vst [vmem:[#allocation18_spill] sm:$0xff] %v9619_v28  ;;  %v2096_v63 = vrot.slane %v2095_v59, 1  ;;  %v2131_v13 = vsel %vm9609_vm3, %v6283_v6, -inf  ;;  %v2132_v38 = vsel %vm9595_vm4, %v6284_v40, -inf  ;;  %v2133_v52 = vsel %vm9609_vm3, %v6285_v18, -inf }
 0x1e5   :  { %v2134_v55 = vsel %vm9595_vm4, %v6286_v45, -inf  ;;  %v2135_v56 = vsel %vm9609_vm3, %v6287_v34, -inf  ;;  %v2136_v46 = vsel %vm9595_vm4, %v6288_v43, -inf  ;;  %v2137_v21 = vsel %vm9609_vm3, %v6289_v62, -inf  ;;  %v6290_v36 = vld [vmem:[%s8638_s10 + $0x60] sm:$0xff]  ;;  %v6292_v11 = vld [vmem:[%s8638_s10 + $0x70] sm:$0xff] }
 0x1e6   :  { %v2138_v27 = vsel %vm9595_vm4, %v6290_v36, -inf  ;;  %v2139_v19 = vsel %vm9609_vm3, %v6291_v9, -inf  ;;  %v2140_v44 = vsel %vm9595_vm4, %v6292_v11, -inf  ;;  %v9663_v5 = vmax.f32 %v2095_v59, %v2096_v63  ;;  %v9666_v15 = vld [vmem:[%s8638_s10 + $0x78] sm:$0xff]  ;;  %v9672_v20 = vld [vmem:[%s8638_s10 + $0x80] sm:$0xff]  ;;  %v9678_v6 = vld [vmem:[%s8638_s10 + $0x88] sm:$0xff] }
 0x1e7   :  { %v9684_v63 = vld [vmem:[%s8638_s10 + $0x90] sm:$0xff]  ;;  %v9690_v18 = vld [vmem:[%s8638_s10 + $0x98] sm:$0xff]  ;;  %v9696_v34 = vld [vmem:[%s8638_s10 + $0xa0] sm:$0xff]  ;;  %v2158_v45 = vsel %vm153_vm6, %v2126_v42, -inf  ;;  %v2159_v12 = vsel %vm153_vm6, %v2127_v17, -inf  ;;  %v2168_v40 = vsel %vm153_vm6, %v2129_v24, -inf }
 0x1e8   :  { %15399 = vst [vmem:[#allocation19_spill] sm:$0xff] %v9663_v5  ;;  %v9702_v62 = vld [vmem:[%s8638_s10 + $0xa8] sm:$0xff]  ;;  %v9709_v9 = vld [vmem:[%s8638_s10 + $0xb0] sm:$0xff]  ;;  %v9721_v43 = vld [vmem:[%s8638_s10 + $0xc0] sm:$0xff]  ;;  %v2167_v5 = vsel %vm153_vm6, %v2128_v48, -inf  ;;  %v2160_v28 = vmax.f32 %v2158_v45, %v2159_v12  ;;  %v2176_v31 = vsel %vm153_vm6, %v2130_v23, -inf }
 0x1e9   :  { %v9727_v36 = vld [vmem:[%s8638_s10 + $0xc8] sm:$0xff]  ;;  %v9733_v37 = vld [vmem:[%s8638_s10 + $0xd0] sm:$0xff]  ;;  %v2177_v35 = vsel %vm153_vm6, %v2131_v13, -inf  ;;  %v2169_v59 = vmax.f32 %v2167_v5, %v2168_v40  ;;  %v2185_v14 = vsel %vm153_vm6, %v2132_v38, -inf  ;;  %v2186_v11 = vsel %vm153_vm6, %v2133_v52, -inf }
 0x1ea   :  { %v2178_v26 = vmax.f32 %v2176_v31, %v2177_v35  ;;  %v2161_v42 = vrot.slane %v2160_v28, 4  ;;  %v2187_v10 = vmax.f32 %v2185_v14, %v2186_v11  ;;  %v2194_v17 = vsel %vm153_vm6, %v2134_v55, -inf }
 0x1eb   :  { %v2195_v48 = vsel %vm153_vm6, %v2135_v56, -inf  ;;  %v2170_v12 = vrot.slane %v2169_v59, 4  ;;  %v2203_v23 = vsel %vm153_vm6, %v2136_v46, -inf  ;;  %v2204_v5 = vsel %vm153_vm6, %v2137_v21, -inf }
 0x1ec   :  { %v2179_v24 = vrot.slane %v2178_v26, 4  ;;  %v2196_v45 = vmax.f32 %v2194_v17, %v2195_v48  ;;  %v2162_v13 = vmax.f32 %v2160_v28, %v2161_v42  ;;  %v2188_v25 = vrot.slane %v2187_v10, 4 }
 0x1ed   :  { %v2212_v35 = vsel %vm153_vm6, %v2138_v27, -inf  ;;  %v2171_v31 = vmax.f32 %v2169_v59, %v2170_v12  ;;  %v2205_v52 = vmax.f32 %v2203_v23, %v2204_v5  ;;  %v2213_v40 = vsel %vm153_vm6, %v2139_v19, -inf }
 0x1ee   :  { %v2180_v14 = vmax.f32 %v2178_v26, %v2179_v24  ;;  %v2197_v38 = vrot.slane %v2196_v45, 4  ;;  %v2163_v55 = vrot.slane %v2162_v13, 2  ;;  %v2189_v56 = vmax.f32 %v2187_v10, %v2188_v25 }
 0x1ef   :  { %v2221_v46 = vsel %vm153_vm6, %v2140_v44, -inf  ;;  %v2172_v28 = vrot.slane %v2171_v31, 2  ;;  %v2206_v21 = vrot.slane %v2205_v52, 4  ;;  %v2214_v26 = vmax.f32 %v2212_v35, %v2213_v40 }
 0x1f0   :  { %v2181_v11 = vrot.slane %v2180_v14, 2  ;;  %v2198_v42 = vmax.f32 %v2196_v45, %v2197_v38  ;;  %v2164_v27 = vmax.f32 %v2162_v13, %v2163_v55  ;;  %v2190_v59 = vrot.slane %v2189_v56, 2 }
 0x1f1   :  { %v15400_v25 = vsel %vm9609_vm3, %v9666_v15, -inf  ;;  %v2173_v19 = vmax.f32 %v2171_v31, %v2172_v28  ;;  %v2207_v48 = vmax.f32 %v2205_v52, %v2206_v21  ;;  %v2215_v45 = vrot.slane %v2214_v26, 4  ;;  %v9766_v15 = vld [vmem:[%s8638_s10 + $0xd8] sm:$0xff]  ;;  %v9781_v52 = vld [vmem:[%s8638_s10 + $0xe8] sm:$0xff] }
 0x1f2   :  { %v2222_v10 = vsel %vm153_vm6, %v15400_v25, -inf  ;;  %v2182_v44 = vmax.f32 %v2180_v14, %v2181_v11  ;;  %v2199_v17 = vrot.slane %v2198_v42, 2  ;;  %v2165_v12 = vrot.slane %v2164_v27, 1  ;;  %v9775_v14 = vld [vmem:[%s8638_s10 + $0xe0] sm:$0xff]  ;;  %v9793_v11 = vld [vmem:[%s8638_s10 + $0xf8] sm:$0xff] }
 0x1f3   :  { %v2191_v24 = vmax.f32 %v2189_v56, %v2190_v59  ;;  %v2223_v23 = vmax.f32 %v2221_v46, %v2222_v10  ;;  %v2153_v13 = vsel %vm9609_vm3, %v9766_v15, -inf  ;;  %v2174_v5 = vrot.slane %v2173_v19, 1  ;;  %v9787_v46 = vld [vmem:[%s8638_s10 + $0xf0] sm:$0xff]  ;;  %s9807_s10 = sceil.f32 %s2535_s29 }
 0x1f4   :  { %v2183_v35 = vrot.slane %v2182_v44, 1  ;;  %v2200_v31 = vmax.f32 %v2198_v42, %v2199_v17  ;;  %v2154_v38 = vsel %vm9595_vm4, %v9775_v14, -inf  ;;  %v2155_v55 = vsel %vm9609_vm3, %v9781_v52, -inf  ;;  %s6168_s24 = scvt.f32.s32 %s9807_s10  ;;  %s10045_s10 = sld [smem:[#allocation4 + $0x2]] }
 0x1f5   :  { %v2216_v56 = vmax.f32 %v2214_v26, %v2215_v45  ;;  %v2224_v40 = vrot.slane %v2223_v23, 4  ;;  %v2156_v28 = vsel %vm9595_vm4, %v9787_v46, -inf  ;;  %v2157_v42 = vsel %vm9609_vm3, %v9793_v11, -inf }
 0x1f6   :  { %v9798_v21 = vmax.f32 %v2164_v27, %v2165_v12  ;;  %v2208_v59 = vrot.slane %v2207_v48, 2  ;;  %v2192_v26 = vrot.slane %v2191_v24, 1  ;;  %v2201_v25 = vrot.slane %v2200_v31, 1  ;;  %s9891_s11 = sadd.s32 %s6168_s24, %s9268_s12 }
 0x1f7   :  { %v2225_v10 = vmax.f32 %v2223_v23, %v2224_v40  ;;  %v15401_v17 = vsel %vm9595_vm4, %v9672_v20, -inf  ;;  %v9809_v14 = vmax.f32 %v2173_v19, %v2174_v5  ;;  %v9811_v27 = vmax.f32 %v2182_v44, %v2183_v35  ;;  %p2539_p9 = scmp.gt.s32.totalorder %s9891_s11, 0  ;;  %p5744_p2 = scmp.lt.s32.totalorder %s9891_s11, 16 }
 0x1f8   :  { %v2230_v45 = vsel %vm153_vm6, %v15401_v17, -inf  ;;  %v15402_v12 = vsel %vm9609_vm3, %v9678_v6, -inf  ;;  %v15403_v20 = vsel %vm9595_vm4, %v9684_v63, -inf  ;;  %v2217_v19 = vrot.slane %v2216_v56, 2  ;;  %s2628_s24 = scalar_select %p2627_p12, %s9975_s8, 0 }
 0x1f9   :  { %v2231_v23 = vsel %vm153_vm6, %v15402_v12, -inf  ;;  %v2239_v40 = vsel %vm153_vm6, %v15403_v20, -inf  ;;  %v2226_v44 = vrot.slane %v2225_v10, 2  ;;  %v15404_v6 = vsel %vm9609_vm3, %v9690_v18, -inf  ;;  %s9959_s13 = scalar_select %p2539_p9, %s9891_s11, 0 }
 0x1fa   :  { %v2232_v5 = vmax.f32 %v2230_v45, %v2231_v23  ;;  %v2240_v35 = vsel %vm153_vm6, %v15404_v6, -inf  ;;  %v2209_v63 = vmax.f32 %v2207_v48, %v2208_v59  ;;  %v15405_v12 = vsel %vm9595_vm4, %v9696_v34, -inf  ;;  %s2474_s11 = scalar_select %p10014_p8, 1, 0 }
 0x1fb   :  { %v2241_v17 = vmax.f32 %v2239_v40, %v2240_v35  ;;  %v2248_v20 = vsel %vm153_vm6, %v15405_v12, -inf  ;;  %v15406_v45 = vsel %vm9609_vm3, %v9702_v62, -inf  ;;  %v9850_v18 = vmax.f32 %v2191_v24, %v2192_v26  ;;  %s16003_s13 = smov (!%p5744_p2, %s9959_s13), 16  ;;  %s16005_s24 = smov (!%p5753_p4, %s2628_s24), 16 }
 0x1fc   :  { %v2249_v23 = vsel %vm153_vm6, %v15406_v45, -inf  ;;  %v9852_v6 = vmax.f32 %v2200_v31, %v2201_v25  ;;  %v2233_v48 = vrot.slane %v2232_v5, 4  ;;  %v15407_v62 = vsel %vm9595_vm4, %v9709_v9, -inf  ;;  %p2551_p11 = scmp.le.s32.totalorder %s16003_s13, %s16001_s7  ;;  %p5758_p2 = scmp.lt.s32.totalorder %s10108_s16, 16 }
 0x1fd   :  { %v2250_v34 = vmax.f32 %v2248_v20, %v2249_v23  ;;  %v2242_v59 = vrot.slane %v2241_v17, 4  ;;  %v2257_v40 = vsel %vm153_vm6, %v15407_v62, -inf  ;;  %v15408_v24 = vsel %vm9609_vm3, %v9715_v32, -inf }
 0x1fe   :  { %v2258_v31 = vsel %vm153_vm6, %v15408_v24, -inf  ;;  %v15409_v26 = vsel %vm9595_vm4, %v9721_v43, -inf  ;;  %v2218_v35 = vmax.f32 %v2216_v56, %v2217_v19  ;;  %v2227_v12 = vmax.f32 %v2225_v10, %v2226_v44  ;;  %p10172_p9 = por %p2551_p11, %p1690_p0  ;;  %p10203_p1 = por %p2551_p11, %p1894_p5 }
 0x1ff   :  { %v2266_v25 = vsel %vm153_vm6, %v15409_v26, -inf  ;;  %v2234_v20 = vmax.f32 %v2232_v5, %v2233_v48  ;;  %v2251_v45 = vrot.slane %v2250_v34, 4  ;;  %v2243_v9 = vmax.f32 %v2241_v17, %v2242_v59  ;;  %p10254_p13 = por %p2551_p11, %p2098_p7  ;;  %p10299_p4 = por %p2551_p11, %p2302_p6 }
 0x200   :  { %v2259_v23 = vmax.f32 %v2257_v40, %v2258_v31  ;;  %v15410_v32 = vsel %vm9609_vm3, %v9727_v36, -inf  ;;  %v15411_v43 = vsel %vm9595_vm4, %v9733_v37, -inf  ;;  %v2210_v36 = vrot.slane %v2209_v63, 1  ;;  %s2568_s2 = scalar_select %p10172_p9, 1, 0 }
 0x201   :  { %v2267_v62 = vsel %vm153_vm6, %v15410_v32, -inf  ;;  %v2275_v24 = vsel %vm153_vm6, %v15411_v43, -inf  ;;  %v2235_v56 = vrot.slane %v2234_v20, 2  ;;  %v2252_v10 = vmax.f32 %v2250_v34, %v2251_v45  ;;  %s2602_s29 = scalar_select %p10254_p13, 1, 0 }
 0x202   :  { %v2268_v19 = vmax.f32 %v2266_v25, %v2267_v62  ;;  %v2244_v44 = vrot.slane %v2243_v9, 2  ;;  %v2260_v37 = vrot.slane %v2259_v23, 4  ;;  %v2276_v5 = vsel %vm153_vm6, %v2153_v13, -inf  ;;  %v15437_v25 = vld [vmem:[#allocation9_spill] sm:$0xff]  ;;  %s16007_s27 = smov (!%p5758_p2, %s10217_s27), 16 }
 0x203   :  { %v2284_v17 = vsel %vm153_vm6, %v2154_v38, -inf  ;;  %v2236_v48 = vmax.f32 %v2234_v20, %v2235_v56  ;;  %v2253_v34 = vrot.slane %v2252_v10, 2  ;;  %v2277_v40 = vmax.f32 %v2275_v24, %v2276_v5  ;;  %p2647_p11 = scmp.le.s32.totalorder %s16007_s27, %s16005_s24 }
 0x204   :  { %v2269_v59 = vrot.slane %v2268_v19, 4  ;;  %v2219_v15 = vrot.slane %v2218_v35, 1  ;;  %v2228_v13 = vrot.slane %v2227_v12, 1  ;;  %v2261_v38 = vmax.f32 %v2259_v23, %v2260_v37 }
 0x205   :  { %v2285_v31 = vsel %vm153_vm6, %v2155_v55, -inf  ;;  %v15413_v26 = vstv %s15997_s14  ;;  %v2245_v20 = vmax.f32 %v2243_v9, %v2244_v44  ;;  %v2278_v23 = vrot.slane %v2277_v40, 4  ;;  %s10144_s14 = sfloor.f32 %s2631_s20  ;;  %s2822_s20 = ssub.s32 %s10056_s3, %s10045_s10 }
 0x206   :  { %vm9919_vm2 = vcmp.ge.s32.totalorder %v6499_v1, %v15413_v26  ;;  %v2270_v45 = vmax.f32 %v2268_v19, %v2269_v59  ;;  %v2293_v52 = vsel %vm153_vm6, %v2156_v28, -inf  ;;  %v2237_v55 = vrot.slane %v2236_v48, 1 }
 0x207   :  { %v2262_v9 = vrot.slane %v2261_v38, 2  ;;  %v2286_v32 = vmax.f32 %v2284_v17, %v2285_v31  ;;  %v2294_v50 = vsel %vm153_vm6, %v2157_v42, -inf  ;;  %v15417_v62 = vmov %v15413_v26  ;;  %v15424_v26 = vld [vmem:[#allocation20_spill] sm:$0xff] }
 0x208   :  { %vm9948_vm5 = vcmp.ge.s32.totalorder %v6508_v2, %v15417_v62  ;;  %v9954_v28 = vmax.f32 %v2209_v63, %v2210_v36  ;;  %v2254_v43 = vmax.f32 %v2252_v10, %v2253_v34  ;;  %v2271_v24 = vrot.slane %v2270_v45, 2 }
 0x209   :  { %v2279_v56 = vmax.f32 %v2277_v40, %v2278_v23  ;;  %v9963_v16 = vmax.f32 %v2218_v35, %v2219_v15  ;;  %v2263_v11 = vmax.f32 %v2261_v38, %v2262_v9  ;;  %v2287_v42 = vrot.slane %v2286_v32, 4  ;;  %v15420_v40 = vld [vmem:[#allocation23_spill] sm:$0xff]  ;;  %v15421_v15 = vld [vmem:[#allocation24_spill] sm:$0xff] }
 0x20a   :  { %v2295_v19 = vmax.f32 %v2293_v52, %v2294_v50  ;;  %v9966_v44 = vmax.f32 %v2227_v12, %v2228_v13  ;;  %v2272_v63 = vmax.f32 %v2270_v45, %v2271_v24  ;;  %v2321_v10 = vstv %s15999_s26  ;;  %v15429_v50 = vld [vmem:[#allocation27_spill] sm:$0xff]  ;;  %s2523_s26 = scalar_select %p10103_p10, 1, 0 }
 0x20b   :  { %v2280_v36 = vrot.slane %v2279_v56, 2  ;;  %v9971_v37 = vmax.f32 %v2236_v48, %v2237_v55  ;;  %v2246_v35 = vrot.slane %v2245_v20, 1  ;;  %v2288_v5 = vmax.f32 %v2286_v32, %v2287_v42  ;;  %v15427_v55 = vld [vmem:[#allocation25_spill] sm:$0xff]  ;;  %v15428_v32 = vld [vmem:[#allocation22_spill] sm:$0xff]  ;;  %p10411_p10 = por %p2647_p11, %p1690_p0 }
 0x20c   :  { %v2296_v17 = vrot.slane %v2295_v19, 4  ;;  %v2255_v12 = vrot.slane %v2254_v43, 1  ;;  %v2264_v34 = vrot.slane %v2263_v11, 1  ;;  %v2347_v48 = vsel %vm955_vm12, %v15421_v15, %v15420_v40  ;;  %v15431_v42 = vld [vmem:[#allocation21_spill] sm:$0xff] }
 0x20d   :  { %v2281_v59 = vmax.f32 %v2279_v56, %v2280_v36  ;;  %v2273_v13 = vrot.slane %v2272_v63, 1  ;;  %v2289_v38 = vrot.slane %v2288_v5, 2  ;;  %vm9988_vm7 = vcmp.lt.s32.totalorder %v6499_v1, %v2321_v10  ;;  %v15432_v36 = vld [vmem:[#allocation31_spill] sm:$0xff] }
 0x20e   :  { %v2348_v45 = vsel %vm957_vm13, %v15424_v26, %v2347_v48  ;;  %v2297_v23 = vmax.f32 %v2295_v19, %v2296_v17  ;;  %vm9999_vm8 = vcmp.lt.s32.totalorder %v6508_v2, %v2321_v10  ;;  %v2354_v62 = vsel %vm955_vm12, %v15429_v50, %v15428_v32  ;;  %vm10036_vm10 = vmand %vm9919_vm2, %vm9988_vm7  ;;  %v15446_v32 = vld [vmem:[#allocation11_spill] sm:$0xff] }
 0x20f   :  { %v2349_v9 = vsel %vm959_vm14, %v15427_v55, %v2348_v45  ;;  %v2282_v24 = vrot.slane %v2281_v59, 1  ;;  %v2290_v56 = vmax.f32 %v2288_v5, %v2289_v38  ;;  %v2355_v10 = vsel %vm957_vm13, %v15432_v36, %v2354_v62  ;;  %v15435_v5 = vld [vmem:[#allocation26_spill] sm:$0xff]  ;;  %v15436_v38 = vld [vmem:[#allocation28_spill] sm:$0xff]  ;;  %vm10062_vm0 = vmand %vm9948_vm5, %vm9999_vm8 }
 0x210   :  { %v2350_v19 = vsel %vm961_vm15, %v15431_v42, %v2349_v9  ;;  %v10028_v17 = vmax.f32 %v2245_v20, %v2246_v35  ;;  %v10030_v40 = vmax.f32 %v2254_v43, %v2255_v12  ;;  %v2356_v26 = vsel %vm959_vm14, %v15436_v38, %v2355_v10  ;;  %v15439_v12 = vld [vmem:[#allocation32_spill] sm:$0xff]  ;;  %v15445_v9 = vld [vmem:[#allocation13_spill] sm:$0xff]  ;;  %v15449_v36 = vld [vmem:[#allocation30_spill] sm:$0xff] }
 0x211   :  { %v2351_v48 = vsel %vm963_vm1, %v15435_v5, %v2350_v19  ;;  %v10047_v20 = vmax.f32 %v2263_v11, %v2264_v34  ;;  %v10049_v43 = vmax.f32 %v2272_v63, %v2273_v13  ;;  %vm15438_vm11 = vcmask 1046534   ;;  %v15442_v63 = vld [vmem:[#allocation10_spill] sm:$0xff]  ;;  %v15444_v13 = vld [vmem:[#allocation29_spill] sm:$0xff] }
 0x212   :  { %v2352_v35 = vsel %vm15438_vm11, %v15437_v25, %v2351_v48  ;;  %v2357_v31 = vsel %vm961_vm15, %v15439_v12, %v2356_v26  ;;  %v2298_v45 = vrot.slane %v2297_v23, 2  ;;  %vm15443_vm4 = vcmask 1047559   ;;  %v15447_v62 = vld [vmem:[#allocation33_spill] sm:$0xff]  ;;  %vm15448_vm3 = vmmov %vm15438_vm11  ;;  %v15451_v48 = vld [vmem:[#allocation14_spill] sm:$0xff] }
 0x213   :  { %v10068_v34 = vsel %vm15443_vm4, %v15442_v63, %v2352_v35  ;;  %v2358_v55 = vsel %vm963_vm1, %v15444_v13, %v2357_v31  ;;  %v2397_v50 = vsel %vm955_vm12, %v15446_v32, %v15445_v9  ;;  %v10078_v46 = vmax.f32 %v2281_v59, %v2282_v24  ;;  %vm15450_vm2 = vmmov %vm15443_vm4  ;;  %v15453_v25 = vld [vmem:[#allocation12_spill] sm:$0xff]  ;;  %v15460_v9 = vld [vmem:[#allocation34_spill] sm:$0xff] }
 0x214   :  { %v2291_v52 = vrot.slane %v2290_v56, 1  ;;  %v2359_v42 = vsel %vm15448_vm3, %v15447_v62, %v2358_v55  ;;  %v2363_v19 = vsel %vm10036_vm10, %v10068_v34, -inf  ;;  %v2398_v59 = vsel %vm957_vm13, %v15451_v48, %v2397_v50  ;;  %vm15454_vm5 = vmmov %vm15448_vm3  ;;  %v15461_v50 = vld [vmem:[#allocation15_spill] sm:$0xff] }
 0x215   :  { %v10089_v10 = vsel %vm15450_vm2, %v15449_v36, %v2359_v42  ;;  %v2365_v5 = vsel %vm153_vm6, %v2363_v19, -inf  ;;  %v2404_v24 = vsel %vm955_vm12, %v9318_v51, %v9310_v41  ;;  %v10116_v26 = vstv %s2375_s30  ;;  %vm15455_vm7 = vmmov %vm15450_vm2  ;;  %s6174_s30 = scvt.f32.s32 %s10144_s14  ;;  %v15462_v42 = vld [vmem:[#allocation35_spill] sm:$0xff]  ;;  %v15463_v36 = vld [vmem:[#allocation16_spill] sm:$0xff] }
 0x216   :  { %v2364_v38 = vsel %vm10062_vm0, %v10089_v10, -inf  ;;  %v2399_v41 = vsel %vm959_vm14, %v15453_v25, %v2398_v59  ;;  %v2405_v51 = vsel %vm957_vm13, %v9320_v60, %v2404_v24  ;;  %v10124_v35 = vmax.f32 %v2297_v23, %v2298_v45  ;;  %vm15456_vm8 = vmmov %vm15448_vm3  ;;  %v15464_v59 = vld [vmem:[#allocation36_spill] sm:$0xff] }
 0x217   :  { %v2366_v12 = vsel %vm153_vm6, %v2364_v38, -inf  ;;  %v2400_v31 = vsel %vm961_vm15, %v9274_v57, %v2399_v41  ;;  %v2406_v63 = vsel %vm959_vm14, %v9324_v7, %v2405_v51  ;;  %v10135_v60 = vmax.f32 %v2290_v56, %v2291_v52  ;;  %vm15458_vm4 = vmmov %vm15450_vm2  ;;  %v15465_v38 = vld [vmem:[#allocation17_spill] sm:$0xff]  ;;  %s10241_s14 = sadd.s32 %s6174_s30, %s9268_s12 }
 0x218   :  { %v2367_v13 = vmax.f32 %v2365_v5, %v2366_v12  ;;  %v2401_v23 = vsel %vm963_vm1, %v9297_v58, %v2400_v31  ;;  %v2407_v45 = vsel %vm961_vm15, %v9326_v53, %v2406_v63  ;;  %v2446_v58 = vsel %vm955_vm12, %v9470_v39, %v9468_v54  ;;  %v15466_v31 = vld [vmem:[#allocation18_spill] sm:$0xff]  ;;  %s2585_s30 = scalar_select %p10203_p1, 1, 0 }
 0x219   :  { %v2402_v57 = vsel %vm15454_vm5, %v9306_v8, %v2401_v23  ;;  %v2408_v7 = vsel %vm963_vm1, %v9343_v30, %v2407_v45  ;;  %v2453_v53 = vsel %vm955_vm12, %v9599_v0, %v9593_v29  ;;  %v2447_v54 = vsel %vm957_vm13, %v9484_v22, %v2446_v58  ;;  %vm15467_vm5 = vmmov %vm15448_vm3  ;;  %p2723_p12 = scmp.gt.s32.totalorder %s10241_s14, 0  ;;  %p5767_p8 = scmp.lt.s32.totalorder %s10241_s14, 16 }
 0x21a   :  { %v2368_v56 = vrot.slane %v2367_v13, 4  ;;  %v10160_v8 = vsel %vm15455_vm7, %v9308_v3, %v2402_v57  ;;  %v2409_v30 = vsel %vm15456_vm8, %v9355_v47, %v2408_v7  ;;  %vm2377_vm11 = vcmp.eq.s32.totalorder %v10116_v26, 1  ;;  %vm15470_vm7 = vmmov %vm15450_vm2 }
 0x21b   :  { %v10179_v39 = vsel %vm15458_vm4, %v9387_v33, %v2409_v30  ;;  %v2413_v3 = vsel %vm10036_vm10, %v10160_v8, -inf  ;;  %v2448_v47 = vsel %vm959_vm14, %v9526_v4, %v2447_v54  ;;  %v2454_v22 = vsel %vm957_vm13, %v9601_v49, %v2453_v53  ;;  %vm15472_vm8 = vmmov %vm15448_vm3 }
 0x21c   :  { %v2369_v29 = vmax.f32 %v2367_v13, %v2368_v56  ;;  %v2414_v33 = vsel %vm10062_vm0, %v10179_v39, -inf  ;;  %v2415_v0 = vsel %vm153_vm6, %v2413_v3, -inf  ;;  %v2449_v55 = vsel %vm961_vm15, %v9543_v61, %v2448_v47  ;;  %vm15473_vm4 = vmmov %vm15450_vm2 }
 0x21d   :  { %v2300_v4 = vrot.slane %v10124_v35, 1  ;;  %v2416_v49 = vsel %vm153_vm6, %v2414_v33, -inf  ;;  %v2450_v32 = vsel %vm963_vm1, %v15460_v9, %v2449_v55  ;;  %v2455_v52 = vsel %vm959_vm14, %v15461_v50, %v2454_v22 }
 0x21e   :  { %v2370_v61 = vrot.slane %v2369_v29, 2  ;;  %v2417_v62 = vmax.f32 %v2415_v0, %v2416_v49  ;;  %v2451_v19 = vsel %vm15448_vm3, %v15462_v42, %v2450_v32  ;;  %v2456_v5 = vsel %vm961_vm15, %v15463_v36, %v2455_v52 }
 0x21f   :  { %v10228_v48 = vstv %s2425_s28  ;;  %v10232_v24 = vsel %vm15450_vm2, %v15464_v59, %v2451_v19  ;;  %v2457_v25 = vsel %vm963_vm1, %v15465_v38, %v2456_v5  ;;  %v2495_v41 = vsel %vm955_vm12, %v9809_v14, %v9798_v21  ;;  %s10258_s28 = sceil.f32 %s2727_s19  ;;  %v15469_v21 = vld [vmem:[#allocation19_spill] sm:$0xff]  ;;  %s10281_s19 = sadd.s32 1, %s2822_s20 }
 0x220   :  { %v2371_v51 = vmax.f32 %v2369_v29, %v2370_v61  ;;  %v2418_v12 = vrot.slane %v2417_v62, 4  ;;  %v2458_v63 = vsel %vm15467_vm5, %v15466_v31, %v2457_v25  ;;  %v2462_v13 = vsel %vm10036_vm10, %v10232_v24, -inf  ;;  %s6176_s20 = scvt.f32.s32 %s10258_s28  ;;  %p2824_p3 = scmp.gt.s32.totalorder %s10281_s19, 1 }
 0x221   :  { %v10262_v14 = vsel %vm15470_vm7, %v15469_v21, %v2458_v63  ;;  %v2464_v23 = vsel %vm153_vm6, %v2462_v13, -inf  ;;  %v2496_v45 = vsel %vm957_vm13, %v9811_v27, %v2495_v41  ;;  %v2502_v57 = vsel %vm955_vm12, %v10028_v17, %v9971_v37  ;;  %vm15479_vm7 = vmmov %vm15473_vm4 }
 0x222   :  { %v2372_v7 = vrot.slane %v2371_v51, 1  ;;  %v2419_v58 = vmax.f32 %v2417_v62, %v2418_v12  ;;  %v2463_v53 = vsel %vm10062_vm0, %v10262_v14, -inf  ;;  %v2497_v56 = vsel %vm959_vm14, %v9850_v18, %v2496_v45  ;;  %s10341_s16 = sadd.s32 %s6176_s20, %s9268_s12  ;;  %s16011_s19 = smov (!%p2824_p3, %s10281_s19), 1 }
 0x223   :  { %v2465_v27 = vsel %vm153_vm6, %v2463_v53, -inf  ;;  %v10287_v37 = vstv %s2474_s11  ;;  %v2498_v17 = vsel %vm961_vm15, %v9852_v6, %v2497_v56  ;;  %v2503_v30 = vsel %vm957_vm13, %v10030_v40, %v2502_v57  ;;  %s2724_s11 = scalar_select %p2723_p12, %s10241_s14, 0 }
 0x224   :  { %v2373_v18 = vmax.f32 %v2371_v51, %v2372_v7  ;;  %v2420_v54 = vrot.slane %v2419_v58, 2  ;;  %v2466_v3 = vmax.f32 %v2464_v23, %v2465_v27  ;;  %v2499_v47 = vsel %vm963_vm1, %v9954_v28, %v2498_v17  ;;  %s2619_s12 = scalar_select %p10299_p4, 1, 0 }
 0x225   :  { %v2301_v6 = vmax.f32 %v10124_v35, %v2300_v4  ;;  %v2500_v40 = vsel %vm15472_vm8, %v9963_v16, %v2499_v47  ;;  %v2504_v22 = vsel %vm959_vm14, %v10047_v20, %v2503_v30  ;;  %v2543_v29 = vstv %s16001_s7  ;;  %p2731_p2 = scmp.gt.s32.totalorder %s10341_s16, 0  ;;  %s16009_s11 = smov (!%p5767_p8, %s2724_s11), 16 }
 0x226   :  { %v2378_v33 = vsel %vm2377_vm11, 0.0, %v2373_v18  ;;  %v2421_v28 = vmax.f32 %v2419_v58, %v2420_v54  ;;  %v2467_v0 = vrot.slane %v2466_v3, 4  ;;  %v10323_v35 = vsel %vm15473_vm4, %v9966_v44, %v2500_v40  ;;  %p5772_p9 = scmp.lt.s32.totalorder %s10341_s16, 16  ;;  %p10450_p12 = por %p2647_p11, %p1894_p5 }
 0x227   :  { %5735 = vst.msk [vmem:[%s15063_s6 + $0x10] sm:$0x1] %vm994_vm9, %v2378_v33  ;;  %vm2427_vm3 = vcmp.eq.s32.totalorder %v10228_v48, 1  ;;  %vm2476_vm11 = vcmp.eq.s32.totalorder %v10287_v37, 1  ;;  %v2505_v16 = vsel %vm961_vm15, %v10049_v43, %v2504_v22  ;;  %v2511_v44 = vsel %vm10036_vm10, %v10323_v35, -inf  ;;  %vm15476_vm10 = vmmov %vm15467_vm5  ;;  %s2732_s22 = scalar_select %p2731_p2, %s10341_s16, 0 }
 0x228   :  { %v2422_v20 = vrot.slane %v2421_v28, 1  ;;  %v2468_v26 = vmax.f32 %v2466_v3, %v2467_v0  ;;  %v2506_v55 = vsel %vm963_vm1, %v10078_v46, %v2505_v16  ;;  %vm10346_vm2 = vcmp.ge.s32.totalorder %v6499_v1, %v2543_v29  ;;  %s2664_s14 = scalar_select %p10411_p10, 1, 0 }
 0x229   :  { %v2507_v15 = vsel %vm15476_vm10, %v10135_v60, %v2506_v55  ;;  %v2513_v43 = vsel %vm153_vm6, %v2511_v44, -inf  ;;  %vm10357_vm5 = vcmp.ge.s32.totalorder %v6508_v2, %v2543_v29  ;;  %v2546_v46 = vstv %s16003_s13  ;;  %p10473_p8 = por %p2647_p11, %p2098_p7  ;;  %s2830_s28 = scvt.s32.f32 %s16011_s19 }
 0x22a   :  { %v2423_v9 = vmax.f32 %v2421_v28, %v2422_v20  ;;  %v2469_v32 = vrot.slane %v2468_v26, 2  ;;  %v10365_v50 = vsel %vm15479_vm7, %v2301_v6, %v2507_v15  ;;  %vm2547_vm8 = vcmp.lt.s32.totalorder %v6499_v1, %v2546_v46  ;;  %s16013_s22 = smov (!%p5772_p9, %s2732_s22), 16  ;;  %p10521_p3 = por %p2647_p11, %p2302_p6 }
 0x22b   :  { %v2512_v60 = vsel %vm10062_vm0, %v10365_v50, -inf  ;;  %v10375_v52 = vstv %s2523_s26  ;;  %vm2548_vm4 = vcmp.lt.s32.totalorder %v6508_v2, %v2546_v46  ;;  %vm10380_vm10 = vmand %vm10346_vm2, %vm2547_vm8  ;;  %v10387_v62 = vstv %s2568_s2  ;;  %s2681_s19 = scalar_select %p10450_p12, 1, 0 }
 0x22c   :  { %v2428_v11 = vsel %vm2427_vm3, 0.0, %v2423_v9  ;;  %v2470_v42 = vmax.f32 %v2468_v26, %v2469_v32  ;;  %v2514_v19 = vsel %vm153_vm6, %v2512_v60, -inf  ;;  %vm10398_vm0 = vmand %vm10357_vm5, %vm2548_vm4  ;;  %v2556_v5 = vsel %vm10380_vm10, %v10068_v34, -inf  ;;  %p2743_p1 = scmp.le.s32.totalorder %s16013_s22, %s16009_s11  ;;  %s10502_s7 = smul.f32 0.25, %s2830_s28 }
 0x22d   :  { %5736 = vst.msk [vmem:[%s15063_s6 + $0x11] sm:$0x1] %vm994_vm9, %v2428_v11  ;;  %v2515_v48 = vmax.f32 %v2513_v43, %v2514_v19  ;;  %v2557_v59 = vsel %vm10398_vm0, %v10089_v10, -inf  ;;  %v2558_v38 = vsel %vm153_vm6, %v2556_v5, -inf  ;;  %v2573_v25 = vsel %vm10380_vm10, %v10160_v8, -inf }
 0x22e   :  { %v2471_v41 = vrot.slane %v2470_v42, 1  ;;  %v2559_v51 = vsel %vm153_vm6, %v2557_v59, -inf  ;;  %v2574_v12 = vsel %vm10398_vm0, %v10179_v39, -inf  ;;  %v2575_v31 = vsel %vm153_vm6, %v2573_v25, -inf  ;;  %s2698_s16 = scalar_select %p10473_p8, 1, 0 }
 0x22f   :  { %v2516_v63 = vrot.slane %v2515_v48, 4  ;;  %v2560_v13 = vmax.f32 %v2558_v38, %v2559_v51  ;;  %v2576_v21 = vsel %vm153_vm6, %v2574_v12, -inf  ;;  %v2590_v23 = vsel %vm10380_vm10, %v10232_v24, -inf  ;;  %p10537_p13 = por %p2743_p1, %p1690_p0  ;;  %s2872_s4 = smul.f32 0.0, %s10502_s7 }
 0x230   :  { %v2472_v45 = vmax.f32 %v2470_v42, %v2471_v41  ;;  %vm2525_vm3 = vcmp.eq.s32.totalorder %v10375_v52, 1  ;;  %v2577_v57 = vmax.f32 %v2575_v31, %v2576_v21  ;;  %v2591_v7 = vsel %vm10398_vm0, %v10262_v14, -inf  ;;  %p10559_p0 = por %p2743_p1, %p1894_p5  ;;  %p10595_p5 = por %p2743_p1, %p2098_p7 }
 0x231   :  { %v2592_v58 = vsel %vm153_vm6, %v2590_v23, -inf  ;;  %v2517_v53 = vmax.f32 %v2515_v48, %v2516_v63  ;;  %v2561_v56 = vrot.slane %v2560_v13, 4  ;;  %v10464_v27 = vstv %s2585_s30  ;;  %s2715_s9 = scalar_select %p10521_p3, 1, 0 }
 0x232   :  { %v2593_v17 = vsel %vm153_vm6, %v2591_v7, -inf  ;;  %v2477_v30 = vsel %vm2476_vm11, 0.0, %v2472_v45  ;;  %vm2570_vm2 = vcmp.eq.s32.totalorder %v10387_v62, 1  ;;  %v2578_v18 = vrot.slane %v2577_v57, 4  ;;  %s2777_s15 = scalar_select %p10559_p0, 1, 0 }
 0x233   :  { %v2594_v54 = vmax.f32 %v2592_v58, %v2593_v17  ;;  %5737 = vst.msk [vmem:[%s15063_s6 + $0x12] sm:$0x1] %vm994_vm9, %v2477_v30  ;;  %v2518_v3 = vrot.slane %v2517_v53, 2  ;;  %v2562_v47 = vmax.f32 %v2560_v13, %v2561_v56  ;;  %v2607_v37 = vsel %vm10380_vm10, %v10323_v35, -inf  ;;  %s2880_s8 = sceil.f32 %s10502_s7  ;;  %p10787_p9 = por %p2743_p1, %p2302_p6 }
 0x234   :  { %v2608_v6 = vsel %vm10398_vm0, %v10365_v50, -inf  ;;  %v2579_v40 = vmax.f32 %v2577_v57, %v2578_v18  ;;  %v2609_v29 = vsel %vm153_vm6, %v2607_v37, -inf  ;;  %vm2587_vm11 = vcmp.eq.s32.totalorder %v10464_v27, 1  ;;  %s2794_s13 = scalar_select %p10595_p5, 1, 0 }
 0x235   :  { %v2595_v22 = vrot.slane %v2594_v54, 4  ;;  %v2610_v33 = vsel %vm153_vm6, %v2608_v6, -inf  ;;  %v2519_v28 = vmax.f32 %v2517_v53, %v2518_v3  ;;  %v2563_v0 = vrot.slane %v2562_v47, 2  ;;  %s6180_s25 = scvt.f32.s32 %s2880_s8 }
 0x236   :  { %v2611_v16 = vmax.f32 %v2609_v29, %v2610_v33  ;;  %v2580_v44 = vrot.slane %v2579_v40, 2  ;;  %v2603_v26 = vstv %s2602_s29  ;;  %v2639_v55 = vstv %s16005_s24  ;;  %s10599_s29 = sfloor.f32 %s2872_s4 }
 0x237   :  { %v2596_v20 = vmax.f32 %v2594_v54, %v2595_v22  ;;  %v2520_v4 = vrot.slane %v2519_v28, 1  ;;  %v2564_v15 = vmax.f32 %v2562_v47, %v2563_v0  ;;  %vm10511_vm5 = vcmp.ge.s32.totalorder %v6499_v1, %v2639_v55  ;;  %s6178_s30 = scvt.f32.s32 %s10599_s29  ;;  %s3083_s29 = smul.f32 2.0, %s10502_s7 }
 0x238   :  { %v2612_v43 = vrot.slane %v2611_v16, 4  ;;  %v2581_v46 = vmax.f32 %v2579_v40, %v2580_v44  ;;  %vm10526_vm7 = vcmp.ge.s32.totalorder %v6508_v2, %v2639_v55  ;;  %v2642_v60 = vstv %s16007_s27  ;;  %s2760_s27 = scalar_select %p10537_p13, 1, 0 }
 0x239   :  { %v2597_v9 = vrot.slane %v2596_v20, 2  ;;  %v2521_v61 = vmax.f32 %v2519_v28, %v2520_v4  ;;  %v2565_v11 = vrot.slane %v2564_v15, 1  ;;  %vm2643_vm8 = vcmp.lt.s32.totalorder %v6499_v1, %v2642_v60  ;;  %s10664_s2 = sadd.s32 %s6178_s30, %s10045_s10  ;;  %s10672_s1 = sadd.s32 %s6180_s25, %s10045_s10 }
 0x23a   :  { %v2613_v42 = vmax.f32 %v2611_v16, %v2612_v43  ;;  %v2582_v19 = vrot.slane %v2581_v46, 1  ;;  %v2620_v5 = vstv %s2619_s12  ;;  %vm2644_vm4 = vcmp.lt.s32.totalorder %v6508_v2, %v2642_v60  ;;  %vm10549_vm10 = vmand %vm10511_vm5, %vm2643_vm8  ;;  %p2876_p7 = scmp.gt.s32.totalorder %s10664_s2, 0  ;;  %s10685_s28 = sceil.f32 %s3083_s29 }
 0x23b   :  { %v2598_v36 = vmax.f32 %v2596_v20, %v2597_v9  ;;  %v2526_v59 = vsel %vm2525_vm3, 0.0, %v2521_v61  ;;  %v2566_v38 = vmax.f32 %v2564_v15, %v2565_v11  ;;  %vm10567_vm0 = vmand %vm10526_vm7, %vm2644_vm4  ;;  %v2652_v51 = vsel %vm10549_vm10, %v10068_v34, -inf  ;;  %p2883_p4 = scmp.gt.s32.totalorder %s10672_s1, 0  ;;  %s6184_s8 = scvt.f32.s32 %s10685_s28 }
 0x23c   :  { %v2614_v25 = vrot.slane %v2613_v42, 2  ;;  %5738 = vst.msk [vmem:[%s15063_s6 + $0x13] sm:$0x1] %vm994_vm9, %v2526_v59  ;;  %v2583_v52 = vmax.f32 %v2581_v46, %v2582_v19  ;;  %v2653_v31 = vsel %vm10567_vm0, %v10089_v10, -inf  ;;  %v2654_v63 = vsel %vm153_vm6, %v2652_v51, -inf  ;;  %s10722_s0 = scalar_select %p2876_p7, %s10664_s2, 0 }
 0x23d   :  { %v2599_v12 = vrot.slane %v2598_v36, 1  ;;  %v2571_v13 = vsel %vm2570_vm2, 0.0, %v2566_v38  ;;  %vm2604_vm3 = vcmp.eq.s32.totalorder %v2603_v26, 1  ;;  %v2655_v23 = vsel %vm153_vm6, %v2653_v31, -inf  ;;  %p5787_p11 = scmp.lt.s32.totalorder %s10664_s2, 16  ;;  %p5792_p2 = scmp.lt.s32.totalorder %s10672_s1, 16 }
 0x23e   :  { %v2615_v21 = vmax.f32 %v2613_v42, %v2614_v25  ;;  %5749 = vst.msk [vmem:[%s15063_s6 + $0x14] sm:$0x1] %vm994_vm9, %v2571_v13  ;;  %v2588_v62 = vsel %vm2587_vm11, 0.0, %v2583_v52  ;;  %v2656_v57 = vmax.f32 %v2654_v63, %v2655_v23  ;;  %v2669_v7 = vsel %vm10549_vm10, %v10160_v8, -inf  ;;  %s10745_s17 = scalar_select %p2883_p4, %s10672_s1, 0 }
 0x23f   :  { %v2600_v45 = vmax.f32 %v2598_v36, %v2599_v12  ;;  %5750 = vst.msk [vmem:[%s15063_s6 + $0x15] sm:$0x1] %vm994_vm9, %v2588_v62  ;;  %vm2621_vm2 = vcmp.eq.s32.totalorder %v2620_v5, 1  ;;  %v2670_v53 = vsel %vm10567_vm0, %v10179_v39, -inf  ;;  %v2671_v56 = vsel %vm153_vm6, %v2669_v7, -inf  ;;  %s10751_s25 = sadd.s32 %s6184_s8, %s10045_s10  ;;  %s16015_s0 = smov (!%p5787_p11, %s10722_s0), 16 }
 0x240   :  { %v2616_v58 = vrot.slane %v2615_v21, 1  ;;  %v2657_v17 = vrot.slane %v2656_v57, 4  ;;  %v10625_v30 = vstv %s2664_s14  ;;  %v2672_v18 = vsel %vm153_vm6, %v2670_v53, -inf  ;;  %s10643_s14 = sld [smem:[#allocation3 + $0x2]]  ;;  %p3087_p12 = scmp.gt.s32.totalorder %s10751_s25, 0 }
 0x241   :  { %v2605_v27 = vsel %vm2604_vm3, 0.0, %v2600_v45  ;;  %v2673_v3 = vmax.f32 %v2671_v56, %v2672_v18  ;;  %v2686_v47 = vsel %vm10549_vm10, %v10232_v24, -inf  ;;  %v2687_v37 = vsel %vm10567_vm0, %v10262_v14, -inf  ;;  %s16017_s17 = smov (!%p5792_p2, %s10745_s17), 16  ;;  %p5802_p8 = scmp.lt.s32.totalorder %s10751_s25, 16 }
 0x242   :  { %5751 = vst.msk [vmem:[%s15063_s6 + $0x16] sm:$0x1] %vm994_vm9, %v2605_v27  ;;  %v2617_v54 = vmax.f32 %v2615_v21, %v2616_v58  ;;  %v2658_v6 = vmax.f32 %v2656_v57, %v2657_v17  ;;  %v2688_v40 = vsel %vm153_vm6, %v2686_v47, -inf  ;;  %v2689_v22 = vsel %vm153_vm6, %v2687_v37, -inf  ;;  %s2811_s24 = scalar_select %p10787_p9, 1, 0 }
 0x243   :  { %v2674_v33 = vrot.slane %v2673_v3, 4  ;;  %v10649_v28 = vstv %s2681_s19  ;;  %v2690_v0 = vmax.f32 %v2688_v40, %v2689_v22  ;;  %vm2666_vm11 = vcmp.eq.s32.totalorder %v10625_v30, 1  ;;  %s3076_s19 = sfloor.f32 %s10502_s7  ;;  %s11112_s30 = sfloor.f32 %s3083_s29 }
 0x244   :  { %v2622_v29 = vsel %vm2621_vm2, 0.0, %v2617_v54  ;;  %v2659_v16 = vrot.slane %v2658_v6, 2  ;;  %v2703_v44 = vsel %vm10549_vm10, %v10323_v35, -inf  ;;  %v2704_v20 = vsel %vm10567_vm0, %v10365_v50, -inf  ;;  %s6182_s20 = scvt.f32.s32 %s3076_s19  ;;  %s6186_s29 = scvt.f32.s32 %s11112_s30 }
 0x245   :  { %5752 = vst.msk [vmem:[%s15063_s6 + $0x17] sm:$0x1] %vm994_vm9, %v2622_v29  ;;  %v2675_v26 = vmax.f32 %v2673_v3, %v2674_v33  ;;  %v2691_v55 = vrot.slane %v2690_v0, 4  ;;  %v2705_v4 = vsel %vm153_vm6, %v2703_v44, -inf  ;;  %v2706_v15 = vsel %vm153_vm6, %v2704_v20, -inf  ;;  %s3287_s12 = smul.f32 3.0, %s10502_s7 }
 0x246   :  { %v2660_v43 = vmax.f32 %v2658_v6, %v2659_v16  ;;  %vm2683_vm5 = vcmp.eq.s32.totalorder %v10649_v28, 1  ;;  %v2707_v49 = vmax.f32 %v2705_v4, %v2706_v15  ;;  %v2735_v46 = vstv %s16009_s11  ;;  %s11161_s4 = sadd.s32 %s6186_s29, %s10045_s10 }
 0x247   :  { %v2676_v9 = vrot.slane %v2675_v26, 2  ;;  %v2692_v32 = vmax.f32 %v2690_v0, %v2691_v55  ;;  %v2699_v60 = vstv %s2698_s16  ;;  %vm10678_vm7 = vcmp.ge.s32.totalorder %v6499_v1, %v2735_v46  ;;  %s5786_s16 = sshll.u32 %s10643_s14, 8  ;;  %p3283_p1 = scmp.gt.s32.totalorder %s11161_s4, 0 }
 0x248   :  { %v2661_v11 = vrot.slane %v2660_v43, 1  ;;  %v2708_v42 = vrot.slane %v2707_v49, 4  ;;  %vm10688_vm8 = vcmp.ge.s32.totalorder %v6508_v2, %v2735_v46  ;;  %v2738_v36 = vstv %s16013_s22  ;;  %s10760_s19 = scalar_lea.vmem %s15062_s5, %s5786_s16  ;;  %p5807_p3 = scmp.lt.s32.totalorder %s11161_s4, 16 }
 0x249   :  { %v2677_v5 = vmax.f32 %v2675_v26, %v2676_v9  ;;  %v2693_v48 = vrot.slane %v2692_v32, 2  ;;  %vm2739_vm4 = vcmp.lt.s32.totalorder %v6499_v1, %v2738_v36  ;;  %vm2740_vm10 = vcmp.lt.s32.totalorder %v6508_v2, %v2738_v36  ;;  %s3088_s22 = scalar_select %p3087_p12, %s10751_s25, 0  ;;  %v10872_v12 = vld [vmem:[%s10760_s19 + $0x20] sm:$0xff]  ;;  %v10996_v46 = vld [vmem:[%s10760_s19 + $0xb8] sm:$0xff] }
 0x24a   :  { %v2662_v59 = vmax.f32 %v2660_v43, %v2661_v11  ;;  %vm2700_vm0 = vcmp.eq.s32.totalorder %v2699_v60, 1  ;;  %v2709_v38 = vmax.f32 %v2707_v49, %v2708_v42  ;;  %v2716_v25 = vstv %s2715_s9  ;;  %vm10701_vm3 = vmand %vm10678_vm7, %vm2739_vm4  ;;  %s10732_s9 = sadd.s32 %s6182_s20, %s10045_s10  ;;  %s11332_s26 = sceil.f32 %s3287_s12 }
 0x24b   :  { %v2678_v51 = vrot.slane %v2677_v5, 1  ;;  %v2694_v52 = vmax.f32 %v2692_v32, %v2693_v48  ;;  %vm10709_vm2 = vmand %vm10688_vm8, %vm2740_vm10  ;;  %v2748_v31 = vsel %vm10701_vm3, %v10068_v34, -inf  ;;  %v2765_v63 = vsel %vm10701_vm3, %v10160_v8, -inf  ;;  %p3079_p10 = scmp.gt.s32.totalorder %s10732_s9, 0  ;;  %p5797_p6 = scmp.lt.s32.totalorder %s10732_s9, 16  ;;  %v10858_v48 = vld [vmem:[%s10760_s19 + $0x8] sm:$0xff] }
 0x24c   :  { %v2667_v13 = vsel %vm2666_vm11, 0.0, %v2662_v59  ;;  %v2710_v21 = vrot.slane %v2709_v38, 2  ;;  %v2749_v23 = vsel %vm10709_vm2, %v10089_v10, -inf  ;;  %v2750_v62 = vsel %vm153_vm6, %v2748_v31, -inf  ;;  %s16021_s22 = smov (!%p5802_p8, %s3088_s22), 16  ;;  %v10875_v31 = vld [vmem:[%s10760_s19 + $0x28] sm:$0xff]  ;;  %s6188_s28 = scvt.f32.s32 %s11332_s26 }
 0x24d   :  { %5763 = vst.msk [vmem:[%s15063_s6 + $0x18] sm:$0x1] %vm994_vm9, %v2667_v13  ;;  %v2679_v34 = vmax.f32 %v2677_v5, %v2678_v51  ;;  %v2695_v8 = vrot.slane %v2694_v52, 1  ;;  %v2751_v45 = vsel %vm153_vm6, %v2749_v23, -inf  ;;  %v2766_v10 = vsel %vm10709_vm2, %v10179_v39, -inf  ;;  %s3080_s21 = scalar_select %p3079_p10, %s10732_s9, 0 }
 0x24e   :  { %v2711_v57 = vmax.f32 %v2709_v38, %v2710_v21  ;;  %v2752_v7 = vmax.f32 %v2750_v62, %v2751_v45  ;;  %v2767_v58 = vsel %vm153_vm6, %v2765_v63, -inf  ;;  %v2768_v53 = vsel %vm153_vm6, %v2766_v10, -inf  ;;  %v10855_v5 = vld [vmem:[%s10760_s19] sm:$0xff]  ;;  %v10866_v51 = vld [vmem:[%s10760_s19 + $0x10] sm:$0xff]  ;;  %v10889_v23 = vld [vmem:[%s10760_s19 + $0x38] sm:$0xff]  ;;  %s3284_s25 = scalar_select %p3283_p1, %s11161_s4, 0 }
 0x24f   :  { %v2684_v56 = vsel %vm2683_vm5, 0.0, %v2679_v34  ;;  %v2696_v39 = vmax.f32 %v2694_v52, %v2695_v8  ;;  %vm2717_vm11 = vcmp.eq.s32.totalorder %v2716_v25, 1  ;;  %v2769_v27 = vmax.f32 %v2767_v58, %v2768_v53  ;;  %s16019_s21 = smov (!%p5797_p6, %s3080_s21), 16  ;;  %v10869_v52 = vld [vmem:[%s10760_s19 + $0x18] sm:$0xff]  ;;  %v10886_v21 = vld [vmem:[%s10760_s19 + $0x30] sm:$0xff]  ;;  %v10899_v10 = vld [vmem:[%s10760_s19 + $0x40] sm:$0xff]  ;;  %s11363_s20 = sfloor.f32 %s3287_s12 }
 0x250   :  { %5764 = vst.msk [vmem:[%s15063_s6 + $0x19] sm:$0x1] %vm994_vm9, %v2684_v56  ;;  %v2712_v17 = vrot.slane %v2711_v57, 1  ;;  %v2753_v30 = vrot.slane %v2752_v7, 4  ;;  %v2782_v18 = vsel %vm10701_vm3, %v10232_v24, -inf  ;;  %v2783_v54 = vsel %vm10709_vm2, %v10262_v14, -inf  ;;  %s11381_s14 = sadd.s32 %s6188_s28, %s10045_s10  ;;  %s6190_s2 = scvt.f32.s32 %s11363_s20 }
 0x251   :  { %v2701_v3 = vsel %vm2700_vm0, 0.0, %v2696_v39  ;;  %v2770_v47 = vrot.slane %v2769_v27, 4  ;;  %v2784_v37 = vsel %vm153_vm6, %v2782_v18, -inf  ;;  %v2785_v6 = vsel %vm153_vm6, %v2783_v54, -inf  ;;  %v10913_v53 = vld [vmem:[%s10760_s19 + $0x58] sm:$0xff]  ;;  %v10916_v56 = vld [vmem:[%s10760_s19 + $0x60] sm:$0xff]  ;;  %p3075_p8 = scmp.le.s32.totalorder %s16017_s17, %s16015_s0 }
 0x252   :  { %5765 = vst.msk [vmem:[%s15063_s6 + $0x1a] sm:$0x1] %vm994_vm9, %v2701_v3  ;;  %v2713_v24 = vmax.f32 %v2711_v57, %v2712_v17  ;;  %v2754_v14 = vmax.f32 %v2752_v7, %v2753_v30  ;;  %v2761_v40 = vstv %s2760_s27  ;;  %v2786_v22 = vmax.f32 %v2784_v37, %v2785_v6  ;;  %v10902_v57 = vld [vmem:[%s10760_s19 + $0x48] sm:$0xff]  ;;  %v10905_v7 = vld [vmem:[%s10760_s19 + $0x50] sm:$0xff]  ;;  %s16023_s25 = smov (!%p5807_p3, %s3284_s25), 16  ;;  %p3291_p13 = scmp.gt.s32.totalorder %s11381_s14, 0 }
 0x253   :  { %v2771_v29 = vmax.f32 %v2769_v27, %v2770_v47  ;;  %v2799_v33 = vsel %vm10701_vm3, %v10323_v35, -inf  ;;  %v2800_v28 = vsel %vm10709_vm2, %v10365_v50, -inf  ;;  %vm2762_vm5 = vcmp.eq.s32.totalorder %v2761_v40, 1  ;;  %v10925_v18 = vld [vmem:[%s10760_s19 + $0x68] sm:$0xff]  ;;  %v10928_v54 = vld [vmem:[%s10760_s19 + $0x70] sm:$0xff]  ;;  %v10931_v3 = vld [vmem:[%s10760_s19 + $0x78] sm:$0xff]  ;;  %s11424_s16 = sadd.s32 %s6190_s2, %s10045_s10 }
 0x254   :  { %v2718_v0 = vsel %vm2717_vm11, 0.0, %v2713_v24  ;;  %v2755_v16 = vrot.slane %v2754_v14, 2  ;;  %v2787_v44 = vrot.slane %v2786_v22, 4  ;;  %v2801_v20 = vsel %vm153_vm6, %v2799_v33, -inf  ;;  %v10940_v6 = vld [vmem:[%s10760_s19 + $0x80] sm:$0xff]  ;;  %v10943_v24 = vld [vmem:[%s10760_s19 + $0x88] sm:$0xff] }
 0x255   :  { %5766 = vst.msk [vmem:[%s15063_s6 + $0x1b] sm:$0x1] %vm994_vm9, %v2718_v0  ;;  %v2772_v35 = vrot.slane %v2771_v29, 2  ;;  %v2802_v50 = vsel %vm153_vm6, %v2800_v28, -inf  ;;  %v2887_v26 = vstv %s16015_s0  ;;  %v2778_v4 = vstv %s2777_s15  ;;  %v10959_v0 = vld [vmem:[%s10760_s19 + $0x90] sm:$0xff]  ;;  %p5812_p0 = scmp.lt.s32.totalorder %s11381_s14, 16 }
 0x256   :  { %v2756_v55 = vmax.f32 %v2754_v14, %v2755_v16  ;;  %v2788_v15 = vmax.f32 %v2786_v22, %v2787_v44  ;;  %v2803_v43 = vmax.f32 %v2801_v20, %v2802_v50  ;;  %vm10832_vm7 = vcmp.ge.s32.totalorder %v6499_v1, %v2887_v26  ;;  %v10962_v16 = vld [vmem:[%s10760_s19 + $0x98] sm:$0xff]  ;;  %v10978_v50 = vld [vmem:[%s10760_s19 + $0xa8] sm:$0xff]  ;;  %s3292_s11 = scalar_select %p3291_p13, %s11381_s14, 0 }
 0x257   :  { %v2773_v49 = vmax.f32 %v2771_v29, %v2772_v35  ;;  %vm10837_vm8 = vcmp.ge.s32.totalorder %v6508_v2, %v2887_v26  ;;  %v2890_v32 = vstv %s16017_s17  ;;  %vm2779_vm10 = vcmp.eq.s32.totalorder %v2778_v4, 1  ;;  %v10975_v35 = vld [vmem:[%s10760_s19 + $0xa0] sm:$0xff]  ;;  %p3487_p5 = scmp.gt.s32.totalorder %s11424_s16, 0  ;;  %p5817_p7 = scmp.lt.s32.totalorder %s11424_s16, 16 }
 0x258   :  { %v2757_v60 = vrot.slane %v2756_v55, 1  ;;  %v2789_v61 = vrot.slane %v2788_v15, 2  ;;  %v2804_v11 = vrot.slane %v2803_v43, 4  ;;  %vm10843_vm4 = vcmp.lt.s32.totalorder %v6499_v1, %v2890_v32  ;;  %s16025_s11 = smov (!%p5812_p0, %s3292_s11), 16  ;;  %p3279_p0 = scmp.le.s32.totalorder %s16021_s22, %s16019_s21 }
 0x259   :  { %v2774_v19 = vrot.slane %v2773_v49, 1  ;;  %v2795_v36 = vstv %s2794_s13  ;;  %vm2892_vm0 = vcmp.lt.s32.totalorder %v6508_v2, %v2890_v32  ;;  %v2812_v41 = vstv %s2811_s24  ;;  %vm10881_vm3 = vmand %vm10832_vm7, %vm10843_vm4  ;;  %s11434_s24 = sld [smem:[#allocation7 + $0x2]]  ;;  %s3491_s13 = smul.f32 4.0, %s10502_s7 }
 0x25a   :  { %v2758_v59 = vmax.f32 %v2756_v55, %v2757_v60  ;;  %v2790_v38 = vmax.f32 %v2788_v15, %v2789_v61  ;;  %v2805_v25 = vmax.f32 %v2803_v43, %v2804_v11  ;;  %vm10893_vm2 = vmand %vm10837_vm8, %vm2892_vm0  ;;  %vm2796_vm11 = vcmp.eq.s32.totalorder %v2795_v36, 1  ;;  %s3488_s18 = scalar_select %p3487_p5, %s11424_s16, 0 }
 0x25b   :  { %v2775_v13 = vmax.f32 %v2773_v49, %v2774_v19  ;;  %v2899_v47 = vsel %vm10881_vm3, %v10855_v5, -inf  ;;  %v2900_v37 = vsel %vm10893_vm2, %v10858_v48, -inf  ;;  %v2901_v14 = vsel %vm10881_vm3, %v10866_v51, -inf  ;;  %v10993_v49 = vld [vmem:[%s10760_s19 + $0xb0] sm:$0xff]  ;;  %s11620_s7 = sceil.f32 %s3491_s13 }
 0x25c   :  { %v2763_v34 = vsel %vm2762_vm5, 0.0, %v2758_v59  ;;  %v2791_v8 = vrot.slane %v2790_v38, 1  ;;  %v2806_v45 = vrot.slane %v2805_v25, 2  ;;  %vm2813_vm5 = vcmp.eq.s32.totalorder %v2812_v41, 1  ;;  %s16027_s18 = smov (!%p5817_p7, %s3488_s18), 16  ;;  %s6192_s9 = scvt.f32.s32 %s11620_s7 }
 0x25d   :  { %5777 = vst.msk [vmem:[%s15063_s6 + $0x1c] sm:$0x1] %vm994_vm9, %v2763_v34  ;;  %v2780_v58 = vsel %vm2779_vm10, 0.0, %v2775_v13  ;;  %v2902_v40 = vsel %vm10893_vm2, %v10869_v52, -inf  ;;  %v2903_v22 = vsel %vm10881_vm3, %v10872_v12, -inf  ;;  %v2904_v29 = vsel %vm10893_vm2, %v10875_v31, -inf }
 0x25e   :  { %5778 = vst.msk [vmem:[%s15063_s6 + $0x1d] sm:$0x1] %vm994_vm9, %v2780_v58  ;;  %v2792_v17 = vmax.f32 %v2790_v38, %v2791_v8  ;;  %v2807_v30 = vmax.f32 %v2805_v25, %v2806_v45  ;;  %v2905_v44 = vsel %vm10881_vm3, %v10886_v21, -inf  ;;  %v2906_v20 = vsel %vm10893_vm2, %v10889_v23, -inf  ;;  %s11659_s29 = sadd.s32 %s6192_s9, %s10045_s10 }
 0x25f   :  { %v2907_v26 = vsel %vm10881_vm3, %v10899_v10, -inf  ;;  %v2908_v55 = vsel %vm10893_vm2, %v10902_v57, -inf  ;;  %v2909_v4 = vsel %vm10881_vm3, %v10905_v7, -inf  ;;  %v2910_v15 = vsel %vm10893_vm2, %v10913_v53, -inf  ;;  %s2826_s27 = ssub.s32 %s11434_s24, %s11426_s23  ;;  %p3495_p11 = scmp.gt.s32.totalorder %s11659_s29, 0 }
 0x260   :  { %v2797_v33 = vsel %vm2796_vm11, 0.0, %v2792_v17  ;;  %v2808_v28 = vrot.slane %v2807_v30, 1  ;;  %v2911_v9 = vsel %vm10881_vm3, %v10916_v56, -inf  ;;  %v2912_v32 = vsel %vm10893_vm2, %v10925_v18, -inf  ;;  %s11491_s3 = sadd.s32 1, %s2826_s27  ;;  %p5822_p2 = scmp.lt.s32.totalorder %s11659_s29, 16 }
 0x261   :  { %5779 = vst.msk [vmem:[%s15063_s6 + $0x1e] sm:$0x1] %vm994_vm9, %v2797_v33  ;;  %v2913_v60 = vsel %vm10881_vm3, %v10928_v54, -inf  ;;  %v2914_v61 = vsel %vm10893_vm2, %v10931_v3, -inf  ;;  %v2915_v11 = vsel %vm10881_vm3, %v10940_v6, -inf  ;;  %v2931_v34 = vsel %vm153_vm6, %v2899_v47, -inf }
 0x262   :  { %v2809_v43 = vmax.f32 %v2807_v30, %v2808_v28  ;;  %v2932_v8 = vsel %vm153_vm6, %v2900_v37, -inf  ;;  %v2940_v58 = vsel %vm153_vm6, %v2901_v14, -inf  ;;  %v2941_v17 = vsel %vm153_vm6, %v2902_v40, -inf  ;;  %p2828_p4 = scmp.gt.s32.totalorder %s11491_s3, 1 }
 0x263   :  { %v2933_v45 = vmax.f32 %v2931_v34, %v2932_v8  ;;  %v2949_v30 = vsel %vm153_vm6, %v2903_v22, -inf  ;;  %v2942_v33 = vmax.f32 %v2940_v58, %v2941_v17  ;;  %v2950_v28 = vsel %vm153_vm6, %v2904_v29, -inf  ;;  %s3496_s12 = scalar_select %p3495_p11, %s11659_s29, 0 }
 0x264   :  { %v2814_v36 = vsel %vm2813_vm5, 0.0, %v2809_v43  ;;  %v2958_v43 = vsel %vm153_vm6, %v2905_v44, -inf  ;;  %v2951_v39 = vmax.f32 %v2949_v30, %v2950_v28  ;;  %v2967_v47 = vsel %vm153_vm6, %v2907_v26, -inf  ;;  %s16029_s3 = smov (!%p2828_p4, %s11491_s3), 1  ;;  %p3483_p11 = scmp.le.s32.totalorder %s16025_s11, %s16023_s25 }
 0x265   :  { %5780 = vst.msk [vmem:[%s15063_s6 + $0x1f] sm:$0x1] %vm994_vm9, %v2814_v36  ;;  %v2959_v36 = vsel %vm153_vm6, %v2906_v20, -inf  ;;  %v2934_v27 = vrot.slane %v2933_v45, 4  ;;  %v2943_v37 = vrot.slane %v2942_v33, 4  ;;  %v2968_v14 = vsel %vm153_vm6, %v2908_v55, -inf  ;;  %s2834_s15 = scvt.s32.f32 %s16029_s3 }
 0x266   :  { %v2960_v13 = vmax.f32 %v2958_v43, %v2959_v36  ;;  %v2976_v40 = vsel %vm153_vm6, %v2909_v4, -inf  ;;  %v2977_v22 = vsel %vm153_vm6, %v2910_v15, -inf  ;;  %v2952_v29 = vrot.slane %v2951_v39, 4  ;;  %v11054_v4 = vld [vmem:[%s10760_s19 + $0xc0] sm:$0xff]  ;;  %v11057_v15 = vld [vmem:[%s10760_s19 + $0xc8] sm:$0xff]  ;;  %s16031_s12 = smov (!%p5822_p2, %s3496_s12), 16 }
 0x267   :  { %v2935_v34 = vmax.f32 %v2933_v45, %v2934_v27  ;;  %v2969_v44 = vmax.f32 %v2967_v47, %v2968_v14  ;;  %v2944_v58 = vmax.f32 %v2942_v33, %v2943_v37  ;;  %v2978_v20 = vmax.f32 %v2976_v40, %v2977_v22  ;;  %15518 = vst [vmem:[#allocation23_spill] sm:$0xff] %v11057_v15  ;;  %v11061_v14 = vld [vmem:[%s10760_s19 + $0xd0] sm:$0xff]  ;;  %s11615_s1 = smul.f32 0.25, %s2834_s15 }
 0x268   :  { %v2961_v8 = vrot.slane %v2960_v13, 4  ;;  %v2985_v17 = vsel %vm153_vm6, %v2911_v9, -inf  ;;  %v2986_v26 = vsel %vm153_vm6, %v2912_v32, -inf  ;;  %v2953_v55 = vmax.f32 %v2951_v39, %v2952_v29  ;;  %15519 = vst [vmem:[#allocation24_spill] sm:$0xff] %v11061_v14  ;;  %v11064_v39 = vld [vmem:[%s10760_s19 + $0xd8] sm:$0xff] }
 0x269   :  { %v2936_v30 = vrot.slane %v2935_v34, 2  ;;  %v2970_v43 = vrot.slane %v2969_v44, 4  ;;  %v2945_v27 = vrot.slane %v2944_v58, 2  ;;  %v2979_v45 = vrot.slane %v2978_v20, 4  ;;  %15520 = vst [vmem:[#allocation20_spill] sm:$0xff] %v11064_v39  ;;  %s3688_s8 = smul.f32 0.0, %s11615_s1  ;;  %s3696_s28 = sceil.f32 %s11615_s1 }
 0x26a   :  { %v2962_v28 = vmax.f32 %v2960_v13, %v2961_v8  ;;  %v2987_v33 = vmax.f32 %v2985_v17, %v2986_v26  ;;  %v2994_v36 = vsel %vm153_vm6, %v2913_v60, -inf  ;;  %v2954_v47 = vrot.slane %v2953_v55, 2  ;;  %v11067_v13 = vld [vmem:[%s10760_s19 + $0xe0] sm:$0xff]  ;;  %v11071_v17 = vld [vmem:[%s10760_s19 + $0xe8] sm:$0xff]  ;;  %s6196_s20 = scvt.f32.s32 %s3696_s28  ;;  %s3913_s2 = sfloor.f32 %s11615_s1 }
 0x26b   :  { %v2937_v9 = vmax.f32 %v2935_v34, %v2936_v30  ;;  %v2971_v37 = vmax.f32 %v2969_v44, %v2970_v43  ;;  %15521 = vst [vmem:[#allocation25_spill] sm:$0xff] %v11067_v13  ;;  %v2946_v40 = vmax.f32 %v2944_v58, %v2945_v27  ;;  %v2980_v22 = vmax.f32 %v2978_v20, %v2979_v45  ;;  %v11080_v30 = vld [vmem:[%s10760_s19 + $0xf0] sm:$0xff]  ;;  %v11083_v43 = vld [vmem:[%s10760_s19 + $0xf8] sm:$0xff]  ;;  %s11639_s30 = sfloor.f32 %s3688_s8  ;;  %s3920_s16 = smul.f32 2.0, %s11615_s1 }
 0x26c   :  { %v2963_v32 = vrot.slane %v2962_v28, 2  ;;  %v2988_v29 = vrot.slane %v2987_v33, 4  ;;  %v2995_v8 = vsel %vm153_vm6, %v2914_v61, -inf  ;;  %15522 = vst [vmem:[#allocation22_spill] sm:$0xff] %v11071_v17  ;;  %v2923_v60 = vsel %vm10881_vm3, %v11054_v4, -inf  ;;  %15523 = vst [vmem:[#allocation27_spill] sm:$0xff] %v11080_v30  ;;  %s6194_s4 = scvt.f32.s32 %s11639_s30  ;;  %s11936_s14 = sadd.s32 %s6196_s20, %s11426_s23 }
 0x26d   :  { %v2924_v34 = vsel %vm10893_vm2, %v11057_v15, -inf  ;;  %v2938_v44 = vrot.slane %v2937_v9, 1  ;;  %v2955_v26 = vmax.f32 %v2953_v55, %v2954_v47  ;;  %v2947_v58 = vrot.slane %v2946_v40, 1  ;;  %p3699_p12 = scmp.gt.s32.totalorder %s11936_s14, 0  ;;  %p5832_p6 = scmp.lt.s32.totalorder %s11936_s14, 16 }
 0x26e   :  { %v2964_v20 = vmax.f32 %v2962_v28, %v2963_v32  ;;  %v2972_v61 = vrot.slane %v2971_v37, 2  ;;  %v2996_v27 = vmax.f32 %v2994_v36, %v2995_v8  ;;  %v2925_v45 = vsel %vm10881_vm3, %v11061_v14, -inf  ;;  %s11702_s10 = sadd.s32 %s6194_s4, %s11426_s23  ;;  %s6198_s27 = scvt.f32.s32 %s3913_s2 }
 0x26f   :  { %v2926_v41 = vsel %vm10893_vm2, %v11064_v39, -inf  ;;  %v2927_v55 = vsel %vm10881_vm3, %v11067_v13, -inf  ;;  %v2981_v47 = vrot.slane %v2980_v22, 2  ;;  %v2928_v25 = vsel %vm10893_vm2, %v11071_v17, -inf  ;;  %p3692_p10 = scmp.gt.s32.totalorder %s11702_s10, 0  ;;  %p5827_p9 = scmp.lt.s32.totalorder %s11702_s10, 16 }
 0x270   :  { %v2956_v28 = vrot.slane %v2955_v26, 1  ;;  %v2989_v32 = vmax.f32 %v2987_v33, %v2988_v29  ;;  %v2997_v36 = vrot.slane %v2996_v27, 4  ;;  %v2929_v8 = vsel %vm10881_vm3, %v11080_v30, -inf  ;;  %s3700_s24 = scalar_select %p3699_p12, %s11936_s14, 0 }
 0x271   :  { %v11103_v59 = vmax.f32 %v2937_v9, %v2938_v44  ;;  %v3003_v19 = vsel %vm153_vm6, %v2915_v11, -inf  ;;  %v11114_v33 = vmax.f32 %v2946_v40, %v2947_v58  ;;  %v2965_v29 = vrot.slane %v2964_v20, 1  ;;  %s3693_s26 = scalar_select %p3692_p10, %s11702_s10, 0 }
 0x272   :  { %v2973_v42 = vmax.f32 %v2971_v37, %v2972_v61  ;;  %v15526_v38 = vsel %vm10893_vm2, %v10943_v24, -inf  ;;  %v11121_v44 = vmax.f32 %v2980_v22, %v2981_v47  ;;  %v15527_v11 = vsel %vm10881_vm3, %v10959_v0, -inf  ;;  %s16035_s24 = smov (!%p5832_p6, %s3700_s24), 16  ;;  %s12025_s3 = sadd.s32 %s6198_s27, %s11426_s23 }
 0x273   :  { %15524 = vst [vmem:[#allocation21_spill] sm:$0xff] %v11103_v59  ;;  %15525 = vst [vmem:[#allocation31_spill] sm:$0xff] %v11114_v33  ;;  %v3004_v9 = vsel %vm153_vm6, %v15526_v38, -inf  ;;  %v3012_v30 = vsel %vm153_vm6, %v15527_v11, -inf  ;;  %v15528_v40 = vsel %vm10893_vm2, %v10962_v16, -inf  ;;  %v11133_v58 = vmax.f32 %v2955_v26, %v2956_v28  ;;  %s16033_s26 = smov (!%p5827_p9, %s3693_s26), 16  ;;  %s12099_s9 = sfloor.f32 %s3920_s16 }
 0x274   :  { %v3005_v59 = vmax.f32 %v3003_v19, %v3004_v9  ;;  %v3013_v37 = vsel %vm153_vm6, %v15528_v40, -inf  ;;  %v2990_v61 = vrot.slane %v2989_v32, 2  ;;  %v2998_v33 = vmax.f32 %v2996_v27, %v2997_v36  ;;  %p3711_p1 = scmp.le.s32.totalorder %s16035_s24, %s16033_s26  ;;  %p3916_p3 = scmp.gt.s32.totalorder %s12025_s3, 0 }
 0x275   :  { %15529 = vst [vmem:[#allocation26_spill] sm:$0xff] %v11133_v58  ;;  %v3014_v38 = vmax.f32 %v3012_v30, %v3013_v37  ;;  %v15530_v19 = vsel %vm10881_vm3, %v10975_v35, -inf  ;;  %v15531_v9 = vsel %vm10893_vm2, %v10978_v50, -inf  ;;  %v15532_v26 = vsel %vm10881_vm3, %v10993_v49, -inf  ;;  %p5841_p4 = scmp.lt.s32.totalorder %s12025_s3, 16  ;;  %s6202_s4 = scvt.f32.s32 %s12099_s9 }
 0x276   :  { %v3006_v22 = vrot.slane %v3005_v59, 4  ;;  %v3021_v47 = vsel %vm153_vm6, %v15530_v19, -inf  ;;  %v3022_v11 = vsel %vm153_vm6, %v15531_v9, -inf  ;;  %v3030_v30 = vsel %vm153_vm6, %v15532_v26, -inf  ;;  %p12075_p13 = por %p3711_p1, %p3075_p8  ;;  %p12121_p7 = por %p3711_p1, %p3279_p0 }
 0x277   :  { %v11151_v27 = vmax.f32 %v2964_v20, %v2965_v29  ;;  %v2974_v28 = vrot.slane %v2973_v42, 1  ;;  %v3015_v36 = vrot.slane %v3014_v38, 4  ;;  %v3023_v40 = vmax.f32 %v3021_v47, %v3022_v11  ;;  %s12089_s8 = scalar_select %p3916_p3, %s12025_s3, 0 }
 0x278   :  { %v3007_v37 = vmax.f32 %v3005_v59, %v3006_v22  ;;  %v15534_v19 = vsel %vm10893_vm2, %v10996_v46, -inf  ;;  %v3039_v9 = vsel %vm153_vm6, %v2923_v60, -inf  ;;  %v3040_v63 = vsel %vm153_vm6, %v2924_v34, -inf  ;;  %s3760_s30 = scalar_select %p12075_p13, 1, 0 }
 0x279   :  { %15533 = vst [vmem:[#allocation28_spill] sm:$0xff] %v11151_v27  ;;  %v3031_v58 = vsel %vm153_vm6, %v15534_v19, -inf  ;;  %v2999_v17 = vrot.slane %v2998_v33, 2  ;;  %v3016_v13 = vmax.f32 %v3014_v38, %v3015_v36  ;;  %v3024_v39 = vrot.slane %v3023_v40, 4  ;;  %s4016_s28 = smul.f32 3.0, %s11615_s1  ;;  %s12152_s14 = sadd.s32 %s6202_s4, %s11426_s23 }
 0x27a   :  { %v3032_v26 = vmax.f32 %v3030_v30, %v3031_v58  ;;  %v3008_v20 = vrot.slane %v3007_v37, 2  ;;  %v3041_v29 = vmax.f32 %v3039_v9, %v3040_v63  ;;  %v3048_v59 = vsel %vm153_vm6, %v2925_v45, -inf  ;;  %s3810_s20 = scalar_select %p12121_p7, 1, 0 }
 0x27b   :  { %v3049_v22 = vsel %vm153_vm6, %v2926_v41, -inf  ;;  %v2983_v47 = vrot.slane %v11121_v44, 1  ;;  %v3017_v11 = vrot.slane %v3016_v13, 2  ;;  %v3025_v19 = vmax.f32 %v3023_v40, %v3024_v39  ;;  %s16037_s8 = smov (!%p5841_p4, %s12089_s8), 16  ;;  %p3687_p10 = scmp.le.s32.totalorder %s16031_s12, %s16027_s18 }
 0x27c   :  { %v3033_v60 = vrot.slane %v3032_v26, 4  ;;  %v2991_v27 = vmax.f32 %v2989_v32, %v2990_v61  ;;  %v3042_v34 = vrot.slane %v3041_v29, 4  ;;  %v3050_v14 = vmax.f32 %v3048_v59, %v3049_v22  ;;  %s12178_s2 = sceil.f32 %s4016_s28  ;;  %p12199_p9 = por %p3711_p1, %p3483_p11 }
 0x27d   :  { %v3057_v38 = vsel %vm153_vm6, %v2927_v55, -inf  ;;  %v3000_v58 = vmax.f32 %v2998_v33, %v2999_v17  ;;  %v3026_v30 = vrot.slane %v3025_v19, 2  ;;  %v3058_v45 = vsel %vm153_vm6, %v2928_v25, -inf  ;;  %p4012_p12 = scmp.gt.s32.totalorder %s12152_s14, 0  ;;  %s6204_s27 = scvt.f32.s32 %s12178_s2 }
 0x27e   :  { %v3034_v36 = vmax.f32 %v3032_v26, %v3033_v60  ;;  %v3009_v9 = vmax.f32 %v3007_v37, %v3008_v20  ;;  %v3043_v41 = vmax.f32 %v3041_v29, %v3042_v34  ;;  %v3051_v63 = vrot.slane %v3050_v14, 4  ;;  %p5855_p6 = scmp.lt.s32.totalorder %s12152_s14, 16  ;;  %s12245_s3 = sld [smem:[#allocation6 + $0x3]] }
 0x27f   :  { %v3059_v15 = vmax.f32 %v3057_v38, %v3058_v45  ;;  %v3018_v39 = vmax.f32 %v3016_v13, %v3017_v11  ;;  %v3027_v40 = vmax.f32 %v3025_v19, %v3026_v30  ;;  %v3066_v61 = vsel %vm153_vm6, %v2929_v8, -inf  ;;  %s3859_s13 = scalar_select %p12199_p9, 1, 0 }
 0x280   :  { %v3035_v32 = vrot.slane %v3034_v36, 2  ;;  %v11170_v59 = vmax.f32 %v2973_v42, %v2974_v28  ;;  %v3044_v55 = vrot.slane %v3043_v41, 2  ;;  %v3052_v17 = vmax.f32 %v3050_v14, %v3051_v63  ;;  %p12294_p3 = por %p3711_p1, %p3687_p10  ;;  %s12299_s9 = sadd.s32 %s6204_s27, %s11426_s23 }
 0x281   :  { %v3060_v33 = vrot.slane %v3059_v15, 4  ;;  %v2992_v26 = vrot.slane %v2991_v27, 1  ;;  %v3001_v25 = vrot.slane %v3000_v58, 1  ;;  %v15536_v20 = vsel %vm10893_vm2, %v11083_v43, -inf  ;;  %p4020_p13 = scmp.gt.s32.totalorder %s12299_s9, 0  ;;  %s4112_s2 = smul.f32 4.0, %s11615_s1 }
 0x282   :  { %15535 = vst [vmem:[#allocation9_spill] sm:$0xff] %v11170_v59  ;;  %v3036_v37 = vmax.f32 %v3034_v36, %v3035_v32  ;;  %v3067_v13 = vsel %vm153_vm6, %v15536_v20, -inf  ;;  %v3045_v42 = vmax.f32 %v3043_v41, %v3044_v55  ;;  %v3053_v8 = vrot.slane %v3052_v17, 2 }
 0x283   :  { %v3061_v14 = vmax.f32 %v3059_v15, %v3060_v33  ;;  %v3068_v28 = vmax.f32 %v3066_v61, %v3067_v13  ;;  %v3010_v29 = vrot.slane %v3009_v9, 1  ;;  %v3019_v22 = vrot.slane %v3018_v39, 1  ;;  %s12405_s27 = scalar_select %p4020_p13, %s12299_s9, 0 }
 0x284   :  { %v3028_v11 = vrot.slane %v3027_v40, 1  ;;  %v15537_v19 = vstv %s16019_s21  ;;  %v3037_v62 = vrot.slane %v3036_v37, 1  ;;  %v3054_v60 = vmax.f32 %v3052_v17, %v3053_v8 }
 0x285   :  { %vm3092_vm7 = vcmp.ge.s32.totalorder %v6499_v1, %v15537_v19  ;;  %v3062_v34 = vrot.slane %v3061_v14, 2  ;;  %v3069_v38 = vrot.slane %v3068_v28, 4  ;;  %v3046_v30 = vrot.slane %v3045_v42, 1 }
 0x286   :  { %v15538_v36 = vmov %v15537_v19  ;;  %v15541_v41 = vstv %s16021_s22  ;;  %v11206_v32 = vmax.f32 %v11121_v44, %v2983_v47  ;;  %v3055_v61 = vrot.slane %v3054_v60, 1 }
 0x287   :  { %vm11187_vm8 = vcmp.ge.s32.totalorder %v6508_v2, %v15538_v36  ;;  %vm3095_vm4 = vcmp.lt.s32.totalorder %v6499_v1, %v15541_v41  ;;  %v15542_v15 = vmov %v15541_v41  ;;  %v3063_v55 = vmax.f32 %v3061_v14, %v3062_v34 }
 0x288   :  { %vm11197_vm10 = vcmp.lt.s32.totalorder %v6508_v2, %v15542_v15  ;;  %15545 = vst [vmem:[#allocation32_spill] sm:$0xff] %v11206_v32  ;;  %v3070_v17 = vmax.f32 %v3068_v28, %v3069_v38  ;;  %vm11208_vm0 = vmand %vm3092_vm7, %vm3095_vm4  ;;  %v11212_v20 = vmax.f32 %v2991_v27, %v2992_v26  ;;  %v11214_v13 = vmax.f32 %v3000_v58, %v3001_v25 }
 0x289   :  { %v11216_v8 = vmax.f32 %v3009_v9, %v3010_v29  ;;  %v11218_v19 = vmax.f32 %v3018_v39, %v3019_v22  ;;  %v11220_v36 = vmax.f32 %v3027_v40, %v3028_v11  ;;  %v11222_v44 = vmax.f32 %v3036_v37, %v3037_v62  ;;  %vm11228_vm3 = vmand %vm11187_vm8, %vm11197_vm10 }
 0x28a   :  { %15548 = vst [vmem:[#allocation10_spill] sm:$0xff] %v11212_v20  ;;  %15549 = vst [vmem:[#allocation29_spill] sm:$0xff] %v11214_v13  ;;  %v3064_v47 = vrot.slane %v3063_v55, 1  ;;  %v3071_v41 = vrot.slane %v3070_v17, 2  ;;  %v11232_v27 = vmax.f32 %v3045_v42, %v3046_v30  ;;  %v3103_v58 = vsel %vm11208_vm0, %v10855_v5, -inf }
 0x28b   :  { %15550 = vst [vmem:[#allocation13_spill] sm:$0xff] %v11216_v8  ;;  %15551 = vst [vmem:[#allocation11_spill] sm:$0xff] %v11218_v19  ;;  %v3105_v9 = vsel %vm11208_vm0, %v10866_v51, -inf  ;;  %v11241_v40 = vmax.f32 %v3054_v60, %v3055_v61  ;;  %v3107_v25 = vsel %vm11208_vm0, %v10872_v12, -inf  ;;  %v3109_v37 = vsel %vm11208_vm0, %v10886_v21, -inf }
 0x28c   :  { %15552 = vst [vmem:[#allocation33_spill] sm:$0xff] %v11220_v36  ;;  %15553 = vst [vmem:[#allocation30_spill] sm:$0xff] %v11222_v44  ;;  %v3072_v26 = vmax.f32 %v3070_v17, %v3071_v41  ;;  %v3104_v42 = vsel %vm11228_vm3, %v10858_v48, -inf  ;;  %v3106_v28 = vsel %vm11228_vm3, %v10869_v52, -inf  ;;  %v3108_v29 = vsel %vm11228_vm3, %v10875_v31, -inf }
 0x28d   :  { %15556 = vst [vmem:[#allocation14_spill] sm:$0xff] %v11232_v27  ;;  %15557 = vst [vmem:[#allocation12_spill] sm:$0xff] %v11241_v40  ;;  %v3110_v22 = vsel %vm11228_vm3, %v10889_v23, -inf  ;;  %v11261_v11 = vmax.f32 %v3063_v55, %v3064_v47  ;;  %v3111_v60 = vsel %vm11208_vm0, %v10899_v10, -inf  ;;  %v3112_v34 = vsel %vm11228_vm3, %v10902_v57, -inf }
 0x28e   :  { %v3073_v62 = vrot.slane %v3072_v26, 1  ;;  %v3113_v38 = vsel %vm11208_vm0, %v10905_v7, -inf  ;;  %v3114_v30 = vsel %vm11228_vm3, %v10913_v53, -inf  ;;  %v3115_v45 = vsel %vm11208_vm0, %v10916_v56, -inf }
 0x28f   :  { %15558 = vst [vmem:[#allocation34_spill] sm:$0xff] %v11261_v11  ;;  %v3116_v15 = vsel %vm11228_vm3, %v10925_v18, -inf  ;;  %v3117_v63 = vsel %vm11208_vm0, %v10928_v54, -inf  ;;  %v3118_v61 = vsel %vm11228_vm3, %v10931_v3, -inf  ;;  %v3135_v41 = vsel %vm153_vm6, %v3103_v58, -inf }
 0x290   :  { %v11305_v13 = vmax.f32 %v3072_v26, %v3073_v62  ;;  %v3136_v11 = vsel %vm153_vm6, %v3104_v42, -inf  ;;  %v3144_v39 = vsel %vm153_vm6, %v3105_v9, -inf  ;;  %v3145_v20 = vsel %vm153_vm6, %v3106_v28, -inf }
 0x291   :  { %v3153_v55 = vsel %vm153_vm6, %v3107_v25, -inf  ;;  %v3137_v26 = vmax.f32 %v3135_v41, %v3136_v11  ;;  %v3146_v62 = vmax.f32 %v3144_v39, %v3145_v20  ;;  %v3162_v17 = vsel %vm153_vm6, %v3109_v37, -inf }
 0x292   :  { %15559 = vst [vmem:[#allocation15_spill] sm:$0xff] %v11305_v13  ;;  %v3154_v13 = vsel %vm153_vm6, %v3108_v29, -inf  ;;  %v3163_v47 = vsel %vm153_vm6, %v3110_v22, -inf  ;;  %v3171_v58 = vsel %vm153_vm6, %v3111_v60, -inf  ;;  %v3172_v42 = vsel %vm153_vm6, %v3112_v34, -inf }
 0x293   :  { %v3155_v40 = vmax.f32 %v3153_v55, %v3154_v13  ;;  %v3138_v32 = vrot.slane %v3137_v26, 4  ;;  %v3147_v9 = vrot.slane %v3146_v62, 4  ;;  %v3164_v27 = vmax.f32 %v3162_v17, %v3163_v47 }
 0x294   :  { %v3173_v28 = vmax.f32 %v3171_v58, %v3172_v42  ;;  %v3180_v25 = vsel %vm153_vm6, %v3113_v38, -inf  ;;  %v3181_v20 = vsel %vm153_vm6, %v3114_v30, -inf  ;;  %v3189_v39 = vsel %vm153_vm6, %v3115_v45, -inf }
 0x295   :  { %v3156_v59 = vrot.slane %v3155_v40, 4  ;;  %v3139_v37 = vmax.f32 %v3137_v26, %v3138_v32  ;;  %v3148_v13 = vmax.f32 %v3146_v62, %v3147_v9  ;;  %v3165_v29 = vrot.slane %v3164_v27, 4 }
 0x296   :  { %v3174_v11 = vrot.slane %v3173_v28, 4  ;;  %v3182_v60 = vmax.f32 %v3180_v25, %v3181_v20  ;;  %v3190_v34 = vsel %vm153_vm6, %v3116_v15, -inf  ;;  %v3198_v55 = vsel %vm153_vm6, %v3117_v63, -inf }
 0x297   :  { %v3157_v22 = vmax.f32 %v3155_v40, %v3156_v59  ;;  %v3140_v17 = vrot.slane %v3139_v37, 2  ;;  %v3149_v47 = vrot.slane %v3148_v13, 2  ;;  %v3166_v41 = vmax.f32 %v3164_v27, %v3165_v29 }
 0x298   :  { %v3175_v38 = vmax.f32 %v3173_v28, %v3174_v11  ;;  %v3183_v30 = vrot.slane %v3182_v60, 4  ;;  %v3191_v42 = vmax.f32 %v3189_v39, %v3190_v34  ;;  %v3199_v32 = vsel %vm153_vm6, %v3118_v61, -inf  ;;  %v15560_v28 = vld [vmem:[#allocation23_spill] sm:$0xff]  ;;  %v15561_v39 = vld [vmem:[#allocation24_spill] sm:$0xff]  ;;  %v15563_v34 = vld [vmem:[#allocation25_spill] sm:$0xff] }
 0x299   :  { %v3158_v58 = vrot.slane %v3157_v22, 2  ;;  %v3141_v45 = vmax.f32 %v3139_v37, %v3140_v17  ;;  %v3150_v26 = vmax.f32 %v3148_v13, %v3149_v47  ;;  %v3167_v62 = vrot.slane %v3166_v41, 2  ;;  %v15564_v17 = vld [vmem:[#allocation22_spill] sm:$0xff] }
 0x29a   :  { %v3176_v9 = vrot.slane %v3175_v38, 2  ;;  %v3184_v40 = vmax.f32 %v3182_v60, %v3183_v30  ;;  %v3192_v15 = vrot.slane %v3191_v42, 4  ;;  %v3200_v63 = vmax.f32 %v3198_v55, %v3199_v32 }
 0x29b   :  { %v3159_v59 = vmax.f32 %v3157_v22, %v3158_v58  ;;  %v3127_v27 = vsel %vm11208_vm0, %v11054_v4, -inf  ;;  %v3128_v61 = vsel %vm11228_vm3, %v15560_v28, -inf  ;;  %v3142_v25 = vrot.slane %v3141_v45, 1  ;;  %v15562_v22 = vld [vmem:[#allocation20_spill] sm:$0xff]  ;;  %v15565_v58 = vld [vmem:[#allocation27_spill] sm:$0xff] }
 0x29c   :  { %v3151_v20 = vrot.slane %v3150_v26, 1  ;;  %v3129_v37 = vsel %vm11208_vm0, %v15561_v39, -inf  ;;  %v3168_v13 = vmax.f32 %v3166_v41, %v3167_v62  ;;  %v11343_v29 = vmax.f32 %v3175_v38, %v3176_v9 }
 0x29d   :  { %v3201_v11 = vrot.slane %v3200_v63, 4  ;;  %v3130_v60 = vsel %vm11228_vm3, %v15562_v22, -inf  ;;  %v3131_v55 = vsel %vm11208_vm0, %v15563_v34, -inf  ;;  %v3132_v47 = vsel %vm11228_vm3, %v15564_v17, -inf }
 0x29e   :  { %v3160_v30 = vrot.slane %v3159_v59, 1  ;;  %v3185_v32 = vrot.slane %v3184_v40, 2  ;;  %v3193_v62 = vmax.f32 %v3191_v42, %v3192_v15  ;;  %v11365_v9 = vmax.f32 %v3141_v45, %v3142_v25 }
 0x29f   :  { %v11367_v44 = vmax.f32 %v3150_v26, %v3151_v20  ;;  %v15568_v36 = vsel %vm11208_vm0, %v10940_v6, -inf  ;;  %v15569_v38 = vsel %vm11228_vm3, %v10943_v24, -inf  ;;  %v3169_v15 = vrot.slane %v3168_v13, 1 }
 0x2a0   :  { %15566 = vst [vmem:[#allocation35_spill] sm:$0xff] %v11365_v9  ;;  %v3207_v41 = vsel %vm153_vm6, %v15568_v36, -inf  ;;  %v3208_v42 = vsel %vm153_vm6, %v15569_v38, -inf  ;;  %v3178_v19 = vrot.slane %v11343_v29, 1  ;;  %v3202_v8 = vmax.f32 %v3200_v63, %v3201_v11 }
 0x2a1   :  { %15567 = vst [vmem:[#allocation16_spill] sm:$0xff] %v11367_v44  ;;  %v3209_v45 = vmax.f32 %v3207_v41, %v3208_v42  ;;  %v15570_v26 = vsel %vm11208_vm0, %v10959_v0, -inf  ;;  %v15571_v25 = vsel %vm11228_vm3, %v10962_v16, -inf  ;;  %v15572_v63 = vsel %vm11208_vm0, %v10975_v35, -inf }
 0x2a2   :  { %v3216_v36 = vsel %vm153_vm6, %v15570_v26, -inf  ;;  %v3217_v20 = vsel %vm153_vm6, %v15571_v25, -inf  ;;  %v3225_v11 = vsel %vm153_vm6, %v15572_v63, -inf  ;;  %v15573_v41 = vsel %vm11228_vm3, %v10978_v50, -inf }
 0x2a3   :  { %v3226_v38 = vsel %vm153_vm6, %v15573_v41, -inf  ;;  %v11404_v42 = vmax.f32 %v3159_v59, %v3160_v30  ;;  %v11406_v26 = vmax.f32 %v3184_v40, %v3185_v32  ;;  %v3194_v44 = vrot.slane %v3193_v62, 2 }
 0x2a4   :  { %v3210_v25 = vrot.slane %v3209_v45, 4  ;;  %v3218_v9 = vmax.f32 %v3216_v36, %v3217_v20  ;;  %v3227_v17 = vmax.f32 %v3225_v11, %v3226_v38  ;;  %v15575_v63 = vsel %vm11208_vm0, %v10993_v49, -inf }
 0x2a5   :  { %15574 = vst [vmem:[#allocation36_spill] sm:$0xff] %v11404_v42  ;;  %v3234_v34 = vsel %vm153_vm6, %v15575_v63, -inf  ;;  %v15576_v41 = vsel %vm11228_vm3, %v10996_v46, -inf  ;;  %v11419_v40 = vmax.f32 %v3168_v13, %v3169_v15  ;;  %v3203_v30 = vrot.slane %v3202_v8, 2 }
 0x2a6   :  { %v3235_v59 = vsel %vm153_vm6, %v15576_v41, -inf  ;;  %v3211_v32 = vmax.f32 %v3209_v45, %v3210_v25  ;;  %v3219_v20 = vrot.slane %v3218_v9, 4  ;;  %v3228_v11 = vrot.slane %v3227_v17, 4 }
 0x2a7   :  { %15577 = vst [vmem:[#allocation17_spill] sm:$0xff] %v11419_v40  ;;  %v3236_v36 = vmax.f32 %v3234_v34, %v3235_v59  ;;  %v3243_v38 = vsel %vm153_vm6, %v3127_v27, -inf  ;;  %v3244_v63 = vsel %vm153_vm6, %v3128_v61, -inf  ;;  %v3195_v41 = vmax.f32 %v3193_v62, %v3194_v44 }
 0x2a8   :  { %v3212_v42 = vrot.slane %v3211_v32, 2  ;;  %v3245_v15 = vmax.f32 %v3243_v38, %v3244_v63  ;;  %v3220_v45 = vmax.f32 %v3218_v9, %v3219_v20  ;;  %v3229_v34 = vmax.f32 %v3227_v17, %v3228_v11 }
 0x2a9   :  { %v3237_v13 = vrot.slane %v3236_v36, 4  ;;  %v3252_v25 = vsel %vm153_vm6, %v3129_v37, -inf  ;;  %v3253_v59 = vsel %vm153_vm6, %v3130_v60, -inf  ;;  %v3204_v27 = vmax.f32 %v3202_v8, %v3203_v30 }
 0x2aa   :  { %v3246_v40 = vrot.slane %v3245_v15, 4  ;;  %v3254_v22 = vmax.f32 %v3252_v25, %v3253_v59  ;;  %v3221_v44 = vrot.slane %v3220_v45, 2  ;;  %v3230_v62 = vrot.slane %v3229_v34, 2 }
 0x2ab   :  { %v3238_v61 = vmax.f32 %v3236_v36, %v3237_v13  ;;  %v3261_v17 = vsel %vm153_vm6, %v3131_v55, -inf  ;;  %v3262_v37 = vsel %vm153_vm6, %v3132_v47, -inf  ;;  %v3213_v9 = vmax.f32 %v3211_v32, %v3212_v42 }
 0x2ac   :  { %v3247_v20 = vmax.f32 %v3245_v15, %v3246_v40  ;;  %v3255_v11 = vrot.slane %v3254_v22, 4  ;;  %v3222_v38 = vmax.f32 %v3220_v45, %v3221_v44  ;;  %v3231_v8 = vmax.f32 %v3229_v34, %v3230_v62 }
 0x2ad   :  { %v3239_v60 = vrot.slane %v3238_v61, 2  ;;  %v3263_v30 = vmax.f32 %v3261_v17, %v3262_v37  ;;  %v15578_v36 = vsel %vm11208_vm0, %v15565_v58, -inf  ;;  %v11449_v55 = vmax.f32 %v11343_v29, %v3178_v19 }
 0x2ae   :  { %v3270_v63 = vsel %vm153_vm6, %v15578_v36, -inf  ;;  %v3248_v42 = vrot.slane %v3247_v20, 2  ;;  %v3256_v40 = vmax.f32 %v3254_v22, %v3255_v11  ;;  %v3187_v32 = vrot.slane %v11406_v26, 1 }
 0x2af   :  { %v3240_v47 = vmax.f32 %v3238_v61, %v3239_v60  ;;  %v3196_v33 = vrot.slane %v3195_v41, 1  ;;  %v3264_v13 = vrot.slane %v3263_v30, 4  ;;  %v15579_v15 = vsel %vm11228_vm3, %v11083_v43, -inf }
 0x2b0   :  { %v3271_v45 = vsel %vm153_vm6, %v15579_v15, -inf  ;;  %v3205_v19 = vrot.slane %v3204_v27, 1  ;;  %v3249_v29 = vmax.f32 %v3247_v20, %v3248_v42  ;;  %v3257_v22 = vrot.slane %v3256_v40, 2 }
 0x2b1   :  { %v3272_v34 = vmax.f32 %v3270_v63, %v3271_v45  ;;  %v3214_v25 = vrot.slane %v3213_v9, 1  ;;  %v3223_v59 = vrot.slane %v3222_v38, 1  ;;  %v3232_v61 = vrot.slane %v3231_v8, 1 }
 0x2b2   :  { %v3265_v44 = vmax.f32 %v3263_v30, %v3264_v13  ;;  %v3241_v62 = vrot.slane %v3240_v47, 1  ;;  %v3258_v17 = vmax.f32 %v3256_v40, %v3257_v22  ;;  %v15580_v37 = vstv %s16023_s25 }
 0x2b3   :  { %v3273_v14 = vrot.slane %v3272_v34, 4  ;;  %vm3296_vm2 = vcmp.ge.s32.totalorder %v6499_v1, %v15580_v37  ;;  %v3250_v60 = vrot.slane %v3249_v29, 1  ;;  %v15581_v36 = vmov %v15580_v37 }
 0x2b4   :  { %v3266_v11 = vrot.slane %v3265_v44, 2  ;;  %vm11469_vm11 = vcmp.ge.s32.totalorder %v6508_v2, %v15581_v36  ;;  %v3298_v63 = vstv %s16025_s11  ;;  %v11479_v30 = vmax.f32 %v11406_v26, %v3187_v32 }
 0x2b5   :  { %v3259_v42 = vrot.slane %v3258_v17, 1  ;;  %v3274_v40 = vmax.f32 %v3272_v34, %v3273_v14  ;;  %vm3299_vm5 = vcmp.lt.s32.totalorder %v6499_v1, %v3298_v63  ;;  %v11482_v13 = vmax.f32 %v3195_v41, %v3196_v33 }
 0x2b6   :  { %v11484_v15 = vmax.f32 %v3204_v27, %v3205_v19  ;;  %v3267_v45 = vmax.f32 %v3265_v44, %v3266_v11  ;;  %vm3300_vm7 = vcmp.lt.s32.totalorder %v6508_v2, %v3298_v63  ;;  %vm11487_vm8 = vmand %vm3296_vm2, %vm3299_vm5  ;;  %v11493_v26 = vmax.f32 %v3213_v9, %v3214_v25 }
 0x2b7   :  { %v11495_v32 = vmax.f32 %v3222_v38, %v3223_v59  ;;  %v11497_v34 = vmax.f32 %v3231_v8, %v3232_v61  ;;  %v3275_v41 = vrot.slane %v3274_v40, 2  ;;  %vm11501_vm4 = vmand %vm11469_vm11, %vm3300_vm7  ;;  %v11505_v33 = vmax.f32 %v3240_v47, %v3241_v62 }
 0x2b8   :  { %v11507_v19 = vmax.f32 %v3249_v29, %v3250_v60  ;;  %v3268_v44 = vrot.slane %v3267_v45, 1  ;;  %v11510_v37 = vmax.f32 %v3258_v17, %v3259_v42  ;;  %v3307_v38 = vsel %vm11487_vm8, %v10855_v5, -inf }
 0x2b9   :  { %v3276_v9 = vmax.f32 %v3274_v40, %v3275_v41  ;;  %v3309_v8 = vsel %vm11487_vm8, %v10866_v51, -inf  ;;  %v3308_v47 = vsel %vm11501_vm4, %v10858_v48, -inf  ;;  %v3310_v29 = vsel %vm11501_vm4, %v10869_v52, -inf }
 0x2ba   :  { %v3311_v25 = vsel %vm11487_vm8, %v10872_v12, -inf  ;;  %v3312_v5 = vsel %vm11501_vm4, %v10875_v31, -inf  ;;  %v11531_v51 = vmax.f32 %v3267_v45, %v3268_v44  ;;  %v3313_v48 = vsel %vm11487_vm8, %v10886_v21, -inf }
 0x2bb   :  { %v3277_v59 = vrot.slane %v3276_v9, 1  ;;  %v3314_v61 = vsel %vm11501_vm4, %v10889_v23, -inf  ;;  %v3315_v52 = vsel %vm11487_vm8, %v10899_v10, -inf  ;;  %v3316_v12 = vsel %vm11501_vm4, %v10902_v57, -inf }
 0x2bc   :  { %v3317_v31 = vsel %vm11487_vm8, %v10905_v7, -inf  ;;  %v3318_v21 = vsel %vm11501_vm4, %v10913_v53, -inf  ;;  %v3319_v23 = vsel %vm11487_vm8, %v10916_v56, -inf  ;;  %v3320_v10 = vsel %vm11501_vm4, %v10925_v18, -inf }
 0x2bd   :  { %v3321_v57 = vsel %vm11487_vm8, %v10928_v54, -inf  ;;  %v3322_v7 = vsel %vm11501_vm4, %v10931_v3, -inf  ;;  %v11568_v53 = vmax.f32 %v3276_v9, %v3277_v59  ;;  %v3323_v56 = vsel %vm11487_vm8, %v10940_v6, -inf }
 0x2be   :  { %v3324_v18 = vsel %vm11501_vm4, %v10943_v24, -inf  ;;  %v3325_v54 = vsel %vm11487_vm8, %v10959_v0, -inf  ;;  %v3326_v3 = vsel %vm11501_vm4, %v10962_v16, -inf  ;;  %v3327_v62 = vsel %vm11487_vm8, %v10975_v35, -inf }
 0x2bf   :  { %v3339_v63 = vsel %vm153_vm6, %v3307_v38, -inf  ;;  %v3340_v42 = vsel %vm153_vm6, %v3308_v47, -inf  ;;  %v3348_v40 = vsel %vm153_vm6, %v3309_v8, -inf  ;;  %v3349_v45 = vsel %vm153_vm6, %v3310_v29, -inf }
 0x2c0   :  { %v3357_v41 = vsel %vm153_vm6, %v3311_v25, -inf  ;;  %v3341_v44 = vmax.f32 %v3339_v63, %v3340_v42  ;;  %v3350_v9 = vmax.f32 %v3348_v40, %v3349_v45  ;;  %v3358_v59 = vsel %vm153_vm6, %v3312_v5, -inf }
 0x2c1   :  { %v3366_v14 = vsel %vm153_vm6, %v3313_v48, -inf  ;;  %v3359_v36 = vmax.f32 %v3357_v41, %v3358_v59  ;;  %v3367_v20 = vsel %vm153_vm6, %v3314_v61, -inf  ;;  %v3375_v38 = vsel %vm153_vm6, %v3315_v52, -inf }
 0x2c2   :  { %v3376_v47 = vsel %vm153_vm6, %v3316_v12, -inf  ;;  %v3342_v8 = vrot.slane %v3341_v44, 4  ;;  %v3351_v11 = vrot.slane %v3350_v9, 4  ;;  %v3368_v29 = vmax.f32 %v3366_v14, %v3367_v20 }
 0x2c3   :  { %v3377_v60 = vmax.f32 %v3375_v38, %v3376_v47  ;;  %v3360_v25 = vrot.slane %v3359_v36, 4  ;;  %v3384_v63 = vsel %vm153_vm6, %v3317_v31, -inf  ;;  %v3385_v42 = vsel %vm153_vm6, %v3318_v21, -inf }
 0x2c4   :  { %v3393_v5 = vsel %vm153_vm6, %v3319_v23, -inf  ;;  %v3343_v48 = vmax.f32 %v3341_v44, %v3342_v8  ;;  %v3352_v61 = vmax.f32 %v3350_v9, %v3351_v11  ;;  %v3369_v40 = vrot.slane %v3368_v29, 4 }
 0x2c5   :  { %v3378_v52 = vrot.slane %v3377_v60, 4  ;;  %v3361_v45 = vmax.f32 %v3359_v36, %v3360_v25  ;;  %v3386_v12 = vmax.f32 %v3384_v63, %v3385_v42  ;;  %v3394_v14 = vsel %vm153_vm6, %v3320_v10, -inf }
 0x2c6   :  { %v3402_v20 = vsel %vm153_vm6, %v3321_v57, -inf  ;;  %v3344_v41 = vrot.slane %v3343_v48, 2  ;;  %v3353_v31 = vrot.slane %v3352_v61, 2  ;;  %v3370_v59 = vmax.f32 %v3368_v29, %v3369_v40  ;;  %v15588_v40 = vld [vmem:[#allocation20_spill] sm:$0xff] }
 0x2c7   :  { %v3379_v21 = vmax.f32 %v3377_v60, %v3378_v52  ;;  %v3362_v38 = vrot.slane %v3361_v45, 2  ;;  %v3387_v23 = vrot.slane %v3386_v12, 4  ;;  %v3395_v47 = vmax.f32 %v3393_v5, %v3394_v14 }
 0x2c8   :  { %v3403_v17 = vsel %vm153_vm6, %v3322_v7, -inf  ;;  %v3345_v11 = vmax.f32 %v3343_v48, %v3344_v41  ;;  %v3354_v36 = vmax.f32 %v3352_v61, %v3353_v31  ;;  %v3371_v44 = vrot.slane %v3370_v59, 2 }
 0x2c9   :  { %v3380_v9 = vrot.slane %v3379_v21, 2  ;;  %v3363_v10 = vmax.f32 %v3361_v45, %v3362_v38  ;;  %v3388_v8 = vmax.f32 %v3386_v12, %v3387_v23  ;;  %v3396_v57 = vrot.slane %v3395_v47, 4  ;;  %v15589_v45 = vld [vmem:[#allocation25_spill] sm:$0xff]  ;;  %v15590_v12 = vld [vmem:[#allocation22_spill] sm:$0xff] }
 0x2ca   :  { %v3404_v25 = vmax.f32 %v3402_v20, %v3403_v17  ;;  %v3333_v60 = vsel %vm11487_vm8, %v15561_v39, -inf  ;;  %v3346_v29 = vrot.slane %v3345_v11, 1  ;;  %v3355_v63 = vrot.slane %v3354_v36, 1 }
 0x2cb   :  { %v3372_v42 = vmax.f32 %v3370_v59, %v3371_v44  ;;  %v3364_v7 = vrot.slane %v3363_v10, 1  ;;  %v3381_v5 = vmax.f32 %v3379_v21, %v3380_v9  ;;  %v3397_v48 = vmax.f32 %v3395_v47, %v3396_v57 }
 0x2cc   :  { %v3405_v61 = vrot.slane %v3404_v25, 4  ;;  %v3334_v52 = vsel %vm11501_vm4, %v15588_v40, -inf  ;;  %v3335_v17 = vsel %vm11487_vm8, %v15589_v45, -inf  ;;  %v3336_v39 = vsel %vm11501_vm4, %v15590_v12, -inf }
 0x2cd   :  { %v3337_v14 = vsel %vm11487_vm8, %v15565_v58, -inf  ;;  %v3338_v20 = vsel %vm11501_vm4, %v11083_v43, -inf  ;;  %v3373_v41 = vrot.slane %v3372_v42, 1  ;;  %v3389_v31 = vrot.slane %v3388_v8, 2 }
 0x2ce   :  { %v3406_v59 = vmax.f32 %v3404_v25, %v3405_v61  ;;  %v11644_v21 = vmax.f32 %v3345_v11, %v3346_v29  ;;  %v11646_v38 = vmax.f32 %v3354_v36, %v3355_v63  ;;  %v3411_v23 = vsel %vm153_vm6, %v3323_v56, -inf }
 0x2cf   :  { %v3412_v47 = vsel %vm153_vm6, %v3324_v18, -inf  ;;  %v11661_v44 = vmax.f32 %v3363_v10, %v3364_v7  ;;  %v3382_v11 = vrot.slane %v3381_v5, 1  ;;  %v3398_v36 = vrot.slane %v3397_v48, 2 }
 0x2d0   :  { %v3413_v9 = vmax.f32 %v3411_v23, %v3412_v47  ;;  %v3420_v6 = vsel %vm153_vm6, %v3325_v54, -inf  ;;  %v3421_v24 = vsel %vm153_vm6, %v3326_v3, -inf  ;;  %v3429_v56 = vsel %vm153_vm6, %v3327_v62, -inf }
 0x2d1   :  { %v15591_v18 = vsel %vm11501_vm4, %v10978_v50, -inf  ;;  %v11684_v54 = vmax.f32 %v3372_v42, %v3373_v41  ;;  %v11686_v10 = vmax.f32 %v3388_v8, %v3389_v31  ;;  %v3407_v16 = vrot.slane %v3406_v59, 2 }
 0x2d2   :  { %v3430_v0 = vsel %vm153_vm6, %v15591_v18, -inf  ;;  %v3414_v3 = vrot.slane %v3413_v9, 4  ;;  %v3422_v57 = vmax.f32 %v3420_v6, %v3421_v24  ;;  %v15592_v35 = vsel %vm11487_vm8, %v10993_v49, -inf }
 0x2d3   :  { %v3431_v25 = vmax.f32 %v3429_v56, %v3430_v0  ;;  %v3438_v62 = vsel %vm153_vm6, %v15592_v35, -inf  ;;  %v15593_v50 = vsel %vm11501_vm4, %v10996_v46, -inf  ;;  %v11699_v29 = vmax.f32 %v3381_v5, %v3382_v11 }
 0x2d4   :  { %v3439_v8 = vsel %vm153_vm6, %v15593_v50, -inf  ;;  %v3399_v63 = vmax.f32 %v3397_v48, %v3398_v36  ;;  %v3415_v42 = vmax.f32 %v3413_v9, %v3414_v3  ;;  %v3423_v49 = vrot.slane %v3422_v57, 4 }
 0x2d5   :  { %v3440_v7 = vmax.f32 %v3438_v62, %v3439_v8  ;;  %v3432_v61 = vrot.slane %v3431_v25, 4  ;;  %v15594_v40 = vsel %vm11487_vm8, %v11054_v4, -inf  ;;  %v15595_v5 = vsel %vm11501_vm4, %v15560_v28, -inf }
 0x2d6   :  { %v3447_v46 = vsel %vm153_vm6, %v15594_v40, -inf  ;;  %v3448_v48 = vsel %vm153_vm6, %v15595_v5, -inf  ;;  %v3408_v45 = vmax.f32 %v3406_v59, %v3407_v16  ;;  %v3416_v12 = vrot.slane %v3415_v42, 2 }
 0x2d7   :  { %v3441_v41 = vrot.slane %v3440_v7, 4  ;;  %v3449_v31 = vmax.f32 %v3447_v46, %v3448_v48  ;;  %v3424_v23 = vmax.f32 %v3422_v57, %v3423_v49  ;;  %v3433_v47 = vmax.f32 %v3431_v25, %v3432_v61 }
 0x2d8   :  { %v3456_v4 = vsel %vm153_vm6, %v3333_v60, -inf  ;;  %v3457_v11 = vsel %vm153_vm6, %v3334_v52, -inf  ;;  %v15596_v36 = vstv %s16027_s18  ;;  %v3417_v59 = vmax.f32 %v3415_v42, %v3416_v12 }
 0x2d9   :  { %vm11723_vm10 = vcmp.ge.s32.totalorder %v6499_v1, %v15596_v36  ;;  %v3442_v9 = vmax.f32 %v3440_v7, %v3441_v41  ;;  %v3450_v6 = vrot.slane %v3449_v31, 4  ;;  %v3458_v24 = vmax.f32 %v3456_v4, %v3457_v11 }
 0x2da   :  { %v15599_v56 = vmov %v15596_v36  ;;  %v3425_v52 = vrot.slane %v3424_v23, 2  ;;  %v3434_v18 = vrot.slane %v3433_v47, 2  ;;  %v3465_v0 = vsel %vm153_vm6, %v3335_v17, -inf }
 0x2db   :  { %vm11731_vm0 = vcmp.ge.s32.totalorder %v6508_v2, %v15599_v56  ;;  %v3466_v16 = vsel %vm153_vm6, %v3336_v39, -inf  ;;  %v3391_v3 = vrot.slane %v11686_v10, 1  ;;  %v3443_v57 = vrot.slane %v3442_v9, 2 }
 0x2dc   :  { %v3451_v25 = vmax.f32 %v3449_v31, %v3450_v6  ;;  %v3459_v35 = vrot.slane %v3458_v24, 4  ;;  %v3426_v62 = vmax.f32 %v3424_v23, %v3425_v52  ;;  %v3435_v50 = vmax.f32 %v3433_v47, %v3434_v18 }
 0x2dd   :  { %v3467_v8 = vmax.f32 %v3465_v0, %v3466_v16  ;;  %v3474_v17 = vsel %vm153_vm6, %v3337_v14, -inf  ;;  %v3400_v39 = vrot.slane %v3399_v63, 1  ;;  %v3444_v42 = vmax.f32 %v3442_v9, %v3443_v57  ;;  %v11793_v0 = vld [vmem:[%s10760_s19] sm:$0xff] }
 0x2de   :  { %v3452_v7 = vrot.slane %v3451_v25, 2  ;;  %v3460_v49 = vmax.f32 %v3458_v24, %v3459_v35  ;;  %v3409_v61 = vrot.slane %v3408_v45, 1  ;;  %v3418_v40 = vrot.slane %v3417_v59, 1 }
 0x2df   :  { %v3468_v46 = vrot.slane %v3467_v8, 4  ;;  %v3475_v58 = vsel %vm153_vm6, %v3338_v20, -inf  ;;  %v3427_v22 = vrot.slane %v3426_v62, 1  ;;  %v3436_v12 = vrot.slane %v3435_v50, 1 }
 0x2e0   :  { %v3453_v14 = vmax.f32 %v3451_v25, %v3452_v7  ;;  %v3461_v5 = vrot.slane %v3460_v49, 2  ;;  %v3476_v48 = vmax.f32 %v3474_v17, %v3475_v58  ;;  %v3445_v41 = vrot.slane %v3444_v42, 1  ;;  %v6311_v25 = vld [vmem:[%s10760_s19 + $0x10] sm:$0xff]  ;;  %v6313_v17 = vld [vmem:[%s10760_s19 + $0x8] sm:$0xff]  ;;  %v6317_v58 = vld [vmem:[%s10760_s19 + $0x38] sm:$0xff] }
 0x2e1   :  { %v3469_v31 = vmax.f32 %v3467_v8, %v3468_v46  ;;  %v3502_v23 = vstv %s16031_s12  ;;  %v11758_v47 = vmax.f32 %v11686_v10, %v3391_v3  ;;  %v11764_v43 = vmax.f32 %v3399_v63, %v3400_v39  ;;  %v11912_v3 = vld [vmem:[%s10760_s19 + $0xc8] sm:$0xff] }
 0x2e2   :  { %v3454_v4 = vrot.slane %v3453_v14, 1  ;;  %v3462_v11 = vmax.f32 %v3460_v49, %v3461_v5  ;;  %v3477_v36 = vrot.slane %v3476_v48, 4  ;;  %vm3503_vm3 = vcmp.lt.s32.totalorder %v6499_v1, %v3502_v23  ;;  %v6315_v49 = vld [vmem:[%s10760_s19 + $0x28] sm:$0xff] }
 0x2e3   :  { %15602 = vst [vmem:[#allocation18_spill] sm:$0xff] %v11764_v43  ;;  %v3470_v27 = vrot.slane %v3469_v31, 2  ;;  %vm3504_vm2 = vcmp.lt.s32.totalorder %v6508_v2, %v3502_v23  ;;  %v11768_v20 = vmax.f32 %v3408_v45, %v3409_v61  ;;  %v11770_v9 = vmax.f32 %v3417_v59, %v3418_v40  ;;  %vm11774_vm11 = vmand %vm11723_vm10, %vm3503_vm3  ;;  %v6316_v40 = vld [vmem:[%s10760_s19 + $0x30] sm:$0xff] }
 0x2e4   :  { %v3463_v10 = vrot.slane %v3462_v11, 1  ;;  %v3478_v6 = vmax.f32 %v3476_v48, %v3477_v36  ;;  %v11778_v24 = vmax.f32 %v3426_v62, %v3427_v22  ;;  %v11780_v56 = vmax.f32 %v3435_v50, %v3436_v12  ;;  %vm11786_vm5 = vmand %vm11731_vm0, %vm3504_vm2  ;;  %v6312_v62 = vld [vmem:[%s10760_s19 + $0x20] sm:$0xff]  ;;  %v6319_v48 = vld [vmem:[%s10760_s19 + $0x48] sm:$0xff] }
 0x2e5   :  { %15603 = vst [vmem:[#allocation19_spill] sm:$0xff] %v11768_v20  ;;  %v11782_v52 = vmax.f32 %v3444_v42, %v3445_v41  ;;  %v3471_v45 = vmax.f32 %v3469_v31, %v3470_v27  ;;  %v11790_v28 = vmax.f32 %v3453_v14, %v3454_v4  ;;  %v3511_v16 = vsel %vm11774_vm11, %v11793_v0, -inf  ;;  %v6314_v42 = vld [vmem:[%s10760_s19 + $0x18] sm:$0xff]  ;;  %v6318_v14 = vld [vmem:[%s10760_s19 + $0x40] sm:$0xff]  ;;  %v6320_v23 = vld [vmem:[%s10760_s19 + $0x50] sm:$0xff] }
 0x2e6   :  { %v3479_v18 = vrot.slane %v3478_v6, 2  ;;  %v11799_v57 = vmax.f32 %v3462_v11, %v3463_v10  ;;  %v3513_v35 = vsel %vm11774_vm11, %v6311_v25, -inf  ;;  %v3515_v50 = vsel %vm11774_vm11, %v6312_v62, -inf  ;;  %v6321_v11 = vld [vmem:[%s10760_s19 + $0x58] sm:$0xff]  ;;  %v6322_v27 = vld [vmem:[%s10760_s19 + $0x60] sm:$0xff] }
 0x2e7   :  { %15606 = vst [vmem:[#allocation23_spill] sm:$0xff] %v11782_v52  ;;  %15609 = vst [vmem:[#allocation24_spill] sm:$0xff] %v11790_v28  ;;  %v3472_v60 = vrot.slane %v3471_v45, 1  ;;  %v3512_v39 = vsel %vm11786_vm5, %v6313_v17, -inf  ;;  %v3514_v7 = vsel %vm11786_vm5, %v6314_v42, -inf  ;;  %v3516_v61 = vsel %vm11786_vm5, %v6315_v49, -inf }
 0x2e8   :  { %15610 = vst [vmem:[#allocation27_spill] sm:$0xff] %v11799_v57  ;;  %v3480_v8 = vmax.f32 %v3478_v6, %v3479_v18  ;;  %v3517_v46 = vsel %vm11774_vm11, %v6316_v40, -inf  ;;  %v3518_v22 = vsel %vm11786_vm5, %v6317_v58, -inf  ;;  %v3519_v5 = vsel %vm11774_vm11, %v6318_v14, -inf  ;;  %v6323_v6 = vld [vmem:[%s10760_s19 + $0x68] sm:$0xff]  ;;  %v11843_v18 = vld [vmem:[%s10760_s19 + $0x70] sm:$0xff] }
 0x2e9   :  { %v3520_v12 = vsel %vm11786_vm5, %v6319_v48, -inf  ;;  %v11828_v41 = vmax.f32 %v3471_v45, %v3472_v60  ;;  %v3521_v4 = vsel %vm11774_vm11, %v6320_v23, -inf  ;;  %v3522_v36 = vsel %vm11786_vm5, %v6321_v11, -inf  ;;  %v11849_v60 = vld [vmem:[%s10760_s19 + $0x78] sm:$0xff]  ;;  %v11855_v62 = vld [vmem:[%s10760_s19 + $0x80] sm:$0xff]  ;;  %v11861_v42 = vld [vmem:[%s10760_s19 + $0x88] sm:$0xff] }
 0x2ea   :  { %v3481_v31 = vrot.slane %v3480_v8, 1  ;;  %v3523_v10 = vsel %vm11774_vm11, %v6322_v27, -inf  ;;  %v3524_v45 = vsel %vm11786_vm5, %v6323_v6, -inf  ;;  %v11867_v40 = vld [vmem:[%s10760_s19 + $0x90] sm:$0xff]  ;;  %v11873_v14 = vld [vmem:[%s10760_s19 + $0x98] sm:$0xff]  ;;  %v11881_v11 = vld [vmem:[%s10760_s19 + $0xa0] sm:$0xff] }
 0x2eb   :  { %15611 = vst [vmem:[#allocation20_spill] sm:$0xff] %v11828_v41  ;;  %v11887_v6 = vld [vmem:[%s10760_s19 + $0xa8] sm:$0xff]  ;;  %v11893_v58 = vld [vmem:[%s10760_s19 + $0xb0] sm:$0xff]  ;;  %v11906_v27 = vld [vmem:[%s10760_s19 + $0xc0] sm:$0xff]  ;;  %v3544_v0 = vsel %vm153_vm6, %v3512_v39, -inf  ;;  %v3553_v49 = vsel %vm153_vm6, %v3514_v7, -inf }
 0x2ec   :  { %v11878_v23 = vmax.f32 %v3480_v8, %v3481_v31  ;;  %v11900_v8 = vld [vmem:[%s10760_s19 + $0xb8] sm:$0xff]  ;;  %v11918_v48 = vld [vmem:[%s10760_s19 + $0xd0] sm:$0xff]  ;;  %v3543_v31 = vsel %vm153_vm6, %v3511_v16, -inf  ;;  %v3561_v20 = vsel %vm153_vm6, %v3515_v50, -inf  ;;  %v3562_v17 = vsel %vm153_vm6, %v3516_v61, -inf }
 0x2ed   :  { %v3545_v41 = vmax.f32 %v3543_v31, %v3544_v0  ;;  %v3563_v28 = vmax.f32 %v3561_v20, %v3562_v17  ;;  %v3570_v43 = vsel %vm153_vm6, %v3517_v46, -inf  ;;  %v3571_v25 = vsel %vm153_vm6, %v3518_v22, -inf }
 0x2ee   :  { %15612 = vst [vmem:[#allocation25_spill] sm:$0xff] %v11878_v23  ;;  %v3552_v23 = vsel %vm153_vm6, %v3513_v35, -inf  ;;  %v3579_v16 = vsel %vm153_vm6, %v3519_v5, -inf  ;;  %v3572_v35 = vmax.f32 %v3570_v43, %v3571_v25  ;;  %v3580_v7 = vsel %vm153_vm6, %v3520_v12, -inf }
 0x2ef   :  { %v3554_v57 = vmax.f32 %v3552_v23, %v3553_v49  ;;  %v3546_v39 = vrot.slane %v3545_v41, 4  ;;  %v3564_v0 = vrot.slane %v3563_v28, 4  ;;  %v3581_v49 = vmax.f32 %v3579_v16, %v3580_v7 }
 0x2f0   :  { %v3588_v50 = vsel %vm153_vm6, %v3521_v4, -inf  ;;  %v3589_v61 = vsel %vm153_vm6, %v3522_v36, -inf  ;;  %v3573_v17 = vrot.slane %v3572_v35, 4  ;;  %v3597_v5 = vsel %vm153_vm6, %v3523_v10, -inf }
 0x2f1   :  { %v3555_v52 = vrot.slane %v3554_v57, 4  ;;  %v3547_v23 = vmax.f32 %v3545_v41, %v3546_v39  ;;  %v3590_v31 = vmax.f32 %v3588_v50, %v3589_v61  ;;  %v3565_v46 = vmax.f32 %v3563_v28, %v3564_v0 }
 0x2f2   :  { %v3582_v22 = vrot.slane %v3581_v49, 4  ;;  %v3598_v43 = vsel %vm153_vm6, %v3524_v45, -inf  ;;  %v3574_v16 = vmax.f32 %v3572_v35, %v3573_v17  ;;  %vm15660_vm2 = vcmask 1046534  }
 0x2f3   :  { %v3556_v20 = vmax.f32 %v3554_v57, %v3555_v52  ;;  %v3548_v12 = vrot.slane %v3547_v23, 2  ;;  %v3591_v4 = vrot.slane %v3590_v31, 4  ;;  %v3566_v7 = vrot.slane %v3565_v46, 2 }
 0x2f4   :  { %v3583_v36 = vmax.f32 %v3581_v49, %v3582_v22  ;;  %v3599_v41 = vmax.f32 %v3597_v5, %v3598_v43  ;;  %v15613_v52 = vsel %vm11774_vm11, %v11843_v18, -inf  ;;  %v3575_v45 = vrot.slane %v3574_v16, 2  ;;  %v6338_v43 = vld [vmem:[%s10760_s19 + $0xe0] sm:$0xff] }
 0x2f5   :  { %v3557_v25 = vrot.slane %v3556_v20, 2  ;;  %v3606_v28 = vsel %vm153_vm6, %v15613_v52, -inf  ;;  %v3549_v57 = vmax.f32 %v3547_v23, %v3548_v12  ;;  %v3592_v39 = vmax.f32 %v3590_v31, %v3591_v4  ;;  %v11955_v31 = vld [vmem:[%s10760_s19 + $0xd8] sm:$0xff]  ;;  %v11973_v52 = vld [vmem:[%s10760_s19 + $0xf0] sm:$0xff] }
 0x2f6   :  { %v3567_v0 = vmax.f32 %v3565_v46, %v3566_v7  ;;  %v3584_v35 = vrot.slane %v3583_v36, 2  ;;  %v3600_v49 = vrot.slane %v3599_v41, 4  ;;  %v15614_v18 = vsel %vm11786_vm5, %v11849_v60, -inf }
 0x2f7   :  { %v3558_v10 = vmax.f32 %v3556_v20, %v3557_v25  ;;  %v3607_v50 = vsel %vm153_vm6, %v15614_v18, -inf  ;;  %v3550_v61 = vrot.slane %v3549_v57, 1  ;;  %v3576_v23 = vmax.f32 %v3574_v16, %v3575_v45  ;;  %v11967_v25 = vld [vmem:[%s10760_s19 + $0xe8] sm:$0xff] }
 0x2f8   :  { %v3593_v20 = vrot.slane %v3592_v39, 2  ;;  %v3538_v46 = vsel %vm11786_vm5, %v11955_v31, -inf  ;;  %v3568_v22 = vrot.slane %v3567_v0, 1  ;;  %v3585_v60 = vmax.f32 %v3583_v36, %v3584_v35 }
 0x2f9   :  { %v3559_v17 = vrot.slane %v3558_v10, 1  ;;  %v3608_v5 = vmax.f32 %v3606_v28, %v3607_v50  ;;  %v3539_v12 = vsel %vm11774_vm11, %v6338_v43, -inf  ;;  %v3540_v16 = vsel %vm11786_vm5, %v11967_v25, -inf  ;;  %v11979_v28 = vld [vmem:[%s10760_s19 + $0xf8] sm:$0xff]  ;;  %s12002_s19 = sceil.f32 %s3920_s16 }
 0x2fa   :  { %v3577_v4 = vrot.slane %v3576_v23, 1  ;;  %v3601_v7 = vmax.f32 %v3599_v41, %v3600_v49  ;;  %v3541_v36 = vsel %vm11774_vm11, %v11973_v52, -inf  ;;  %v11984_v35 = vmax.f32 %v3592_v39, %v3593_v20  ;;  %s6200_s15 = scvt.f32.s32 %s12002_s19  ;;  %s12225_s19 = sld [smem:[#allocation4 + $0x3]] }
 0x2fb   :  { %v3609_v18 = vrot.slane %v3608_v5, 4  ;;  %v11986_v41 = vmax.f32 %v3549_v57, %v3550_v61  ;;  %v11988_v49 = vmax.f32 %v3558_v10, %v3559_v17  ;;  %v15615_v50 = vsel %vm11774_vm11, %v11855_v62, -inf }
 0x2fc   :  { %v3615_v31 = vsel %vm153_vm6, %v15615_v50, -inf  ;;  %v15616_v43 = vsel %vm11786_vm5, %v11861_v42, -inf  ;;  %v12004_v57 = vmax.f32 %v3567_v0, %v3568_v22  ;;  %v3586_v10 = vrot.slane %v3585_v60, 1  ;;  %s12080_s7 = sadd.s32 %s6200_s15, %s11426_s23 }
 0x2fd   :  { %v3616_v45 = vsel %vm153_vm6, %v15616_v43, -inf  ;;  %v3610_v39 = vmax.f32 %v3608_v5, %v3609_v18  ;;  %v12012_v62 = vmax.f32 %v3576_v23, %v3577_v4  ;;  %v3602_v42 = vrot.slane %v3601_v7, 2  ;;  %p3924_p5 = scmp.gt.s32.totalorder %s12080_s7, 0  ;;  %p5846_p2 = scmp.lt.s32.totalorder %s12080_s7, 16 }
 0x2fe   :  { %v3617_v61 = vmax.f32 %v3615_v31, %v3616_v45  ;;  %v15617_v17 = vsel %vm11774_vm11, %v11867_v40, -inf  ;;  %v15618_v0 = vsel %vm11786_vm5, %v11873_v14, -inf  ;;  %v15619_v45 = vsel %vm11774_vm11, %v11881_v11, -inf  ;;  %s4013_s15 = scalar_select %p4012_p12, %s12152_s14, 0 }
 0x2ff   :  { %v3624_v20 = vsel %vm153_vm6, %v15617_v17, -inf  ;;  %v3625_v22 = vsel %vm153_vm6, %v15618_v0, -inf  ;;  %v3633_v40 = vsel %vm153_vm6, %v15619_v45, -inf  ;;  %v15620_v14 = vsel %vm11786_vm5, %v11887_v6, -inf  ;;  %s12135_s10 = scalar_select %p3924_p5, %s12080_s7, 0 }
 0x300   :  { %v3618_v23 = vrot.slane %v3617_v61, 4  ;;  %v3626_v4 = vmax.f32 %v3624_v20, %v3625_v22  ;;  %v3634_v18 = vsel %vm153_vm6, %v15620_v14, -inf  ;;  %v15621_v50 = vsel %vm11774_vm11, %v11893_v58, -inf  ;;  %s16041_s15 = smov (!%p5855_p6, %s4013_s15), 16 }
 0x301   :  { %v3642_v31 = vsel %vm153_vm6, %v15621_v50, -inf  ;;  %v15622_v11 = vsel %vm11786_vm5, %v11900_v8, -inf  ;;  %v15623_v6 = vsel %vm11774_vm11, %v11906_v27, -inf  ;;  %v12056_v58 = vmax.f32 %v3585_v60, %v3586_v10  ;;  %s16039_s10 = smov (!%p5846_p2, %s12135_s10), 16  ;;  %p5860_p2 = scmp.lt.s32.totalorder %s12299_s9, 16 }
 0x302   :  { %v3643_v43 = vsel %vm153_vm6, %v15622_v11, -inf  ;;  %v3651_v17 = vsel %vm153_vm6, %v15623_v6, -inf  ;;  %v3611_v20 = vrot.slane %v3610_v39, 2  ;;  %v3619_v0 = vmax.f32 %v3617_v61, %v3618_v23  ;;  %p3936_p1 = scmp.le.s32.totalorder %s16039_s10, %s16037_s8 }
 0x303   :  { %v3627_v8 = vrot.slane %v3626_v4, 4  ;;  %v3603_v22 = vmax.f32 %v3601_v7, %v3602_v42  ;;  %v3635_v45 = vmax.f32 %v3633_v40, %v3634_v18  ;;  %v3644_v14 = vmax.f32 %v3642_v31, %v3643_v43  ;;  %s16043_s27 = smov (!%p5860_p2, %s12405_s27), 16 }
 0x304   :  { %v15624_v50 = vsel %vm11786_vm5, %v11912_v3, -inf  ;;  %v3620_v11 = vrot.slane %v3619_v0, 2  ;;  %v15625_v60 = vsel %vm11774_vm11, %v11918_v48, -inf  ;;  %v3661_v61 = vsel %vm153_vm6, %v3538_v46, -inf  ;;  %vm15662_vm11 = vmmov %vm15660_vm2  ;;  %p12360_p5 = por %p3936_p1, %p3075_p8  ;;  %p12391_p4 = por %p3936_p1, %p3279_p0 }
 0x305   :  { %v3652_v27 = vsel %vm153_vm6, %v15624_v50, -inf  ;;  %v3628_v6 = vmax.f32 %v3626_v4, %v3627_v8  ;;  %v3660_v10 = vsel %vm153_vm6, %v15625_v60, -inf  ;;  %v3636_v3 = vrot.slane %v3635_v45, 4  ;;  %p12442_p7 = por %p3936_p1, %p3483_p11  ;;  %p12487_p6 = por %p3936_p1, %p3687_p10 }
 0x306   :  { %v3653_v5 = vmax.f32 %v3651_v17, %v3652_v27  ;;  %v3645_v7 = vrot.slane %v3644_v14, 4  ;;  %v3669_v42 = vsel %vm153_vm6, %v3539_v12, -inf  ;;  %v3612_v48 = vmax.f32 %v3610_v39, %v3611_v20  ;;  %s3953_s1 = scalar_select %p12360_p5, 1, 0 }
 0x307   :  { %v3621_v23 = vmax.f32 %v3619_v0, %v3620_v11  ;;  %v3629_v4 = vrot.slane %v3628_v6, 2  ;;  %v3637_v18 = vmax.f32 %v3635_v45, %v3636_v3  ;;  %v3662_v43 = vmax.f32 %v3660_v10, %v3661_v61  ;;  %s3987_s16 = scalar_select %p12442_p7, 1, 0 }
 0x308   :  { %v3654_v40 = vrot.slane %v3653_v5, 4  ;;  %v3646_v31 = vmax.f32 %v3644_v14, %v3645_v7  ;;  %v3670_v46 = vsel %vm153_vm6, %v3540_v16, -inf  ;;  %v3604_v12 = vrot.slane %v3603_v22, 1  ;;  %p4032_p1 = scmp.le.s32.totalorder %s16043_s27, %s16041_s15 }
 0x309   :  { %v3630_v39 = vmax.f32 %v3628_v6, %v3629_v4  ;;  %v3671_v20 = vmax.f32 %v3669_v42, %v3670_v46  ;;  %v3638_v0 = vrot.slane %v3637_v18, 2  ;;  %v3663_v25 = vrot.slane %v3662_v43, 4 }
 0x30a   :  { %v3655_v17 = vmax.f32 %v3653_v5, %v3654_v40  ;;  %v3647_v8 = vrot.slane %v3646_v31, 2  ;;  %v3678_v16 = vsel %vm153_vm6, %v3541_v36, -inf  ;;  %v15627_v45 = vstv %s16033_s26  ;;  %s12332_s26 = sfloor.f32 %s4016_s28  ;;  %s4207_s28 = ssub.s32 %s12245_s3, %s12225_s19 }
 0x30b   :  { %vm12111_vm7 = vcmp.ge.s32.totalorder %v6499_v1, %v15627_v45  ;;  %v3613_v14 = vrot.slane %v3612_v48, 1  ;;  %v3622_v50 = vrot.slane %v3621_v23, 1  ;;  %v3672_v27 = vrot.slane %v3671_v20, 4  ;;  %s6206_s4 = scvt.f32.s32 %s12332_s26 }
 0x30c   :  { %v3656_v63 = vrot.slane %v3655_v17, 2  ;;  %v3639_v52 = vmax.f32 %v3637_v18, %v3638_v0  ;;  %v3648_v36 = vmax.f32 %v3646_v31, %v3647_v8  ;;  %v3664_v11 = vmax.f32 %v3662_v43, %v3663_v25 }
 0x30d   :  { %v15631_v6 = vsel %vm11786_vm5, %v11979_v28, -inf  ;;  %v3631_v10 = vrot.slane %v3630_v39, 1  ;;  %v3673_v7 = vmax.f32 %v3671_v20, %v3672_v27  ;;  %v15632_v42 = vrot.slane %v11984_v35, 1  ;;  %s12429_s26 = sadd.s32 %s6206_s4, %s11426_s23 }
 0x30e   :  { %v3679_v60 = vsel %vm153_vm6, %v15631_v6, -inf  ;;  %v3657_v3 = vmax.f32 %v3655_v17, %v3656_v63  ;;  %v3640_v28 = vrot.slane %v3639_v52, 1  ;;  %v3649_v4 = vrot.slane %v3648_v36, 1  ;;  %v15641_v63 = vld [vmem:[#allocation11_spill] sm:$0xff]  ;;  %s3970_s4 = scalar_select %p12391_p4, 1, 0 }
 0x30f   :  { %v3680_v61 = vmax.f32 %v3678_v16, %v3679_v60  ;;  %v12143_v59 = vmax.f32 %v11984_v35, %v15632_v42  ;;  %v3665_v40 = vrot.slane %v3664_v11, 2  ;;  %v12147_v18 = vmax.f32 %v3603_v22, %v3604_v12  ;;  %v15638_v16 = vld [vmem:[#allocation21_spill] sm:$0xff]  ;;  %p4108_p12 = scmp.gt.s32.totalorder %s12429_s26, 0  ;;  %p5869_p9 = scmp.lt.s32.totalorder %s12429_s26, 16 }
 0x310   :  { %v3674_v31 = vrot.slane %v3673_v7, 2  ;;  %v3706_v46 = vstv %s16035_s24  ;;  %v12154_v35 = vmax.f32 %v3612_v48, %v3613_v14  ;;  %v12156_v17 = vmax.f32 %v3621_v23, %v3622_v50  ;;  %v15640_v50 = vld [vmem:[#allocation13_spill] sm:$0xff]  ;;  %s3908_s24 = scalar_select %p12294_p3, 1, 0 }
 0x311   :  { %v3681_v43 = vrot.slane %v3680_v61, 4  ;;  %v3658_v20 = vrot.slane %v3657_v3, 1  ;;  %v3666_v0 = vmax.f32 %v3664_v11, %v3665_v40  ;;  %v12163_v22 = vmax.f32 %v3630_v39, %v3631_v10  ;;  %v15645_v11 = vld [vmem:[#allocation26_spill] sm:$0xff]  ;;  %v15646_v60 = vld [vmem:[#allocation33_spill] sm:$0xff]  ;;  %v15655_v39 = vld [vmem:[#allocation32_spill] sm:$0xff]  ;;  %p12599_p3 = por %p4032_p1, %p3075_p8 }
 0x312   :  { %v12165_v12 = vmax.f32 %v3639_v52, %v3640_v28  ;;  %v3675_v8 = vmax.f32 %v3673_v7, %v3674_v31  ;;  %v15633_v25 = vmov %v15627_v45  ;;  %v12180_v23 = vmax.f32 %v3648_v36, %v3649_v4  ;;  %v15639_v45 = vld [vmem:[#allocation31_spill] sm:$0xff]  ;;  %v15647_v28 = vld [vmem:[#allocation28_spill] sm:$0xff]  ;;  %v15648_v4 = vld [vmem:[#allocation30_spill] sm:$0xff] }
 0x313   :  { %vm12172_vm8 = vcmp.ge.s32.totalorder %v6508_v2, %v15633_v25  ;;  %vm12183_vm4 = vcmp.lt.s32.totalorder %v6499_v1, %v3706_v46  ;;  %v3732_v14 = vsel %vm955_vm12, %v15639_v45, %v15638_v16  ;;  %v3739_v27 = vsel %vm955_vm12, %v15641_v63, %v15640_v50  ;;  %v15657_v63 = vld [vmem:[#allocation35_spill] sm:$0xff] }
 0x314   :  { %v3682_v52 = vmax.f32 %v3680_v61, %v3681_v43  ;;  %vm12205_vm10 = vcmp.lt.s32.totalorder %v6508_v2, %v3706_v46  ;;  %v3733_v6 = vsel %vm957_vm13, %v15645_v11, %v3732_v14  ;;  %v3740_v10 = vsel %vm957_vm13, %v15646_v60, %v3739_v27  ;;  %vm12231_vm0 = vmand %vm12111_vm7, %vm12183_vm4  ;;  %v15651_v43 = vld [vmem:[#allocation9_spill] sm:$0xff]  ;;  %v15656_v14 = vld [vmem:[#allocation12_spill] sm:$0xff] }
 0x315   :  { %v12218_v7 = vmax.f32 %v3657_v3, %v3658_v20  ;;  %v3667_v42 = vrot.slane %v3666_v0, 1  ;;  %v3734_v61 = vsel %vm959_vm14, %v15647_v28, %v3733_v6  ;;  %v3741_v40 = vsel %vm959_vm14, %v15648_v4, %v3740_v10  ;;  %v15652_v20 = vld [vmem:[#allocation14_spill] sm:$0xff]  ;;  %vm12251_vm3 = vmand %vm12172_vm8, %vm12205_vm10  ;;  %v15658_v27 = vld [vmem:[#allocation16_spill] sm:$0xff] }
 0x316   :  { %v3676_v31 = vrot.slane %v3675_v8, 1  ;;  %v3735_v46 = vsel %vm961_vm15, %v15651_v43, %v3734_v61  ;;  %v3742_v25 = vsel %vm961_vm15, %v15652_v20, %v3741_v40  ;;  %v12242_v16 = vstv %s3760_s30  ;;  %v15659_v6 = vld [vmem:[#allocation10_spill] sm:$0xff]  ;;  %v15663_v61 = vld [vmem:[#allocation36_spill] sm:$0xff]  ;;  %v15664_v40 = vld [vmem:[#allocation29_spill] sm:$0xff] }
 0x317   :  { %v3736_v45 = vsel %vm963_vm1, %v15655_v39, %v3735_v46  ;;  %v3743_v50 = vsel %vm963_vm1, %v15656_v14, %v3742_v25  ;;  %v3782_v36 = vsel %vm955_vm12, %v15658_v27, %v15657_v63  ;;  %v3789_v48 = vsel %vm955_vm12, %v11495_v32, %v11493_v26  ;;  %v15661_v10 = vld [vmem:[#allocation34_spill] sm:$0xff]  ;;  %v15666_v32 = vld [vmem:[#allocation15_spill] sm:$0xff]  ;;  %v15668_v46 = vld [vmem:[#allocation17_spill] sm:$0xff] }
 0x318   :  { %v3683_v11 = vrot.slane %v3682_v52, 2  ;;  %v3737_v60 = vsel %vm15660_vm2, %v15659_v6, %v3736_v45  ;;  %v3744_v28 = vsel %vm15662_vm11, %v15661_v10, %v3743_v50  ;;  %v3783_v4 = vsel %vm957_vm13, %v15663_v61, %v3782_v36  ;;  %vm15670_vm8 = vmmov %vm15660_vm2 }
 0x319   :  { %vm15665_vm5 = vcmask 1047559   ;;  %v3784_v20 = vsel %vm959_vm14, %v15668_v46, %v3783_v4  ;;  %v3790_v25 = vsel %vm957_vm13, %v11497_v34, %v3789_v48  ;;  %v12301_v39 = vmax.f32 %v3666_v0, %v3667_v42  ;;  %vm15672_vm10 = vmmov %vm15660_vm2  ;;  %v15679_v4 = vld [vmem:[#allocation24_spill] sm:$0xff] }
 0x31a   :  { %v12278_v26 = vsel %vm15665_vm5, %v15664_v40, %v3737_v60  ;;  %vm15667_vm7 = vmmov %vm15665_vm5  ;;  %v3785_v14 = vsel %vm961_vm15, %v11449_v55, %v3784_v20  ;;  %v3791_v42 = vsel %vm959_vm14, %v11505_v33, %v3790_v25  ;;  %v12323_v55 = vmax.f32 %v3675_v8, %v3676_v31  ;;  %v15682_v20 = vld [vmem:[#allocation27_spill] sm:$0xff] }
 0x31b   :  { %v12282_v43 = vsel %vm15667_vm7, %v15666_v32, %v3744_v28  ;;  %v3748_v45 = vsel %vm12231_vm0, %v12278_v26, -inf  ;;  %v3786_v0 = vsel %vm963_vm1, %v11479_v30, %v3785_v14  ;;  %v3792_v48 = vsel %vm961_vm15, %v11507_v19, %v3791_v42  ;;  %vm15671_vm4 = vmmov %vm15665_vm5  ;;  %v15677_v28 = vld [vmem:[#allocation18_spill] sm:$0xff]  ;;  %v15680_v32 = vld [vmem:[#allocation19_spill] sm:$0xff] }
 0x31c   :  { %v3749_v34 = vsel %vm12251_vm3, %v12282_v43, -inf  ;;  %v3750_v50 = vsel %vm153_vm6, %v3748_v45, -inf  ;;  %v3787_v36 = vsel %vm15670_vm8, %v11482_v13, %v3786_v0  ;;  %v12334_v30 = vmax.f32 %v3682_v52, %v3683_v11  ;;  %vm15674_vm11 = vmmov %vm15671_vm4 }
 0x31d   :  { %v3751_v63 = vsel %vm153_vm6, %v3749_v34, -inf  ;;  %v12338_v33 = vsel %vm15671_vm4, %v11484_v15, %v3787_v36  ;;  %v3793_v8 = vsel %vm963_vm1, %v11510_v37, %v3792_v48  ;;  %v3831_v13 = vsel %vm955_vm12, %v11646_v38, %v11644_v21  ;;  %vm15678_vm5 = vmmov %vm15670_vm8 }
 0x31e   :  { %v3752_v27 = vmax.f32 %v3750_v50, %v3751_v63  ;;  %v3794_v52 = vsel %vm15672_vm10, %v11531_v51, %v3793_v8  ;;  %v3798_v15 = vsel %vm12231_vm0, %v12338_v33, -inf  ;;  %v3832_v37 = vsel %vm957_vm13, %v11661_v44, %v3831_v13  ;;  %vm15681_vm7 = vmmov %vm15671_vm4  ;;  %v15683_v50 = vld [vmem:[#allocation20_spill] sm:$0xff] }
 0x31f   :  { %vm3762_vm2 = vcmp.eq.s32.totalorder %v12242_v16, 1  ;;  %v12367_v21 = vsel %vm15674_vm11, %v11568_v53, %v3794_v52  ;;  %v3800_v51 = vsel %vm153_vm6, %v3798_v15, -inf  ;;  %v3833_v38 = vsel %vm959_vm14, %v11684_v54, %v3832_v37  ;;  %vm15684_vm8 = vmmov %vm15678_vm5 }
 0x320   :  { %v3753_v19 = vrot.slane %v3752_v27, 4  ;;  %v3838_v44 = vsel %vm955_vm12, %v11778_v24, %v11770_v9  ;;  %v3799_v53 = vsel %vm12251_vm3, %v12367_v21, -inf  ;;  %v3834_v11 = vsel %vm961_vm15, %v11699_v29, %v3833_v38  ;;  %v15676_v29 = vld [vmem:[#allocation23_spill] sm:$0xff]  ;;  %vm15688_vm10 = vmmov %vm15678_vm5 }
 0x321   :  { %v3839_v6 = vsel %vm957_vm13, %v11780_v56, %v3838_v44  ;;  %v3685_v54 = vrot.slane %v12334_v30, 1  ;;  %v3801_v9 = vsel %vm153_vm6, %v3799_v53, -inf  ;;  %v3835_v24 = vsel %vm963_vm1, %v11758_v47, %v3834_v11  ;;  %vm15689_vm11 = vmmov %vm15671_vm4 }
 0x322   :  { %v3754_v31 = vmax.f32 %v3752_v27, %v3753_v19  ;;  %v3840_v60 = vsel %vm959_vm14, %v15676_v29, %v3839_v6  ;;  %v3802_v10 = vmax.f32 %v3800_v51, %v3801_v9  ;;  %v3836_v61 = vsel %vm15678_vm5, %v15677_v28, %v3835_v24 }
 0x323   :  { %v3841_v40 = vsel %vm961_vm15, %v15679_v4, %v3840_v60  ;;  %v12416_v47 = vstv %s3810_s20  ;;  %v12420_v46 = vsel %vm15681_vm7, %v15680_v32, %v3836_v61  ;;  %v3880_v45 = vsel %vm955_vm12, %v11988_v49, %v11986_v41  ;;  %s12446_s20 = sceil.f32 %s4112_s2  ;;  %v15686_v41 = vld [vmem:[#allocation25_spill] sm:$0xff]  ;;  %s12469_s2 = sadd.s32 1, %s4207_s28 }
 0x324   :  { %v3755_v56 = vrot.slane %v3754_v31, 2  ;;  %v3842_v25 = vsel %vm963_vm1, %v15682_v20, %v3841_v40  ;;  %v3803_v14 = vrot.slane %v3802_v10, 4  ;;  %v3847_v0 = vsel %vm12231_vm0, %v12420_v46, -inf  ;;  %s6208_s28 = scvt.f32.s32 %s12446_s20  ;;  %p4209_p13 = scmp.gt.s32.totalorder %s12469_s2, 1 }
 0x325   :  { %v3843_v63 = vsel %vm15684_vm8, %v15683_v50, %v3842_v25  ;;  %v3849_v42 = vsel %vm153_vm6, %v3847_v0, -inf  ;;  %v3881_v27 = vsel %vm957_vm13, %v12004_v57, %v3880_v45  ;;  %v3887_v36 = vsel %vm955_vm12, %v12163_v22, %v12156_v17 }
 0x326   :  { %v3756_v34 = vmax.f32 %v3754_v31, %v3755_v56  ;;  %v12450_v49 = vsel %vm15671_vm4, %v15686_v41, %v3843_v63  ;;  %v3804_v8 = vmax.f32 %v3802_v10, %v3803_v14  ;;  %v3882_v19 = vsel %vm959_vm14, %v12012_v62, %v3881_v27  ;;  %s12529_s9 = sadd.s32 %s6208_s28, %s11426_s23  ;;  %s16047_s2 = smov (!%p4209_p13, %s12469_s2), 1 }
 0x327   :  { %v3848_v13 = vsel %vm12251_vm3, %v12450_v49, -inf  ;;  %v12475_v17 = vstv %s3859_s13  ;;  %v3883_v22 = vsel %vm961_vm15, %v12056_v58, %v3882_v19  ;;  %v3888_v52 = vsel %vm957_vm13, %v12165_v12, %v3887_v36  ;;  %s4109_s13 = scalar_select %p4108_p12, %s12429_s26, 0 }
 0x328   :  { %v3757_v48 = vrot.slane %v3756_v34, 1  ;;  %v3850_v57 = vsel %vm153_vm6, %v3848_v13, -inf  ;;  %v3805_v15 = vrot.slane %v3804_v8, 2  ;;  %v3884_v51 = vsel %vm963_vm1, %v12143_v59, %v3883_v22  ;;  %s4004_s23 = scalar_select %p12487_p6, 1, 0 }
 0x329   :  { %v3851_v37 = vmax.f32 %v3849_v42, %v3850_v57  ;;  %v3686_v58 = vmax.f32 %v12334_v30, %v3685_v54  ;;  %v3885_v12 = vsel %vm15688_vm10, %v12147_v18, %v3884_v51  ;;  %v3889_v38 = vsel %vm959_vm14, %v12180_v23, %v3888_v52  ;;  %p4116_p2 = scmp.gt.s32.totalorder %s12529_s9, 0  ;;  %s16045_s13 = smov (!%p5869_p9, %s4109_s13), 16 }
 0x32a   :  { %v3758_v62 = vmax.f32 %v3756_v34, %v3757_v48  ;;  %v3928_v44 = vstv %s16037_s8  ;;  %v3806_v59 = vmax.f32 %v3804_v8, %v3805_v15  ;;  %v12511_v30 = vsel %vm15689_vm11, %v12154_v35, %v3885_v12  ;;  %p5874_p5 = scmp.lt.s32.totalorder %s12529_s9, 16  ;;  %p12638_p12 = por %p4032_p1, %p3279_p0 }
 0x32b   :  { %v3852_v53 = vrot.slane %v3851_v37, 4  ;;  %vm3812_vm5 = vcmp.eq.s32.totalorder %v12416_v47, 1  ;;  %v3890_v18 = vsel %vm961_vm15, %v12218_v7, %v3889_v38  ;;  %v3896_v35 = vsel %vm12231_vm0, %v12511_v30, -inf  ;;  %vm15692_vm0 = vmmov %vm15684_vm8  ;;  %s4117_s30 = scalar_select %p4116_p2, %s12529_s9, 0 }
 0x32c   :  { %v3763_v31 = vsel %vm3762_vm2, 0.0, %v3758_v62  ;;  %vm3861_vm2 = vcmp.eq.s32.totalorder %v12475_v17, 1  ;;  %v3807_v23 = vrot.slane %v3806_v59, 1  ;;  %v3891_v11 = vsel %vm963_vm1, %v12301_v39, %v3890_v18  ;;  %s4049_s26 = scalar_select %p12599_p3, 1, 0 }
 0x32d   :  { %5837 = vst.msk [vmem:[%s15063_s6 + $0x20] sm:$0x1] %vm994_vm9, %v3763_v31  ;;  %v3853_v16 = vmax.f32 %v3851_v37, %v3852_v53  ;;  %vm12534_vm7 = vcmp.ge.s32.totalorder %v6499_v1, %v3928_v44  ;;  %v3892_v7 = vsel %vm15692_vm0, %v12323_v55, %v3891_v11  ;;  %v3898_v3 = vsel %vm153_vm6, %v3896_v35, -inf  ;;  %p12661_p9 = por %p4032_p1, %p3483_p11  ;;  %s4215_s20 = scvt.s32.f32 %s16047_s2 }
 0x32e   :  { %vm12545_vm8 = vcmp.ge.s32.totalorder %v6508_v2, %v3928_v44  ;;  %v3931_v39 = vstv %s16039_s10  ;;  %v3808_v9 = vmax.f32 %v3806_v59, %v3807_v23  ;;  %v12553_v29 = vsel %vm15671_vm4, %v3686_v58, %v3892_v7  ;;  %s16049_s30 = smov (!%p5874_p5, %s4117_s30), 16  ;;  %p12709_p13 = por %p4032_p1, %p3687_p10 }
 0x32f   :  { %v3854_v24 = vrot.slane %v3853_v16, 2  ;;  %vm3932_vm10 = vcmp.lt.s32.totalorder %v6499_v1, %v3931_v39  ;;  %v3897_v55 = vsel %vm12251_vm3, %v12553_v29, -inf  ;;  %v12563_v60 = vstv %s3908_s24  ;;  %s4066_s2 = scalar_select %p12638_p12, 1, 0 }
 0x330   :  { %vm3933_vm11 = vcmp.lt.s32.totalorder %v6508_v2, %v3931_v39  ;;  %vm12568_vm0 = vmand %vm12534_vm7, %vm3932_vm10  ;;  %v12575_v10 = vstv %s3953_s1  ;;  %v3813_v5 = vsel %vm3812_vm5, 0.0, %v3808_v9  ;;  %v3899_v61 = vsel %vm153_vm6, %v3897_v55, -inf  ;;  %p4128_p4 = scmp.le.s32.totalorder %s16049_s30, %s16045_s13  ;;  %s12690_s8 = smul.f32 0.25, %s4215_s20 }
 0x331   :  { %v3855_v28 = vmax.f32 %v3853_v16, %v3854_v24  ;;  %vm12586_vm3 = vmand %vm12545_vm8, %vm3933_vm11  ;;  %v3941_v40 = vsel %vm12568_vm0, %v12278_v26, -inf  ;;  %5838 = vst.msk [vmem:[%s15063_s6 + $0x21] sm:$0x1] %vm994_vm9, %v3813_v5  ;;  %v3900_v47 = vmax.f32 %v3898_v3, %v3899_v61  ;;  %v3958_v25 = vsel %vm12568_vm0, %v12338_v33, -inf  ;;  %s4083_s9 = scalar_select %p12661_p9, 1, 0 }
 0x332   :  { %v3942_v32 = vsel %vm12586_vm3, %v12282_v43, -inf  ;;  %v3943_v20 = vsel %vm153_vm6, %v3941_v40, -inf  ;;  %v3959_v14 = vsel %vm12586_vm3, %v12367_v21, -inf  ;;  %v3960_v50 = vsel %vm153_vm6, %v3958_v25, -inf  ;;  %p12725_p7 = por %p4128_p4, %p3075_p8  ;;  %s4257_s29 = smul.f32 0.0, %s12690_s8 }
 0x333   :  { %v3856_v45 = vrot.slane %v3855_v28, 1  ;;  %v3944_v34 = vsel %vm153_vm6, %v3942_v32, -inf  ;;  %v3901_v63 = vrot.slane %v3900_v47, 4  ;;  %v3961_v41 = vsel %vm153_vm6, %v3959_v14, -inf  ;;  %p12747_p8 = por %p4128_p4, %p3279_p0  ;;  %p12783_p0 = por %p4128_p4, %p3483_p11 }
 0x334   :  { %v3945_v0 = vmax.f32 %v3943_v20, %v3944_v34  ;;  %v3975_v42 = vsel %vm12568_vm0, %v12420_v46, -inf  ;;  %vm3910_vm5 = vcmp.eq.s32.totalorder %v12563_v60, 1  ;;  %v3962_v36 = vmax.f32 %v3960_v50, %v3961_v41  ;;  %s4100_s17 = scalar_select %p12709_p13, 1, 0 }
 0x335   :  { %v3857_v27 = vmax.f32 %v3855_v28, %v3856_v45  ;;  %v3976_v48 = vsel %vm12586_vm3, %v12450_v49, -inf  ;;  %v3977_v8 = vsel %vm153_vm6, %v3975_v42, -inf  ;;  %v3902_v13 = vmax.f32 %v3900_v47, %v3901_v63  ;;  %s4162_s25 = scalar_select %p12747_p8, 1, 0 }
 0x336   :  { %v3946_v19 = vrot.slane %v3945_v0, 4  ;;  %v12652_v57 = vstv %s3970_s4  ;;  %v3978_v22 = vsel %vm153_vm6, %v3976_v48, -inf  ;;  %vm3955_vm7 = vcmp.eq.s32.totalorder %v12575_v10, 1  ;;  %s4265_s14 = sceil.f32 %s12690_s8  ;;  %p12975_p5 = por %p4128_p4, %p3687_p10 }
 0x337   :  { %v3862_v52 = vsel %vm3861_vm2, 0.0, %v3857_v27  ;;  %v3963_v62 = vrot.slane %v3962_v36, 4  ;;  %v3979_v15 = vmax.f32 %v3977_v8, %v3978_v22  ;;  %v3903_v37 = vrot.slane %v3902_v13, 2  ;;  %s4179_s10 = scalar_select %p12783_p0, 1, 0 }
 0x338   :  { %5839 = vst.msk [vmem:[%s15063_s6 + $0x22] sm:$0x1] %vm994_vm9, %v3862_v52  ;;  %v3947_v51 = vmax.f32 %v3945_v0, %v3946_v19  ;;  %v3992_v17 = vsel %vm12568_vm0, %v12511_v30, -inf  ;;  %v3993_v58 = vsel %vm12586_vm3, %v12553_v29, -inf  ;;  %vm3972_vm2 = vcmp.eq.s32.totalorder %v12652_v57, 1  ;;  %s6212_s22 = scvt.f32.s32 %s4265_s14 }
 0x339   :  { %v3964_v12 = vmax.f32 %v3962_v36, %v3963_v62  ;;  %v3980_v38 = vrot.slane %v3979_v15, 4  ;;  %v3994_v44 = vsel %vm153_vm6, %v3992_v17, -inf  ;;  %v3995_v31 = vsel %vm153_vm6, %v3993_v58, -inf }
 0x33a   :  { %v3904_v59 = vmax.f32 %v3902_v13, %v3903_v37  ;;  %v3948_v53 = vrot.slane %v3947_v51, 2  ;;  %v3996_v18 = vmax.f32 %v3994_v44, %v3995_v31  ;;  %v3988_v16 = vstv %s3987_s16  ;;  %s12787_s16 = sfloor.f32 %s4257_s29  ;;  %s12860_s11 = sadd.s32 %s6212_s22, %s12225_s19 }
 0x33b   :  { %v3965_v35 = vrot.slane %v3964_v12, 2  ;;  %v3981_v23 = vmax.f32 %v3979_v15, %v3980_v38  ;;  %v4024_v11 = vstv %s16041_s15  ;;  %v4027_v55 = vstv %s16043_s27  ;;  %s4145_s27 = scalar_select %p12725_p7, 1, 0 }
 0x33c   :  { %v3905_v6 = vrot.slane %v3904_v59, 1  ;;  %v3949_v7 = vmax.f32 %v3947_v51, %v3948_v53  ;;  %v3997_v3 = vrot.slane %v3996_v18, 4  ;;  %vm12699_vm8 = vcmp.ge.s32.totalorder %v6499_v1, %v4024_v11  ;;  %s6210_s4 = scvt.f32.s32 %s12787_s16  ;;  %s4468_s16 = smul.f32 2.0, %s12690_s8 }
 0x33d   :  { %v3966_v39 = vmax.f32 %v3964_v12, %v3965_v35  ;;  %v3982_v9 = vrot.slane %v3981_v23, 2  ;;  %vm12714_vm4 = vcmp.ge.s32.totalorder %v6508_v2, %v4024_v11  ;;  %vm4028_vm10 = vcmp.lt.s32.totalorder %v6499_v1, %v4027_v55  ;;  %p4268_p6 = scmp.gt.s32.totalorder %s12860_s11, 0  ;;  %p5894_p2 = scmp.lt.s32.totalorder %s12860_s11, 16 }
 0x33e   :  { %v3906_v56 = vmax.f32 %v3904_v59, %v3905_v6  ;;  %v3950_v5 = vrot.slane %v3949_v7, 1  ;;  %v3998_v28 = vmax.f32 %v3996_v18, %v3997_v3  ;;  %v4005_v40 = vstv %s4004_s23  ;;  %vm12737_vm0 = vmand %vm12699_vm8, %vm4028_vm10  ;;  %s12852_s1 = sadd.s32 %s6210_s4, %s12225_s19  ;;  %s12873_s20 = sceil.f32 %s4468_s16 }
 0x33f   :  { %v3967_v61 = vrot.slane %v3966_v39, 1  ;;  %v3983_v4 = vmax.f32 %v3981_v23, %v3982_v9  ;;  %vm4029_vm11 = vcmp.lt.s32.totalorder %v6508_v2, %v4027_v55  ;;  %v4037_v34 = vsel %vm12737_vm0, %v12278_v26, -inf  ;;  %p4261_p11 = scmp.gt.s32.totalorder %s12852_s1, 0  ;;  %s6216_s14 = scvt.f32.s32 %s12873_s20 }
 0x340   :  { %v3911_v32 = vsel %vm3910_vm5, 0.0, %v3906_v56  ;;  %v3951_v20 = vmax.f32 %v3949_v7, %v3950_v5  ;;  %v3999_v25 = vrot.slane %v3998_v28, 2  ;;  %vm12755_vm3 = vmand %vm12714_vm4, %vm4029_vm11  ;;  %v4039_v63 = vsel %vm153_vm6, %v4037_v34, -inf  ;;  %p5889_p1 = scmp.lt.s32.totalorder %s12852_s1, 16 }
 0x341   :  { %5840 = vst.msk [vmem:[%s15063_s6 + $0x23] sm:$0x1] %vm994_vm9, %v3911_v32  ;;  %v3968_v60 = vmax.f32 %v3966_v39, %v3967_v61  ;;  %v3984_v14 = vrot.slane %v3983_v4, 1  ;;  %v4038_v50 = vsel %vm12755_vm3, %v12282_v43, -inf  ;;  %vm3989_vm5 = vcmp.eq.s32.totalorder %v3988_v16, 1  ;;  %s12910_s7 = scalar_select %p4261_p11, %s12852_s1, 0 }
 0x342   :  { %v3956_v0 = vsel %vm3955_vm7, 0.0, %v3951_v20  ;;  %v4000_v41 = vmax.f32 %v3998_v28, %v3999_v25  ;;  %v4040_v42 = vsel %vm153_vm6, %v4038_v50, -inf  ;;  %v4054_v48 = vsel %vm12737_vm0, %v12338_v33, -inf  ;;  %s12933_s21 = scalar_select %p4268_p6, %s12860_s11, 0 }
 0x343   :  { %5851 = vst.msk [vmem:[%s15063_s6 + $0x24] sm:$0x1] %vm994_vm9, %v3956_v0  ;;  %v3973_v10 = vsel %vm3972_vm2, 0.0, %v3968_v60  ;;  %v3985_v27 = vmax.f32 %v3983_v4, %v3984_v14  ;;  %v4041_v36 = vmax.f32 %v4039_v63, %v4040_v42  ;;  %vm4006_vm7 = vcmp.eq.s32.totalorder %v4005_v40, 1  ;;  %s12939_s22 = sadd.s32 %s6216_s14, %s12225_s19  ;;  %s16051_s7 = smov (!%p5889_p1, %s12910_s7), 16 }
 0x344   :  { %5852 = vst.msk [vmem:[%s15063_s6 + $0x25] sm:$0x1] %vm994_vm9, %v3973_v10  ;;  %v4001_v8 = vrot.slane %v4000_v41, 1  ;;  %v4055_v13 = vsel %vm12755_vm3, %v12367_v21, -inf  ;;  %v4056_v19 = vsel %vm153_vm6, %v4054_v48, -inf  ;;  %v12813_v52 = vstv %s4049_s26  ;;  %s12831_s26 = sld [smem:[#allocation3 + $0x3]] }
 0x345   :  { %v3990_v57 = vsel %vm3989_vm5, 0.0, %v3985_v27  ;;  %v4042_v22 = vrot.slane %v4041_v36, 4  ;;  %v4057_v62 = vsel %vm153_vm6, %v4055_v13, -inf  ;;  %v4071_v51 = vsel %vm12737_vm0, %v12420_v46, -inf  ;;  %p4472_p12 = scmp.gt.s32.totalorder %s12939_s22, 0  ;;  %s16053_s21 = smov (!%p5894_p2, %s12933_s21), 16 }
 0x346   :  { %5853 = vst.msk [vmem:[%s15063_s6 + $0x26] sm:$0x1] %vm994_vm9, %v3990_v57  ;;  %v4002_v15 = vmax.f32 %v4000_v41, %v4001_v8  ;;  %v4058_v37 = vmax.f32 %v4056_v19, %v4057_v62  ;;  %v4072_v17 = vsel %vm12755_vm3, %v12450_v49, -inf  ;;  %v4073_v12 = vsel %vm153_vm6, %v4071_v51, -inf  ;;  %p5904_p9 = scmp.lt.s32.totalorder %s12939_s22, 16  ;;  %s13614_s1 = sld [smem:[#allocation5 + $0x3]] }
 0x347   :  { %v4043_v58 = vmax.f32 %v4041_v36, %v4042_v22  ;;  %v4074_v38 = vsel %vm153_vm6, %v4072_v17, -inf  ;;  %v12837_v59 = vstv %s4066_s2  ;;  %vm4051_vm2 = vcmp.eq.s32.totalorder %v12813_v52, 1  ;;  %s4461_s2 = sfloor.f32 %s12690_s8 }
 0x348   :  { %v4007_v44 = vsel %vm4006_vm7, 0.0, %v4002_v15  ;;  %v4059_v31 = vrot.slane %v4058_v37, 4  ;;  %v4075_v53 = vmax.f32 %v4073_v12, %v4074_v38  ;;  %v4088_v35 = vsel %vm12737_vm0, %v12511_v30, -inf  ;;  %s6214_s28 = scvt.f32.s32 %s4461_s2 }
 0x349   :  { %5854 = vst.msk [vmem:[%s15063_s6 + $0x27] sm:$0x1] %vm994_vm9, %v4007_v44  ;;  %v4044_v18 = vrot.slane %v4043_v58, 2  ;;  %v4089_v23 = vsel %vm12755_vm3, %v12553_v29, -inf  ;;  %v4090_v6 = vsel %vm153_vm6, %v4088_v35, -inf  ;;  %vm4068_vm8 = vcmp.eq.s32.totalorder %v12837_v59, 1 }
 0x34a   :  { %v4060_v16 = vmax.f32 %v4058_v37, %v4059_v31  ;;  %v4076_v11 = vrot.slane %v4075_v53, 4  ;;  %v4091_v7 = vsel %vm153_vm6, %v4089_v23, -inf  ;;  %v4120_v39 = vstv %s16045_s13  ;;  %s4196_s15 = scalar_select %p12975_p5, 1, 0 }
 0x34b   :  { %v4045_v3 = vmax.f32 %v4043_v58, %v4044_v18  ;;  %v4092_v54 = vmax.f32 %v4090_v6, %v4091_v7  ;;  %v4084_v55 = vstv %s4083_s9  ;;  %vm12866_vm4 = vcmp.ge.s32.totalorder %v6499_v1, %v4120_v39  ;;  %s5888_s9 = sshll.u32 %s12831_s26, 8  ;;  %s13622_s13 = sld [smem:[#allocation7 + $0x3]] }
 0x34c   :  { %v4061_v9 = vrot.slane %v4060_v16, 2  ;;  %v4077_v24 = vmax.f32 %v4075_v53, %v4076_v11  ;;  %vm12876_vm10 = vcmp.ge.s32.totalorder %v6508_v2, %v4120_v39  ;;  %v4123_v4 = vstv %s16049_s30  ;;  %s12948_s2 = scalar_lea.vmem %s15062_s5, %s5888_s9 }
 0x34d   :  { %v4046_v5 = vrot.slane %v4045_v3, 1  ;;  %v4093_v28 = vrot.slane %v4092_v54, 4  ;;  %vm4124_vm11 = vcmp.lt.s32.totalorder %v6499_v1, %v4123_v4  ;;  %vm4125_vm0 = vcmp.lt.s32.totalorder %v6508_v2, %v4123_v4  ;;  %s4473_s30 = scalar_select %p4472_p12, %s12939_s22, 0  ;;  %v13060_v14 = vld [vmem:[%s12948_s2 + $0x20] sm:$0xff]  ;;  %v13184_v39 = vld [vmem:[%s12948_s2 + $0xb8] sm:$0xff] }
 0x34e   :  { %v4062_v40 = vmax.f32 %v4060_v16, %v4061_v9  ;;  %v4078_v47 = vrot.slane %v4077_v24, 2  ;;  %vm4085_vm3 = vcmp.eq.s32.totalorder %v4084_v55, 1  ;;  %v4101_v25 = vstv %s4100_s17  ;;  %vm12889_vm5 = vmand %vm12866_vm4, %vm4124_vm11  ;;  %s12920_s17 = sadd.s32 %s6214_s28, %s12225_s19  ;;  %s4672_s22 = smul.f32 3.0, %s12690_s8 }
 0x34f   :  { %v4047_v32 = vmax.f32 %v4045_v3, %v4046_v5  ;;  %v4094_v20 = vmax.f32 %v4092_v54, %v4093_v28  ;;  %vm12897_vm7 = vmand %vm12876_vm10, %vm4125_vm0  ;;  %v4133_v50 = vsel %vm12889_vm5, %v12278_v26, -inf  ;;  %v4150_v63 = vsel %vm12889_vm5, %v12338_v33, -inf  ;;  %p4464_p3 = scmp.gt.s32.totalorder %s12920_s17, 0  ;;  %p5899_p10 = scmp.lt.s32.totalorder %s12920_s17, 16 }
 0x350   :  { %v4063_v34 = vrot.slane %v4062_v40, 1  ;;  %v4079_v60 = vmax.f32 %v4077_v24, %v4078_v47  ;;  %v4134_v42 = vsel %vm12897_vm7, %v12282_v43, -inf  ;;  %v4135_v10 = vsel %vm153_vm6, %v4133_v50, -inf  ;;  %v13046_v47 = vld [vmem:[%s12948_s2 + $0x8] sm:$0xff]  ;;  %s16057_s30 = smov (!%p5904_p9, %s4473_s30), 16  ;;  %s13520_s23 = sceil.f32 %s4672_s22 }
 0x351   :  { %v4052_v0 = vsel %vm4051_vm2, 0.0, %v4047_v32  ;;  %v4095_v41 = vrot.slane %v4094_v20, 2  ;;  %v4136_v27 = vsel %vm153_vm6, %v4134_v42, -inf  ;;  %v4151_v43 = vsel %vm12897_vm7, %v12367_v21, -inf  ;;  %s4465_s18 = scalar_select %p4464_p3, %s12920_s17, 0  ;;  %v13063_v50 = vld [vmem:[%s12948_s2 + $0x28] sm:$0xff] }
 0x352   :  { %5865 = vst.msk [vmem:[%s15063_s6 + $0x28] sm:$0x1] %vm994_vm9, %v4052_v0  ;;  %v4064_v26 = vmax.f32 %v4062_v40, %v4063_v34  ;;  %v4080_v33 = vrot.slane %v4079_v60, 1  ;;  %v4137_v48 = vmax.f32 %v4135_v10, %v4136_v27  ;;  %v4152_v8 = vsel %vm153_vm6, %v4150_v63, -inf  ;;  %v13043_v40 = vld [vmem:[%s12948_s2] sm:$0xff]  ;;  %v13054_v34 = vld [vmem:[%s12948_s2 + $0x10] sm:$0xff]  ;;  %s13300_s17 = sfloor.f32 %s4468_s16  ;;  %s6220_s24 = scvt.f32.s32 %s13520_s23 }
 0x353   :  { %v4096_v36 = vmax.f32 %v4094_v20, %v4095_v41  ;;  %v4153_v13 = vsel %vm153_vm6, %v4151_v43, -inf  ;;  %vm4102_vm2 = vcmp.eq.s32.totalorder %v4101_v25, 1  ;;  %v4167_v62 = vsel %vm12889_vm5, %v12420_v46, -inf  ;;  %s16055_s18 = smov (!%p5899_p10, %s4465_s18), 16  ;;  %v13074_v41 = vld [vmem:[%s12948_s2 + $0x30] sm:$0xff]  ;;  %v13077_v42 = vld [vmem:[%s12948_s2 + $0x38] sm:$0xff]  ;;  %s6218_s16 = scvt.f32.s32 %s13300_s17 }
 0x354   :  { %v4069_v19 = vsel %vm4068_vm8, 0.0, %v4064_v26  ;;  %v4081_v21 = vmax.f32 %v4079_v60, %v4080_v33  ;;  %v4154_v57 = vmax.f32 %v4152_v8, %v4153_v13  ;;  %v4138_v52 = vrot.slane %v4137_v48, 4  ;;  %v13057_v60 = vld [vmem:[%s12948_s2 + $0x18] sm:$0xff]  ;;  %v13087_v43 = vld [vmem:[%s12948_s2 + $0x40] sm:$0xff]  ;;  %s13551_s20 = sfloor.f32 %s4672_s22  ;;  %s13569_s28 = sadd.s32 %s6220_s24, %s12225_s19 }
 0x355   :  { %5866 = vst.msk [vmem:[%s15063_s6 + $0x29] sm:$0x1] %vm994_vm9, %v4069_v19  ;;  %v4097_v22 = vrot.slane %v4096_v36, 1  ;;  %v4168_v15 = vsel %vm12897_vm7, %v12450_v49, -inf  ;;  %v4169_v17 = vsel %vm153_vm6, %v4167_v62, -inf  ;;  %v4146_v12 = vstv %s4145_s27  ;;  %v13101_v13 = vld [vmem:[%s12948_s2 + $0x58] sm:$0xff]  ;;  %s13349_s4 = sadd.s32 %s6218_s16, %s12225_s19  ;;  %s6222_s5 = scvt.f32.s32 %s13551_s20 }
 0x356   :  { %v4086_v37 = vsel %vm4085_vm3, 0.0, %v4081_v21  ;;  %v4155_v51 = vrot.slane %v4154_v57, 4  ;;  %v4170_v58 = vsel %vm153_vm6, %v4168_v15, -inf  ;;  %v4139_v49 = vmax.f32 %v4137_v48, %v4138_v52  ;;  %v13093_v48 = vld [vmem:[%s12948_s2 + $0x50] sm:$0xff]  ;;  %v13104_v19 = vld [vmem:[%s12948_s2 + $0x60] sm:$0xff]  ;;  %v13113_v62 = vld [vmem:[%s12948_s2 + $0x68] sm:$0xff]  ;;  %s4211_s0 = ssub.s32 %s13622_s13, %s13614_s1  ;;  %p4460_p9 = scmp.le.s32.totalorder %s16053_s21, %s16051_s7 }
 0x357   :  { %5867 = vst.msk [vmem:[%s15063_s6 + $0x2a] sm:$0x1] %vm994_vm9, %v4086_v37  ;;  %v4098_v46 = vmax.f32 %v4096_v36, %v4097_v22  ;;  %v4171_v38 = vmax.f32 %v4169_v17, %v4170_v58  ;;  %v4184_v31 = vsel %vm12889_vm5, %v12511_v30, -inf  ;;  %v4185_v59 = vsel %vm12897_vm7, %v12553_v29, -inf  ;;  %v13090_v36 = vld [vmem:[%s12948_s2 + $0x48] sm:$0xff]  ;;  %v13116_v15 = vld [vmem:[%s12948_s2 + $0x70] sm:$0xff]  ;;  %s13612_s26 = sadd.s32 %s6222_s5, %s12225_s19 }
 0x358   :  { %v4156_v44 = vmax.f32 %v4154_v57, %v4155_v51  ;;  %v4140_v18 = vrot.slane %v4139_v49, 2  ;;  %v4186_v23 = vsel %vm153_vm6, %v4184_v31, -inf  ;;  %vm4147_vm8 = vcmp.eq.s32.totalorder %v4146_v12, 1  ;;  %v13119_v37 = vld [vmem:[%s12948_s2 + $0x78] sm:$0xff]  ;;  %v13128_v58 = vld [vmem:[%s12948_s2 + $0x80] sm:$0xff]  ;;  %p4668_p4 = scmp.gt.s32.totalorder %s13349_s4, 0 }
 0x359   :  { %v4103_v53 = vsel %vm4102_vm2, 0.0, %v4098_v46  ;;  %v4172_v35 = vrot.slane %v4171_v38, 4  ;;  %v4187_v29 = vsel %vm153_vm6, %v4185_v59, -inf  ;;  %v4272_v16 = vstv %s16051_s7  ;;  %v13131_v46 = vld [vmem:[%s12948_s2 + $0x88] sm:$0xff]  ;;  %p5909_p13 = scmp.lt.s32.totalorder %s13349_s4, 16  ;;  %p4676_p7 = scmp.gt.s32.totalorder %s13569_s28, 0 }
 0x35a   :  { %5868 = vst.msk [vmem:[%s15063_s6 + $0x2b] sm:$0x1] %vm994_vm9, %v4103_v53  ;;  %v4157_v30 = vrot.slane %v4156_v44, 2  ;;  %v4141_v11 = vmax.f32 %v4139_v49, %v4140_v18  ;;  %v4163_v6 = vstv %s4162_s25  ;;  %v4188_v3 = vmax.f32 %v4186_v23, %v4187_v29  ;;  %v13147_v53 = vld [vmem:[%s12948_s2 + $0x90] sm:$0xff]  ;;  %v13150_v18 = vld [vmem:[%s12948_s2 + $0x98] sm:$0xff]  ;;  %s4669_s29 = scalar_select %p4668_p4, %s13349_s4, 0 }
 0x35b   :  { %v4173_v7 = vmax.f32 %v4171_v38, %v4172_v35  ;;  %vm13020_vm4 = vcmp.ge.s32.totalorder %v6499_v1, %v4272_v16  ;;  %vm13025_vm10 = vcmp.ge.s32.totalorder %v6508_v2, %v4272_v16  ;;  %v4275_v24 = vstv %s16053_s21  ;;  %v13166_v29 = vld [vmem:[%s12948_s2 + $0xa8] sm:$0xff]  ;;  %p5914_p8 = scmp.lt.s32.totalorder %s13569_s28, 16  ;;  %p4872_p0 = scmp.gt.s32.totalorder %s13612_s26, 0 }
 0x35c   :  { %v4158_v54 = vmax.f32 %v4156_v44, %v4157_v30  ;;  %v4142_v55 = vrot.slane %v4141_v11, 1  ;;  %v4189_v5 = vrot.slane %v4188_v3, 4  ;;  %vm13031_vm11 = vcmp.lt.s32.totalorder %v6499_v1, %v4275_v24  ;;  %v13163_v30 = vld [vmem:[%s12948_s2 + $0xa0] sm:$0xff]  ;;  %s16059_s29 = smov (!%p5909_p13, %s4669_s29), 16  ;;  %p5919_p11 = scmp.lt.s32.totalorder %s13612_s26, 16 }
 0x35d   :  { %v4174_v56 = vrot.slane %v4173_v7, 2  ;;  %vm4164_vm0 = vcmp.eq.s32.totalorder %v4163_v6, 1  ;;  %v4180_v4 = vstv %s4179_s10  ;;  %vm4277_vm3 = vcmp.lt.s32.totalorder %v6508_v2, %v4275_v24  ;;  %vm13069_vm5 = vmand %vm13020_vm4, %vm13031_vm11  ;;  %s4677_s12 = scalar_select %p4676_p7, %s13569_s28, 0 }
 0x35e   :  { %v4159_v61 = vrot.slane %v4158_v54, 1  ;;  %v4143_v32 = vmax.f32 %v4141_v11, %v4142_v55  ;;  %v4190_v25 = vmax.f32 %v4188_v3, %v4189_v5  ;;  %v4197_v45 = vstv %s4196_s15  ;;  %vm13081_vm7 = vmand %vm13025_vm10, %vm4277_vm3  ;;  %s4873_s15 = scalar_select %p4872_p0, %s13612_s26, 0 }
 0x35f   :  { %v4175_v20 = vmax.f32 %v4173_v7, %v4174_v56  ;;  %vm4181_vm2 = vcmp.eq.s32.totalorder %v4180_v4, 1  ;;  %v4284_v51 = vsel %vm13069_vm5, %v13043_v40, -inf  ;;  %v4285_v17 = vsel %vm13081_vm7, %v13046_v47, -inf  ;;  %s16061_s12 = smov (!%p5914_p8, %s4677_s12), 16  ;;  %s13679_s27 = sadd.s32 1, %s4211_s0 }
 0x360   :  { %v4160_v0 = vmax.f32 %v4158_v54, %v4159_v61  ;;  %v4148_v26 = vsel %vm4147_vm8, 0.0, %v4143_v32  ;;  %v4191_v27 = vrot.slane %v4190_v25, 2  ;;  %vm4198_vm8 = vcmp.eq.s32.totalorder %v4197_v45, 1  ;;  %v13181_v54 = vld [vmem:[%s12948_s2 + $0xb0] sm:$0xff]  ;;  %s16063_s15 = smov (!%p5919_p11, %s4873_s15), 16  ;;  %p4213_p6 = scmp.gt.s32.totalorder %s13679_s27, 1 }
 0x361   :  { %v4176_v33 = vrot.slane %v4175_v20, 1  ;;  %5879 = vst.msk [vmem:[%s15063_s6 + $0x2c] sm:$0x1] %vm994_vm9, %v4148_v26  ;;  %v4286_v49 = vsel %vm13069_vm5, %v13054_v34, -inf  ;;  %v4287_v12 = vsel %vm13081_vm7, %v13057_v60, -inf  ;;  %v4288_v38 = vsel %vm13069_vm5, %v13060_v14, -inf  ;;  %p4664_p8 = scmp.le.s32.totalorder %s16057_s30, %s16055_s18 }
 0x362   :  { %v4165_v8 = vsel %vm4164_vm0, 0.0, %v4160_v0  ;;  %v4192_v52 = vmax.f32 %v4190_v25, %v4191_v27  ;;  %v4289_v44 = vsel %vm13081_vm7, %v13063_v50, -inf  ;;  %v4290_v35 = vsel %vm13069_vm5, %v13074_v41, -inf  ;;  %s16065_s27 = smov (!%p4213_p6, %s13679_s27), 1  ;;  %s4876_s25 = smul.f32 4.0, %s12690_s8 }
 0x363   :  { %5880 = vst.msk [vmem:[%s15063_s6 + $0x2d] sm:$0x1] %vm994_vm9, %v4165_v8  ;;  %v4177_v22 = vmax.f32 %v4175_v20, %v4176_v33  ;;  %v4291_v23 = vsel %vm13081_vm7, %v13077_v42, -inf  ;;  %v4292_v16 = vsel %vm13069_vm5, %v13087_v43, -inf  ;;  %v4293_v11 = vsel %vm13081_vm7, %v13090_v36, -inf  ;;  %s4219_s3 = scvt.s32.f32 %s16065_s27 }
 0x364   :  { %v4193_v59 = vrot.slane %v4192_v52, 1  ;;  %v4294_v6 = vsel %vm13069_vm5, %v13093_v48, -inf  ;;  %v4295_v7 = vsel %vm13081_vm7, %v13101_v13, -inf  ;;  %v4296_v9 = vsel %vm13069_vm5, %v13104_v19, -inf  ;;  %s13808_s8 = sceil.f32 %s4876_s25 }
 0x365   :  { %v4182_v31 = vsel %vm4181_vm2, 0.0, %v4177_v22  ;;  %v4297_v24 = vsel %vm13081_vm7, %v13113_v62, -inf  ;;  %v4298_v55 = vsel %vm13069_vm5, %v13116_v15, -inf  ;;  %v4299_v56 = vsel %vm13081_vm7, %v13119_v37, -inf  ;;  %s13803_s10 = smul.f32 0.25, %s4219_s3  ;;  %s6224_s9 = scvt.f32.s32 %s13808_s8 }
 0x366   :  { %5881 = vst.msk [vmem:[%s15063_s6 + $0x2e] sm:$0x1] %vm994_vm9, %v4182_v31  ;;  %v4194_v3 = vmax.f32 %v4192_v52, %v4193_v59  ;;  %v4300_v5 = vsel %vm13069_vm5, %v13128_v58, -inf  ;;  %v4316_v26 = vsel %vm153_vm6, %v4284_v51, -inf  ;;  %v4317_v33 = vsel %vm153_vm6, %v4285_v17, -inf }
 0x367   :  { %v4318_v27 = vmax.f32 %v4316_v26, %v4317_v33  ;;  %v4325_v8 = vsel %vm153_vm6, %v4286_v49, -inf  ;;  %v4326_v22 = vsel %vm153_vm6, %v4287_v12, -inf  ;;  %v4334_v52 = vsel %vm153_vm6, %v4288_v38, -inf  ;;  %s5073_s11 = smul.f32 0.0, %s13803_s10  ;;  %s13847_s17 = sadd.s32 %s6224_s9, %s12225_s19 }
 0x368   :  { %v4199_v4 = vsel %vm4198_vm8, 0.0, %v4194_v3  ;;  %v4327_v31 = vmax.f32 %v4325_v8, %v4326_v22  ;;  %v4335_v59 = vsel %vm153_vm6, %v4289_v44, -inf  ;;  %v4343_v3 = vsel %vm153_vm6, %v4290_v35, -inf  ;;  %p4880_p1 = scmp.gt.s32.totalorder %s13847_s17, 0  ;;  %p5924_p2 = scmp.lt.s32.totalorder %s13847_s17, 16 }
 0x369   :  { %5882 = vst.msk [vmem:[%s15063_s6 + $0x2f] sm:$0x1] %vm994_vm9, %v4199_v4  ;;  %v4344_v4 = vsel %vm153_vm6, %v4291_v23, -inf  ;;  %v4319_v57 = vrot.slane %v4318_v27, 4  ;;  %v4336_v21 = vmax.f32 %v4334_v52, %v4335_v59  ;;  %v4352_v51 = vsel %vm153_vm6, %v4292_v16, -inf  ;;  %s13827_s14 = sfloor.f32 %s5073_s11  ;;  %s5081_s23 = sceil.f32 %s13803_s10 }
 0x36a   :  { %v4345_v0 = vmax.f32 %v4343_v3, %v4344_v4  ;;  %v4328_v17 = vrot.slane %v4327_v31, 4  ;;  %v4353_v49 = vsel %vm153_vm6, %v4293_v11, -inf  ;;  %v4361_v12 = vsel %vm153_vm6, %v4294_v6, -inf  ;;  %v13242_v6 = vld [vmem:[%s12948_s2 + $0xc0] sm:$0xff]  ;;  %s6226_s16 = scvt.f32.s32 %s13827_s14  ;;  %s6228_s24 = scvt.f32.s32 %s5081_s23 }
 0x36b   :  { %v4362_v38 = vsel %vm153_vm6, %v4295_v7, -inf  ;;  %v4320_v26 = vmax.f32 %v4318_v27, %v4319_v57  ;;  %v4337_v44 = vrot.slane %v4336_v21, 4  ;;  %v4354_v35 = vmax.f32 %v4352_v51, %v4353_v49  ;;  %v13245_v7 = vld [vmem:[%s12948_s2 + $0xc8] sm:$0xff]  ;;  %v13249_v49 = vld [vmem:[%s12948_s2 + $0xd0] sm:$0xff]  ;;  %s4881_s4 = scalar_select %p4880_p1, %s13847_s17, 0 }
 0x36c   :  { %v4346_v33 = vrot.slane %v4345_v0, 4  ;;  %v4329_v8 = vmax.f32 %v4327_v31, %v4328_v17  ;;  %v4363_v23 = vmax.f32 %v4361_v12, %v4362_v38  ;;  %v4370_v22 = vsel %vm153_vm6, %v4296_v9, -inf  ;;  %15733 = vst [vmem:[#allocation22_spill] sm:$0xff] %v13245_v7  ;;  %15734 = vst [vmem:[#allocation21_spill] sm:$0xff] %v13249_v49  ;;  %s13890_s19 = sadd.s32 %s6226_s16, %s13614_s1  ;;  %s14133_s20 = sadd.s32 %s6228_s24, %s13614_s1 }
 0x36d   :  { %v4371_v16 = vsel %vm153_vm6, %v4297_v24, -inf  ;;  %v4321_v52 = vrot.slane %v4320_v26, 2  ;;  %v4338_v11 = vmax.f32 %v4336_v21, %v4337_v44  ;;  %v4355_v3 = vrot.slane %v4354_v35, 4  ;;  %v13252_v21 = vld [vmem:[%s12948_s2 + $0xd8] sm:$0xff]  ;;  %p5077_p3 = scmp.gt.s32.totalorder %s13890_s19, 0  ;;  %s16067_s4 = smov (!%p5924_p2, %s4881_s4), 16 }
 0x36e   :  { %v4347_v59 = vmax.f32 %v4345_v0, %v4346_v33  ;;  %v4330_v57 = vrot.slane %v4329_v8, 2  ;;  %v4364_v27 = vrot.slane %v4363_v23, 4  ;;  %v4372_v31 = vmax.f32 %v4370_v22, %v4371_v16  ;;  %15735 = vst [vmem:[#allocation31_spill] sm:$0xff] %v13252_v21  ;;  %v13255_v0 = vld [vmem:[%s12948_s2 + $0xe0] sm:$0xff]  ;;  %v13259_v22 = vld [vmem:[%s12948_s2 + $0xe8] sm:$0xff]  ;;  %p5929_p5 = scmp.lt.s32.totalorder %s13890_s19, 16  ;;  %s5298_s5 = sfloor.f32 %s13803_s10 }
 0x36f   :  { %v4379_v4 = vsel %vm153_vm6, %v4298_v55, -inf  ;;  %v4322_v9 = vmax.f32 %v4320_v26, %v4321_v52  ;;  %v4339_v51 = vrot.slane %v4338_v11, 2  ;;  %v4356_v17 = vmax.f32 %v4354_v35, %v4355_v3  ;;  %15736 = vst [vmem:[#allocation13_spill] sm:$0xff] %v13255_v0  ;;  %15737 = vst [vmem:[#allocation11_spill] sm:$0xff] %v13259_v22  ;;  %v13268_v52 = vld [vmem:[%s12948_s2 + $0xf0] sm:$0xff]  ;;  %v13271_v3 = vld [vmem:[%s12948_s2 + $0xf8] sm:$0xff]  ;;  %s6230_s13 = scvt.f32.s32 %s5298_s5  ;;  %p4868_p1 = scmp.le.s32.totalorder %s16061_s12, %s16059_s29 }
 0x370   :  { %v4348_v24 = vrot.slane %v4347_v59, 2  ;;  %v4331_v12 = vmax.f32 %v4329_v8, %v4330_v57  ;;  %v4365_v38 = vmax.f32 %v4363_v23, %v4364_v27  ;;  %v4373_v44 = vrot.slane %v4372_v31, 4  ;;  %15738 = vst [vmem:[#allocation26_spill] sm:$0xff] %v13268_v52  ;;  %s5078_s22 = scalar_select %p5077_p3, %s13890_s19, 0 }
 0x371   :  { %v4380_v33 = vsel %vm153_vm6, %v4299_v56, -inf  ;;  %v4308_v55 = vsel %vm13069_vm5, %v13242_v6, -inf  ;;  %v4309_v26 = vsel %vm13081_vm7, %v13245_v7, -inf  ;;  %v4323_v35 = vrot.slane %v4322_v9, 1  ;;  %p5084_p12 = scmp.gt.s32.totalorder %s14133_s20, 0  ;;  %p5934_p10 = scmp.lt.s32.totalorder %s14133_s20, 16 }
 0x372   :  { %v4340_v16 = vmax.f32 %v4338_v11, %v4339_v51  ;;  %v4332_v8 = vrot.slane %v4331_v12, 1  ;;  %v4349_v23 = vmax.f32 %v4347_v59, %v4348_v24  ;;  %v4357_v56 = vrot.slane %v4356_v17, 2  ;;  %s16069_s22 = smov (!%p5929_p5, %s5078_s22), 16  ;;  %s5305_s28 = smul.f32 2.0, %s13803_s10 }
 0x373   :  { %v4381_v57 = vmax.f32 %v4379_v4, %v4380_v33  ;;  %v4310_v27 = vsel %vm13069_vm5, %v13249_v49, -inf  ;;  %v4311_v45 = vsel %vm13081_vm7, %v13252_v21, -inf  ;;  %v4312_v11 = vsel %vm13069_vm5, %v13255_v0, -inf  ;;  %s14263_s27 = sadd.s32 %s6230_s13, %s13614_s1  ;;  %s5401_s19 = smul.f32 3.0, %s13803_s10 }
 0x374   :  { %v4366_v51 = vrot.slane %v4365_v38, 2  ;;  %v4313_v25 = vsel %vm13081_vm7, %v13259_v22, -inf  ;;  %v4341_v59 = vrot.slane %v4340_v16, 1  ;;  %v4374_v24 = vmax.f32 %v4372_v31, %v4373_v44  ;;  %s14242_s26 = sceil.f32 %s5305_s28  ;;  %p5301_p7 = scmp.gt.s32.totalorder %s14263_s27, 0 }
 0x375   :  { %v4382_v4 = vrot.slane %v4381_v57, 4  ;;  %v4314_v33 = vsel %vm13069_vm5, %v13268_v52, -inf  ;;  %v13291_v32 = vmax.f32 %v4322_v9, %v4323_v35  ;;  %v4388_v61 = vsel %vm153_vm6, %v4300_v5, -inf  ;;  %s6232_s0 = scvt.f32.s32 %s14242_s26  ;;  %p5943_p6 = scmp.lt.s32.totalorder %s14263_s27, 16 }
 0x376   :  { %v13302_v31 = vmax.f32 %v4331_v12, %v4332_v8  ;;  %v4350_v44 = vrot.slane %v4349_v23, 1  ;;  %v4358_v28 = vmax.f32 %v4356_v17, %v4357_v56  ;;  %v15741_v20 = vsel %vm13081_vm7, %v13131_v46, -inf  ;;  %s14328_s11 = scalar_select %p5301_p7, %s14263_s27, 0 }
 0x377   :  { %15739 = vst [vmem:[#allocation33_spill] sm:$0xff] %v13291_v32  ;;  %v4389_v9 = vsel %vm153_vm6, %v15741_v20, -inf  ;;  %v13309_v35 = vmax.f32 %v4365_v38, %v4366_v51  ;;  %v15742_v5 = vsel %vm13069_vm5, %v13147_v53, -inf  ;;  %v15743_v12 = vsel %vm13081_vm7, %v13150_v18, -inf  ;;  %s14281_s25 = sadd.s32 %s6232_s0, %s13614_s1  ;;  %s14433_s16 = sfloor.f32 %s5305_s28 }
 0x378   :  { %15740 = vst [vmem:[#allocation28_spill] sm:$0xff] %v13302_v31  ;;  %v4390_v32 = vmax.f32 %v4388_v61, %v4389_v9  ;;  %v4397_v52 = vsel %vm153_vm6, %v15742_v5, -inf  ;;  %v4398_v17 = vsel %vm153_vm6, %v15743_v12, -inf  ;;  %v13321_v8 = vmax.f32 %v4340_v16, %v4341_v59  ;;  %p5309_p0 = scmp.gt.s32.totalorder %s14281_s25, 0  ;;  %s16073_s11 = smov (!%p5943_p6, %s14328_s11), 16 }
 0x379   :  { %v4375_v56 = vrot.slane %v4374_v24, 2  ;;  %v4383_v31 = vmax.f32 %v4381_v57, %v4382_v4  ;;  %v4399_v20 = vmax.f32 %v4397_v52, %v4398_v17  ;;  %v15745_v61 = vsel %vm13069_vm5, %v13163_v30, -inf  ;;  %p5948_p2 = scmp.lt.s32.totalorder %s14281_s25, 16  ;;  %s6234_s24 = scvt.f32.s32 %s14433_s16 }
 0x37a   :  { %15744 = vst [vmem:[#allocation30_spill] sm:$0xff] %v13321_v8  ;;  %v4391_v38 = vrot.slane %v4390_v32, 4  ;;  %v4406_v51 = vsel %vm153_vm6, %v15745_v61, -inf  ;;  %v15746_v9 = vsel %vm13081_vm7, %v13166_v29, -inf  ;;  %v15747_v16 = vsel %vm13069_vm5, %v13181_v54, -inf  ;;  %s14393_s14 = scalar_select %p5309_p0, %s14281_s25, 0 }
 0x37b   :  { %v4407_v5 = vsel %vm153_vm6, %v15746_v9, -inf  ;;  %v4415_v52 = vsel %vm153_vm6, %v15747_v16, -inf  ;;  %v13339_v57 = vmax.f32 %v4349_v23, %v4350_v44  ;;  %v4359_v59 = vrot.slane %v4358_v28, 1  ;;  %s14510_s5 = sadd.s32 %s6234_s24, %s13614_s1  ;;  %p5072_p5 = scmp.le.s32.totalorder %s16067_s4, %s16063_s15 }
 0x37c   :  { %v4400_v4 = vrot.slane %v4399_v20, 4  ;;  %v4408_v12 = vmax.f32 %v4406_v51, %v4407_v5  ;;  %v4392_v17 = vmax.f32 %v4390_v32, %v4391_v38  ;;  %v15749_v61 = vsel %vm13081_vm7, %v13184_v39, -inf  ;;  %s16075_s14 = smov (!%p5948_p2, %s14393_s14), 16  ;;  %p5957_p7 = scmp.lt.s32.totalorder %s14510_s5, 16 }
 0x37d   :  { %15748 = vst [vmem:[#allocation9_spill] sm:$0xff] %v13339_v57  ;;  %v4416_v8 = vsel %vm153_vm6, %v15749_v61, -inf  ;;  %v4424_v9 = vsel %vm153_vm6, %v4308_v55, -inf  ;;  %v4425_v63 = vsel %vm153_vm6, %v4309_v26, -inf  ;;  %v4384_v22 = vrot.slane %v4383_v31, 2 }
 0x37e   :  { %v4401_v0 = vmax.f32 %v4399_v20, %v4400_v4  ;;  %v4409_v21 = vrot.slane %v4408_v12, 4  ;;  %v4417_v16 = vmax.f32 %v4415_v52, %v4416_v8  ;;  %v4393_v23 = vrot.slane %v4392_v17, 2 }
 0x37f   :  { %v4426_v44 = vmax.f32 %v4424_v9, %v4425_v63  ;;  %v4433_v32 = vsel %vm153_vm6, %v4310_v27, -inf  ;;  %v4434_v38 = vsel %vm153_vm6, %v4311_v45, -inf  ;;  %v4368_v51 = vrot.slane %v13309_v35, 1 }
 0x380   :  { %v4402_v5 = vrot.slane %v4401_v0, 2  ;;  %v4410_v61 = vmax.f32 %v4408_v12, %v4409_v21  ;;  %v4418_v55 = vrot.slane %v4417_v16, 4  ;;  %v4376_v57 = vmax.f32 %v4374_v24, %v4375_v56 }
 0x381   :  { %v4427_v26 = vrot.slane %v4426_v44, 4  ;;  %v4435_v49 = vmax.f32 %v4433_v32, %v4434_v38  ;;  %v4442_v20 = vsel %vm153_vm6, %v4312_v11, -inf  ;;  %v4385_v8 = vmax.f32 %v4383_v31, %v4384_v22 }
 0x382   :  { %v4411_v52 = vrot.slane %v4410_v61, 2  ;;  %v4419_v4 = vmax.f32 %v4417_v16, %v4418_v55  ;;  %v4443_v27 = vsel %vm153_vm6, %v4313_v25, -inf  ;;  %v4394_v9 = vmax.f32 %v4392_v17, %v4393_v23 }
 0x383   :  { %v4428_v45 = vmax.f32 %v4426_v44, %v4427_v26  ;;  %v4436_v63 = vrot.slane %v4435_v49, 4  ;;  %v4444_v7 = vmax.f32 %v4442_v20, %v4443_v27  ;;  %v4403_v21 = vmax.f32 %v4401_v0, %v4402_v5 }
 0x384   :  { %v4412_v12 = vmax.f32 %v4410_v61, %v4411_v52  ;;  %v4420_v24 = vrot.slane %v4419_v4, 2  ;;  %v4451_v56 = vsel %vm153_vm6, %v4314_v33, -inf  ;;  %v13358_v32 = vmax.f32 %v4358_v28, %v4359_v59 }
 0x385   :  { %v4429_v11 = vrot.slane %v4428_v45, 2  ;;  %v4437_v22 = vmax.f32 %v4435_v49, %v4436_v63  ;;  %v4445_v31 = vrot.slane %v4444_v7, 4  ;;  %v4377_v16 = vrot.slane %v4376_v57, 1 }
 0x386   :  { %15750 = vst [vmem:[#allocation14_spill] sm:$0xff] %v13358_v32  ;;  %v4386_v25 = vrot.slane %v4385_v8, 1  ;;  %v4421_v17 = vmax.f32 %v4419_v4, %v4420_v24  ;;  %v15751_v23 = vsel %vm13081_vm7, %v13271_v3, -inf  ;;  %v4395_v44 = vrot.slane %v4394_v9, 1 }
 0x387   :  { %v4452_v0 = vsel %vm153_vm6, %v15751_v23, -inf  ;;  %v4430_v28 = vmax.f32 %v4428_v45, %v4429_v11  ;;  %v4438_v33 = vrot.slane %v4437_v22, 2  ;;  %v4446_v49 = vmax.f32 %v4444_v7, %v4445_v31 }
 0x388   :  { %v4453_v59 = vmax.f32 %v4451_v56, %v4452_v0  ;;  %v4404_v38 = vrot.slane %v4403_v21, 1  ;;  %v4413_v5 = vrot.slane %v4412_v12, 1  ;;  %v15752_v61 = vstv %s16055_s18 }
 0x389   :  { %vm4477_vm4 = vcmp.ge.s32.totalorder %v6499_v1, %v15752_v61  ;;  %v4422_v10 = vrot.slane %v4421_v17, 1  ;;  %v4439_v55 = vmax.f32 %v4437_v22, %v4438_v33  ;;  %v4447_v26 = vrot.slane %v4446_v49, 2 }
 0x38a   :  { %v4454_v20 = vrot.slane %v4453_v59, 4  ;;  %v4431_v52 = vrot.slane %v4430_v28, 1  ;;  %v15753_v4 = vmov %v15752_v61  ;;  %v15756_v45 = vstv %s16057_s30 }
 0x38b   :  { %vm13375_vm10 = vcmp.ge.s32.totalorder %v6508_v2, %v15753_v4  ;;  %vm4480_vm11 = vcmp.lt.s32.totalorder %v6499_v1, %v15756_v45  ;;  %v15757_v7 = vmov %v15756_v45  ;;  %v13394_v24 = vmax.f32 %v13309_v35, %v4368_v51 }
 0x38c   :  { %vm13385_vm0 = vcmp.lt.s32.totalorder %v6508_v2, %v15757_v7  ;;  %v4440_v56 = vrot.slane %v4439_v55, 1  ;;  %v4448_v11 = vmax.f32 %v4446_v49, %v4447_v26  ;;  %v4455_v22 = vmax.f32 %v4453_v59, %v4454_v20  ;;  %vm13396_vm3 = vmand %vm4477_vm4, %vm4480_vm11 }
 0x38d   :  { %15760 = vst [vmem:[#allocation32_spill] sm:$0xff] %v13394_v24  ;;  %v13400_v23 = vmax.f32 %v4376_v57, %v4377_v16  ;;  %v13402_v0 = vmax.f32 %v4385_v8, %v4386_v25  ;;  %v13404_v33 = vmax.f32 %v4394_v9, %v4395_v44  ;;  %v13406_v61 = vmax.f32 %v4403_v21, %v4404_v38  ;;  %vm13416_vm5 = vmand %vm13375_vm10, %vm13385_vm0 }
 0x38e   :  { %v13408_v4 = vmax.f32 %v4412_v12, %v4413_v5  ;;  %v13410_v35 = vmax.f32 %v4421_v17, %v4422_v10  ;;  %v4449_v51 = vrot.slane %v4448_v11, 1  ;;  %v4456_v45 = vrot.slane %v4455_v22, 2 }
 0x38f   :  { %15763 = vst [vmem:[#allocation12_spill] sm:$0xff] %v13400_v23  ;;  %15764 = vst [vmem:[#allocation35_spill] sm:$0xff] %v13402_v0  ;;  %v13420_v57 = vmax.f32 %v4430_v28, %v4431_v52  ;;  %v4488_v8 = vsel %vm13396_vm3, %v13043_v40, -inf  ;;  %v4490_v9 = vsel %vm13396_vm3, %v13054_v34, -inf  ;;  %v13429_v12 = vmax.f32 %v4439_v55, %v4440_v56 }
 0x390   :  { %15765 = vst [vmem:[#allocation16_spill] sm:$0xff] %v13404_v33  ;;  %15766 = vst [vmem:[#allocation10_spill] sm:$0xff] %v13406_v61  ;;  %v4457_v16 = vmax.f32 %v4455_v22, %v4456_v45  ;;  %v4492_v25 = vsel %vm13396_vm3, %v13060_v14, -inf  ;;  %v4494_v17 = vsel %vm13396_vm3, %v13074_v41, -inf  ;;  %v4489_v28 = vsel %vm13416_vm5, %v13046_v47, -inf }
 0x391   :  { %15767 = vst [vmem:[#allocation34_spill] sm:$0xff] %v13408_v4  ;;  %15768 = vst [vmem:[#allocation36_spill] sm:$0xff] %v13410_v35  ;;  %v4491_v59 = vsel %vm13416_vm5, %v13057_v60, -inf  ;;  %v4493_v44 = vsel %vm13416_vm5, %v13063_v50, -inf  ;;  %v4495_v38 = vsel %vm13416_vm5, %v13077_v42, -inf  ;;  %v13449_v5 = vmax.f32 %v4448_v11, %v4449_v51 }
 0x392   :  { %15771 = vst [vmem:[#allocation29_spill] sm:$0xff] %v13420_v57  ;;  %15772 = vst [vmem:[#allocation15_spill] sm:$0xff] %v13429_v12  ;;  %v4458_v10 = vrot.slane %v4457_v16, 1  ;;  %v4496_v55 = vsel %vm13396_vm3, %v13087_v43, -inf  ;;  %v4497_v26 = vsel %vm13416_vm5, %v13090_v36, -inf  ;;  %v4498_v20 = vsel %vm13396_vm3, %v13093_v48, -inf }
 0x393   :  { %15773 = vst [vmem:[#allocation17_spill] sm:$0xff] %v13449_v5  ;;  %v4499_v52 = vsel %vm13416_vm5, %v13101_v13, -inf  ;;  %v4500_v27 = vsel %vm13396_vm3, %v13104_v19, -inf  ;;  %v4501_v7 = vsel %vm13416_vm5, %v13113_v62, -inf  ;;  %v4502_v63 = vsel %vm13396_vm3, %v13116_v15, -inf }
 0x394   :  { %v4503_v56 = vsel %vm13416_vm5, %v13119_v37, -inf  ;;  %v13493_v0 = vmax.f32 %v4457_v16, %v4458_v10  ;;  %v4520_v45 = vsel %vm153_vm6, %v4488_v8, -inf  ;;  %v4521_v5 = vsel %vm153_vm6, %v4489_v28, -inf }
 0x395   :  { %v4529_v21 = vsel %vm153_vm6, %v4490_v9, -inf  ;;  %v4530_v23 = vsel %vm153_vm6, %v4491_v59, -inf  ;;  %v4538_v11 = vsel %vm153_vm6, %v4492_v25, -inf  ;;  %v4522_v16 = vmax.f32 %v4520_v45, %v4521_v5 }
 0x396   :  { %15774 = vst [vmem:[#allocation23_spill] sm:$0xff] %v13493_v0  ;;  %v4531_v10 = vmax.f32 %v4529_v21, %v4530_v23  ;;  %v4539_v0 = vsel %vm153_vm6, %v4493_v44, -inf  ;;  %v4547_v22 = vsel %vm153_vm6, %v4494_v17, -inf  ;;  %v4548_v51 = vsel %vm153_vm6, %v4495_v38, -inf }
 0x397   :  { %v4540_v12 = vmax.f32 %v4538_v11, %v4539_v0  ;;  %v4556_v8 = vsel %vm153_vm6, %v4496_v55, -inf  ;;  %v4557_v28 = vsel %vm153_vm6, %v4497_v26, -inf  ;;  %v4523_v24 = vrot.slane %v4522_v16, 4 }
 0x398   :  { %v4532_v9 = vrot.slane %v4531_v10, 4  ;;  %v4549_v57 = vmax.f32 %v4547_v22, %v4548_v51  ;;  %v4558_v59 = vmax.f32 %v4556_v8, %v4557_v28  ;;  %v4565_v25 = vsel %vm153_vm6, %v4498_v20, -inf }
 0x399   :  { %v4541_v32 = vrot.slane %v4540_v12, 4  ;;  %v4566_v23 = vsel %vm153_vm6, %v4499_v52, -inf  ;;  %v4574_v21 = vsel %vm153_vm6, %v4500_v27, -inf  ;;  %v4524_v17 = vmax.f32 %v4522_v16, %v4523_v24 }
 0x39a   :  { %v4533_v0 = vmax.f32 %v4531_v10, %v4532_v9  ;;  %v4550_v44 = vrot.slane %v4549_v57, 4  ;;  %v4559_v5 = vrot.slane %v4558_v59, 4  ;;  %v4567_v55 = vmax.f32 %v4565_v25, %v4566_v23 }
 0x39b   :  { %v4542_v38 = vmax.f32 %v4540_v12, %v4541_v32  ;;  %v4575_v26 = vsel %vm153_vm6, %v4501_v7, -inf  ;;  %v4583_v11 = vsel %vm153_vm6, %v4502_v63, -inf  ;;  %v4525_v22 = vrot.slane %v4524_v17, 2 }
 0x39c   :  { %v4534_v51 = vrot.slane %v4533_v0, 2  ;;  %v4551_v45 = vmax.f32 %v4549_v57, %v4550_v44  ;;  %v4560_v20 = vmax.f32 %v4558_v59, %v4559_v5  ;;  %v4568_v52 = vrot.slane %v4567_v55, 4  ;;  %v15775_v59 = vld [vmem:[#allocation22_spill] sm:$0xff] }
 0x39d   :  { %v4543_v8 = vrot.slane %v4542_v38, 2  ;;  %v4576_v28 = vmax.f32 %v4574_v21, %v4575_v26  ;;  %v4584_v24 = vsel %vm153_vm6, %v4503_v56, -inf  ;;  %v4526_v27 = vmax.f32 %v4524_v17, %v4525_v22  ;;  %v15776_v21 = vld [vmem:[#allocation21_spill] sm:$0xff]  ;;  %v15779_v22 = vld [vmem:[#allocation11_spill] sm:$0xff] }
 0x39e   :  { %v4535_v16 = vmax.f32 %v4533_v0, %v4534_v51  ;;  %v4552_v10 = vrot.slane %v4551_v45, 2  ;;  %v4561_v9 = vrot.slane %v4560_v20, 2  ;;  %v4569_v12 = vmax.f32 %v4567_v55, %v4568_v52  ;;  %v15778_v26 = vld [vmem:[#allocation13_spill] sm:$0xff] }
 0x39f   :  { %v4544_v32 = vmax.f32 %v4542_v38, %v4543_v8  ;;  %v4577_v7 = vrot.slane %v4576_v28, 4  ;;  %v4585_v63 = vmax.f32 %v4583_v11, %v4584_v24  ;;  %v4512_v57 = vsel %vm13396_vm3, %v13242_v6, -inf  ;;  %v15777_v38 = vld [vmem:[#allocation31_spill] sm:$0xff]  ;;  %v15780_v8 = vld [vmem:[#allocation26_spill] sm:$0xff] }
 0x3a0   :  { %v4513_v56 = vsel %vm13416_vm5, %v15775_v59, -inf  ;;  %v4527_v25 = vrot.slane %v4526_v27, 1  ;;  %v4536_v23 = vrot.slane %v4535_v16, 1  ;;  %v4514_v17 = vsel %vm13396_vm3, %v15776_v21, -inf }
 0x3a1   :  { %v4553_v0 = vmax.f32 %v4551_v45, %v4552_v10  ;;  %v13531_v44 = vmax.f32 %v4560_v20, %v4561_v9  ;;  %v4586_v5 = vrot.slane %v4585_v63, 4  ;;  %v4515_v55 = vsel %vm13416_vm5, %v15777_v38, -inf }
 0x3a2   :  { %v4516_v11 = vsel %vm13396_vm3, %v15778_v26, -inf  ;;  %v4517_v51 = vsel %vm13416_vm5, %v15779_v22, -inf  ;;  %v4545_v52 = vrot.slane %v4544_v32, 1  ;;  %v4570_v24 = vrot.slane %v4569_v12, 2 }
 0x3a3   :  { %v4578_v10 = vmax.f32 %v4576_v28, %v4577_v7  ;;  %v13553_v9 = vmax.f32 %v4526_v27, %v4527_v25  ;;  %v13555_v35 = vmax.f32 %v4535_v16, %v4536_v23  ;;  %v15783_v4 = vsel %vm13396_vm3, %v13128_v58, -inf }
 0x3a4   :  { %v4592_v45 = vsel %vm153_vm6, %v15783_v4, -inf  ;;  %v15784_v20 = vsel %vm13416_vm5, %v13131_v46, -inf  ;;  %v4554_v7 = vrot.slane %v4553_v0, 1  ;;  %v4563_v61 = vrot.slane %v13531_v44, 1 }
 0x3a5   :  { %15781 = vst [vmem:[#allocation18_spill] sm:$0xff] %v13553_v9  ;;  %15782 = vst [vmem:[#allocation24_spill] sm:$0xff] %v13555_v35  ;;  %v4593_v28 = vsel %vm153_vm6, %v15784_v20, -inf  ;;  %v4587_v33 = vmax.f32 %v4585_v63, %v4586_v5  ;;  %v15785_v16 = vsel %vm13396_vm3, %v13147_v53, -inf  ;;  %v15786_v25 = vsel %vm13416_vm5, %v13150_v18, -inf }
 0x3a6   :  { %v4594_v27 = vmax.f32 %v4592_v45, %v4593_v28  ;;  %v4601_v4 = vsel %vm153_vm6, %v15785_v16, -inf  ;;  %v4602_v23 = vsel %vm153_vm6, %v15786_v25, -inf  ;;  %v15787_v63 = vsel %vm13396_vm3, %v13163_v30, -inf }
 0x3a7   :  { %v4610_v5 = vsel %vm153_vm6, %v15787_v63, -inf  ;;  %v15788_v45 = vsel %vm13416_vm5, %v13166_v29, -inf  ;;  %v13592_v28 = vmax.f32 %v4544_v32, %v4545_v52  ;;  %v13594_v16 = vmax.f32 %v4569_v12, %v4570_v24 }
 0x3a8   :  { %v4611_v20 = vsel %vm153_vm6, %v15788_v45, -inf  ;;  %v4579_v35 = vrot.slane %v4578_v10, 2  ;;  %v4595_v25 = vrot.slane %v4594_v27, 4  ;;  %v4603_v9 = vmax.f32 %v4601_v4, %v4602_v23 }
 0x3a9   :  { %15789 = vst [vmem:[#allocation19_spill] sm:$0xff] %v13592_v28  ;;  %v4612_v22 = vmax.f32 %v4610_v5, %v4611_v20  ;;  %v15790_v63 = vsel %vm13396_vm3, %v13181_v54, -inf  ;;  %v15791_v45 = vsel %vm13416_vm5, %v13184_v39, -inf  ;;  %v13607_v12 = vmax.f32 %v4553_v0, %v4554_v7 }
 0x3aa   :  { %v4619_v26 = vsel %vm153_vm6, %v15790_v63, -inf  ;;  %v4620_v32 = vsel %vm153_vm6, %v15791_v45, -inf  ;;  %v4588_v52 = vrot.slane %v4587_v33, 2  ;;  %v4596_v24 = vmax.f32 %v4594_v27, %v4595_v25 }
 0x3ab   :  { %15792 = vst [vmem:[#allocation27_spill] sm:$0xff] %v13607_v12  ;;  %v4621_v4 = vmax.f32 %v4619_v26, %v4620_v32  ;;  %v4604_v23 = vrot.slane %v4603_v9, 4  ;;  %v4613_v5 = vrot.slane %v4612_v22, 4  ;;  %v4628_v20 = vsel %vm153_vm6, %v4512_v57, -inf }
 0x3ac   :  { %v4629_v63 = vsel %vm153_vm6, %v4513_v56, -inf  ;;  %v4580_v45 = vmax.f32 %v4578_v10, %v4579_v35  ;;  %v4597_v28 = vrot.slane %v4596_v24, 2  ;;  %v4637_v25 = vsel %vm153_vm6, %v4514_v17, -inf }
 0x3ad   :  { %v4622_v0 = vrot.slane %v4621_v4, 4  ;;  %v4630_v7 = vmax.f32 %v4628_v20, %v4629_v63  ;;  %v4605_v27 = vmax.f32 %v4603_v9, %v4604_v23  ;;  %v4614_v26 = vmax.f32 %v4612_v22, %v4613_v5 }
 0x3ae   :  { %v4638_v32 = vsel %vm153_vm6, %v4515_v55, -inf  ;;  %v4589_v57 = vmax.f32 %v4587_v33, %v4588_v52  ;;  %v4646_v22 = vsel %vm153_vm6, %v4516_v11, -inf  ;;  %v4647_v17 = vsel %vm153_vm6, %v4517_v51, -inf }
 0x3af   :  { %v4623_v56 = vmax.f32 %v4621_v4, %v4622_v0  ;;  %v4631_v12 = vrot.slane %v4630_v7, 4  ;;  %v4639_v38 = vmax.f32 %v4637_v25, %v4638_v32  ;;  %v4606_v35 = vrot.slane %v4605_v27, 2 }
 0x3b0   :  { %v4615_v10 = vrot.slane %v4614_v26, 2  ;;  %v4598_v9 = vmax.f32 %v4596_v24, %v4597_v28  ;;  %v4648_v52 = vmax.f32 %v4646_v22, %v4647_v17  ;;  %v15793_v4 = vsel %vm13396_vm3, %v15780_v8, -inf }
 0x3b1   :  { %v4624_v55 = vrot.slane %v4623_v56, 2  ;;  %v4632_v23 = vmax.f32 %v4630_v7, %v4631_v12  ;;  %v4640_v5 = vrot.slane %v4639_v38, 4  ;;  %v4607_v20 = vmax.f32 %v4605_v27, %v4606_v35 }
 0x3b2   :  { %v4616_v33 = vmax.f32 %v4614_v26, %v4615_v10  ;;  %v4655_v63 = vsel %vm153_vm6, %v15793_v4, -inf  ;;  %v13637_v11 = vmax.f32 %v13531_v44, %v4563_v61  ;;  %v4572_v24 = vrot.slane %v13594_v16, 1 }
 0x3b3   :  { %v4625_v51 = vmax.f32 %v4623_v56, %v4624_v55  ;;  %v4633_v28 = vrot.slane %v4632_v23, 2  ;;  %v4641_v12 = vmax.f32 %v4639_v38, %v4640_v5  ;;  %v4581_v31 = vrot.slane %v4580_v45, 1 }
 0x3b4   :  { %v4649_v0 = vrot.slane %v4648_v52, 4  ;;  %v15794_v7 = vsel %vm13416_vm5, %v13271_v3, -inf  ;;  %v4590_v61 = vrot.slane %v4589_v57, 1  ;;  %v4599_v25 = vrot.slane %v4598_v9, 1 }
 0x3b5   :  { %v4656_v27 = vsel %vm153_vm6, %v15794_v7, -inf  ;;  %v4634_v44 = vmax.f32 %v4632_v23, %v4633_v28  ;;  %v4642_v38 = vrot.slane %v4641_v12, 2  ;;  %v4608_v32 = vrot.slane %v4607_v20, 1 }
 0x3b6   :  { %v4657_v26 = vmax.f32 %v4655_v63, %v4656_v27  ;;  %v4617_v56 = vrot.slane %v4616_v33, 1  ;;  %v4650_v35 = vmax.f32 %v4648_v52, %v4649_v0  ;;  %v4626_v10 = vrot.slane %v4625_v51, 1 }
 0x3b7   :  { %v4643_v22 = vmax.f32 %v4641_v12, %v4642_v38  ;;  %v15795_v17 = vstv %s16059_s29  ;;  %v4635_v55 = vrot.slane %v4634_v44, 1  ;;  %v4683_v63 = vstv %s16061_s12 }
 0x3b8   :  { %v4658_v49 = vrot.slane %v4657_v26, 4  ;;  %vm4681_vm7 = vcmp.ge.s32.totalorder %v6499_v1, %v15795_v17  ;;  %v4651_v5 = vrot.slane %v4650_v35, 2  ;;  %v15796_v4 = vmov %v15795_v17 }
 0x3b9   :  { %vm13657_vm2 = vcmp.ge.s32.totalorder %v6508_v2, %v15796_v4  ;;  %v13667_v52 = vmax.f32 %v13594_v16, %v4572_v24  ;;  %v4644_v28 = vrot.slane %v4643_v22, 1  ;;  %vm4684_vm8 = vcmp.lt.s32.totalorder %v6499_v1, %v4683_v63 }
 0x3ba   :  { %v4659_v12 = vmax.f32 %v4657_v26, %v4658_v49  ;;  %v13670_v0 = vmax.f32 %v4580_v45, %v4581_v31  ;;  %v13672_v7 = vmax.f32 %v4589_v57, %v4590_v61  ;;  %v4652_v27 = vmax.f32 %v4650_v35, %v4651_v5  ;;  %vm13675_vm10 = vmand %vm4681_vm7, %vm4684_vm8 }
 0x3bb   :  { %vm4685_vm4 = vcmp.lt.s32.totalorder %v6508_v2, %v4683_v63  ;;  %v13681_v16 = vmax.f32 %v4598_v9, %v4599_v25  ;;  %v13683_v24 = vmax.f32 %v4607_v20, %v4608_v32  ;;  %v13685_v26 = vmax.f32 %v4616_v33, %v4617_v56 }
 0x3bc   :  { %v4660_v45 = vrot.slane %v4659_v12, 2  ;;  %vm13689_vm11 = vmand %vm13657_vm2, %vm4685_vm4  ;;  %v13693_v31 = vmax.f32 %v4625_v51, %v4626_v10  ;;  %v13695_v61 = vmax.f32 %v4634_v44, %v4635_v55  ;;  %v4653_v35 = vrot.slane %v4652_v27, 1 }
 0x3bd   :  { %v13698_v17 = vmax.f32 %v4643_v22, %v4644_v28  ;;  %v4692_v20 = vsel %vm13675_vm10, %v13043_v40, -inf  ;;  %v4694_v33 = vsel %vm13675_vm10, %v13054_v34, -inf  ;;  %v4693_v51 = vsel %vm13689_vm11, %v13046_v47, -inf }
 0x3be   :  { %v4661_v9 = vmax.f32 %v4659_v12, %v4660_v45  ;;  %v4695_v44 = vsel %vm13689_vm11, %v13057_v60, -inf  ;;  %v4696_v25 = vsel %vm13675_vm10, %v13060_v14, -inf  ;;  %v4697_v40 = vsel %vm13689_vm11, %v13063_v50, -inf }
 0x3bf   :  { %v13719_v34 = vmax.f32 %v4652_v27, %v4653_v35  ;;  %v4698_v47 = vsel %vm13675_vm10, %v13074_v41, -inf  ;;  %v4699_v56 = vsel %vm13689_vm11, %v13077_v42, -inf  ;;  %v4700_v60 = vsel %vm13675_vm10, %v13087_v43, -inf }
 0x3c0   :  { %v4662_v32 = vrot.slane %v4661_v9, 1  ;;  %v4701_v14 = vsel %vm13689_vm11, %v13090_v36, -inf  ;;  %v4702_v50 = vsel %vm13675_vm10, %v13093_v48, -inf  ;;  %v4703_v41 = vsel %vm13689_vm11, %v13101_v13, -inf }
 0x3c1   :  { %v4704_v42 = vsel %vm13675_vm10, %v13104_v19, -inf  ;;  %v4705_v43 = vsel %vm13689_vm11, %v13113_v62, -inf  ;;  %v4706_v36 = vsel %vm13675_vm10, %v13116_v15, -inf  ;;  %v4707_v48 = vsel %vm13689_vm11, %v13119_v37, -inf }
 0x3c2   :  { %v13756_v13 = vmax.f32 %v4661_v9, %v4662_v32  ;;  %v4708_v19 = vsel %vm13675_vm10, %v13128_v58, -inf  ;;  %v4709_v62 = vsel %vm13689_vm11, %v13131_v46, -inf  ;;  %v4710_v15 = vsel %vm13675_vm10, %v13147_v53, -inf }
 0x3c3   :  { %v4711_v37 = vsel %vm13689_vm11, %v13150_v18, -inf  ;;  %v4712_v10 = vsel %vm13675_vm10, %v13163_v30, -inf  ;;  %v4724_v63 = vsel %vm153_vm6, %v4692_v20, -inf  ;;  %v4725_v28 = vsel %vm153_vm6, %v4693_v51, -inf }
 0x3c4   :  { %v4733_v12 = vsel %vm153_vm6, %v4694_v33, -inf  ;;  %v4734_v27 = vsel %vm153_vm6, %v4695_v44, -inf  ;;  %v4742_v45 = vsel %vm153_vm6, %v4696_v25, -inf  ;;  %v4726_v35 = vmax.f32 %v4724_v63, %v4725_v28 }
 0x3c5   :  { %v4735_v9 = vmax.f32 %v4733_v12, %v4734_v27  ;;  %v4743_v32 = vsel %vm153_vm6, %v4697_v40, -inf  ;;  %v4751_v49 = vsel %vm153_vm6, %v4698_v47, -inf  ;;  %v4752_v23 = vsel %vm153_vm6, %v4699_v56, -inf }
 0x3c6   :  { %v4744_v4 = vmax.f32 %v4742_v45, %v4743_v32  ;;  %v4760_v20 = vsel %vm153_vm6, %v4700_v60, -inf  ;;  %v4761_v51 = vsel %vm153_vm6, %v4701_v14, -inf  ;;  %v4727_v33 = vrot.slane %v4726_v35, 4 }
 0x3c7   :  { %v4736_v5 = vrot.slane %v4735_v9, 4  ;;  %v4753_v44 = vmax.f32 %v4751_v49, %v4752_v23  ;;  %v4762_v55 = vmax.f32 %v4760_v20, %v4761_v51  ;;  %v4769_v63 = vsel %vm153_vm6, %v4702_v50, -inf }
 0x3c8   :  { %v4745_v25 = vrot.slane %v4744_v4, 4  ;;  %v4770_v28 = vsel %vm153_vm6, %v4703_v41, -inf  ;;  %v4778_v40 = vsel %vm153_vm6, %v4704_v42, -inf  ;;  %v4728_v47 = vmax.f32 %v4726_v35, %v4727_v33 }
 0x3c9   :  { %v4737_v56 = vmax.f32 %v4735_v9, %v4736_v5  ;;  %v4754_v12 = vrot.slane %v4753_v44, 4  ;;  %v4763_v60 = vrot.slane %v4762_v55, 4  ;;  %v4771_v14 = vmax.f32 %v4769_v63, %v4770_v28 }
 0x3ca   :  { %v4746_v27 = vmax.f32 %v4744_v4, %v4745_v25  ;;  %v4779_v49 = vsel %vm153_vm6, %v4705_v43, -inf  ;;  %v4787_v23 = vsel %vm153_vm6, %v4706_v36, -inf  ;;  %v4729_v45 = vrot.slane %v4728_v47, 2 }
 0x3cb   :  { %v4738_v50 = vrot.slane %v4737_v56, 2  ;;  %v4755_v32 = vmax.f32 %v4753_v44, %v4754_v12  ;;  %v4764_v41 = vmax.f32 %v4762_v55, %v4763_v60  ;;  %v4772_v42 = vrot.slane %v4771_v14, 4  ;;  %v15803_v12 = vld [vmem:[#allocation31_spill] sm:$0xff] }
 0x3cc   :  { %v4747_v20 = vrot.slane %v4746_v27, 2  ;;  %v4780_v51 = vmax.f32 %v4778_v40, %v4779_v49  ;;  %v4788_v22 = vsel %vm153_vm6, %v4707_v48, -inf  ;;  %v4730_v5 = vmax.f32 %v4728_v47, %v4729_v45 }
 0x3cd   :  { %v4739_v4 = vmax.f32 %v4737_v56, %v4738_v50  ;;  %v4756_v35 = vrot.slane %v4755_v32, 2  ;;  %v4765_v9 = vrot.slane %v4764_v41, 2  ;;  %v4773_v33 = vmax.f32 %v4771_v14, %v4772_v42  ;;  %v15805_v14 = vld [vmem:[#allocation11_spill] sm:$0xff] }
 0x3ce   :  { %v4748_v43 = vmax.f32 %v4746_v27, %v4747_v20  ;;  %v4781_v36 = vrot.slane %v4780_v51, 4  ;;  %v4789_v25 = vmax.f32 %v4787_v23, %v4788_v22  ;;  %v4718_v55 = vsel %vm13675_vm10, %v15776_v21, -inf  ;;  %v15804_v27 = vld [vmem:[#allocation13_spill] sm:$0xff] }
 0x3cf   :  { %v4731_v44 = vrot.slane %v4730_v5, 1  ;;  %v4740_v63 = vrot.slane %v4739_v4, 1  ;;  %v4757_v28 = vmax.f32 %v4755_v32, %v4756_v35  ;;  %v4766_v40 = vmax.f32 %v4764_v41, %v4765_v9 }
 0x3d0   :  { %v4749_v48 = vrot.slane %v4748_v43, 1  ;;  %v4782_v47 = vmax.f32 %v4780_v51, %v4781_v36  ;;  %v4790_v56 = vrot.slane %v4789_v25, 4  ;;  %v4719_v60 = vsel %vm13689_vm11, %v15803_v12, -inf }
 0x3d1   :  { %v4720_v22 = vsel %vm13675_vm10, %v15804_v27, -inf  ;;  %v4721_v21 = vsel %vm13689_vm11, %v15805_v14, -inf  ;;  %v4722_v49 = vsel %vm13675_vm10, %v15780_v8, -inf  ;;  %v4723_v23 = vsel %vm13689_vm11, %v13271_v3, -inf }
 0x3d2   :  { %v4758_v45 = vrot.slane %v4757_v28, 1  ;;  %v4774_v50 = vrot.slane %v4773_v33, 2  ;;  %v4791_v32 = vmax.f32 %v4789_v25, %v4790_v56  ;;  %v13832_v41 = vmax.f32 %v4730_v5, %v4731_v44 }
 0x3d3   :  { %v13834_v20 = vmax.f32 %v4739_v4, %v4740_v63  ;;  %v4796_v42 = vsel %vm153_vm6, %v4708_v19, -inf  ;;  %v4797_v51 = vsel %vm153_vm6, %v4709_v62, -inf  ;;  %v13849_v35 = vmax.f32 %v4748_v43, %v4749_v48 }
 0x3d4   :  { %v4767_v5 = vrot.slane %v4766_v40, 1  ;;  %v4783_v4 = vrot.slane %v4782_v47, 2  ;;  %v4798_v9 = vmax.f32 %v4796_v42, %v4797_v51  ;;  %v4805_v58 = vsel %vm153_vm6, %v4710_v15, -inf }
 0x3d5   :  { %v4806_v46 = vsel %vm153_vm6, %v4711_v37, -inf  ;;  %v4814_v19 = vsel %vm153_vm6, %v4712_v10, -inf  ;;  %v15806_v62 = vsel %vm13689_vm11, %v13166_v29, -inf  ;;  %v13872_v15 = vmax.f32 %v4757_v28, %v4758_v45 }
 0x3d6   :  { %v4815_v53 = vsel %vm153_vm6, %v15806_v62, -inf  ;;  %v13874_v43 = vmax.f32 %v4773_v33, %v4774_v50  ;;  %v4792_v18 = vrot.slane %v4791_v32, 2  ;;  %v4799_v37 = vrot.slane %v4798_v9, 4 }
 0x3d7   :  { %v4807_v36 = vmax.f32 %v4805_v58, %v4806_v46  ;;  %v4816_v25 = vmax.f32 %v4814_v19, %v4815_v53  ;;  %v15807_v30 = vsel %vm13675_vm10, %v13181_v54, -inf  ;;  %v15808_v29 = vsel %vm13689_vm11, %v13184_v39, -inf }
 0x3d8   :  { %v4823_v10 = vsel %vm153_vm6, %v15807_v30, -inf  ;;  %v4824_v33 = vsel %vm153_vm6, %v15808_v29, -inf  ;;  %v13887_v44 = vmax.f32 %v4766_v40, %v4767_v5  ;;  %v4784_v63 = vmax.f32 %v4782_v47, %v4783_v4 }
 0x3d9   :  { %v4800_v28 = vmax.f32 %v4798_v9, %v4799_v37  ;;  %v4825_v48 = vmax.f32 %v4823_v10, %v4824_v33  ;;  %v4808_v54 = vrot.slane %v4807_v36, 4  ;;  %v4817_v56 = vrot.slane %v4816_v25, 4 }
 0x3da   :  { %v15809_v12 = vsel %vm13675_vm10, %v13242_v6, -inf  ;;  %v15810_v40 = vsel %vm13689_vm11, %v15775_v59, -inf  ;;  %v4793_v27 = vmax.f32 %v4791_v32, %v4792_v18  ;;  %v4841_v6 = vsel %vm153_vm6, %v4718_v55, -inf  ;;  %v6343_v55 = vld [vmem:[%s12948_s2 + $0x10] sm:$0xff] }
 0x3db   :  { %v4832_v39 = vsel %vm153_vm6, %v15809_v12, -inf  ;;  %v4833_v47 = vsel %vm153_vm6, %v15810_v40, -inf  ;;  %v4801_v14 = vrot.slane %v4800_v28, 2  ;;  %v4826_v45 = vrot.slane %v4825_v48, 4 }
 0x3dc   :  { %v4834_v50 = vmax.f32 %v4832_v39, %v4833_v47  ;;  %v4809_v42 = vmax.f32 %v4807_v36, %v4808_v54  ;;  %v4818_v51 = vmax.f32 %v4816_v25, %v4817_v56  ;;  %v4842_v5 = vsel %vm153_vm6, %v4719_v60, -inf }
 0x3dd   :  { %v15811_v4 = vstv %s16063_s15  ;;  %v4802_v32 = vmax.f32 %v4800_v28, %v4801_v14  ;;  %v4827_v9 = vmax.f32 %v4825_v48, %v4826_v45  ;;  %v4843_v46 = vmax.f32 %v4841_v6, %v4842_v5 }
 0x3de   :  { %vm13911_vm0 = vcmp.ge.s32.totalorder %v6499_v1, %v15811_v4  ;;  %v4835_v58 = vrot.slane %v4834_v50, 4  ;;  %v15814_v19 = vmov %v15811_v4  ;;  %v4810_v60 = vrot.slane %v4809_v42, 2 }
 0x3df   :  { %vm13919_vm3 = vcmp.ge.s32.totalorder %v6508_v2, %v15814_v19  ;;  %v4819_v62 = vrot.slane %v4818_v51, 2  ;;  %v4850_v53 = vsel %vm153_vm6, %v4720_v22, -inf  ;;  %v4851_v18 = vsel %vm153_vm6, %v4721_v21, -inf }
 0x3e0   :  { %v4776_v37 = vrot.slane %v13874_v43, 1  ;;  %v4828_v36 = vrot.slane %v4827_v9, 2  ;;  %v4836_v25 = vmax.f32 %v4834_v50, %v4835_v58  ;;  %v4844_v30 = vrot.slane %v4843_v46, 4 }
 0x3e1   :  { %v4811_v10 = vmax.f32 %v4809_v42, %v4810_v60  ;;  %v4820_v29 = vmax.f32 %v4818_v51, %v4819_v62  ;;  %v4852_v33 = vmax.f32 %v4850_v53, %v4851_v18  ;;  %v4859_v22 = vsel %vm153_vm6, %v4722_v49, -inf  ;;  %v6342_v53 = vld [vmem:[%s12948_s2] sm:$0xff] }
 0x3e2   :  { %v4785_v21 = vrot.slane %v4784_v63, 1  ;;  %v4829_v28 = vmax.f32 %v4827_v9, %v4828_v36  ;;  %v4837_v48 = vrot.slane %v4836_v25, 2  ;;  %v4845_v54 = vmax.f32 %v4843_v46, %v4844_v30 }
 0x3e3   :  { %v4794_v56 = vrot.slane %v4793_v27, 1  ;;  %v4803_v12 = vrot.slane %v4802_v32, 1  ;;  %v4853_v39 = vrot.slane %v4852_v33, 4  ;;  %v4860_v8 = vsel %vm153_vm6, %v4723_v23, -inf }
 0x3e4   :  { %v4812_v38 = vrot.slane %v4811_v10, 1  ;;  %v4838_v49 = vmax.f32 %v4836_v25, %v4837_v48  ;;  %v4846_v40 = vrot.slane %v4845_v54, 2  ;;  %v4861_v47 = vmax.f32 %v4859_v22, %v4860_v8  ;;  %v6345_v22 = vld [vmem:[%s12948_s2 + $0x8] sm:$0xff]  ;;  %v6349_v8 = vld [vmem:[%s12948_s2 + $0x38] sm:$0xff] }
 0x3e5   :  { %v4821_v14 = vrot.slane %v4820_v29, 1  ;;  %v4830_v45 = vrot.slane %v4829_v28, 1  ;;  %v4854_v50 = vmax.f32 %v4852_v33, %v4853_v39  ;;  %v4887_v42 = vstv %s16067_s4 }
 0x3e6   :  { %v13946_v51 = vmax.f32 %v13874_v43, %v4776_v37  ;;  %v4839_v6 = vrot.slane %v4838_v49, 1  ;;  %v4847_v5 = vmax.f32 %v4845_v54, %v4846_v40  ;;  %v4862_v4 = vrot.slane %v4861_v47, 4  ;;  %v6347_v54 = vld [vmem:[%s12948_s2 + $0x28] sm:$0xff] }
 0x3e7   :  { %v13952_v3 = vmax.f32 %v4784_v63, %v4785_v21  ;;  %v4855_v57 = vrot.slane %v4854_v50, 2  ;;  %vm4888_vm5 = vcmp.lt.s32.totalorder %v6499_v1, %v4887_v42  ;;  %vm4889_vm7 = vcmp.lt.s32.totalorder %v6508_v2, %v4887_v42  ;;  %v6352_v42 = vld [vmem:[%s12948_s2 + $0x50] sm:$0xff] }
 0x3e8   :  { %15817 = vst [vmem:[#allocation20_spill] sm:$0xff] %v13946_v51  ;;  %v13956_v23 = vmax.f32 %v4793_v27, %v4794_v56  ;;  %v13958_v9 = vmax.f32 %v4802_v32, %v4803_v12  ;;  %v4848_v43 = vrot.slane %v4847_v5, 1  ;;  %v4863_v58 = vmax.f32 %v4861_v47, %v4862_v4  ;;  %vm13962_vm2 = vmand %vm13911_vm0, %vm4888_vm5  ;;  %v6348_v12 = vld [vmem:[%s12948_s2 + $0x30] sm:$0xff]  ;;  %v6351_v47 = vld [vmem:[%s12948_s2 + $0x48] sm:$0xff] }
 0x3e9   :  { %15818 = vst [vmem:[#allocation25_spill] sm:$0xff] %v13952_v3  ;;  %v13966_v46 = vmax.f32 %v4811_v10, %v4812_v38  ;;  %v13968_v19 = vmax.f32 %v4820_v29, %v4821_v14  ;;  %v13970_v60 = vmax.f32 %v4829_v28, %v4830_v45  ;;  %v4856_v27 = vmax.f32 %v4854_v50, %v4855_v57  ;;  %vm13974_vm8 = vmand %vm13919_vm3, %vm4889_vm7  ;;  %v6344_v10 = vld [vmem:[%s12948_s2 + $0x20] sm:$0xff]  ;;  %v6346_v28 = vld [vmem:[%s12948_s2 + $0x18] sm:$0xff] }
 0x3ea   :  { %15819 = vst [vmem:[#allocation22_spill] sm:$0xff] %v13956_v23  ;;  %v13978_v59 = vmax.f32 %v4838_v49, %v4839_v6  ;;  %v4864_v62 = vrot.slane %v4863_v58, 2  ;;  %v4896_v18 = vsel %vm13962_vm2, %v6342_v53, -inf  ;;  %v13984_v36 = vmax.f32 %v4847_v5, %v4848_v43  ;;  %v6350_v49 = vld [vmem:[%s12948_s2 + $0x40] sm:$0xff]  ;;  %v6353_v5 = vld [vmem:[%s12948_s2 + $0x58] sm:$0xff] }
 0x3eb   :  { %15822 = vst [vmem:[#allocation21_spill] sm:$0xff] %v13968_v19  ;;  %15823 = vst [vmem:[#allocation26_spill] sm:$0xff] %v13970_v60  ;;  %v4857_v25 = vrot.slane %v4856_v27, 1  ;;  %v4898_v30 = vsel %vm13962_vm2, %v6343_v55, -inf  ;;  %v4900_v29 = vsel %vm13962_vm2, %v6344_v10, -inf  ;;  %v4897_v21 = vsel %vm13974_vm8, %v6345_v22, -inf }
 0x3ec   :  { %15826 = vst [vmem:[#allocation31_spill] sm:$0xff] %v13978_v59  ;;  %15827 = vst [vmem:[#allocation13_spill] sm:$0xff] %v13984_v36  ;;  %v4865_v33 = vmax.f32 %v4863_v58, %v4864_v62  ;;  %v4899_v48 = vsel %vm13974_vm8, %v6346_v28, -inf  ;;  %v4901_v56 = vsel %vm13974_vm8, %v6347_v54, -inf  ;;  %v4902_v39 = vsel %vm13962_vm2, %v6348_v12, -inf  ;;  %v6354_v57 = vld [vmem:[%s12948_s2 + $0x60] sm:$0xff] }
 0x3ed   :  { %v4903_v38 = vsel %vm13974_vm8, %v6349_v8, -inf  ;;  %v4904_v40 = vsel %vm13962_vm2, %v6350_v49, -inf  ;;  %v4905_v14 = vsel %vm13974_vm8, %v6351_v47, -inf  ;;  %v14013_v45 = vmax.f32 %v4856_v27, %v4857_v25  ;;  %v6355_v58 = vld [vmem:[%s12948_s2 + $0x68] sm:$0xff]  ;;  %v14028_v62 = vld [vmem:[%s12948_s2 + $0x70] sm:$0xff]  ;;  %v14034_v25 = vld [vmem:[%s12948_s2 + $0x78] sm:$0xff] }
 0x3ee   :  { %v4866_v50 = vrot.slane %v4865_v33, 1  ;;  %v4906_v6 = vsel %vm13962_vm2, %v6352_v42, -inf  ;;  %v4907_v4 = vsel %vm13974_vm8, %v6353_v5, -inf  ;;  %v4908_v43 = vsel %vm13962_vm2, %v6354_v57, -inf  ;;  %v14040_v10 = vld [vmem:[%s12948_s2 + $0x80] sm:$0xff]  ;;  %v14046_v28 = vld [vmem:[%s12948_s2 + $0x88] sm:$0xff] }
 0x3ef   :  { %15828 = vst [vmem:[#allocation11_spill] sm:$0xff] %v14013_v45  ;;  %v4909_v27 = vsel %vm13974_vm8, %v6355_v58, -inf  ;;  %v14052_v12 = vld [vmem:[%s12948_s2 + $0x90] sm:$0xff]  ;;  %v14058_v49 = vld [vmem:[%s12948_s2 + $0x98] sm:$0xff]  ;;  %v14066_v5 = vld [vmem:[%s12948_s2 + $0xa0] sm:$0xff]  ;;  %v4929_v53 = vsel %vm153_vm6, %v4897_v21, -inf }
 0x3f0   :  { %v14063_v42 = vmax.f32 %v4865_v33, %v4866_v50  ;;  %v14072_v58 = vld [vmem:[%s12948_s2 + $0xa8] sm:$0xff]  ;;  %v14078_v8 = vld [vmem:[%s12948_s2 + $0xb0] sm:$0xff]  ;;  %v14084_v33 = vld [vmem:[%s12948_s2 + $0xb8] sm:$0xff]  ;;  %v4928_v50 = vsel %vm153_vm6, %v4896_v18, -inf  ;;  %v4938_v57 = vsel %vm153_vm6, %v4899_v48, -inf  ;;  %v4946_v23 = vsel %vm153_vm6, %v4900_v29, -inf }
 0x3f1   :  { %v14090_v54 = vld [vmem:[%s12948_s2 + $0xc0] sm:$0xff]  ;;  %v14096_v22 = vld [vmem:[%s12948_s2 + $0xc8] sm:$0xff]  ;;  %v14102_v55 = vld [vmem:[%s12948_s2 + $0xd0] sm:$0xff]  ;;  %v4930_v45 = vmax.f32 %v4928_v50, %v4929_v53  ;;  %v4947_v37 = vsel %vm153_vm6, %v4901_v56, -inf  ;;  %v4955_v3 = vsel %vm153_vm6, %v4902_v39, -inf  ;;  %v4956_v47 = vsel %vm153_vm6, %v4903_v38, -inf }
 0x3f2   :  { %15829 = vst [vmem:[#allocation37_spill] sm:$0xff] %v14063_v42  ;;  %v4937_v42 = vsel %vm153_vm6, %v4898_v30, -inf  ;;  %v4948_v59 = vmax.f32 %v4946_v23, %v4947_v37  ;;  %v4964_v18 = vsel %vm153_vm6, %v4904_v40, -inf  ;;  %v4957_v51 = vmax.f32 %v4955_v3, %v4956_v47 }
 0x3f3   :  { %v4939_v36 = vmax.f32 %v4937_v42, %v4938_v57  ;;  %v4931_v60 = vrot.slane %v4930_v45, 4  ;;  %v4965_v30 = vsel %vm153_vm6, %v4905_v14, -inf  ;;  %v4973_v42 = vsel %vm153_vm6, %v4906_v6, -inf }
 0x3f4   :  { %v4949_v48 = vrot.slane %v4948_v59, 4  ;;  %v4966_v53 = vmax.f32 %v4964_v18, %v4965_v30  ;;  %v4974_v29 = vsel %vm153_vm6, %v4907_v4, -inf  ;;  %v4958_v37 = vrot.slane %v4957_v51, 4 }
 0x3f5   :  { %v4940_v21 = vrot.slane %v4939_v36, 4  ;;  %v4932_v56 = vmax.f32 %v4930_v45, %v4931_v60  ;;  %v4975_v39 = vmax.f32 %v4973_v42, %v4974_v29  ;;  %v4982_v40 = vsel %vm153_vm6, %v4908_v43, -inf }
 0x3f6   :  { %v4950_v57 = vmax.f32 %v4948_v59, %v4949_v48  ;;  %v4967_v38 = vrot.slane %v4966_v53, 4  ;;  %v4983_v50 = vsel %vm153_vm6, %v4909_v27, -inf  ;;  %v4959_v14 = vmax.f32 %v4957_v51, %v4958_v37 }
 0x3f7   :  { %v4941_v23 = vmax.f32 %v4939_v36, %v4940_v21  ;;  %v4933_v3 = vrot.slane %v4932_v56, 2  ;;  %v4976_v19 = vrot.slane %v4975_v39, 4  ;;  %v4984_v4 = vmax.f32 %v4982_v40, %v4983_v50  ;;  %v14142_v40 = vld [vmem:[%s12948_s2 + $0xe8] sm:$0xff] }
 0x3f8   :  { %v4951_v18 = vrot.slane %v4950_v57, 2  ;;  %v4968_v6 = vmax.f32 %v4966_v53, %v4967_v38  ;;  %v15830_v60 = vsel %vm13962_vm2, %v14028_v62, -inf  ;;  %v4960_v43 = vrot.slane %v4959_v14, 2  ;;  %v6370_v38 = vld [vmem:[%s12948_s2 + $0xe0] sm:$0xff] }
 0x3f9   :  { %v4942_v47 = vrot.slane %v4941_v23, 2  ;;  %v4991_v59 = vsel %vm153_vm6, %v15830_v60, -inf  ;;  %v4934_v36 = vmax.f32 %v4932_v56, %v4933_v3  ;;  %v4977_v27 = vmax.f32 %v4975_v39, %v4976_v19 }
 0x3fa   :  { %v4952_v21 = vmax.f32 %v4950_v57, %v4951_v18  ;;  %v4969_v51 = vrot.slane %v4968_v6, 2  ;;  %v4985_v30 = vrot.slane %v4984_v4, 4  ;;  %v15831_v48 = vsel %vm13974_vm8, %v14034_v25, -inf }
 0x3fb   :  { %v4943_v45 = vmax.f32 %v4941_v23, %v4942_v47  ;;  %v4992_v53 = vsel %vm153_vm6, %v15831_v48, -inf  ;;  %v4935_v42 = vrot.slane %v4934_v36, 1  ;;  %v4961_v29 = vmax.f32 %v4959_v14, %v4960_v43  ;;  %v6369_v23 = vld [vmem:[%s12948_s2 + $0xd8] sm:$0xff]  ;;  %v14148_v14 = vld [vmem:[%s12948_s2 + $0xf0] sm:$0xff] }
 0x3fc   :  { %v4978_v56 = vrot.slane %v4977_v27, 2  ;;  %v4923_v19 = vsel %vm13974_vm8, %v6369_v23, -inf  ;;  %v4953_v37 = vrot.slane %v4952_v21, 1  ;;  %v4970_v39 = vmax.f32 %v4968_v6, %v4969_v51  ;;  %v14154_v6 = vld [vmem:[%s12948_s2 + $0xf8] sm:$0xff]  ;;  %s5085_s2 = scalar_select %p5084_p12, %s14133_s20, 0 }
 0x3fd   :  { %v4944_v62 = vrot.slane %v4943_v45, 1  ;;  %v4993_v57 = vmax.f32 %v4991_v59, %v4992_v53  ;;  %v4924_v25 = vsel %vm13962_vm2, %v6370_v38, -inf  ;;  %v4925_v50 = vsel %vm13974_vm8, %v14142_v40, -inf  ;;  %s14493_s20 = sceil.f32 %s5401_s19  ;;  %p5321_p12 = scmp.le.s32.totalorder %s16075_s14, %s16073_s11 }
 0x3fe   :  { %v4962_v3 = vrot.slane %v4961_v29, 1  ;;  %v4986_v47 = vmax.f32 %v4984_v4, %v4985_v30  ;;  %v4926_v18 = vsel %vm13962_vm2, %v14148_v14, -inf  ;;  %v4927_v60 = vsel %vm13974_vm8, %v14154_v6, -inf  ;;  %s16071_s2 = smov (!%p5934_p10, %s5085_s2), 16  ;;  %s6236_s26 = scvt.f32.s32 %s14493_s20 }
 0x3ff   :  { %v14159_v59 = vmax.f32 %v4977_v27, %v4978_v56  ;;  %v4994_v43 = vrot.slane %v4993_v57, 4  ;;  %v14162_v51 = vmax.f32 %v4934_v36, %v4935_v42  ;;  %v14164_v4 = vmax.f32 %v4943_v45, %v4944_v62  ;;  %p5096_p4 = scmp.le.s32.totalorder %s16071_s2, %s16069_s22  ;;  %p5397_p10 = scmp.gt.s32.totalorder %s14510_s5, 0 }
 0x400   :  { %v15832_v30 = vsel %vm13962_vm2, %v14040_v10, -inf  ;;  %v15833_v53 = vsel %vm13974_vm8, %v14046_v28, -inf  ;;  %v14176_v56 = vmax.f32 %v4952_v21, %v4953_v37  ;;  %v4971_v36 = vrot.slane %v4970_v39, 1  ;;  %s14567_s0 = sadd.s32 %s6236_s26, %s13614_s1  ;;  %p14690_p6 = por %p5321_p12, %p4868_p1 }
 0x401   :  { %v5000_v48 = vsel %vm153_vm6, %v15832_v30, -inf  ;;  %v5001_v27 = vsel %vm153_vm6, %v15833_v53, -inf  ;;  %v4995_v42 = vmax.f32 %v4993_v57, %v4994_v43  ;;  %v14178_v62 = vmax.f32 %v4961_v29, %v4962_v3  ;;  %p14276_p13 = por %p5096_p4, %p4460_p9  ;;  %p14345_p11 = por %p5096_p4, %p4664_p8 }
 0x402   :  { %v5002_v45 = vmax.f32 %v5000_v48, %v5001_v27  ;;  %v4987_v23 = vrot.slane %v4986_v47, 2  ;;  %v15834_v10 = vsel %vm13962_vm2, %v14052_v12, -inf  ;;  %v15835_v28 = vsel %vm13974_vm8, %v14058_v49, -inf  ;;  %p14454_p3 = por %p5096_p4, %p4868_p1  ;;  %p5405_p0 = scmp.gt.s32.totalorder %s14567_s0, 0 }
 0x403   :  { %v5009_v38 = vsel %vm153_vm6, %v15834_v10, -inf  ;;  %v5010_v21 = vsel %vm153_vm6, %v15835_v28, -inf  ;;  %v4980_v37 = vrot.slane %v14159_v59, 1  ;;  %v15836_v29 = vsel %vm13962_vm2, %v14066_v5, -inf  ;;  %s5145_s8 = scalar_select %p14276_p13, 1, 0 }
 0x404   :  { %v5003_v57 = vrot.slane %v5002_v45, 4  ;;  %v5011_v40 = vmax.f32 %v5009_v38, %v5010_v21  ;;  %v5018_v12 = vsel %vm153_vm6, %v15836_v29, -inf  ;;  %v15837_v49 = vsel %vm13974_vm8, %v14072_v58, -inf  ;;  %s5195_s17 = scalar_select %p14345_p11, 1, 0 }
 0x405   :  { %v5019_v3 = vsel %vm153_vm6, %v15837_v49, -inf  ;;  %v15838_v43 = vsel %vm13962_vm2, %v14078_v8, -inf  ;;  %v15839_v5 = vsel %vm13974_vm8, %v14084_v33, -inf  ;;  %v15840_v53 = vsel %vm13962_vm2, %v14090_v54, -inf  ;;  %s5244_s28 = scalar_select %p14454_p3, 1, 0 }
 0x406   :  { %v5027_v30 = vsel %vm153_vm6, %v15838_v43, -inf  ;;  %v5028_v48 = vsel %vm153_vm6, %v15839_v5, -inf  ;;  %v5036_v58 = vsel %vm153_vm6, %v15840_v53, -inf  ;;  %v14221_v27 = vmax.f32 %v4970_v39, %v4971_v36  ;;  %p14562_p13 = por %p5096_p4, %p5072_p5  ;;  %p14585_p4 = por %p5321_p12, %p4460_p9 }
 0x407   :  { %v4996_v10 = vrot.slane %v4995_v42, 2  ;;  %v5004_v8 = vmax.f32 %v5002_v45, %v5003_v57  ;;  %v5012_v38 = vrot.slane %v5011_v40, 4  ;;  %v4988_v28 = vmax.f32 %v4986_v47, %v4987_v23  ;;  %p14642_p11 = por %p5321_p12, %p4664_p8  ;;  %p5962_p2 = scmp.lt.s32.totalorder %s14567_s0, 16 }
 0x408   :  { %v5020_v21 = vmax.f32 %v5018_v12, %v5019_v3  ;;  %v5029_v29 = vmax.f32 %v5027_v30, %v5028_v48  ;;  %v15841_v33 = vsel %vm13974_vm8, %v14096_v22, -inf  ;;  %v15842_v36 = vsel %vm13962_vm2, %v14102_v55, -inf  ;;  %s5293_s27 = scalar_select %p14562_p13, 1, 0 }
 0x409   :  { %v5037_v49 = vsel %vm153_vm6, %v15841_v33, -inf  ;;  %v5005_v54 = vrot.slane %v5004_v8, 2  ;;  %v5013_v43 = vmax.f32 %v5011_v40, %v5012_v38  ;;  %v5045_v47 = vsel %vm153_vm6, %v15842_v36, -inf  ;;  %s5355_s20 = scalar_select %p14642_p11, 1, 0 }
 0x40a   :  { %v5038_v39 = vmax.f32 %v5036_v58, %v5037_v49  ;;  %v5021_v45 = vrot.slane %v5020_v21, 4  ;;  %v5030_v23 = vrot.slane %v5029_v29, 4  ;;  %v5046_v22 = vsel %vm153_vm6, %v4923_v19, -inf  ;;  %p14724_p3 = por %p5321_p12, %p5072_p5  ;;  %s14730_s26 = sfloor.f32 %s5401_s19 }
 0x40b   :  { %v5054_v57 = vsel %vm153_vm6, %v4924_v25, -inf  ;;  %v4997_v40 = vmax.f32 %v4995_v42, %v4996_v10  ;;  %v5006_v12 = vmax.f32 %v5004_v8, %v5005_v54  ;;  %v5014_v55 = vrot.slane %v5013_v43, 2 }
 0x40c   :  { %v5039_v3 = vrot.slane %v5038_v39, 4  ;;  %v5022_v30 = vmax.f32 %v5020_v21, %v5021_v45  ;;  %v5031_v5 = vmax.f32 %v5029_v29, %v5030_v23  ;;  %v5047_v48 = vmax.f32 %v5045_v47, %v5046_v22 }
 0x40d   :  { %v5055_v19 = vsel %vm153_vm6, %v4925_v50, -inf  ;;  %v4989_v25 = vrot.slane %v4988_v28, 1  ;;  %v5015_v53 = vmax.f32 %v5013_v43, %v5014_v55  ;;  %v5063_v50 = vsel %vm153_vm6, %v4926_v18, -inf }
 0x40e   :  { %v5040_v58 = vmax.f32 %v5038_v39, %v5039_v3  ;;  %v5056_v38 = vmax.f32 %v5054_v57, %v5055_v19  ;;  %v5023_v33 = vrot.slane %v5022_v30, 2  ;;  %v5032_v42 = vrot.slane %v5031_v5, 2 }
 0x40f   :  { %v5048_v10 = vrot.slane %v5047_v48, 4  ;;  %v15843_v8 = vstv %s16069_s22  ;;  %v4998_v29 = vrot.slane %v4997_v40, 1  ;;  %v5007_v49 = vrot.slane %v5006_v12, 1 }
 0x410   :  { %vm14258_vm4 = vcmp.ge.s32.totalorder %v6499_v1, %v15843_v8  ;;  %v5041_v54 = vrot.slane %v5040_v58, 2  ;;  %v5057_v43 = vrot.slane %v5056_v38, 4  ;;  %v5024_v63 = vmax.f32 %v5022_v30, %v5023_v33  ;;  %v15853_v33 = vld [vmem:[#allocation28_spill] sm:$0xff] }
 0x411   :  { %v5033_v14 = vmax.f32 %v5031_v5, %v5032_v42  ;;  %v5049_v39 = vmax.f32 %v5047_v48, %v5048_v10  ;;  %v5064_v18 = vsel %vm153_vm6, %v4927_v60, -inf  ;;  %v5016_v36 = vrot.slane %v5015_v53, 1  ;;  %v15854_v10 = vld [vmem:[#allocation16_spill] sm:$0xff] }
 0x412   :  { %v5042_v47 = vmax.f32 %v5040_v58, %v5041_v54  ;;  %v5058_v45 = vmax.f32 %v5056_v38, %v5057_v43  ;;  %v5065_v23 = vmax.f32 %v5063_v50, %v5064_v18  ;;  %v14286_v32 = vmax.f32 %v14159_v59, %v4980_v37  ;;  %v15855_v50 = vld [vmem:[#allocation10_spill] sm:$0xff] }
 0x413   :  { %v5025_v6 = vrot.slane %v5024_v63, 1  ;;  %v5034_v60 = vrot.slane %v5033_v14, 1  ;;  %v5050_v22 = vrot.slane %v5049_v39, 2  ;;  %v14291_v57 = vmax.f32 %v4988_v28, %v4989_v25  ;;  %v15858_v54 = vld [vmem:[#allocation30_spill] sm:$0xff] }
 0x414   :  { %v5059_v55 = vrot.slane %v5058_v45, 2  ;;  %v5066_v3 = vrot.slane %v5065_v23, 4  ;;  %v5091_v30 = vstv %s16071_s2  ;;  %v14294_v5 = vmax.f32 %v4997_v40, %v4998_v29  ;;  %s14594_s2 = scalar_select %p5397_p10, %s14510_s5, 0 }
 0x415   :  { %v14296_v48 = vmax.f32 %v5006_v12, %v5007_v49  ;;  %v5043_v59 = vrot.slane %v5042_v47, 1  ;;  %v5051_v37 = vmax.f32 %v5049_v39, %v5050_v22  ;;  %v14299_v19 = vmax.f32 %v5015_v53, %v5016_v36  ;;  %v15852_v53 = vld [vmem:[#allocation33_spill] sm:$0xff]  ;;  %v15865_v22 = vld [vmem:[#allocation14_spill] sm:$0xff]  ;;  %v15873_v49 = vld [vmem:[#allocation12_spill] sm:$0xff] }
 0x416   :  { %v14301_v28 = vmax.f32 %v5024_v63, %v5025_v6  ;;  %v5060_v25 = vmax.f32 %v5058_v45, %v5059_v55  ;;  %v15847_v58 = vmov %v15843_v8  ;;  %v14312_v40 = vmax.f32 %v5033_v14, %v5034_v60  ;;  %v15859_v63 = vld [vmem:[#allocation34_spill] sm:$0xff]  ;;  %v15861_v36 = vld [vmem:[#allocation9_spill] sm:$0xff]  ;;  %s16077_s2 = smov (!%p5957_p7, %s14594_s2), 16 }
 0x417   :  { %vm14306_vm10 = vcmp.ge.s32.totalorder %v6508_v2, %v15847_v58  ;;  %vm14315_vm11 = vcmp.lt.s32.totalorder %v6499_v1, %v5091_v30  ;;  %v5117_v42 = vsel %vm955_vm12, %v15853_v33, %v15852_v53  ;;  %v5124_v8 = vsel %vm955_vm12, %v15855_v50, %v15854_v10  ;;  %v15869_v58 = vld [vmem:[#allocation32_spill] sm:$0xff]  ;;  %v15870_v53 = vld [vmem:[#allocation15_spill] sm:$0xff] }
 0x418   :  { %v5067_v29 = vmax.f32 %v5065_v23, %v5066_v3  ;;  %vm14331_vm0 = vcmp.lt.s32.totalorder %v6508_v2, %v5091_v30  ;;  %v5118_v43 = vsel %vm957_vm13, %v15858_v54, %v5117_v42  ;;  %v5125_v14 = vsel %vm957_vm13, %v15859_v63, %v5124_v8  ;;  %v15862_v23 = vld [vmem:[#allocation36_spill] sm:$0xff]  ;;  %vm14362_vm3 = vmand %vm14258_vm4, %vm14315_vm11  ;;  %v15866_v3 = vld [vmem:[#allocation29_spill] sm:$0xff] }
 0x419   :  { %v14349_v39 = vmax.f32 %v5042_v47, %v5043_v59  ;;  %v5052_v18 = vrot.slane %v5051_v37, 1  ;;  %v5119_v45 = vsel %vm959_vm14, %v15861_v36, %v5118_v43  ;;  %v5126_v6 = vsel %vm959_vm14, %v15862_v23, %v5125_v14  ;;  %vm14376_vm5 = vmand %vm14306_vm10, %vm14331_vm0  ;;  %v15871_v42 = vld [vmem:[#allocation18_spill] sm:$0xff]  ;;  %v15872_v10 = vld [vmem:[#allocation24_spill] sm:$0xff] }
 0x41a   :  { %v5061_v60 = vrot.slane %v5060_v25, 1  ;;  %v5120_v55 = vsel %vm961_vm15, %v15865_v22, %v5119_v45  ;;  %v5127_v30 = vsel %vm961_vm15, %v15866_v3, %v5126_v6  ;;  %v14370_v59 = vstv %s5145_s8  ;;  %v15875_v43 = vld [vmem:[#allocation17_spill] sm:$0xff]  ;;  %v15877_v14 = vld [vmem:[#allocation19_spill] sm:$0xff]  ;;  %s5338_s8 = scalar_select %p14585_p4, 1, 0 }
 0x41b   :  { %v5121_v12 = vsel %vm963_vm1, %v15869_v58, %v5120_v55  ;;  %v5128_v33 = vsel %vm963_vm1, %v15870_v53, %v5127_v30  ;;  %v5167_v50 = vsel %vm955_vm12, %v15872_v10, %v15871_v42  ;;  %v5174_v38 = vsel %vm955_vm12, %v13683_v24, %v13681_v16  ;;  %v15878_v45 = vld [vmem:[#allocation35_spill] sm:$0xff] }
 0x41c   :  { %v5068_v8 = vrot.slane %v5067_v29, 2  ;;  %vm15874_vm7 = vcmask 1046534   ;;  %v5168_v36 = vsel %vm957_vm13, %v15877_v14, %v5167_v50  ;;  %vm15879_vm8 = vcmask 1047559   ;;  %v15880_v24 = vld [vmem:[#allocation23_spill] sm:$0xff]  ;;  %v15891_v14 = vld [vmem:[#allocation25_spill] sm:$0xff] }
 0x41d   :  { %v5122_v54 = vsel %vm15874_vm7, %v15873_v49, %v5121_v12  ;;  %vm15876_vm2 = vmmov %vm15874_vm7  ;;  %v15882_v6 = vld [vmem:[#allocation27_spill] sm:$0xff]  ;;  %v5175_v55 = vsel %vm957_vm13, %v13685_v26, %v5174_v38  ;;  %v14420_v3 = vmax.f32 %v5051_v37, %v5052_v18  ;;  %vm5147_vm7 = vcmp.eq.s32.totalorder %v14370_v59, 1  ;;  %v15888_v38 = vld [vmem:[#allocation21_spill] sm:$0xff] }
 0x41e   :  { %v5129_v63 = vsel %vm15876_vm2, %v15875_v43, %v5128_v33  ;;  %v14405_v16 = vsel %vm15879_vm8, %v15878_v45, %v5122_v54  ;;  %vm15881_vm4 = vmmov %vm15879_vm8  ;;  %v5169_v22 = vsel %vm959_vm14, %v15882_v6, %v5168_v36  ;;  %v5176_v53 = vsel %vm959_vm14, %v13693_v31, %v5175_v55  ;;  %v15890_v54 = vld [vmem:[#allocation26_spill] sm:$0xff]  ;;  %v15893_v45 = vld [vmem:[#allocation31_spill] sm:$0xff] }
 0x41f   :  { %v14409_v23 = vsel %vm15881_vm4, %v15880_v24, %v5129_v63  ;;  %v5133_v30 = vsel %vm14362_vm3, %v14405_v16, -inf  ;;  %v5170_v26 = vsel %vm961_vm15, %v13637_v11, %v5169_v22  ;;  %v14442_v33 = vmax.f32 %v5060_v25, %v5061_v60  ;;  %vm15883_vm10 = vmmov %vm15876_vm2  ;;  %v15894_v22 = vld [vmem:[#allocation22_spill] sm:$0xff] }
 0x420   :  { %v5134_v58 = vsel %vm14376_vm5, %v14409_v23, -inf  ;;  %v5135_v12 = vsel %vm153_vm6, %v5133_v30, -inf  ;;  %v5171_v18 = vsel %vm963_vm1, %v13667_v52, %v5170_v26  ;;  %v5177_v10 = vsel %vm961_vm15, %v13695_v61, %v5176_v53  ;;  %vm15885_vm11 = vmmov %vm15881_vm4  ;;  %v15896_v30 = vld [vmem:[#allocation13_spill] sm:$0xff] }
 0x421   :  { %v5136_v37 = vsel %vm153_vm6, %v5134_v58, -inf  ;;  %v5172_v42 = vsel %vm15883_vm10, %v13670_v0, %v5171_v18  ;;  %v5069_v52 = vmax.f32 %v5067_v29, %v5068_v8  ;;  %v5178_v25 = vsel %vm963_vm1, %v13698_v17, %v5177_v10  ;;  %vm15886_vm0 = vmmov %vm15876_vm2  ;;  %v15889_v8 = vld [vmem:[#allocation20_spill] sm:$0xff]  ;;  %v15897_v18 = vld [vmem:[#allocation11_spill] sm:$0xff] }
 0x422   :  { %v5137_v11 = vmax.f32 %v5135_v12, %v5136_v37  ;;  %v14460_v31 = vsel %vm15885_vm11, %v13672_v7, %v5172_v42  ;;  %v5216_v0 = vsel %vm955_vm12, %v13834_v20, %v13832_v41  ;;  %v5179_v60 = vsel %vm15886_vm0, %v13719_v34, %v5178_v25  ;;  %vm15887_vm2 = vmmov %vm15881_vm4  ;;  %v15899_v42 = vld [vmem:[#allocation37_spill] sm:$0xff] }
 0x423   :  { %v5183_v29 = vsel %vm14362_vm3, %v14460_v31, -inf  ;;  %v5217_v7 = vsel %vm957_vm13, %v13849_v35, %v5216_v0  ;;  %v14483_v17 = vsel %vm15887_vm2, %v13756_v13, %v5179_v60  ;;  %v5223_v20 = vsel %vm955_vm12, %v13966_v46, %v13958_v9  ;;  %vm15892_vm8 = vmmov %vm15886_vm0 }
 0x424   :  { %v5138_v61 = vrot.slane %v5137_v11, 4  ;;  %v5185_v34 = vsel %vm153_vm6, %v5183_v29, -inf  ;;  %v5218_v41 = vsel %vm959_vm14, %v13872_v15, %v5217_v7  ;;  %v5184_v13 = vsel %vm14376_vm5, %v14483_v17, -inf  ;;  %vm15895_vm4 = vmmov %vm15887_vm2 }
 0x425   :  { %v5219_v50 = vsel %vm961_vm15, %v13887_v44, %v5218_v41  ;;  %v5224_v15 = vsel %vm957_vm13, %v15888_v38, %v5223_v20  ;;  %v5070_v9 = vrot.slane %v5069_v52, 1  ;;  %v5186_v46 = vsel %vm153_vm6, %v5184_v13, -inf  ;;  %vm15898_vm10 = vmmov %vm15886_vm0 }
 0x426   :  { %v5139_v35 = vmax.f32 %v5137_v11, %v5138_v61  ;;  %v5220_v49 = vsel %vm963_vm1, %v15889_v8, %v5219_v50  ;;  %v5225_v43 = vsel %vm959_vm14, %v15890_v54, %v5224_v15  ;;  %v5187_v63 = vmax.f32 %v5185_v34, %v5186_v46  ;;  %vm15900_vm11 = vmmov %vm15887_vm2 }
 0x427   :  { %v5221_v36 = vsel %vm15892_vm8, %v15891_v14, %v5220_v49  ;;  %v5226_v24 = vsel %vm961_vm15, %v15893_v45, %v5225_v43  ;;  %v14522_v6 = vstv %s5195_s17  ;;  %v5265_v26 = vsel %vm955_vm12, %v14164_v4, %v14162_v51  ;;  %s14670_s17 = scalar_select %p5405_p0, %s14567_s0, 0 }
 0x428   :  { %v5140_v44 = vrot.slane %v5139_v35, 2  ;;  %v14526_v55 = vsel %vm15895_vm4, %v15894_v22, %v5221_v36  ;;  %v5227_v58 = vsel %vm963_vm1, %v15896_v30, %v5226_v24  ;;  %v5188_v37 = vrot.slane %v5187_v63, 4  ;;  %s5389_s0 = scalar_select %p14724_p3, 1, 0 }
 0x429   :  { %v5228_v53 = vsel %vm15898_vm10, %v15897_v18, %v5227_v58  ;;  %v5232_v11 = vsel %vm14362_vm3, %v14526_v55, -inf  ;;  %v5266_v10 = vsel %vm957_vm13, %v14176_v56, %v5265_v26  ;;  %v5272_v25 = vsel %vm955_vm12, %v14299_v19, %v14296_v48  ;;  %vm15903_vm12 = vmmov %vm15886_vm0  ;;  %s16079_s17 = smov (!%p5962_p2, %s14670_s17), 16 }
 0x42a   :  { %v5141_v12 = vmax.f32 %v5139_v35, %v5140_v44  ;;  %v14543_v51 = vsel %vm15900_vm11, %v15899_v42, %v5228_v53  ;;  %v5234_v4 = vsel %vm153_vm6, %v5232_v11, -inf  ;;  %v5189_v61 = vmax.f32 %v5187_v63, %v5188_v37  ;;  %p5417_p12 = scmp.le.s32.totalorder %s16079_s17, %s16077_s2 }
 0x42b   :  { %v5233_v60 = vsel %vm14376_vm5, %v14543_v51, -inf  ;;  %v5267_v29 = vsel %vm959_vm14, %v14178_v62, %v5266_v10  ;;  %v14573_v48 = vstv %s5244_s28  ;;  %v5273_v19 = vsel %vm957_vm13, %v14301_v28, %v5272_v25  ;;  %vm15904_vm13 = vmmov %vm15887_vm2  ;;  %s5497_s28 = smul.f32 4.0, %s13803_s10  ;;  %s6238_s10 = scvt.f32.s32 %s14730_s26 }
 0x42c   :  { %v5142_v0 = vrot.slane %v5141_v12, 1  ;;  %v5235_v56 = vsel %vm153_vm6, %v5233_v60, -inf  ;;  %v5268_v62 = vsel %vm961_vm15, %v14221_v27, %v5267_v29  ;;  %v5190_v34 = vrot.slane %v5189_v61, 2  ;;  %vm15905_vm2 = vmmov %vm15892_vm8  ;;  %p14786_p10 = por %p5417_p12, %p4460_p9  ;;  %p14814_p4 = por %p5417_p12, %p4664_p8 }
 0x42d   :  { %v5236_v41 = vmax.f32 %v5234_v4, %v5235_v56  ;;  %v5269_v20 = vsel %vm963_vm1, %v14286_v32, %v5268_v62  ;;  %v5071_v27 = vmax.f32 %v5069_v52, %v5070_v9  ;;  %v5274_v35 = vsel %vm959_vm14, %v14312_v40, %v5273_v19  ;;  %p14872_p11 = por %p5417_p12, %p4868_p1  ;;  %p14904_p2 = por %p5417_p12, %p5072_p5 }
 0x42e   :  { %v5143_v7 = vmax.f32 %v5141_v12, %v5142_v0  ;;  %v5270_v28 = vsel %vm15903_vm12, %v14291_v57, %v5269_v20  ;;  %v5313_v13 = vstv %s16073_s11  ;;  %v5191_v38 = vmax.f32 %v5189_v61, %v5190_v34  ;;  %s5372_s11 = scalar_select %p14690_p6, 1, 0 }
 0x42f   :  { %v5237_v15 = vrot.slane %v5236_v41, 4  ;;  %v14607_v32 = vsel %vm15904_vm13, %v14294_v5, %v5270_v28  ;;  %vm5197_vm14 = vcmp.eq.s32.totalorder %v14522_v6, 1  ;;  %vm5246_vm0 = vcmp.eq.s32.totalorder %v14573_v48, 1 }
 0x430   :  { %v5148_v50 = vsel %vm5147_vm7, 0.0, %v5143_v7  ;;  %v5275_v57 = vsel %vm961_vm15, %v14349_v39, %v5274_v35  ;;  %v5281_v5 = vsel %vm14362_vm3, %v14607_v32, -inf  ;;  %v5192_v40 = vrot.slane %v5191_v38, 1 }
 0x431   :  { %5939 = vst.msk [vmem:[%s15063_s6 + $0x30] sm:$0x1] %vm994_vm9, %v5148_v50  ;;  %v5238_v59 = vmax.f32 %v5236_v41, %v5237_v15  ;;  %v5276_v52 = vsel %vm963_vm1, %v14420_v3, %v5275_v57  ;;  %vm5314_vm7 = vcmp.ge.s32.totalorder %v6499_v1, %v5313_v13  ;;  %v5283_v9 = vsel %vm153_vm6, %v5281_v5, -inf  ;;  %vm15909_vm1 = vmmov %vm15895_vm4 }
 0x432   :  { %v5277_v39 = vsel %vm15905_vm2, %v14442_v33, %v5276_v52  ;;  %vm14631_vm15 = vcmp.ge.s32.totalorder %v6508_v2, %v5313_v13  ;;  %v5316_v46 = vstv %s16075_s14  ;;  %v5193_v3 = vmax.f32 %v5191_v38, %v5192_v40  ;;  %s14751_s14 = sceil.f32 %s5497_s28 }
 0x433   :  { %v5239_v33 = vrot.slane %v5238_v59, 2  ;;  %v14647_v8 = vsel %vm15909_vm1, %v5071_v27, %v5277_v39  ;;  %vm5317_vm3 = vcmp.lt.s32.totalorder %v6499_v1, %v5316_v46  ;;  %v14658_v54 = vstv %s5293_s27  ;;  %s6240_s22 = scvt.f32.s32 %s14751_s14  ;;  %s14773_s27 = sadd.s32 %s6238_s10, %s13614_s1 }
 0x434   :  { %v5282_v49 = vsel %vm14376_vm5, %v14647_v8, -inf  ;;  %vm5318_vm8 = vcmp.lt.s32.totalorder %v6508_v2, %v5316_v46  ;;  %vm14661_vm4 = vmand %vm5314_vm7, %vm5317_vm3  ;;  %v14665_v44 = vstv %s5338_s8  ;;  %v5198_v63 = vsel %vm5197_vm14, 0.0, %v5193_v3  ;;  %p5493_p13 = scmp.gt.s32.totalorder %s14773_s27, 0  ;;  %p5971_p7 = scmp.lt.s32.totalorder %s14773_s27, 16 }
 0x435   :  { %v5240_v14 = vmax.f32 %v5238_v59, %v5239_v33  ;;  %v5284_v21 = vsel %vm153_vm6, %v5282_v49, -inf  ;;  %vm14677_vm5 = vmand %vm14631_vm15, %vm5318_vm8  ;;  %v5326_v45 = vsel %vm14661_vm4, %v14405_v16, -inf  ;;  %5940 = vst.msk [vmem:[%s15063_s6 + $0x31] sm:$0x1] %vm994_vm9, %v5198_v63  ;;  %v5343_v30 = vsel %vm14661_vm4, %v14460_v31, -inf  ;;  %s14799_s25 = sadd.s32 %s6240_s22, %s13614_s1 }
 0x436   :  { %v5285_v24 = vmax.f32 %v5283_v9, %v5284_v21  ;;  %v5327_v6 = vsel %vm14677_vm5, %v14409_v23, -inf  ;;  %v5328_v22 = vsel %vm153_vm6, %v5326_v45, -inf  ;;  %v5344_v12 = vsel %vm14677_vm5, %v14483_v17, -inf  ;;  %s5434_s1 = scalar_select %p14786_p10, 1, 0 }
 0x437   :  { %v5241_v58 = vrot.slane %v5240_v14, 1  ;;  %v5329_v26 = vsel %vm153_vm6, %v5327_v6, -inf  ;;  %v5345_v37 = vsel %vm153_vm6, %v5343_v30, -inf  ;;  %v5346_v11 = vsel %vm153_vm6, %v5344_v12, -inf  ;;  %p5501_p0 = scmp.gt.s32.totalorder %s14799_s25, 0  ;;  %p5976_p6 = scmp.lt.s32.totalorder %s14799_s25, 16 }
 0x438   :  { %v5286_v18 = vrot.slane %v5285_v24, 4  ;;  %v5330_v53 = vmax.f32 %v5328_v22, %v5329_v26  ;;  %v5360_v42 = vsel %vm14661_vm4, %v14526_v55, -inf  ;;  %vm5295_vm10 = vcmp.eq.s32.totalorder %v14658_v54, 1  ;;  %s5494_s23 = scalar_select %p5493_p13, %s14773_s27, 0 }
 0x439   :  { %v5242_v4 = vmax.f32 %v5240_v14, %v5241_v58  ;;  %v5347_v10 = vmax.f32 %v5345_v37, %v5346_v11  ;;  %v5361_v25 = vsel %vm14677_vm5, %v14543_v51, -inf  ;;  %v5362_v0 = vsel %vm153_vm6, %v5360_v42, -inf  ;;  %s5451_s28 = scalar_select %p14814_p4, 1, 0 }
 0x43a   :  { %v5287_v61 = vmax.f32 %v5285_v24, %v5286_v18  ;;  %v5331_v60 = vrot.slane %v5330_v53, 4  ;;  %v14739_v29 = vstv %s5355_s20  ;;  %v5363_v56 = vsel %vm153_vm6, %v5361_v25, -inf  ;;  %s5502_s10 = scalar_select %p5501_p0, %s14799_s25, 0 }
 0x43b   :  { %v5247_v62 = vsel %vm5246_vm0, 0.0, %v5242_v4  ;;  %vm5340_vm11 = vcmp.eq.s32.totalorder %v14665_v44, 1  ;;  %v5348_v19 = vrot.slane %v5347_v10, 4  ;;  %v5364_v7 = vmax.f32 %v5362_v0, %v5363_v56  ;;  %s16081_s23 = smov (!%p5971_p7, %s5494_s23), 16 }
 0x43c   :  { %5941 = vst.msk [vmem:[%s15063_s6 + $0x32] sm:$0x1] %vm994_vm9, %v5247_v62  ;;  %v5288_v34 = vrot.slane %v5287_v61, 2  ;;  %v5332_v41 = vmax.f32 %v5330_v53, %v5331_v60  ;;  %v5377_v48 = vsel %vm14661_vm4, %v14607_v32, -inf  ;;  %v5378_v20 = vsel %vm14677_vm5, %v14647_v8, -inf  ;;  %s16083_s10 = smov (!%p5976_p6, %s5502_s10), 16 }
 0x43d   :  { %v5349_v27 = vmax.f32 %v5347_v10, %v5348_v19  ;;  %v5365_v28 = vrot.slane %v5364_v7, 4  ;;  %v5379_v35 = vsel %vm153_vm6, %v5377_v48, -inf  ;;  %v5380_v13 = vsel %vm153_vm6, %v5378_v20, -inf  ;;  %p5513_p3 = scmp.le.s32.totalorder %s16083_s10, %s16081_s23 }
 0x43e   :  { %v5289_v50 = vmax.f32 %v5287_v61, %v5288_v34  ;;  %v5333_v38 = vrot.slane %v5332_v41, 2  ;;  %vm5357_vm12 = vcmp.eq.s32.totalorder %v14739_v29, 1  ;;  %v5381_v15 = vmax.f32 %v5379_v35, %v5380_v13 }
 0x43f   :  { %v5350_v57 = vrot.slane %v5349_v27, 2  ;;  %v5366_v5 = vmax.f32 %v5364_v7, %v5365_v28  ;;  %v5373_v40 = vstv %s5372_s11  ;;  %v5409_v59 = vstv %s16077_s2  ;;  %s5485_s2 = scalar_select %p14904_p2, 1, 0 }
 0x440   :  { %v5290_v52 = vrot.slane %v5289_v50, 1  ;;  %v5334_v39 = vmax.f32 %v5332_v41, %v5333_v38  ;;  %v5382_v9 = vrot.slane %v5381_v15, 4  ;;  %vm14776_vm13 = vcmp.ge.s32.totalorder %v6499_v1, %v5409_v59  ;;  %p14962_p12 = por %p5513_p3, %p4460_p9  ;;  %p14982_p9 = por %p5513_p3, %p4664_p8 }
 0x441   :  { %v5351_v46 = vmax.f32 %v5349_v27, %v5350_v57  ;;  %v5367_v3 = vrot.slane %v5366_v5, 2  ;;  %vm14791_vm14 = vcmp.ge.s32.totalorder %v6508_v2, %v5409_v59  ;;  %v5412_v49 = vstv %s16079_s17  ;;  %p15008_p8 = por %p5513_p3, %p4868_p1  ;;  %p15039_p1 = por %p5513_p3, %p5072_p5 }
 0x442   :  { %v5291_v43 = vmax.f32 %v5289_v50, %v5290_v52  ;;  %v5335_v63 = vrot.slane %v5334_v39, 1  ;;  %v5383_v14 = vmax.f32 %v5381_v15, %v5382_v9  ;;  %vm5413_vm0 = vcmp.lt.s32.totalorder %v6499_v1, %v5412_v49  ;;  %s5530_s18 = scalar_select %p14962_p12, 1, 0 }
 0x443   :  { %v5352_v21 = vrot.slane %v5351_v46, 1  ;;  %v5368_v36 = vmax.f32 %v5366_v5, %v5367_v3  ;;  %v5390_v45 = vstv %s5389_s0  ;;  %vm5414_vm7 = vcmp.lt.s32.totalorder %v6508_v2, %v5412_v49  ;;  %vm14804_vm2 = vmand %vm14776_vm13, %vm5413_vm0  ;;  %s5468_s0 = scalar_select %p14872_p11, 1, 0 }
 0x444   :  { %v5296_v6 = vsel %vm5295_vm10, 0.0, %v5291_v43  ;;  %v5336_v22 = vmax.f32 %v5334_v39, %v5335_v63  ;;  %v5384_v30 = vrot.slane %v5383_v14, 2  ;;  %vm14822_vm15 = vmand %vm14791_vm14, %vm5414_vm7  ;;  %v5422_v26 = vsel %vm14804_vm2, %v14405_v16, -inf  ;;  %s5547_s16 = scalar_select %p14982_p9, 1, 0 }
 0x445   :  { %5942 = vst.msk [vmem:[%s15063_s6 + $0x33] sm:$0x1] %vm994_vm9, %v5296_v6  ;;  %v5353_v54 = vmax.f32 %v5351_v46, %v5352_v21  ;;  %v5369_v12 = vrot.slane %v5368_v36, 1  ;;  %v5423_v37 = vsel %vm14822_vm15, %v14409_v23, -inf  ;;  %v5424_v18 = vsel %vm153_vm6, %v5422_v26, -inf }
 0x446   :  { %v5341_v53 = vsel %vm5340_vm11, 0.0, %v5336_v22  ;;  %vm5374_vm1 = vcmp.eq.s32.totalorder %v5373_v40, 1  ;;  %v5385_v11 = vmax.f32 %v5383_v14, %v5384_v30  ;;  %v5425_v42 = vsel %vm153_vm6, %v5423_v37, -inf  ;;  %s5564_s24 = scalar_select %p15008_p8, 1, 0 }
 0x447   :  { %5953 = vst.msk [vmem:[%s15063_s6 + $0x34] sm:$0x1] %vm994_vm9, %v5341_v53  ;;  %v5358_v44 = vsel %vm5357_vm12, 0.0, %v5353_v54  ;;  %v5370_v4 = vmax.f32 %v5368_v36, %v5369_v12  ;;  %v5426_v10 = vmax.f32 %v5424_v18, %v5425_v42  ;;  %v5439_v25 = vsel %vm14804_vm2, %v14460_v31, -inf }
 0x448   :  { %5954 = vst.msk [vmem:[%s15063_s6 + $0x35] sm:$0x1] %vm994_vm9, %v5358_v44  ;;  %v5386_v0 = vrot.slane %v5385_v11, 1  ;;  %vm5391_vm3 = vcmp.eq.s32.totalorder %v5390_v45, 1  ;;  %v5440_v61 = vsel %vm14822_vm15, %v14483_v17, -inf  ;;  %v5441_v60 = vsel %vm153_vm6, %v5439_v25, -inf }
 0x449   :  { %v5375_v29 = vsel %vm5374_vm1, 0.0, %v5370_v4  ;;  %v5427_v56 = vrot.slane %v5426_v10, 4  ;;  %v5435_v62 = vstv %s5434_s1  ;;  %v5442_v19 = vsel %vm153_vm6, %v5440_v61, -inf }
 0x44a   :  { %5955 = vst.msk [vmem:[%s15063_s6 + $0x36] sm:$0x1] %vm994_vm9, %v5375_v29  ;;  %v5387_v7 = vmax.f32 %v5385_v11, %v5386_v0  ;;  %v5443_v34 = vmax.f32 %v5441_v60, %v5442_v19  ;;  %v5456_v41 = vsel %vm14804_vm2, %v14526_v55, -inf  ;;  %v5457_v48 = vsel %vm14822_vm15, %v14543_v51, -inf }
 0x44b   :  { %v5428_v20 = vmax.f32 %v5426_v10, %v5427_v56  ;;  %v5458_v27 = vsel %vm153_vm6, %v5456_v41, -inf  ;;  %v5459_v28 = vsel %vm153_vm6, %v5457_v48, -inf  ;;  %v5452_v50 = vstv %s5451_s28  ;;  %s5581_s28 = scalar_select %p15039_p1, 1, 0 }
 0x44c   :  { %v5392_v35 = vsel %vm5391_vm3, 0.0, %v5387_v7  ;;  %v5444_v13 = vrot.slane %v5443_v34, 4  ;;  %v5460_v38 = vmax.f32 %v5458_v27, %v5459_v28  ;;  %vm5436_vm8 = vcmp.eq.s32.totalorder %v5435_v62, 1 }
 0x44d   :  { %5956 = vst.msk [vmem:[%s15063_s6 + $0x37] sm:$0x1] %vm994_vm9, %v5392_v35  ;;  %v5429_v15 = vrot.slane %v5428_v20, 2  ;;  %v5473_v57 = vsel %vm14804_vm2, %v14607_v32, -inf  ;;  %v5474_v5 = vsel %vm14822_vm15, %v14647_v8, -inf  ;;  %vm5453_vm4 = vcmp.eq.s32.totalorder %v5452_v50, 1 }
 0x44e   :  { %v5445_v40 = vmax.f32 %v5443_v34, %v5444_v13  ;;  %v5461_v59 = vrot.slane %v5460_v38, 4  ;;  %v5475_v52 = vsel %vm153_vm6, %v5473_v57, -inf  ;;  %v5476_v39 = vsel %vm153_vm6, %v5474_v5, -inf }
 0x44f   :  { %v5430_v9 = vmax.f32 %v5428_v20, %v5429_v15  ;;  %v5477_v47 = vmax.f32 %v5475_v52, %v5476_v39  ;;  %v5505_v46 = vstv %s16081_s23  ;;  %v5469_v49 = vstv %s5468_s0 }
 0x450   :  { %v5446_v3 = vrot.slane %v5445_v40, 2  ;;  %v5462_v33 = vmax.f32 %v5460_v38, %v5461_v59  ;;  %vm5506_vm5 = vcmp.ge.s32.totalorder %v6499_v1, %v5505_v46  ;;  %vm5507_vm10 = vcmp.ge.s32.totalorder %v6508_v2, %v5505_v46 }
 0x451   :  { %v5431_v43 = vrot.slane %v5430_v9, 1  ;;  %v5478_v63 = vrot.slane %v5477_v47, 4  ;;  %v5508_v14 = vstv %s16083_s10  ;;  %vm5470_vm13 = vcmp.eq.s32.totalorder %v5469_v49, 1 }
 0x452   :  { %v5447_v21 = vmax.f32 %v5445_v40, %v5446_v3  ;;  %v5463_v36 = vrot.slane %v5462_v33, 2  ;;  %vm5509_vm11 = vcmp.lt.s32.totalorder %v6499_v1, %v5508_v14  ;;  %vm5510_vm12 = vcmp.lt.s32.totalorder %v6508_v2, %v5508_v14 }
 0x453   :  { %v5432_v45 = vmax.f32 %v5430_v9, %v5431_v43  ;;  %v5479_v24 = vmax.f32 %v5477_v47, %v5478_v63  ;;  %v5486_v6 = vstv %s5485_s2  ;;  %vm14937_vm14 = vmand %vm5506_vm5, %vm5509_vm11  ;;  %v5531_v50 = vstv %s5530_s18 }
 0x454   :  { %v5448_v30 = vrot.slane %v5447_v21, 1  ;;  %v5464_v58 = vmax.f32 %v5462_v33, %v5463_v36  ;;  %vm14941_vm0 = vmand %vm5507_vm10, %vm5510_vm12  ;;  %v5518_v1 = vsel %vm14937_vm14, %v14405_v16, -inf  ;;  %v5535_v2 = vsel %vm14937_vm14, %v14460_v31, -inf }
 0x455   :  { %v5437_v54 = vsel %vm5436_vm8, 0.0, %v5432_v45  ;;  %v5480_v12 = vrot.slane %v5479_v24, 2  ;;  %v5519_v37 = vsel %vm14941_vm0, %v14409_v23, -inf  ;;  %v5520_v18 = vsel %vm153_vm6, %v5518_v1, -inf }
 0x456   :  { %5967 = vst.msk [vmem:[%s15063_s6 + $0x38] sm:$0x1] %vm994_vm9, %v5437_v54  ;;  %v5449_v16 = vmax.f32 %v5447_v21, %v5448_v30  ;;  %v5465_v31 = vrot.slane %v5464_v58, 1  ;;  %v5521_v53 = vsel %vm153_vm6, %v5519_v37, -inf  ;;  %v5536_v23 = vsel %vm14941_vm0, %v14483_v17, -inf }
 0x457   :  { %v5481_v11 = vmax.f32 %v5479_v24, %v5480_v12  ;;  %v5522_v42 = vmax.f32 %v5520_v18, %v5521_v53  ;;  %v5537_v44 = vsel %vm153_vm6, %v5535_v2, -inf  ;;  %v5538_v4 = vsel %vm153_vm6, %v5536_v23, -inf }
 0x458   :  { %v5454_v10 = vsel %vm5453_vm4, 0.0, %v5449_v16  ;;  %v5466_v25 = vmax.f32 %v5464_v58, %v5465_v31  ;;  %vm5487_vm7 = vcmp.eq.s32.totalorder %v5486_v6, 1  ;;  %v5539_v17 = vmax.f32 %v5537_v44, %v5538_v4 }
 0x459   :  { %5968 = vst.msk [vmem:[%s15063_s6 + $0x39] sm:$0x1] %vm994_vm9, %v5454_v10  ;;  %v5482_v0 = vrot.slane %v5481_v11, 1  ;;  %v5523_v61 = vrot.slane %v5522_v42, 4  ;;  %v5552_v60 = vsel %vm14937_vm14, %v14526_v55, -inf  ;;  %v5553_v29 = vsel %vm14941_vm0, %v14543_v51, -inf }
 0x45a   :  { %v5471_v56 = vsel %vm5470_vm13, 0.0, %v5466_v25  ;;  %v5540_v62 = vrot.slane %v5539_v17, 4  ;;  %v5554_v19 = vsel %vm153_vm6, %v5552_v60, -inf  ;;  %v5555_v7 = vsel %vm153_vm6, %v5553_v29, -inf }
 0x45b   :  { %5969 = vst.msk [vmem:[%s15063_s6 + $0x3a] sm:$0x1] %vm994_vm9, %v5471_v56  ;;  %v5483_v55 = vmax.f32 %v5481_v11, %v5482_v0  ;;  %v5524_v51 = vmax.f32 %v5522_v42, %v5523_v61  ;;  %v5556_v34 = vmax.f32 %v5554_v19, %v5555_v7  ;;  %v5569_v48 = vsel %vm14937_vm14, %v14607_v32, -inf }
 0x45c   :  { %v5541_v41 = vmax.f32 %v5539_v17, %v5540_v62  ;;  %v5570_v20 = vsel %vm14941_vm0, %v14647_v8, -inf  ;;  %v5571_v13 = vsel %vm153_vm6, %v5569_v48, -inf  ;;  %v5548_v57 = vstv %s5547_s16 }
 0x45d   :  { %v5488_v27 = vsel %vm5487_vm7, 0.0, %v5483_v55  ;;  %v5525_v28 = vrot.slane %v5524_v51, 2  ;;  %v5557_v35 = vrot.slane %v5556_v34, 4  ;;  %v5572_v32 = vsel %vm153_vm6, %v5570_v20, -inf }
 0x45e   :  { %5970 = vst.msk [vmem:[%s15063_s6 + $0x3b] sm:$0x1] %vm994_vm9, %v5488_v27  ;;  %v5542_v38 = vrot.slane %v5541_v41, 2  ;;  %v5573_v5 = vmax.f32 %v5571_v13, %v5572_v32  ;;  %vm5532_vm2 = vcmp.eq.s32.totalorder %v5531_v50, 1  ;;  %vm5549_vm15 = vcmp.eq.s32.totalorder %v5548_v57, 1 }
 0x45f   :  { %v5526_v15 = vmax.f32 %v5524_v51, %v5525_v28  ;;  %v5558_v8 = vmax.f32 %v5556_v34, %v5557_v35  ;;  %v5565_v3 = vstv %s5564_s24  ;;  %v5582_v24 = vstv %s5581_s28 }
 0x460   :  { %v5543_v40 = vmax.f32 %v5541_v41, %v5542_v38  ;;  %v5574_v39 = vrot.slane %v5573_v5, 4  ;;  %vm5566_vm6 = vcmp.eq.s32.totalorder %v5565_v3, 1  ;;  %vm5583_vm1 = vcmp.eq.s32.totalorder %v5582_v24, 1 }
 0x461   :  { %v5527_v59 = vrot.slane %v5526_v15, 1  ;;  %v5559_v52 = vrot.slane %v5558_v8, 2 }
 0x462   :  { %v5544_v9 = vrot.slane %v5543_v40, 1  ;;  %v5575_v33 = vmax.f32 %v5573_v5, %v5574_v39 }
 0x463   :  { %v5528_v47 = vmax.f32 %v5526_v15, %v5527_v59  ;;  %v5560_v46 = vmax.f32 %v5558_v8, %v5559_v52 }
 0x464   :  { %v5545_v49 = vmax.f32 %v5543_v40, %v5544_v9  ;;  %v5576_v14 = vrot.slane %v5575_v33, 2 }
 0x465   :  { %v5533_v43 = vsel %vm5532_vm2, 0.0, %v5528_v47  ;;  %v5561_v63 = vrot.slane %v5560_v46, 1 }
 0x466   :  { %5981 = vst.msk [vmem:[%s15063_s6 + $0x3c] sm:$0x1] %vm994_vm9, %v5533_v43  ;;  %v5550_v21 = vsel %vm5549_vm15, 0.0, %v5545_v49  ;;  %v5577_v45 = vmax.f32 %v5575_v33, %v5576_v14 }
 0x467   :  { %5982 = vst.msk [vmem:[%s15063_s6 + $0x3d] sm:$0x1] %vm994_vm9, %v5550_v21  ;;  %v5562_v36 = vmax.f32 %v5560_v46, %v5561_v63 }
 0x468   :  { %v5578_v22 = vrot.slane %v5577_v45, 1 }
 0x469   :  { %v5567_v6 = vsel %vm5566_vm6, 0.0, %v5562_v36 }
 0x46a   :  { %5983 = vst.msk [vmem:[%s15063_s6 + $0x3e] sm:$0x1] %vm994_vm9, %v5567_v6  ;;  %v5579_v30 = vmax.f32 %v5577_v45, %v5578_v22 }
 0x46c   :  { %v5584_v58 = vsel %vm5583_vm1, 0.0, %v5579_v30 }
 0x46d   :  { %5984 = vst.msk [vmem:[%s15063_s6 + $0x3f] sm:$0x1] %vm994_vm9, %v5584_v58 }

</bundles_post_ra>
